<compile_context>
chip_gen: v6e
topology: v6e:2x2x1
jax: 0.10.0
libtpu: 0.0.40
codegen_flags: <defaults>
</compile_context>

<pallas_src>
import functools

import jax
import jax.numpy as jnp
from jax.experimental import pallas as pl
from jax.experimental.pallas import tpu as pltpu


class Config:
    camera_frame_type = "face"
    spatial_model = "proposed"          # embed_dim_inp = 512 * 3
    face_net_rnn_num_features = 64
    face_net_rnn_num_cells = 2
    face_net_rnn_type = "LSTM"
    tanh = False


SELU_ALPHA = 1.6732632423543772
SELU_SCALE = 1.0507009873554805
HALF_PI = 0.5 * 3.141592653589793

F_REAL = Config.face_net_rnn_num_features   # logical hidden width (64)
FP = 128                                     # lane-padded hidden width (gate slices 128-aligned)
PRED_PAD = 128                               # lane-dense padded width of the 2-wide gaze output
CONV_OUT = 256


def _round_up(n, m):
    return ((n + m - 1) // m) * m


# ----------------------------------------------------------------------------
# Kernel 1: conv-stem im2col matmul + ReLU with FUSED per-frame mean/max pooling.
# Tiles are whole frames (fpt * Ho*Wo rows), >=2 parallel grid steps for v7x.
# ----------------------------------------------------------------------------
def _stem_pool_kernel(x_ref, w_ref, b_ref, feat_ref, pool_ref, *, hw, fpt):
    y = jnp.dot(x_ref[...], w_ref[...], preferred_element_type=jnp.float32)
    y = jnp.maximum(y + b_ref[...], 0.0)                       # (fpt*hw, 256) f32
    feat_ref[...] = y
    # fused per-frame global [mean, max] pooling (saves an HBM re-read of feats)
    rows = []
    for j in range(fpt):                                       # static unroll, aligned slices
        yj = y[j * hw:(j + 1) * hw, :]
        rows.append(jnp.concatenate(
            [jnp.mean(yj, axis=0, keepdims=True),
             jnp.max(yj, axis=0, keepdims=True)], axis=-1))    # (1, 512)
    pool_ref[0] = jnp.concatenate(rows, axis=0)                # (fpt, 512)


def conv_stem_pool(patches, w, b, *, hw, frames):
    """relu(patches @ w + b) with fused per-frame [mean, max] pooling.

    patches: (frames*hw, K) bf16, rows frame-major.
    Returns: feats (frames*hw, M) f32 (model output stays f32), pooled (frames, 2M) f32.
    """
    n_rows, k = patches.shape
    m = w.shape[1]
    # frames per tile: target ~1024 rows, >=2 grid steps (v7x has 2 TCs), and an
    # exact divisor of `frames` so no padded rows are ever computed or written.
    fpt = max(1, min(frames, 1024 // hw))
    if frames >= 2:
        fpt = min(fpt, max(1, frames // 2))
    while frames % fpt:
        fpt -= 1
    grid = frames // fpt

    feats, pooled = pl.pallas_call(
        functools.partial(_stem_pool_kernel, hw=hw, fpt=fpt),
        out_shape=(jax.ShapeDtypeStruct((n_rows, m), jnp.float32),
                   jax.ShapeDtypeStruct((grid, fpt, 2 * m), jnp.float32)),
        grid_spec=pltpu.PrefetchScalarGridSpec(
            num_scalar_prefetch=0,
            grid=(grid,),
            in_specs=[pl.BlockSpec((fpt * hw, k), lambda i: (i, 0)),
                      pl.BlockSpec((k, m), lambda i: (0, 0)),
                      pl.BlockSpec((1, m), lambda i: (0, 0))],
            out_specs=[pl.BlockSpec((fpt * hw, m), lambda i: (i, 0)),
                       pl.BlockSpec((1, fpt, 2 * m), lambda i: (i, 0, 0))]),
        compiler_params=pltpu.CompilerParams(
            dimension_semantics=("parallel",)),
    )(patches, w, b.reshape(1, m))
    return feats, pooled.reshape(frames, 2 * m)


# ----------------------------------------------------------------------------
# Kernel 2: per-frame pooled (x_t - x_{t-1}) via scalar-prefetched prev indices.
# ----------------------------------------------------------------------------
def _diff_pool_kernel(prev_ref, xt_ref, xp_ref, o_ref):
    del prev_ref                                               # only used by index maps
    d = xt_ref[0] - xp_ref[0]                                  # (hw, 256) f32
    o_ref[0] = jnp.concatenate(
        [jnp.mean(d, axis=0, keepdims=True),
         jnp.max(d, axis=0, keepdims=True)], axis=-1)          # (1, 512)


def diff_pool(feats, prev_idx, *, hw):
    frames = prev_idx.shape[0]
    m = feats.shape[-1]
    x3 = feats.reshape(frames, hw, m)
    out = pl.pallas_call(
        _diff_pool_kernel,
        out_shape=jax.ShapeDtypeStruct((frames, 1, 2 * m), jnp.float32),
        grid_spec=pltpu.PrefetchScalarGridSpec(
            num_scalar_prefetch=1,
            grid=(frames,),
            in_specs=[pl.BlockSpec((1, hw, m), lambda i, prev: (i, 0, 0)),
                      pl.BlockSpec((1, hw, m), lambda i, prev: (prev[i], 0, 0))],
            out_specs=pl.BlockSpec((1, 1, 2 * m), lambda i, prev: (i, 0, 0))),
        compiler_params=pltpu.CompilerParams(
            dimension_semantics=("parallel",)),
    )(prev_idx, x3, x3)
    return out.reshape(frames, 2 * m)


# ----------------------------------------------------------------------------
# Kernel 3: fused temporal kernel — hoisted embed + cell-0 input projection,
# LSTM recurrence with only recurrent matmuls on the serial path, deferred head.
# ----------------------------------------------------------------------------
def _temporal_kernel(sam_ref, we_ref, be_ref, wih_ref, whh_ref, bl_ref,
                     wg1_ref, bg1_ref, wg2_ref, bg2_ref, pred_ref,
                     gates0_ref, htop_ref, *, num_cells, seq_len, b_pad):
    fp = whh_ref.shape[1]                                      # padded hidden width (128)

    # ---- hoisted (no time dependence), batched over all T*B rows -------------
    # embed: Linear + ReLU for every timestep (one big bf16 MXU matmul, K=1536)
    feat_all = jnp.maximum(
        jnp.dot(sam_ref[...], we_ref[...],
                preferred_element_type=jnp.float32) + be_ref[...], 0.0)
    # cuDNN-style split: input half of cell-0's gates for every timestep
    gates0_ref[...] = jnp.dot(feat_all, wih_ref[0],
                              preferred_element_type=jnp.float32) + bl_ref[0]

    # ---- serial recurrence: only h @ W_hh (+ inter-cell h @ W_ih) remains -----
    def step(t, carry):
        hs, cs = carry
        row = pl.multiple_of(t * b_pad, b_pad)
        new_h, new_c = [], []
        x_gates = gates0_ref[pl.ds(row, b_pad), :]             # (Bp, 4*fp)
        for l in range(num_cells):                             # static unroll over cells
            if l > 0:
                x_gates = jnp.dot(new_h[-1], wih_ref[l],
                                  preferred_element_type=jnp.float32) + bl_ref[l]
            gates = x_gates + jnp.dot(hs[l], whh_ref[l],
                                      preferred_element_type=jnp.float32)
            # torch.nn.LSTMCell gate order [i, f, g, o]; each slice 128-lane aligned
            i_g = jax.nn.sigmoid(gates[:, 0 * fp:1 * fp])
            f_g = jax.nn.sigmoid(gates[:, 1 * fp:2 * fp])
            g_g = jnp.tanh(gates[:, 2 * fp:3 * fp])
            o_g = jax.nn.sigmoid(gates[:, 3 * fp:4 * fp])
            c_new = f_g * cs[l] + i_g * g_g
            h_new = o_g * jnp.tanh(c_new)
            new_h.append(h_new)
            new_c.append(c_new)
        htop_ref[pl.ds(row, b_pad), :] = new_h[-1]
        return tuple(new_h), tuple(new_c)

    init = tuple(jnp.zeros((b_pad, fp), jnp.float32) for _ in range(num_cells))
    jax.lax.fori_loop(0, seq_len, step, (init, init),
                      unroll=(seq_len if seq_len <= 8 else 2))

    # ---- deferred gaze head: two batched matmuls + one lane-dense store -------
    h_all = htop_ref[...]                                      # (T*Bp, fp)
    hid = jnp.dot(h_all, wg1_ref[...],
                  preferred_element_type=jnp.float32) + bg1_ref[...]
    hid = SELU_SCALE * jnp.where(
        hid > 0, hid, SELU_ALPHA * (jnp.exp(jnp.minimum(hid, 0.0)) - 1.0))
    pred_ref[...] = jnp.dot(hid, wg2_ref[...],
                            preferred_element_type=jnp.float32) + bg2_ref[...]


def temporal_head(sam_2d, we, be, w_ih, w_hh, b_lstm, w_g1, b_g1, w_g2, b_g2,
                  *, seq_len, b_pad):
    """sam_2d: (T*B_pad, D_sam) bf16, time-major rows.  Returns (T*B_pad, PRED_PAD)."""
    n = sam_2d.shape[0]
    num_cells, fp, four_fp = w_ih.shape
    kernel = functools.partial(_temporal_kernel, num_cells=num_cells,
                               seq_len=seq_len, b_pad=b_pad)
    args = (sam_2d, we, be.reshape(1, -1), w_ih, w_hh, b_lstm,
            w_g1, b_g1.reshape(1, -1), w_g2, b_g2.reshape(1, -1))
    est = sum(int(a.size) * a.dtype.itemsize for a in args)
    est += n * (four_fp + fp + PRED_PAD) * 4                   # scratches + output
    vmem_limit = int(min(64 * 2 ** 20, max(32 * 2 ** 20, 2 * est)))
    # TODO(synk): for large T*B on v7x (64 MiB VMEM) stream T-chunks (grid over T with
    # h/c carried in scratch) and add a batch-parallel grid axis when B/core >= 16 rows.
    return pl.pallas_call(
        kernel,
        out_shape=jax.ShapeDtypeStruct((n, PRED_PAD), jnp.float32),
        in_specs=[pl.BlockSpec(memory_space=pltpu.MemorySpace.VMEM)] * 10,
        out_specs=pl.BlockSpec(memory_space=pltpu.MemorySpace.VMEM),
        scratch_shapes=[pltpu.VMEM((n, four_fp), jnp.float32),   # cell-0 input gates
                        pltpu.VMEM((n, fp), jnp.float32)],       # top-cell h per step
        compiler_params=pltpu.CompilerParams(vmem_limit_bytes=vmem_limit),
    )(*args)


# ----------------------------------------------------------------------------
# Forward pass (glue in plain JAX, hot paths in Pallas)
# ----------------------------------------------------------------------------
def stage_lstm_forward(params, face_patch):
    B, T, C, H, W = face_patch.shape
    KH = KW = 4
    Ho, Wo = H // KH, W // KW
    HW = Ho * Wo
    frames = B * T
    K_raw = C * KH * KW
    K_pad = _round_up(K_raw, 64)

    x = face_patch.reshape(frames, C, H, W)

    # --- conv_feature_extractor -------------------------------------------------
    # TODO(synk): the reference uses a pretrained ResNet18 (GazeCLR checkpoint,
    # external .pth) truncated at layer3; it cannot be loaded here.  Stand-in:
    # one 4x4/stride-4 conv + ReLU giving 256-channel Ho x Wo features (same output
    # contract), run as an im2col matmul fused with per-frame pooling in Pallas.
    # TODO(synk): the im2col rearrangement below is an XLA transpose with tiny
    # contiguous runs; pulling it into the Pallas stem would need a gather-style DMA.
    patches = x.reshape(frames, C, Ho, KH, Wo, KW)
    patches = patches.transpose(0, 2, 4, 1, 3, 5).reshape(frames * HW, K_raw)
    patches = jnp.pad(patches, ((0, 0), (0, K_pad - K_raw))).astype(jnp.bfloat16)
    w_conv = jnp.pad(params["w_conv"],
                     ((0, K_pad - K_raw), (0, 0))).astype(jnp.bfloat16)
    feats, pool_t_flat = conv_stem_pool(patches, w_conv, params["b_conv"],
                                        hw=HW, frames=frames)

    # 'feats' output matches torch's NCHW inter_Feats.view(b, t, -1)  (kept f32)
    feats_out = (feats.reshape(frames, Ho, Wo, CONV_OUT)
                      .transpose(0, 3, 1, 2)
                      .reshape(B, T, -1))

    # --- spatial_attention_difference --------------------------------------------
    # TODO(synk): Proposed_SAM is not defined in the reference source; stand-in
    # produces the documented embed_dim_inp = 512*3 by concatenating
    # [global-avg-pool, global-max-pool] (256+256) of (x_{t-1}, x_t, x_t - x_{t-1}).
    # Per-frame pools come fused out of the stem; the diff pool is its own kernel.
    t_ids = jnp.arange(T)
    prev_idx = (jnp.arange(B)[:, None] * T
                + jnp.maximum(t_ids - 1, 0)[None, :]).reshape(-1).astype(jnp.int32)
    pool_diff = diff_pool(feats, prev_idx, hw=HW).reshape(B, T, 2 * CONV_OUT)

    pool_t = pool_t_flat.reshape(B, T, 2 * CONV_OUT)
    pool_tm1 = jnp.concatenate([pool_t[:, :1], pool_t[:, :-1]], axis=1)
    sam = jnp.concatenate([pool_tm1, pool_t, pool_diff], axis=-1)    # (B, T, 1536)

    # --- fused embed + stacked LSTM cells + gaze head (single Pallas kernel) ------
    B_pad = _round_up(B, 8)              # sublane-aligned batch rows inside the kernel
    sam_tm = sam.transpose(1, 0, 2)                                  # (T, B, 1536)
    if B_pad != B:
        sam_tm = jnp.pad(sam_tm, ((0, 0), (0, B_pad - B), (0, 0)))
    sam_2d = sam_tm.reshape(T * B_pad, sam.shape[-1]).astype(jnp.bfloat16)

    pred_full = temporal_head(
        sam_2d, params["w_embed"].astype(jnp.bfloat16), params["b_embed"],
        params["w_ih"], params["w_hh"], params["b_lstm"],
        params["w_g1"], params["b_g1"], params["w_g2"], params["b_g2"],
        seq_len=T, b_pad=B_pad)

    pred = (pred_full.reshape(T, B_pad, PRED_PAD)[:, :B, :2]
                     .transpose(1, 0, 2))                            # (B, T, 2)
    if Config.tanh:
        pred = HALF_PI * jnp.tanh(pred)   # with config.tanh the torch head ends in Tanh

    return {"feats": feats_out, "pred": pred}


# ----------------------------------------------------------------------------
# Deterministic parameter init (PyTorch-style uniform(-1/sqrt(fan_in), +..)),
# pre-padded so the hidden width is FP=128 and every gate block is 128-lane aligned.
# ----------------------------------------------------------------------------
def init_params(key):
    F = F_REAL
    L = Config.face_net_rnn_num_cells
    c_patch = 3 * 4 * 4
    d_sam = 512 * 3
    keys = jax.random.split(key, 16)

    def u(k, shape, fan_in):
        bound = 1.0 / float(fan_in) ** 0.5
        return jax.random.uniform(k, shape, jnp.float32, -bound, bound)

    def pad_cols(w, cols):
        return jnp.pad(w, [(0, 0)] * (w.ndim - 1) + [(0, cols - w.shape[-1])])

    params = {}
    params["w_conv"] = u(keys[0], (c_patch, CONV_OUT), c_patch)
    params["b_conv"] = u(keys[1], (CONV_OUT,), c_patch)

    # embed Linear(1536 -> 64), zero-padded to 128 output lanes
    params["w_embed"] = pad_cols(u(keys[2], (d_sam, F), d_sam), FP)
    params["b_embed"] = pad_cols(u(keys[3], (F,), d_sam), FP)

    # torch.nn.LSTMCell: W_ih (4F,F), W_hh (4F,F), gate order [i,f,g,o], init
    # uniform(-1/sqrt(hidden_size), ..).  Stored transposed and zero-padded so each
    # gate occupies its own 128-lane block (gate slices never cut an (8,128) tile).
    def pad_gate_w(w_t):                 # w_t: (F, 4F) -> (FP, 4*FP)
        out = jnp.zeros((FP, 4 * FP), jnp.float32)
        for g in range(4):
            out = out.at[:F, g * FP:g * FP + F].set(w_t[:, g * F:(g + 1) * F])
        return out

    def pad_gate_b(bv):                  # (4F,) -> (1, 4*FP)
        out = jnp.zeros((1, 4 * FP), jnp.float32)
        for g in range(4):
            out = out.at[0, g * FP:g * FP + F].set(bv[g * F:(g + 1) * F])
        return out

    w_ih, w_hh, b_l = [], [], []
    for l in range(L):
        kk = jax.random.split(keys[4 + l], 4)
        w_ih.append(pad_gate_w(u(kk[0], (4 * F, F), F).T))
        w_hh.append(pad_gate_w(u(kk[1], (4 * F, F), F).T))
        b_l.append(pad_gate_b(u(kk[2], (4 * F,), F) + u(kk[3], (4 * F,), F)))
    params["w_ih"] = jnp.stack(w_ih)     # (L, FP, 4*FP)   b_ih + b_hh folded into b_lstm
    params["w_hh"] = jnp.stack(w_hh)     # (L, FP, 4*FP)
    params["b_lstm"] = jnp.stack(b_l)    # (L, 1, 4*FP)

    # gaze head: Linear(64,64) -> SELU -> Linear(64,2), padded to FP / PRED_PAD lanes
    params["w_g1"] = (jnp.zeros((FP, FP), jnp.float32)
                      .at[:F, :F].set(u(keys[8], (F, F), F)))
    params["b_g1"] = pad_cols(u(keys[9], (F,), F), FP)
    params["w_g2"] = (jnp.zeros((FP, PRED_PAD), jnp.float32)
                      .at[:F, :2].set(u(keys[10], (F, 2), F)))
    params["b_g2"] = pad_cols(u(keys[11], (2,), F), PRED_PAD)
    return params


if __name__ == "__main__":
    key = jax.random.PRNGKey(0)
    k_param, k_data = jax.random.split(key)

    B, T, C, H, W = 2, 4, 3, 32, 32
    face_patch = jax.random.normal(k_data, (B, T, C, H, W), jnp.float32)
    params = init_params(k_param)

    fwd = jax.jit(stage_lstm_forward)
    out = fwd(params, face_patch)
    jax.block_until_ready(out["pred"])
    jax.block_until_ready(out["feats"])

    assert out["pred"].shape == (B, T, 2)
    assert out["feats"].shape == (B, T, CONV_OUT * (H // 4) * (W // 4))
    print("KERNEL_OK")
</pallas_src>

<mosaic_0001>
module attributes {stable_mosaic.version = 11 : i64} {
  func.func @_stem_pool_kernel(%arg0: i32, %arg1: memref<256x64xbf16, #tpu.memory_space<vmem>>, %arg2: memref<64x256xbf16, #tpu.memory_space<vmem>>, %arg3: memref<1x256xf32, #tpu.memory_space<vmem>>, %arg4: memref<256x256xf32, #tpu.memory_space<vmem>>, %arg5: memref<1x4x512xf32, #tpu.memory_space<vmem>>) attributes {dimension_semantics = [#tpu.dimension_semantics<parallel>], iteration_bounds = array<i64: 2>, scalar_prefetch = 0 : i64, scratch_operands = 0 : i64, tpu.core_type = #tpu.core_type<tc>, window_params = [{transform_indices = @transform_0, window_bounds = array<i64: 256, 64>}, {pipeline_mode = #tpu.pipeline_mode<synchronous>, transform_indices = @transform_1, window_bounds = array<i64: 64, 256>}, {pipeline_mode = #tpu.pipeline_mode<synchronous>, transform_indices = @transform_2, window_bounds = array<i64: 1, 256>}, {transform_indices = @transform_3, window_bounds = array<i64: 256, 256>}, {transform_indices = @transform_4, window_bounds = array<i64: 1, 4, 512>}]} {
    %c0 = arith.constant 0 : index
    %c0_0 = arith.constant 0 : index
    %0 = vector.load %arg1[%c0, %c0_0] : memref<256x64xbf16, #tpu.memory_space<vmem>>, vector<256x64xbf16>
    %c0_1 = arith.constant 0 : index
    %c0_2 = arith.constant 0 : index
    %1 = vector.load %arg2[%c0_1, %c0_2] : memref<64x256xbf16, #tpu.memory_space<vmem>>, vector<64x256xbf16>
    %cst = arith.constant dense<0.000000e+00> : vector<256x256xf32>
    %2 = tpu.matmul %0, %1, %cst {dimension_numbers = #tpu.dot_dimension_numbers<[1], [0], [0], [1], [0, 0, 1, 1], [], []>} : vector<256x64xbf16>, vector<64x256xbf16>, vector<256x256xf32> -> vector<256x256xf32>
    %c0_3 = arith.constant 0 : index
    %c0_4 = arith.constant 0 : index
    %3 = vector.load %arg3[%c0_3, %c0_4] : memref<1x256xf32, #tpu.memory_space<vmem>>, vector<1x256xf32>
    %4 = vector.broadcast %3 : vector<1x256xf32> to vector<256x256xf32>
    %5 = arith.addf %2, %4 : vector<256x256xf32>
    %cst_5 = arith.constant 0.000000e+00 : f32
    %6 = vector.broadcast %cst_5 : f32 to vector<256x256xf32>
    %7 = arith.maximumf %5, %6 : vector<256x256xf32>
    %c0_6 = arith.constant 0 : index
    %c0_7 = arith.constant 0 : index
    %8 = vector.load %arg4[%c0_6, %c0_7] : memref<256x256xf32, #tpu.memory_space<vmem>>, vector<256x256xf32>
    tpu.vector_store %arg4[%c0_6, %c0_7], %7 {strides = array<i32>} : memref<256x256xf32, #tpu.memory_space<vmem>>, vector<256x256xf32>,
    %9 = vector.extract_strided_slice %7 {offsets = [0, 0], sizes = [64, 256], strides = [1, 1]} : vector<256x256xf32> to vector<64x256xf32>
    %cst_8 = arith.constant dense<0.000000e+00> : vector<256xf32>
    %10 = vector.multi_reduction <add>, %9, %cst_8 [0] : vector<64x256xf32> to vector<256xf32>
    %11 = vector.shape_cast %10 : vector<256xf32> to vector<1x256xf32>
    %cst_9 = arith.constant 6.400000e+01 : f32
    %12 = vector.broadcast %cst_9 : f32 to vector<1x256xf32>
    %13 = arith.divf %11, %12 : vector<1x256xf32>
    %cst_10 = arith.constant dense<0xFF800000> : vector<256xf32>
    %14 = vector.multi_reduction <maximumf>, %9, %cst_10 [0] : vector<64x256xf32> to vector<256xf32>
    %15 = vector.shape_cast %14 : vector<256xf32> to vector<1x256xf32>
    %16 = tpu.concatenate %13, %15 in 1 : vector<1x256xf32>, vector<1x256xf32> -> vector<1x512xf32>
    %17 = vector.extract_strided_slice %7 {offsets = [64, 0], sizes = [64, 256], strides = [1, 1]} : vector<256x256xf32> to vector<64x256xf32>
    %cst_11 = arith.constant dense<0.000000e+00> : vector<256xf32>
    %18 = vector.multi_reduction <add>, %17, %cst_11 [0] : vector<64x256xf32> to vector<256xf32>
    %19 = vector.shape_cast %18 : vector<256xf32> to vector<1x256xf32>
    %cst_12 = arith.constant 6.400000e+01 : f32
    %20 = vector.broadcast %cst_12 : f32 to vector<1x256xf32>
    %21 = arith.divf %19, %20 : vector<1x256xf32>
    %cst_13 = arith.constant dense<0xFF800000> : vector<256xf32>
    %22 = vector.multi_reduction <maximumf>, %17, %cst_13 [0] : vector<64x256xf32> to vector<256xf32>
    %23 = vector.shape_cast %22 : vector<256xf32> to vector<1x256xf32>
    %24 = tpu.concatenate %21, %23 in 1 : vector<1x256xf32>, vector<1x256xf32> -> vector<1x512xf32>
    %25 = vector.extract_strided_slice %7 {offsets = [128, 0], sizes = [64, 256], strides = [1, 1]} : vector<256x256xf32> to vector<64x256xf32>
    %cst_14 = arith.constant dense<0.000000e+00> : vector<256xf32>
    %26 = vector.multi_reduction <add>, %25, %cst_14 [0] : vector<64x256xf32> to vector<256xf32>
    %27 = vector.shape_cast %26 : vector<256xf32> to vector<1x256xf32>
    %cst_15 = arith.constant 6.400000e+01 : f32
    %28 = vector.broadcast %cst_15 : f32 to vector<1x256xf32>
    %29 = arith.divf %27, %28 : vector<1x256xf32>
    %cst_16 = arith.constant dense<0xFF800000> : vector<256xf32>
    %30 = vector.multi_reduction <maximumf>, %25, %cst_16 [0] : vector<64x256xf32> to vector<256xf32>
    %31 = vector.shape_cast %30 : vector<256xf32> to vector<1x256xf32>
    %32 = tpu.concatenate %29, %31 in 1 : vector<1x256xf32>, vector<1x256xf32> -> vector<1x512xf32>
    %33 = vector.extract_strided_slice %7 {offsets = [192, 0], sizes = [64, 256], strides = [1, 1]} : vector<256x256xf32> to vector<64x256xf32>
    %cst_17 = arith.constant dense<0.000000e+00> : vector<256xf32>
    %34 = vector.multi_reduction <add>, %33, %cst_17 [0] : vector<64x256xf32> to vector<256xf32>
    %35 = vector.shape_cast %34 : vector<256xf32> to vector<1x256xf32>
    %cst_18 = arith.constant 6.400000e+01 : f32
    %36 = vector.broadcast %cst_18 : f32 to vector<1x256xf32>
    %37 = arith.divf %35, %36 : vector<1x256xf32>
    %cst_19 = arith.constant dense<0xFF800000> : vector<256xf32>
    %38 = vector.multi_reduction <maximumf>, %33, %cst_19 [0] : vector<64x256xf32> to vector<256xf32>
    %39 = vector.shape_cast %38 : vector<256xf32> to vector<1x256xf32>
    %40 = tpu.concatenate %37, %39 in 1 : vector<1x256xf32>, vector<1x256xf32> -> vector<1x512xf32>
    %41 = tpu.concatenate %16, %24, %32, %40 in 0 : vector<1x512xf32>, vector<1x512xf32>, vector<1x512xf32>, vector<1x512xf32> -> vector<4x512xf32>
    %c0_20 = arith.constant 0 : index
    %c0_21 = arith.constant 0 : index
    %c0_22 = arith.constant 0 : index
    %42 = vector.load %arg5[%c0_20, %c0_21, %c0_22] : memref<1x4x512xf32, #tpu.memory_space<vmem>>, vector<1x4x512xf32>
    %43 = vector.shape_cast %42 : vector<1x4x512xf32> to vector<4x512xf32>
    %44 = vector.shape_cast %41 : vector<4x512xf32> to vector<1x4x512xf32>
    tpu.vector_store %arg5[%c0_20, %c0_21, %c0_22], %44 {strides = array<i32>} : memref<1x4x512xf32, #tpu.memory_space<vmem>>, vector<1x4x512xf32>,
    return
  }
  func.func @transform_0(%arg0: i32) -> (i32, i32) {
    %c0_i32 = arith.constant 0 : i32
    %c0_i32_0 = arith.constant 0 : i32
    return %arg0, %c0_i32 : i32, i32
  }
  func.func @transform_1(%arg0: i32) -> (i32, i32) {
    %c0_i32 = arith.constant 0 : i32
    %c0_i32_0 = arith.constant 0 : i32
    %c0_i32_1 = arith.constant 0 : i32
    return %c0_i32, %c0_i32_0 : i32, i32
  }
  func.func @transform_2(%arg0: i32) -> (i32, i32) {
    %c0_i32 = arith.constant 0 : i32
    %c0_i32_0 = arith.constant 0 : i32
    %c0_i32_1 = arith.constant 0 : i32
    return %c0_i32, %c0_i32_0 : i32, i32
  }
  func.func @transform_3(%arg0: i32) -> (i32, i32) {
    %c0_i32 = arith.constant 0 : i32
    %c0_i32_0 = arith.constant 0 : i32
    return %arg0, %c0_i32 : i32, i32
  }
  func.func @transform_4(%arg0: i32) -> (i32, i32, i32) {
    %c0_i32 = arith.constant 0 : i32
    %c0_i32_0 = arith.constant 0 : i32
    %c0_i32_1 = arith.constant 0 : i32
    return %arg0, %c0_i32, %c0_i32_0 : i32, i32, i32
  }
}

module attributes {stable_mosaic.version = 11 : i64} {
  func.func @_diff_pool_kernel(%arg0: i32, %arg1: memref<8xi32, #tpu.memory_space<smem>>, %arg2: memref<1x64x256xf32, #tpu.memory_space<vmem>>, %arg3: memref<1x64x256xf32, #tpu.memory_space<vmem>>, %arg4: memref<1x1x512xf32, #tpu.memory_space<vmem>>) attributes {dimension_semantics = [#tpu.dimension_semantics<parallel>], iteration_bounds = array<i64: 8>, scalar_prefetch = 1 : i64, scratch_operands = 0 : i64, tpu.core_type = #tpu.core_type<tc>, window_params = [{transform_indices = @transform_0, window_bounds = array<i64: 1, 64, 256>}, {transform_indices = @transform_1, window_bounds = array<i64: 1, 64, 256>}, {transform_indices = @transform_2, window_bounds = array<i64: 1, 1, 512>}]} {
    %c0 = arith.constant 0 : index
    %c0_0 = arith.constant 0 : index
    %c0_1 = arith.constant 0 : index
    %0 = vector.load %arg2[%c0, %c0_0, %c0_1] : memref<1x64x256xf32, #tpu.memory_space<vmem>>, vector<1x64x256xf32>
    %1 = vector.shape_cast %0 : vector<1x64x256xf32> to vector<64x256xf32>
    %c0_2 = arith.constant 0 : index
    %c0_3 = arith.constant 0 : index
    %c0_4 = arith.constant 0 : index
    %2 = vector.load %arg3[%c0_2, %c0_3, %c0_4] : memref<1x64x256xf32, #tpu.memory_space<vmem>>, vector<1x64x256xf32>
    %3 = vector.shape_cast %2 : vector<1x64x256xf32> to vector<64x256xf32>
    %4 = arith.subf %1, %3 : vector<64x256xf32>
    %cst = arith.constant dense<0.000000e+00> : vector<256xf32>
    %5 = vector.multi_reduction <add>, %4, %cst [0] : vector<64x256xf32> to vector<256xf32>
    %6 = vector.shape_cast %5 : vector<256xf32> to vector<1x256xf32>
    %cst_5 = arith.constant 6.400000e+01 : f32
    %7 = vector.broadcast %cst_5 : f32 to vector<1x256xf32>
    %8 = arith.divf %6, %7 : vector<1x256xf32>
    %cst_6 = arith.constant dense<0xFF800000> : vector<256xf32>
    %9 = vector.multi_reduction <maximumf>, %4, %cst_6 [0] : vector<64x256xf32> to vector<256xf32>
    %10 = vector.shape_cast %9 : vector<256xf32> to vector<1x256xf32>
    %11 = tpu.concatenate %8, %10 in 1 : vector<1x256xf32>, vector<1x256xf32> -> vector<1x512xf32>
    %c0_7 = arith.constant 0 : index
    %c0_8 = arith.constant 0 : index
    %c0_9 = arith.constant 0 : index
    %12 = vector.load %arg4[%c0_7, %c0_8, %c0_9] : memref<1x1x512xf32, #tpu.memory_space<vmem>>, vector<1x1x512xf32>
    %13 = vector.shape_cast %12 : vector<1x1x512xf32> to vector<1x512xf32>
    %14 = vector.shape_cast %11 : vector<1x512xf32> to vector<1x1x512xf32>
    tpu.vector_store %arg4[%c0_7, %c0_8, %c0_9], %14 {strides = array<i32>} : memref<1x1x512xf32, #tpu.memory_space<vmem>>, vector<1x1x512xf32>,
    return
  }
  func.func @transform_0(%arg0: i32, %arg1: memref<8xi32, #tpu.memory_space<smem>>) -> (i32, i32, i32) {
    %c0_i32 = arith.constant 0 : i32
    %c0_i32_0 = arith.constant 0 : i32
    %c0_i32_1 = arith.constant 0 : i32
    return %arg0, %c0_i32, %c0_i32_0 : i32, i32, i32
  }
  func.func @transform_1(%arg0: i32, %arg1: memref<8xi32, #tpu.memory_space<smem>>) -> (i32, i32, i32) {
    %0 = arith.index_cast %arg0 : i32 to index
    %1 = memref.load %arg1[%0] : memref<8xi32, #tpu.memory_space<smem>>
    %c0_i32 = arith.constant 0 : i32
    %c0_i32_0 = arith.constant 0 : i32
    %c0_i32_1 = arith.constant 0 : i32
    return %1, %c0_i32, %c0_i32_0 : i32, i32, i32
  }
  func.func @transform_2(%arg0: i32, %arg1: memref<8xi32, #tpu.memory_space<smem>>) -> (i32, i32, i32) {
    %c0_i32 = arith.constant 0 : i32
    %c0_i32_0 = arith.constant 0 : i32
    %c0_i32_1 = arith.constant 0 : i32
    return %arg0, %c0_i32, %c0_i32_0 : i32, i32, i32
  }
}

module attributes {stable_mosaic.version = 11 : i64} {
  func.func @_temporal_kernel(%arg0: memref<32x1536xbf16, #tpu.memory_space<vmem>>, %arg1: memref<1536x128xbf16, #tpu.memory_space<vmem>>, %arg2: memref<1x128xf32, #tpu.memory_space<vmem>>, %arg3: memref<2x128x512xf32, #tpu.memory_space<vmem>>, %arg4: memref<2x128x512xf32, #tpu.memory_space<vmem>>, %arg5: memref<2x1x512xf32, #tpu.memory_space<vmem>>, %arg6: memref<128x128xf32, #tpu.memory_space<vmem>>, %arg7: memref<1x128xf32, #tpu.memory_space<vmem>>, %arg8: memref<128x128xf32, #tpu.memory_space<vmem>>, %arg9: memref<1x128xf32, #tpu.memory_space<vmem>>, %arg10: memref<32x128xf32, #tpu.memory_space<vmem>>, %arg11: memref<32x512xf32, #tpu.memory_space<vmem>>, %arg12: memref<32x128xf32, #tpu.memory_space<vmem>>) attributes {dimension_semantics = [], scalar_prefetch = 0 : i64, scratch_operands = 2 : i64, tpu.core_type = #tpu.core_type<tc>} {
    %c0 = arith.constant 0 : index
    %c0_0 = arith.constant 0 : index
    %0 = vector.load %arg0[%c0, %c0_0] : memref<32x1536xbf16, #tpu.memory_space<vmem>>, vector<32x1536xbf16>
    %c0_1 = arith.constant 0 : index
    %c0_2 = arith.constant 0 : index
    %1 = vector.load %arg1[%c0_1, %c0_2] : memref<1536x128xbf16, #tpu.memory_space<vmem>>, vector<1536x128xbf16>
    %cst = arith.constant dense<0.000000e+00> : vector<32x128xf32>
    %2 = tpu.matmul %0, %1, %cst {dimension_numbers = #tpu.dot_dimension_numbers<[1], [0], [0], [1], [0, 0, 1, 1], [], []>} : vector<32x1536xbf16>, vector<1536x128xbf16>, vector<32x128xf32> -> vector<32x128xf32>
    %c0_3 = arith.constant 0 : index
    %c0_4 = arith.constant 0 : index
    %3 = vector.load %arg2[%c0_3, %c0_4] : memref<1x128xf32, #tpu.memory_space<vmem>>, vector<1x128xf32>
    %4 = vector.broadcast %3 : vector<1x128xf32> to vector<32x128xf32>
    %5 = arith.addf %2, %4 : vector<32x128xf32>
    %cst_5 = arith.constant 0.000000e+00 : f32
    %6 = vector.broadcast %cst_5 : f32 to vector<32x128xf32>
    %7 = arith.maximumf %5, %6 : vector<32x128xf32>
    %c0_6 = arith.constant 0 : index
    %c0_7 = arith.constant 0 : index
    %c0_8 = arith.constant 0 : index
    %8 = vector.load %arg3[%c0_6, %c0_7, %c0_8] : memref<2x128x512xf32, #tpu.memory_space<vmem>>, vector<1x128x512xf32>
    %9 = vector.shape_cast %8 : vector<1x128x512xf32> to vector<128x512xf32>
    %cst_9 = arith.constant dense<0.000000e+00> : vector<32x512xf32>
    %10 = tpu.matmul %7, %9, %cst_9 {dimension_numbers = #tpu.dot_dimension_numbers<[1], [0], [0], [1], [0, 0, 1, 1], [], []>} : vector<32x128xf32>, vector<128x512xf32>, vector<32x512xf32> -> vector<32x512xf32>
    %c0_10 = arith.constant 0 : index
    %c0_11 = arith.constant 0 : index
    %c0_12 = arith.constant 0 : index
    %11 = vector.load %arg5[%c0_10, %c0_11, %c0_12] : memref<2x1x512xf32, #tpu.memory_space<vmem>>, vector<1x1x512xf32>
    %12 = vector.shape_cast %11 : vector<1x1x512xf32> to vector<1x512xf32>
    %13 = vector.broadcast %12 : vector<1x512xf32> to vector<32x512xf32>
    %14 = arith.addf %10, %13 : vector<32x512xf32>
    %c0_13 = arith.constant 0 : index
    %c0_14 = arith.constant 0 : index
    %15 = vector.load %arg11[%c0_13, %c0_14] : memref<32x512xf32, #tpu.memory_space<vmem>>, vector<32x512xf32>
    tpu.vector_store %arg11[%c0_13, %c0_14], %14 {strides = array<i32>} : memref<32x512xf32, #tpu.memory_space<vmem>>, vector<32x512xf32>,
    %cst_15 = arith.constant 0.000000e+00 : f32
    %16 = vector.broadcast %cst_15 : f32 to vector<8x128xf32>
    %cst_16 = arith.constant 0.000000e+00 : f32
    %17 = vector.broadcast %cst_16 : f32 to vector<8x128xf32>
    %c0_i32 = arith.constant 0 : i32
    %c8_i32 = arith.constant 8 : i32
    %18 = arith.muli %c0_i32, %c8_i32 : i32
    %19 = tpu.assume_multiple %18, 8 : i32
    %20 = arith.index_cast %19 : i32 to index
    %c0_17 = arith.constant 0 : index
    %21 = vector.load %arg11[%20, %c0_17] : memref<32x512xf32, #tpu.memory_space<vmem>>, vector<8x512xf32>
    %c0_18 = arith.constant 0 : index
    %c0_19 = arith.constant 0 : index
    %c0_20 = arith.constant 0 : index
    %22 = vector.load %arg4[%c0_18, %c0_19, %c0_20] : memref<2x128x512xf32, #tpu.memory_space<vmem>>, vector<1x128x512xf32>
    %23 = vector.shape_cast %22 : vector<1x128x512xf32> to vector<128x512xf32>
    %cst_21 = arith.constant dense<0.000000e+00> : vector<8x512xf32>
    %24 = tpu.matmul %16, %23, %cst_21 {dimension_numbers = #tpu.dot_dimension_numbers<[1], [0], [0], [1], [0, 0, 1, 1], [], []>} : vector<8x128xf32>, vector<128x512xf32>, vector<8x512xf32> -> vector<8x512xf32>
    %25 = arith.addf %21, %24 : vector<8x512xf32>
    %26 = vector.extract_strided_slice %25 {offsets = [0, 0], sizes = [8, 128], strides = [1, 1]} : vector<8x512xf32> to vector<8x128xf32>
    %27 = arith.negf %26 : vector<8x128xf32>
    %28 = math.exp %27 : vector<8x128xf32>
    %cst_22 = arith.constant 1.000000e+00 : f32
    %29 = vector.broadcast %cst_22 : f32 to vector<8x128xf32>
    %30 = arith.addf %29, %28 : vector<8x128xf32>
    %31 = arith.divf %29, %30 : vector<8x128xf32>
    %32 = vector.extract_strided_slice %25 {offsets = [0, 128], sizes = [8, 128], strides = [1, 1]} : vector<8x512xf32> to vector<8x128xf32>
    %33 = arith.negf %32 : vector<8x128xf32>
    %34 = math.exp %33 : vector<8x128xf32>
    %cst_23 = arith.constant 1.000000e+00 : f32
    %35 = vector.broadcast %cst_23 : f32 to vector<8x128xf32>
    %36 = arith.addf %35, %34 : vector<8x128xf32>
    %37 = arith.divf %35, %36 : vector<8x128xf32>
    %38 = vector.extract_strided_slice %25 {offsets = [0, 256], sizes = [8, 128], strides = [1, 1]} : vector<8x512xf32> to vector<8x128xf32>
    %39 = math.tanh %38 : vector<8x128xf32>
    %40 = vector.extract_strided_slice %25 {offsets = [0, 384], sizes = [8, 128], strides = [1, 1]} : vector<8x512xf32> to vector<8x128xf32>
    %41 = arith.negf %40 : vector<8x128xf32>
    %42 = math.exp %41 : vector<8x128xf32>
    %cst_24 = arith.constant 1.000000e+00 : f32
    %43 = vector.broadcast %cst_24 : f32 to vector<8x128xf32>
    %44 = arith.addf %43, %42 : vector<8x128xf32>
    %45 = arith.divf %43, %44 : vector<8x128xf32>
    %46 = arith.mulf %37, %16 : vector<8x128xf32>
    %47 = arith.mulf %31, %39 : vector<8x128xf32>
    %48 = arith.addf %46, %47 : vector<8x128xf32>
    %49 = math.tanh %48 : vector<8x128xf32>
    %50 = arith.mulf %45, %49 : vector<8x128xf32>
    %c1 = arith.constant 1 : index
    %c0_25 = arith.constant 0 : index
    %c0_26 = arith.constant 0 : index
    %51 = vector.load %arg3[%c1, %c0_25, %c0_26] : memref<2x128x512xf32, #tpu.memory_space<vmem>>, vector<1x128x512xf32>
    %52 = vector.shape_cast %51 : vector<1x128x512xf32> to vector<128x512xf32>
    %cst_27 = arith.constant dense<0.000000e+00> : vector<8x512xf32>
    %53 = tpu.matmul %50, %52, %cst_27 {dimension_numbers = #tpu.dot_dimension_numbers<[1], [0], [0], [1], [0, 0, 1, 1], [], []>} : vector<8x128xf32>, vector<128x512xf32>, vector<8x512xf32> -> vector<8x512xf32>
    %c1_28 = arith.constant 1 : index
    %c0_29 = arith.constant 0 : index
    %c0_30 = arith.constant 0 : index
    %54 = vector.load %arg5[%c1_28, %c0_29, %c0_30] : memref<2x1x512xf32, #tpu.memory_space<vmem>>, vector<1x1x512xf32>
    %55 = vector.shape_cast %54 : vector<1x1x512xf32> to vector<1x512xf32>
    %56 = vector.broadcast %55 : vector<1x512xf32> to vector<8x512xf32>
    %57 = arith.addf %53, %56 : vector<8x512xf32>
    %c1_31 = arith.constant 1 : index
    %c0_32 = arith.constant 0 : index
    %c0_33 = arith.constant 0 : index
    %58 = vector.load %arg4[%c1_31, %c0_32, %c0_33] : memref<2x128x512xf32, #tpu.memory_space<vmem>>, vector<1x128x512xf32>
    %59 = vector.shape_cast %58 : vector<1x128x512xf32> to vector<128x512xf32>
    %cst_34 = arith.constant dense<0.000000e+00> : vector<8x512xf32>
    %60 = tpu.matmul %17, %59, %cst_34 {dimension_numbers = #tpu.dot_dimension_numbers<[1], [0], [0], [1], [0, 0, 1, 1], [], []>} : vector<8x128xf32>, vector<128x512xf32>, vector<8x512xf32> -> vector<8x512xf32>
    %61 = arith.addf %57, %60 : vector<8x512xf32>
    %62 = vector.extract_strided_slice %61 {offsets = [0, 0], sizes = [8, 128], strides = [1, 1]} : vector<8x512xf32> to vector<8x128xf32>
    %63 = arith.negf %62 : vector<8x128xf32>
    %64 = math.exp %63 : vector<8x128xf32>
    %cst_35 = arith.constant 1.000000e+00 : f32
    %65 = vector.broadcast %cst_35 : f32 to vector<8x128xf32>
    %66 = arith.addf %65, %64 : vector<8x128xf32>
    %67 = arith.divf %65, %66 : vector<8x128xf32>
    %68 = vector.extract_strided_slice %61 {offsets = [0, 128], sizes = [8, 128], strides = [1, 1]} : vector<8x512xf32> to vector<8x128xf32>
    %69 = arith.negf %68 : vector<8x128xf32>
    %70 = math.exp %69 : vector<8x128xf32>
    %cst_36 = arith.constant 1.000000e+00 : f32
    %71 = vector.broadcast %cst_36 : f32 to vector<8x128xf32>
    %72 = arith.addf %71, %70 : vector<8x128xf32>
    %73 = arith.divf %71, %72 : vector<8x128xf32>
    %74 = vector.extract_strided_slice %61 {offsets = [0, 256], sizes = [8, 128], strides = [1, 1]} : vector<8x512xf32> to vector<8x128xf32>
    %75 = math.tanh %74 : vector<8x128xf32>
    %76 = vector.extract_strided_slice %61 {offsets = [0, 384], sizes = [8, 128], strides = [1, 1]} : vector<8x512xf32> to vector<8x128xf32>
    %77 = arith.negf %76 : vector<8x128xf32>
    %78 = math.exp %77 : vector<8x128xf32>
    %cst_37 = arith.constant 1.000000e+00 : f32
    %79 = vector.broadcast %cst_37 : f32 to vector<8x128xf32>
    %80 = arith.addf %79, %78 : vector<8x128xf32>
    %81 = arith.divf %79, %80 : vector<8x128xf32>
    %82 = arith.mulf %73, %17 : vector<8x128xf32>
    %83 = arith.mulf %67, %75 : vector<8x128xf32>
    %84 = arith.addf %82, %83 : vector<8x128xf32>
    %85 = math.tanh %84 : vector<8x128xf32>
    %86 = arith.mulf %81, %85 : vector<8x128xf32>
    %87 = arith.index_cast %19 : i32 to index
    %c0_38 = arith.constant 0 : index
    %88 = vector.load %arg12[%87, %c0_38] : memref<32x128xf32, #tpu.memory_space<vmem>>, vector<8x128xf32>
    tpu.vector_store %arg12[%87, %c0_38], %86 {strides = array<i32>} : memref<32x128xf32, #tpu.memory_space<vmem>>, vector<8x128xf32>,
    %c1_i32 = arith.constant 1 : i32
    %c8_i32_39 = arith.constant 8 : i32
    %89 = arith.muli %c1_i32, %c8_i32_39 : i32
    %90 = tpu.assume_multiple %89, 8 : i32
    %91 = arith.index_cast %90 : i32 to index
    %c0_40 = arith.constant 0 : index
    %92 = vector.load %arg11[%91, %c0_40] : memref<32x512xf32, #tpu.memory_space<vmem>>, vector<8x512xf32>
    %c0_41 = arith.constant 0 : index
    %c0_42 = arith.constant 0 : index
    %c0_43 = arith.constant 0 : index
    %93 = vector.load %arg4[%c0_41, %c0_42, %c0_43] : memref<2x128x512xf32, #tpu.memory_space<vmem>>, vector<1x128x512xf32>
    %94 = vector.shape_cast %93 : vector<1x128x512xf32> to vector<128x512xf32>
    %cst_44 = arith.constant dense<0.000000e+00> : vector<8x512xf32>
    %95 = tpu.matmul %50, %94, %cst_44 {dimension_numbers = #tpu.dot_dimension_numbers<[1], [0], [0], [1], [0, 0, 1, 1], [], []>} : vector<8x128xf32>, vector<128x512xf32>, vector<8x512xf32> -> vector<8x512xf32>
    %96 = arith.addf %92, %95 : vector<8x512xf32>
    %97 = vector.extract_strided_slice %96 {offsets = [0, 0], sizes = [8, 128], strides = [1, 1]} : vector<8x512xf32> to vector<8x128xf32>
    %98 = arith.negf %97 : vector<8x128xf32>
    %99 = math.exp %98 : vector<8x128xf32>
    %cst_45 = arith.constant 1.000000e+00 : f32
    %100 = vector.broadcast %cst_45 : f32 to vector<8x128xf32>
    %101 = arith.addf %100, %99 : vector<8x128xf32>
    %102 = arith.divf %100, %101 : vector<8x128xf32>
    %103 = vector.extract_strided_slice %96 {offsets = [0, 128], sizes = [8, 128], strides = [1, 1]} : vector<8x512xf32> to vector<8x128xf32>
    %104 = arith.negf %103 : vector<8x128xf32>
    %105 = math.exp %104 : vector<8x128xf32>
    %cst_46 = arith.constant 1.000000e+00 : f32
    %106 = vector.broadcast %cst_46 : f32 to vector<8x128xf32>
    %107 = arith.addf %106, %105 : vector<8x128xf32>
    %108 = arith.divf %106, %107 : vector<8x128xf32>
    %109 = vector.extract_strided_slice %96 {offsets = [0, 256], sizes = [8, 128], strides = [1, 1]} : vector<8x512xf32> to vector<8x128xf32>
    %110 = math.tanh %109 : vector<8x128xf32>
    %111 = vector.extract_strided_slice %96 {offsets = [0, 384], sizes = [8, 128], strides = [1, 1]} : vector<8x512xf32> to vector<8x128xf32>
    %112 = arith.negf %111 : vector<8x128xf32>
    %113 = math.exp %112 : vector<8x128xf32>
    %cst_47 = arith.constant 1.000000e+00 : f32
    %114 = vector.broadcast %cst_47 : f32 to vector<8x128xf32>
    %115 = arith.addf %114, %113 : vector<8x128xf32>
    %116 = arith.divf %114, %115 : vector<8x128xf32>
    %117 = arith.mulf %108, %48 : vector<8x128xf32>
    %118 = arith.mulf %102, %110 : vector<8x128xf32>
    %119 = arith.addf %117, %118 : vector<8x128xf32>
    %120 = math.tanh %119 : vector<8x128xf32>
    %121 = arith.mulf %116, %120 : vector<8x128xf32>
    %c1_48 = arith.constant 1 : index
    %c0_49 = arith.constant 0 : index
    %c0_50 = arith.constant 0 : index
    %122 = vector.load %arg3[%c1_48, %c0_49, %c0_50] : memref<2x128x512xf32, #tpu.memory_space<vmem>>, vector<1x128x512xf32>
    %123 = vector.shape_cast %122 : vector<1x128x512xf32> to vector<128x512xf32>
    %cst_51 = arith.constant dense<0.000000e+00> : vector<8x512xf32>
    %124 = tpu.matmul %121, %123, %cst_51 {dimension_numbers = #tpu.dot_dimension_numbers<[1], [0], [0], [1], [0, 0, 1, 1], [], []>} : vector<8x128xf32>, vector<128x512xf32>, vector<8x512xf32> -> vector<8x512xf32>
    %c1_52 = arith.constant 1 : index
    %c0_53 = arith.constant 0 : index
    %c0_54 = arith.constant 0 : index
    %125 = vector.load %arg5[%c1_52, %c0_53, %c0_54] : memref<2x1x512xf32, #tpu.memory_space<vmem>>, vector<1x1x512xf32>
    %126 = vector.shape_cast %125 : vector<1x1x512xf32> to vector<1x512xf32>
    %127 = vector.broadcast %126 : vector<1x512xf32> to vector<8x512xf32>
    %128 = arith.addf %124, %127 : vector<8x512xf32>
    %c1_55 = arith.constant 1 : index
    %c0_56 = arith.constant 0 : index
    %c0_57 = arith.constant 0 : index
    %129 = vector.load %arg4[%c1_55, %c0_56, %c0_57] : memref<2x128x512xf32, #tpu.memory_space<vmem>>, vector<1x128x512xf32>
    %130 = vector.shape_cast %129 : vector<1x128x512xf32> to vector<128x512xf32>
    %cst_58 = arith.constant dense<0.000000e+00> : vector<8x512xf32>
    %131 = tpu.matmul %86, %130, %cst_58 {dimension_numbers = #tpu.dot_dimension_numbers<[1], [0], [0], [1], [0, 0, 1, 1], [], []>} : vector<8x128xf32>, vector<128x512xf32>, vector<8x512xf32> -> vector<8x512xf32>
    %132 = arith.addf %128, %131 : vector<8x512xf32>
    %133 = vector.extract_strided_slice %132 {offsets = [0, 0], sizes = [8, 128], strides = [1, 1]} : vector<8x512xf32> to vector<8x128xf32>
    %134 = arith.negf %133 : vector<8x128xf32>
    %135 = math.exp %134 : vector<8x128xf32>
    %cst_59 = arith.constant 1.000000e+00 : f32
    %136 = vector.broadcast %cst_59 : f32 to vector<8x128xf32>
    %137 = arith.addf %136, %135 : vector<8x128xf32>
    %138 = arith.divf %136, %137 : vector<8x128xf32>
    %139 = vector.extract_strided_slice %132 {offsets = [0, 128], sizes = [8, 128], strides = [1, 1]} : vector<8x512xf32> to vector<8x128xf32>
    %140 = arith.negf %139 : vector<8x128xf32>
    %141 = math.exp %140 : vector<8x128xf32>
    %cst_60 = arith.constant 1.000000e+00 : f32
    %142 = vector.broadcast %cst_60 : f32 to vector<8x128xf32>
    %143 = arith.addf %142, %141 : vector<8x128xf32>
    %144 = arith.divf %142, %143 : vector<8x128xf32>
    %145 = vector.extract_strided_slice %132 {offsets = [0, 256], sizes = [8, 128], strides = [1, 1]} : vector<8x512xf32> to vector<8x128xf32>
    %146 = math.tanh %145 : vector<8x128xf32>
    %147 = vector.extract_strided_slice %132 {offsets = [0, 384], sizes = [8, 128], strides = [1, 1]} : vector<8x512xf32> to vector<8x128xf32>
    %148 = arith.negf %147 : vector<8x128xf32>
    %149 = math.exp %148 : vector<8x128xf32>
    %cst_61 = arith.constant 1.000000e+00 : f32
    %150 = vector.broadcast %cst_61 : f32 to vector<8x128xf32>
    %151 = arith.addf %150, %149 : vector<8x128xf32>
    %152 = arith.divf %150, %151 : vector<8x128xf32>
    %153 = arith.mulf %144, %84 : vector<8x128xf32>
    %154 = arith.mulf %138, %146 : vector<8x128xf32>
    %155 = arith.addf %153, %154 : vector<8x128xf32>
    %156 = math.tanh %155 : vector<8x128xf32>
    %157 = arith.mulf %152, %156 : vector<8x128xf32>
    %158 = arith.index_cast %90 : i32 to index
    %c0_62 = arith.constant 0 : index
    %159 = vector.load %arg12[%158, %c0_62] : memref<32x128xf32, #tpu.memory_space<vmem>>, vector<8x128xf32>
    tpu.vector_store %arg12[%158, %c0_62], %157 {strides = array<i32>} : memref<32x128xf32, #tpu.memory_space<vmem>>, vector<8x128xf32>,
    %c2_i32 = arith.constant 2 : i32
    %c8_i32_63 = arith.constant 8 : i32
    %160 = arith.muli %c2_i32, %c8_i32_63 : i32
    %161 = tpu.assume_multiple %160, 8 : i32
    %162 = arith.index_cast %161 : i32 to index
    %c0_64 = arith.constant 0 : index
    %163 = vector.load %arg11[%162, %c0_64] : memref<32x512xf32, #tpu.memory_space<vmem>>, vector<8x512xf32>
    %c0_65 = arith.constant 0 : index
    %c0_66 = arith.constant 0 : index
    %c0_67 = arith.constant 0 : index
    %164 = vector.load %arg4[%c0_65, %c0_66, %c0_67] : memref<2x128x512xf32, #tpu.memory_space<vmem>>, vector<1x128x512xf32>
    %165 = vector.shape_cast %164 : vector<1x128x512xf32> to vector<128x512xf32>
    %cst_68 = arith.constant dense<0.000000e+00> : vector<8x512xf32>
    %166 = tpu.matmul %121, %165, %cst_68 {dimension_numbers = #tpu.dot_dimension_numbers<[1], [0], [0], [1], [0, 0, 1, 1], [], []>} : vector<8x128xf32>, vector<128x512xf32>, vector<8x512xf32> -> vector<8x512xf32>
    %167 = arith.addf %163, %166 : vector<8x512xf32>
    %168 = vector.extract_strided_slice %167 {offsets = [0, 0], sizes = [8, 128], strides = [1, 1]} : vector<8x512xf32> to vector<8x128xf32>
    %169 = arith.negf %168 : vector<8x128xf32>
    %170 = math.exp %169 : vector<8x128xf32>
    %cst_69 = arith.constant 1.000000e+00 : f32
    %171 = vector.broadcast %cst_69 : f32 to vector<8x128xf32>
    %172 = arith.addf %171, %170 : vector<8x128xf32>
    %173 = arith.divf %171, %172 : vector<8x128xf32>
    %174 = vector.extract_strided_slice %167 {offsets = [0, 128], sizes = [8, 128], strides = [1, 1]} : vector<8x512xf32> to vector<8x128xf32>
    %175 = arith.negf %174 : vector<8x128xf32>
    %176 = math.exp %175 : vector<8x128xf32>
    %cst_70 = arith.constant 1.000000e+00 : f32
    %177 = vector.broadcast %cst_70 : f32 to vector<8x128xf32>
    %178 = arith.addf %177, %176 : vector<8x128xf32>
    %179 = arith.divf %177, %178 : vector<8x128xf32>
    %180 = vector.extract_strided_slice %167 {offsets = [0, 256], sizes = [8, 128], strides = [1, 1]} : vector<8x512xf32> to vector<8x128xf32>
    %181 = math.tanh %180 : vector<8x128xf32>
    %182 = vector.extract_strided_slice %167 {offsets = [0, 384], sizes = [8, 128], strides = [1, 1]} : vector<8x512xf32> to vector<8x128xf32>
    %183 = arith.negf %182 : vector<8x128xf32>
    %184 = math.exp %183 : vector<8x128xf32>
    %cst_71 = arith.constant 1.000000e+00 : f32
    %185 = vector.broadcast %cst_71 : f32 to vector<8x128xf32>
    %186 = arith.addf %185, %184 : vector<8x128xf32>
    %187 = arith.divf %185, %186 : vector<8x128xf32>
    %188 = arith.mulf %179, %119 : vector<8x128xf32>
    %189 = arith.mulf %173, %181 : vector<8x128xf32>
    %190 = arith.addf %188, %189 : vector<8x128xf32>
    %191 = math.tanh %190 : vector<8x128xf32>
    %192 = arith.mulf %187, %191 : vector<8x128xf32>
    %c1_72 = arith.constant 1 : index
    %c0_73 = arith.constant 0 : index
    %c0_74 = arith.constant 0 : index
    %193 = vector.load %arg3[%c1_72, %c0_73, %c0_74] : memref<2x128x512xf32, #tpu.memory_space<vmem>>, vector<1x128x512xf32>
    %194 = vector.shape_cast %193 : vector<1x128x512xf32> to vector<128x512xf32>
    %cst_75 = arith.constant dense<0.000000e+00> : vector<8x512xf32>
    %195 = tpu.matmul %192, %194, %cst_75 {dimension_numbers = #tpu.dot_dimension_numbers<[1], [0], [0], [1], [0, 0, 1, 1], [], []>} : vector<8x128xf32>, vector<128x512xf32>, vector<8x512xf32> -> vector<8x512xf32>
    %c1_76 = arith.constant 1 : index
    %c0_77 = arith.constant 0 : index
    %c0_78 = arith.constant 0 : index
    %196 = vector.load %arg5[%c1_76, %c0_77, %c0_78] : memref<2x1x512xf32, #tpu.memory_space<vmem>>, vector<1x1x512xf32>
    %197 = vector.shape_cast %196 : vector<1x1x512xf32> to vector<1x512xf32>
    %198 = vector.broadcast %197 : vector<1x512xf32> to vector<8x512xf32>
    %199 = arith.addf %195, %198 : vector<8x512xf32>
    %c1_79 = arith.constant 1 : index
    %c0_80 = arith.constant 0 : index
    %c0_81 = arith.constant 0 : index
    %200 = vector.load %arg4[%c1_79, %c0_80, %c0_81] : memref<2x128x512xf32, #tpu.memory_space<vmem>>, vector<1x128x512xf32>
    %201 = vector.shape_cast %200 : vector<1x128x512xf32> to vector<128x512xf32>
    %cst_82 = arith.constant dense<0.000000e+00> : vector<8x512xf32>
    %202 = tpu.matmul %157, %201, %cst_82 {dimension_numbers = #tpu.dot_dimension_numbers<[1], [0], [0], [1], [0, 0, 1, 1], [], []>} : vector<8x128xf32>, vector<128x512xf32>, vector<8x512xf32> -> vector<8x512xf32>
    %203 = arith.addf %199, %202 : vector<8x512xf32>
    %204 = vector.extract_strided_slice %203 {offsets = [0, 0], sizes = [8, 128], strides = [1, 1]} : vector<8x512xf32> to vector<8x128xf32>
    %205 = arith.negf %204 : vector<8x128xf32>
    %206 = math.exp %205 : vector<8x128xf32>
    %cst_83 = arith.constant 1.000000e+00 : f32
    %207 = vector.broadcast %cst_83 : f32 to vector<8x128xf32>
    %208 = arith.addf %207, %206 : vector<8x128xf32>
    %209 = arith.divf %207, %208 : vector<8x128xf32>
    %210 = vector.extract_strided_slice %203 {offsets = [0, 128], sizes = [8, 128], strides = [1, 1]} : vector<8x512xf32> to vector<8x128xf32>
    %211 = arith.negf %210 : vector<8x128xf32>
    %212 = math.exp %211 : vector<8x128xf32>
    %cst_84 = arith.constant 1.000000e+00 : f32
    %213 = vector.broadcast %cst_84 : f32 to vector<8x128xf32>
    %214 = arith.addf %213, %212 : vector<8x128xf32>
    %215 = arith.divf %213, %214 : vector<8x128xf32>
    %216 = vector.extract_strided_slice %203 {offsets = [0, 256], sizes = [8, 128], strides = [1, 1]} : vector<8x512xf32> to vector<8x128xf32>
    %217 = math.tanh %216 : vector<8x128xf32>
    %218 = vector.extract_strided_slice %203 {offsets = [0, 384], sizes = [8, 128], strides = [1, 1]} : vector<8x512xf32> to vector<8x128xf32>
    %219 = arith.negf %218 : vector<8x128xf32>
    %220 = math.exp %219 : vector<8x128xf32>
    %cst_85 = arith.constant 1.000000e+00 : f32
    %221 = vector.broadcast %cst_85 : f32 to vector<8x128xf32>
    %222 = arith.addf %221, %220 : vector<8x128xf32>
    %223 = arith.divf %221, %222 : vector<8x128xf32>
    %224 = arith.mulf %215, %155 : vector<8x128xf32>
    %225 = arith.mulf %209, %217 : vector<8x128xf32>
    %226 = arith.addf %224, %225 : vector<8x128xf32>
    %227 = math.tanh %226 : vector<8x128xf32>
    %228 = arith.mulf %223, %227 : vector<8x128xf32>
    %229 = arith.index_cast %161 : i32 to index
    %c0_86 = arith.constant 0 : index
    %230 = vector.load %arg12[%229, %c0_86] : memref<32x128xf32, #tpu.memory_space<vmem>>, vector<8x128xf32>
    tpu.vector_store %arg12[%229, %c0_86], %228 {strides = array<i32>} : memref<32x128xf32, #tpu.memory_space<vmem>>, vector<8x128xf32>,
    %c3_i32 = arith.constant 3 : i32
    %c8_i32_87 = arith.constant 8 : i32
    %231 = arith.muli %c3_i32, %c8_i32_87 : i32
    %232 = tpu.assume_multiple %231, 8 : i32
    %233 = arith.index_cast %232 : i32 to index
    %c0_88 = arith.constant 0 : index
    %234 = vector.load %arg11[%233, %c0_88] : memref<32x512xf32, #tpu.memory_space<vmem>>, vector<8x512xf32>
    %c0_89 = arith.constant 0 : index
    %c0_90 = arith.constant 0 : index
    %c0_91 = arith.constant 0 : index
    %235 = vector.load %arg4[%c0_89, %c0_90, %c0_91] : memref<2x128x512xf32, #tpu.memory_space<vmem>>, vector<1x128x512xf32>
    %236 = vector.shape_cast %235 : vector<1x128x512xf32> to vector<128x512xf32>
    %cst_92 = arith.constant dense<0.000000e+00> : vector<8x512xf32>
    %237 = tpu.matmul %192, %236, %cst_92 {dimension_numbers = #tpu.dot_dimension_numbers<[1], [0], [0], [1], [0, 0, 1, 1], [], []>} : vector<8x128xf32>, vector<128x512xf32>, vector<8x512xf32> -> vector<8x512xf32>
    %238 = arith.addf %234, %237 : vector<8x512xf32>
    %239 = vector.extract_strided_slice %238 {offsets = [0, 0], sizes = [8, 128], strides = [1, 1]} : vector<8x512xf32> to vector<8x128xf32>
    %240 = arith.negf %239 : vector<8x128xf32>
    %241 = math.exp %240 : vector<8x128xf32>
    %cst_93 = arith.constant 1.000000e+00 : f32
    %242 = vector.broadcast %cst_93 : f32 to vector<8x128xf32>
    %243 = arith.addf %242, %241 : vector<8x128xf32>
    %244 = arith.divf %242, %243 : vector<8x128xf32>
    %245 = vector.extract_strided_slice %238 {offsets = [0, 128], sizes = [8, 128], strides = [1, 1]} : vector<8x512xf32> to vector<8x128xf32>
    %246 = arith.negf %245 : vector<8x128xf32>
    %247 = math.exp %246 : vector<8x128xf32>
    %cst_94 = arith.constant 1.000000e+00 : f32
    %248 = vector.broadcast %cst_94 : f32 to vector<8x128xf32>
    %249 = arith.addf %248, %247 : vector<8x128xf32>
    %250 = arith.divf %248, %249 : vector<8x128xf32>
    %251 = vector.extract_strided_slice %238 {offsets = [0, 256], sizes = [8, 128], strides = [1, 1]} : vector<8x512xf32> to vector<8x128xf32>
    %252 = math.tanh %251 : vector<8x128xf32>
    %253 = vector.extract_strided_slice %238 {offsets = [0, 384], sizes = [8, 128], strides = [1, 1]} : vector<8x512xf32> to vector<8x128xf32>
    %254 = arith.negf %253 : vector<8x128xf32>
    %255 = math.exp %254 : vector<8x128xf32>
    %cst_95 = arith.constant 1.000000e+00 : f32
    %256 = vector.broadcast %cst_95 : f32 to vector<8x128xf32>
    %257 = arith.addf %256, %255 : vector<8x128xf32>
    %258 = arith.divf %256, %257 : vector<8x128xf32>
    %259 = arith.mulf %250, %190 : vector<8x128xf32>
    %260 = arith.mulf %244, %252 : vector<8x128xf32>
    %261 = arith.addf %259, %260 : vector<8x128xf32>
    %262 = math.tanh %261 : vector<8x128xf32>
    %263 = arith.mulf %258, %262 : vector<8x128xf32>
    %c1_96 = arith.constant 1 : index
    %c0_97 = arith.constant 0 : index
    %c0_98 = arith.constant 0 : index
    %264 = vector.load %arg3[%c1_96, %c0_97, %c0_98] : memref<2x128x512xf32, #tpu.memory_space<vmem>>, vector<1x128x512xf32>
    %265 = vector.shape_cast %264 : vector<1x128x512xf32> to vector<128x512xf32>
    %cst_99 = arith.constant dense<0.000000e+00> : vector<8x512xf32>
    %266 = tpu.matmul %263, %265, %cst_99 {dimension_numbers = #tpu.dot_dimension_numbers<[1], [0], [0], [1], [0, 0, 1, 1], [], []>} : vector<8x128xf32>, vector<128x512xf32>, vector<8x512xf32> -> vector<8x512xf32>
    %c1_100 = arith.constant 1 : index
    %c0_101 = arith.constant 0 : index
    %c0_102 = arith.constant 0 : index
    %267 = vector.load %arg5[%c1_100, %c0_101, %c0_102] : memref<2x1x512xf32, #tpu.memory_space<vmem>>, vector<1x1x512xf32>
    %268 = vector.shape_cast %267 : vector<1x1x512xf32> to vector<1x512xf32>
    %269 = vector.broadcast %268 : vector<1x512xf32> to vector<8x512xf32>
    %270 = arith.addf %266, %269 : vector<8x512xf32>
    %c1_103 = arith.constant 1 : index
    %c0_104 = arith.constant 0 : index
    %c0_105 = arith.constant 0 : index
    %271 = vector.load %arg4[%c1_103, %c0_104, %c0_105] : memref<2x128x512xf32, #tpu.memory_space<vmem>>, vector<1x128x512xf32>
    %272 = vector.shape_cast %271 : vector<1x128x512xf32> to vector<128x512xf32>
    %cst_106 = arith.constant dense<0.000000e+00> : vector<8x512xf32>
    %273 = tpu.matmul %228, %272, %cst_106 {dimension_numbers = #tpu.dot_dimension_numbers<[1], [0], [0], [1], [0, 0, 1, 1], [], []>} : vector<8x128xf32>, vector<128x512xf32>, vector<8x512xf32> -> vector<8x512xf32>
    %274 = arith.addf %270, %273 : vector<8x512xf32>
    %275 = vector.extract_strided_slice %274 {offsets = [0, 0], sizes = [8, 128], strides = [1, 1]} : vector<8x512xf32> to vector<8x128xf32>
    %276 = arith.negf %275 : vector<8x128xf32>
    %277 = math.exp %276 : vector<8x128xf32>
    %cst_107 = arith.constant 1.000000e+00 : f32
    %278 = vector.broadcast %cst_107 : f32 to vector<8x128xf32>
    %279 = arith.addf %278, %277 : vector<8x128xf32>
    %280 = arith.divf %278, %279 : vector<8x128xf32>
    %281 = vector.extract_strided_slice %274 {offsets = [0, 128], sizes = [8, 128], strides = [1, 1]} : vector<8x512xf32> to vector<8x128xf32>
    %282 = arith.negf %281 : vector<8x128xf32>
    %283 = math.exp %282 : vector<8x128xf32>
    %cst_108 = arith.constant 1.000000e+00 : f32
    %284 = vector.broadcast %cst_108 : f32 to vector<8x128xf32>
    %285 = arith.addf %284, %283 : vector<8x128xf32>
    %286 = arith.divf %284, %285 : vector<8x128xf32>
    %287 = vector.extract_strided_slice %274 {offsets = [0, 256], sizes = [8, 128], strides = [1, 1]} : vector<8x512xf32> to vector<8x128xf32>
    %288 = math.tanh %287 : vector<8x128xf32>
    %289 = vector.extract_strided_slice %274 {offsets = [0, 384], sizes = [8, 128], strides = [1, 1]} : vector<8x512xf32> to vector<8x128xf32>
    %290 = arith.negf %289 : vector<8x128xf32>
    %291 = math.exp %290 : vector<8x128xf32>
    %cst_109 = arith.constant 1.000000e+00 : f32
    %292 = vector.broadcast %cst_109 : f32 to vector<8x128xf32>
    %293 = arith.addf %292, %291 : vector<8x128xf32>
    %294 = arith.divf %292, %293 : vector<8x128xf32>
    %295 = arith.mulf %286, %226 : vector<8x128xf32>
    %296 = arith.mulf %280, %288 : vector<8x128xf32>
    %297 = arith.addf %295, %296 : vector<8x128xf32>
    %298 = math.tanh %297 : vector<8x128xf32>
    %299 = arith.mulf %294, %298 : vector<8x128xf32>
    %300 = arith.index_cast %232 : i32 to index
    %c0_110 = arith.constant 0 : index
    %301 = vector.load %arg12[%300, %c0_110] : memref<32x128xf32, #tpu.memory_space<vmem>>, vector<8x128xf32>
    tpu.vector_store %arg12[%300, %c0_110], %299 {strides = array<i32>} : memref<32x128xf32, #tpu.memory_space<vmem>>, vector<8x128xf32>,
    %c4_i32 = arith.constant 4 : i32
    %c0_111 = arith.constant 0 : index
    %c0_112 = arith.constant 0 : index
    %302 = vector.load %arg12[%c0_111, %c0_112] : memref<32x128xf32, #tpu.memory_space<vmem>>, vector<32x128xf32>
    %c0_113 = arith.constant 0 : index
    %c0_114 = arith.constant 0 : index
    %303 = vector.load %arg6[%c0_113, %c0_114] : memref<128x128xf32, #tpu.memory_space<vmem>>, vector<128x128xf32>
    %cst_115 = arith.constant dense<0.000000e+00> : vector<32x128xf32>
    %304 = tpu.matmul %302, %303, %cst_115 {dimension_numbers = #tpu.dot_dimension_numbers<[1], [0], [0], [1], [0, 0, 1, 1], [], []>} : vector<32x128xf32>, vector<128x128xf32>, vector<32x128xf32> -> vector<32x128xf32>
    %c0_116 = arith.constant 0 : index
    %c0_117 = arith.constant 0 : index
    %305 = vector.load %arg7[%c0_116, %c0_117] : memref<1x128xf32, #tpu.memory_space<vmem>>, vector<1x128xf32>
    %306 = vector.broadcast %305 : vector<1x128xf32> to vector<32x128xf32>
    %307 = arith.addf %304, %306 : vector<32x128xf32>
    %cst_118 = arith.constant 0.000000e+00 : f32
    %308 = vector.broadcast %cst_118 : f32 to vector<32x128xf32>
    %309 = arith.cmpf ogt, %307, %308 : vector<32x128xf32>
    %cst_119 = arith.constant 0.000000e+00 : f32
    %310 = vector.broadcast %cst_119 : f32 to vector<32x128xf32>
    %311 = arith.minimumf %307, %310 : vector<32x128xf32>
    %312 = math.exp %311 : vector<32x128xf32>
    %cst_120 = arith.constant 1.000000e+00 : f32
    %313 = vector.broadcast %cst_120 : f32 to vector<32x128xf32>
    %314 = arith.subf %312, %313 : vector<32x128xf32>
    %cst_121 = arith.constant 1.67326319 : f32
    %315 = vector.broadcast %cst_121 : f32 to vector<32x128xf32>
    %316 = arith.mulf %315, %314 : vector<32x128xf32>
    %317 = arith.select %309, %307, %316 : vector<32x128xi1>, vector<32x128xf32>
    %cst_122 = arith.constant 1.05070102 : f32
    %318 = vector.broadcast %cst_122 : f32 to vector<32x128xf32>
    %319 = arith.mulf %318, %317 : vector<32x128xf32>
    %c0_123 = arith.constant 0 : index
    %c0_124 = arith.constant 0 : index
    %320 = vector.load %arg8[%c0_123, %c0_124] : memref<128x128xf32, #tpu.memory_space<vmem>>, vector<128x128xf32>
    %cst_125 = arith.constant dense<0.000000e+00> : vector<32x128xf32>
    %321 = tpu.matmul %319, %320, %cst_125 {dimension_numbers = #tpu.dot_dimension_numbers<[1], [0], [0], [1], [0, 0, 1, 1], [], []>} : vector<32x128xf32>, vector<128x128xf32>, vector<32x128xf32> -> vector<32x128xf32>
    %c0_126 = arith.constant 0 : index
    %c0_127 = arith.constant 0 : index
    %322 = vector.load %arg9[%c0_126, %c0_127] : memref<1x128xf32, #tpu.memory_space<vmem>>, vector<1x128xf32>
    %323 = vector.broadcast %322 : vector<1x128xf32> to vector<32x128xf32>
    %324 = arith.addf %321, %323 : vector<32x128xf32>
    %c0_128 = arith.constant 0 : index
    %c0_129 = arith.constant 0 : index
    %325 = vector.load %arg10[%c0_128, %c0_129] : memref<32x128xf32, #tpu.memory_space<vmem>>, vector<32x128xf32>
    tpu.vector_store %arg10[%c0_128, %c0_129], %324 {strides = array<i32>} : memref<32x128xf32, #tpu.memory_space<vmem>>, vector<32x128xf32>,
    return
  }
}

</mosaic_0001>

<bundles_post_ra>
// kernel: stage_lstm_forward.3
= control target key start
LH: loop header
LB: loop body
LE: loop exit
PB: predicated region body
PF: predicated region fallthrough
CT: control target
= control target key end

     0   :  { %10 = vsyncpa [#allocation3], 0  ;;  %s1332_s15 = smov 0   ;;  %s1872_s0 = inlined_call_operand.vmem [shape: bf16[512,64], index: 0, kind: input, shape index: {}]   ;;  %s1873_s1 = inlined_call_operand.vmem [shape: bf16[64,256], index: 1, kind: input, shape index: {}]   ;;  %s1874_s2 = inlined_call_operand.hbm [shape: f32[1,256], index: 2, kind: input, shape index: {}]   ;;  %s1875_s3 = inlined_call_operand.vmem [shape: f32[512,256], index: 3, kind: output, shape index: {0}]   ;;  %s1876_s4 = inlined_call_operand.vmem [shape: f32[2,4,512], index: 4, kind: output, shape index: {1}]  }
   0x1 LB: > { %s1338_s16 = sadd.s32 4294967295, %s1303_s15   ;;  %p1155_p0 = scmp.ge.s32.totalorder %s1303_s15, 1  ;;  %s1303_s15 = sphi %s1332_s15, %s16_s15  }
   0x2   : > { %p141_p1 = scmp.lt.s32.totalorder %s1303_s15, 3  ;;  %p1227_p3 = scmp.eq.s32.totalorder %s1338_s16, 0 }
   0x3   : > { %s1305_s18 = smov [#allocation2]  }
   0x4   : > { %p1342_p2 = pnand %p1155_p0, %p141_p1  ;;  %s157_s19 = sshll.u32 %s1305_s18, 4  ;;  %s158_s19 = int_to_ptr.vmem [resolvable:$true] %s157_s19 }
   0x5   : > { %s1278_s20 = scalar_lea.vmem %s158_s19, 32  ;;  %p1286_p10 = scmp.lt.s32.totalorder %s158_s19, %s158_s19 }
   0x6   : > { %p1223_p4 = pneg %p1342_p2  ;;  %p1279_p7 = scmp.ne.s32.totalorder %s158_s19, %s1278_s20 }
   0x7   : > { %p1287_p11 = scmp.lt.s32.totalorder %s1278_s20, %s1278_s20 }
   0x8   : > { %p1224_p5 = pnand %p1227_p3, %p1223_p4 }
   0x9   : > { %p1288_p12 = por %p1287_p11, %p1286_p10 }
   0xa   : > { %p1269_p6 = pneg %p1224_p5 }
   0xc   : > { %p1281_p8 = pnand %p1279_p7, %p1269_p6 }
   0xe   : > { %p1282_p9 = pneg %p1281_p8 }
  0x10   : > { %p1289_p13 = pnand %p1288_p12, %p1282_p9 }
  0x12   : > { %1292 = shalt.err (!%p1289_p13)
}
  0x13   : > { %1226 = dma.hbm_to_vmem [thread:$0]  (!%p1224_p5), %s1874_s2, 32, %s158_s19, [#allocation3]  }
  0x14   : > { %179 = sbr.rel (%p1342_p2) target bundleno = 342 (0x156), region = 32 }
  0x19   : > { %1298 = dma.done.wait (%p1227_p3), [#allocation3], 32  }
  0x1a   : > { %1300 = vsyncadd (%p1227_p3), [#allocation3], 4294967264  ;;  %s1160_s23 = sshll.u32 %s1338_s16, 5  ;;  %v1306_v0 = vmov 0   ;;  %v1239_v1 = vld [vmem:[%s1873_s1 + $0x34] ss:$8 sps:$4 sm:$0xff]   ;;  %v272_v25 = vlaneseq }
  0x1b   : > { %483 = vmatprep.mubr.bf16.mxu0 %v1306_v0  ;;  %563 = vmatprep.mubr.bf16.mxu1 %v1306_v0  ;;  %p212_p0 = scmp.lt.s32.totalorder %s1160_s23, 63  ;;  %v1241_v2 = vld [vmem:[%s1873_s1 + $0x30] ss:$8 sps:$4 sm:$0xff]   ;;  %v1242_v3 = vld [vmem:[%s1873_s1 + $0x24] ss:$8 sps:$4 sm:$0xff]   ;;  %vm402_vm0 = vcmask 523264  }
  0x1c   : > { %459 = vmatprep.subr.bf16.mxu0 %v1239_v1  ;;  %1211 = vmatprep.subr.bf16.mxu1 %v1239_v1  ;;  %v1244_v4 = vld [vmem:[%s1873_s1 + $0x20] ss:$8 sps:$4 sm:$0xff]   ;;  %v1245_v5 = vld [vmem:[%s1873_s1 + $0x14] ss:$8 sps:$4 sm:$0xff]   ;;  %v1247_v6 = vld [vmem:[%s1873_s1 + $0x10] ss:$8 sps:$4 sm:$0xff]  }
  0x1d   : > { %s1879_s23 = smov (!%p212_p0, %s1160_s23), 63  ;;  %460 = vmatpush1.bf16.msra.mxu0 %v1241_v2  ;;  %1215 = vmatpush1.bf16.msra.mxu1 %v1241_v2  ;;  %v1248_v7 = vld [vmem:[%s1873_s1 + $0x4] ss:$8 sps:$4 sm:$0xff]   ;;  %v1250_v8 = vld [vmem:[%s1873_s1] ss:$8 sps:$4 sm:$0xff]   ;;  %v273_v26 = vshrl.u32 %v272_v25, 7 }
  0x1e   : > { %s1161_s28 = sshll.u32 %s1879_s23, 2  ;;  %461 = vmatprep.subr.bf16.mxu0 %v1242_v3  ;;  %1212 = vmatprep.subr.bf16.mxu1 %v1242_v3  ;;  %v270_v28 = vld [vmem:[#allocation2] sm:$0x3]  ;;  %s1209_s20 = sshll.u32 %s1879_s23, 4  ;;  %vm1025_vm1 = vcmask 1040384   ;;  %vm1030_vm2 = vcmask 1041408  }
  0x1f   : > { %s1384_s11 = scalar_lea.vmem %s1872_s0, %s1161_s28  ;;  %v274_v27 = vsub.s32 0, %v273_v26  ;;  %v278_v29 = vsub.s32 1, %v273_v26  ;;  %s1451_s24 = scalar_lea.vmem %s1875_s3, %s1209_s20  ;;  %vm1035_vm3 = vcmask 1042432  }
  0x20   : > { %v1251_v9 = vld [vmem:[%s1384_s11] sm:$0xff]   ;;  %v1253_v11 = vld [vmem:[%s1384_s11 + $0x8] sm:$0xff]   ;;  %v1255_v13 = vld [vmem:[%s1384_s11 + $0x10] sm:$0xff]   ;;  %p224_p1 = scmp.lt.s32.totalorder %s1338_s16, 1 }
  0x21   : > { %462 = vmatpush1.bf16.msra.mxu0 %v1244_v4  ;;  %1216 = vmatpush1.bf16.msra.mxu1 %v1244_v4  ;;  %v1252_v10 = vld [vmem:[%s1384_s11 + $0x40] sm:$0xff]   ;;  %v1254_v12 = vld [vmem:[%s1384_s11 + $0x48] sm:$0xff]   ;;  %v1256_v14 = vld [vmem:[%s1384_s11 + $0x50] sm:$0xff]   ;;  %v1441_v30 = vrot.slane %v270_v28, %v274_v27  ;;  %v1444_v31 = vrot.slane %v270_v28, %v278_v29 }
  0x22   : > { %463 = vmatprep.subr.bf16.mxu0 %v1245_v5  ;;  %1213 = vmatprep.subr.bf16.mxu1 %v1245_v5  ;;  %v1257_v15 = vld [vmem:[%s1384_s11 + $0x18] sm:$0xff]   ;;  %v1259_v17 = vld [vmem:[%s1384_s11 + $0x20] sm:$0xff]   ;;  %v1261_v19 = vld [vmem:[%s1384_s11 + $0x28] sm:$0xff]   ;;  %s1881_s16 = smov (!%p224_p1, %s1338_s16), 1 }
  0x23   : > { %v1258_v16 = vld [vmem:[%s1384_s11 + $0x58] sm:$0xff]   ;;  %v1260_v18 = vld [vmem:[%s1384_s11 + $0x60] sm:$0xff]   ;;  %v1262_v20 = vld [vmem:[%s1384_s11 + $0x68] sm:$0xff]   ;;  %s1210_s23 = sshll.u32 %s1881_s16, 4 }
  0x24   : > { %v1263_v21 = vld [vmem:[%s1384_s11 + $0x30] sm:$0xff]   ;;  %v1265_v23 = vld [vmem:[%s1384_s11 + $0x38] sm:$0xff]   ;;  %s228_s26 = scalar_lea.vmem %s1876_s4, %s1210_s23 }
  0x25   : > { %464 = vmatpush1.bf16.msra.mxu0 %v1247_v6  ;;  %1217 = vmatpush1.bf16.msra.mxu1 %v1247_v6  ;;  %v1264_v22 = vld [vmem:[%s1384_s11 + $0x70] sm:$0xff]   ;;  %v1266_v24 = vld [vmem:[%s1384_s11 + $0x78] sm:$0xff]  }
  0x26   : > { %465 = vmatprep.subr.bf16.mxu0 %v1248_v7  ;;  %1214 = vmatprep.subr.bf16.mxu1 %v1248_v7 }
  0x29   : > { %466 = vmatpush1.bf16.msra.mxu0 %v1250_v8  ;;  %1218 = vmatpush1.bf16.msra.mxu1 %v1250_v8 }
  0x2c   : > { %1191 = vmatmul.mubr.msk.bf16.vlgmr.msra.gmra.mxu0 %vm402_vm0, %v1251_v9  ;;  %1199 = vmatmul.mubr.msk.bf16.vlgmr.msra.gmra.mxu1 %vm402_vm0, %v1252_v10 }
  0x2d   : > { %493 = vmatprep.mubr.bf16.mxu0 %v1306_v0  ;;  %573 = vmatprep.mubr.bf16.mxu1 %v1306_v0 }
  0x34   : > { %1192 = vmatmul.mubr.msk.bf16.gmra.mxu0 %vm402_vm0, %v1253_v11  ;;  %1200 = vmatmul.mubr.msk.bf16.gmra.mxu1 %vm402_vm0, %v1254_v12 }
  0x35   : > { %503 = vmatprep.mubr.bf16.mxu0 %v1306_v0  ;;  %583 = vmatprep.mubr.bf16.mxu1 %v1306_v0 }
  0x3c   : > { %1193 = vmatmul.mubr.msk.bf16.gmra.mxu0 %vm402_vm0, %v1255_v13  ;;  %1201 = vmatmul.mubr.msk.bf16.gmra.mxu1 %vm402_vm0, %v1256_v14 }
  0x3d   : > { %513 = vmatprep.mubr.bf16.mxu0 %v1306_v0  ;;  %593 = vmatprep.mubr.bf16.mxu1 %v1306_v0 }
  0x44   : > { %1194 = vmatmul.mubr.msk.bf16.gmra.mxu0 %vm402_vm0, %v1257_v15  ;;  %1202 = vmatmul.mubr.msk.bf16.gmra.mxu1 %vm402_vm0, %v1258_v16 }
  0x45   : > { %523 = vmatprep.mubr.bf16.mxu0 %v1306_v0  ;;  %603 = vmatprep.mubr.bf16.mxu1 %v1306_v0 }
  0x4c   : > { %1195 = vmatmul.mubr.msk.bf16.gmra.mxu0 %vm402_vm0, %v1259_v17  ;;  %1203 = vmatmul.mubr.msk.bf16.gmra.mxu1 %vm402_vm0, %v1260_v18 }
  0x4d   : > { %533 = vmatprep.mubr.bf16.mxu0 %v1306_v0  ;;  %613 = vmatprep.mubr.bf16.mxu1 %v1306_v0 }
  0x54   : > { %1196 = vmatmul.mubr.msk.bf16.gmra.mxu0 %vm402_vm0, %v1261_v19  ;;  %1204 = vmatmul.mubr.msk.bf16.gmra.mxu1 %vm402_vm0, %v1262_v20 }
  0x55   : > { %543 = vmatprep.mubr.bf16.mxu0 %v1306_v0  ;;  %623 = vmatprep.mubr.bf16.mxu1 %v1306_v0 }
  0x5c   : > { %1197 = vmatmul.mubr.msk.bf16.gmra.mxu0 %vm402_vm0, %v1263_v21  ;;  %1205 = vmatmul.mubr.msk.bf16.gmra.mxu1 %vm402_vm0, %v1264_v22 }
  0x5d   : > { %553 = vmatprep.mubr.bf16.mxu0 %v1306_v0  ;;  %633 = vmatprep.mubr.bf16.mxu1 %v1306_v0 }
  0x64   : > { %1198 = vmatmul.mubr.msk.bf16.gmra.mxu0 %vm402_vm0, %v1265_v23  ;;  %1206 = vmatmul.mubr.msk.bf16.gmra.mxu1 %vm402_vm0, %v1266_v24 }
  0xec   : > { %v485_v32 = vpop.f32.mrf.mxu0  ;;  %v565_v33 = vpop.f32.mrf.mxu1 }
  0xed   : > { %v486_v34 = vadd.f32 %v485_v32, %v1441_v30  ;;  %v566_v35 = vadd.f32 %v565_v33, %v1441_v30 }
  0xee   : > { %v487_v36 = vpop.f32.mrf.mxu0  ;;  %v567_v37 = vpop.f32.mrf.mxu1 }
  0xef   : > { %v1453_v38 = vmax.f32 %v486_v34, 0.0  ;;  %v1455_v39 = vmax.f32 %v566_v35, 0.0  ;;  %v488_v40 = vadd.f32 %v487_v36, %v1444_v31  ;;  %v568_v41 = vadd.f32 %v567_v37, %v1444_v31 }
  0xf0   : > { %v489_v42 = vpop.f32.mrf.mxu0  ;;  %v569_v43 = vpop.f32.mrf.mxu1 }
  0xf1   : > { %708 = vst [vmem:[%s1451_s24] sm:$0xff] %v1453_v38  ;;  %740 = vst [vmem:[%s1451_s24 + $0x100] sm:$0xff] %v1455_v39  ;;  %v1463_v44 = vmax.f32 %v488_v40, 0.0  ;;  %v1465_v45 = vmax.f32 %v568_v41, 0.0  ;;  %v490_v46 = vadd.f32 %v489_v42, %v1441_v30  ;;  %v570_v47 = vadd.f32 %v569_v43, %v1441_v30 }
  0xf2   : > { %v491_v48 = vpop.f32.mrf.mxu0  ;;  %v571_v49 = vpop.f32.mrf.mxu1 }
  0xf3   : > { %709 = vst [vmem:[%s1451_s24 + $0x8] sm:$0xff] %v1463_v44  ;;  %741 = vst [vmem:[%s1451_s24 + $0x108] sm:$0xff] %v1465_v45  ;;  %v1473_v50 = vmax.f32 %v490_v46, 0.0  ;;  %v1475_v51 = vmax.f32 %v570_v47, 0.0  ;;  %v492_v52 = vadd.f32 %v491_v48, %v1444_v31  ;;  %v572_v53 = vadd.f32 %v571_v49, %v1444_v31 }
  0xf4   : > { %v495_v54 = vpop.f32.mrf.mxu0  ;;  %v575_v55 = vpop.f32.mrf.mxu1 }
  0xf5   : > { %710 = vst [vmem:[%s1451_s24 + $0x10] sm:$0xff] %v1473_v50  ;;  %v772_v56 = vadd.f32 %v1473_v50, %v1453_v38  ;;  %742 = vst [vmem:[%s1451_s24 + $0x110] sm:$0xff] %v1475_v51  ;;  %v1485_v57 = vmax.f32 %v492_v52, 0.0  ;;  %v1487_v58 = vmax.f32 %v572_v53, 0.0  ;;  %v496_v59 = vadd.f32 %v495_v54, %v1441_v30 }
  0xf6   : > { %v576_v60 = vadd.f32 %v575_v55, %v1441_v30  ;;  %v497_v61 = vpop.f32.mrf.mxu0  ;;  %v577_v62 = vpop.f32.mrf.mxu1  ;;  %v881_v23 = vadd.f32 %v1475_v51, %v1455_v39 }
  0xf7   : > { %711 = vst [vmem:[%s1451_s24 + $0x18] sm:$0xff] %v1485_v57  ;;  %743 = vst [vmem:[%s1451_s24 + $0x118] sm:$0xff] %v1487_v58  ;;  %v498_v63 = vadd.f32 %v497_v61, %v1444_v31  ;;  %v578_v0 = vadd.f32 %v577_v62, %v1444_v31  ;;  %v1497_v1 = vmax.f32 %v496_v59, 0.0  ;;  %v785_v24 = vadd.f32 %v1485_v57, %v1463_v44 }
  0xf8   : > { %v1499_v2 = vmax.f32 %v576_v60, 0.0  ;;  %v499_v3 = vpop.f32.mrf.mxu0  ;;  %v579_v4 = vpop.f32.mrf.mxu1  ;;  %v894_v25 = vadd.f32 %v1487_v58, %v1465_v45 }
  0xf9   : > { %v1501_v5 = vmax.f32 %v498_v63, 0.0  ;;  %v1503_v6 = vmax.f32 %v578_v0, 0.0  ;;  %v500_v7 = vadd.f32 %v499_v3, %v1441_v30  ;;  %v580_v8 = vadd.f32 %v579_v4, %v1441_v30  ;;  %712 = vst [vmem:[%s1451_s24 + $0x20] sm:$0xff] %v1497_v1 }
  0xfa   : > { %v801_v9 = vmax.f32 %v1453_v38, %v1497_v1  ;;  %744 = vst [vmem:[%s1451_s24 + $0x120] sm:$0xff] %v1499_v2  ;;  %v909_v10 = vmax.f32 %v1455_v39, %v1499_v2  ;;  %v501_v11 = vpop.f32.mrf.mxu0  ;;  %v581_v12 = vpop.f32.mrf.mxu1  ;;  %v773_v26 = vadd.f32 %v772_v56, %v1497_v1  ;;  %v882_v35 = vadd.f32 %v881_v23, %v1499_v2 }
  0xfb   : > { %713 = vst [vmem:[%s1451_s24 + $0x28] sm:$0xff] %v1501_v5  ;;  %v814_v13 = vmax.f32 %v1463_v44, %v1501_v5  ;;  %745 = vst [vmem:[%s1451_s24 + $0x128] sm:$0xff] %v1503_v6  ;;  %v922_v14 = vmax.f32 %v1465_v45, %v1503_v6  ;;  %v1523_v15 = vmax.f32 %v500_v7, 0.0  ;;  %v1525_v16 = vmax.f32 %v580_v8, 0.0 }
  0xfc   : > { %v502_v17 = vadd.f32 %v501_v11, %v1444_v31  ;;  %v582_v18 = vadd.f32 %v581_v12, %v1444_v31  ;;  %v505_v19 = vpop.f32.mrf.mxu0  ;;  %v585_v20 = vpop.f32.mrf.mxu1  ;;  %v786_v36 = vadd.f32 %v785_v24, %v1501_v5  ;;  %v895_v41 = vadd.f32 %v894_v25, %v1503_v6 }
  0xfd   : > { %v506_v21 = vadd.f32 %v505_v19, %v1441_v30  ;;  %v586_v22 = vadd.f32 %v585_v20, %v1441_v30  ;;  %714 = vst [vmem:[%s1451_s24 + $0x30] sm:$0xff] %v1523_v15  ;;  %746 = vst [vmem:[%s1451_s24 + $0x130] sm:$0xff] %v1525_v16  ;;  %v774_v42 = vadd.f32 %v773_v26, %v1523_v15 }
  0xfe   : > { %v507_v27 = vpop.f32.mrf.mxu0  ;;  %v587_v28 = vpop.f32.mrf.mxu1  ;;  %v1542_v29 = vmax.f32 %v502_v17, 0.0  ;;  %v1544_v32 = vmax.f32 %v582_v18, 0.0  ;;  %v802_v43 = vmax.f32 %v1473_v50, %v1523_v15  ;;  %v883_v46 = vadd.f32 %v882_v35, %v1525_v16 }
  0xff   : > { %v652_v33 = vmax.f32 %v506_v21, 0.0  ;;  %v684_v34 = vmax.f32 %v586_v22, 0.0  ;;  %v508_v37 = vadd.f32 %v507_v27, %v1444_v31  ;;  %v588_v38 = vadd.f32 %v587_v28, %v1444_v31 }
 0x100   : > { %v509_v39 = vpop.f32.mrf.mxu0  ;;  %v589_v40 = vpop.f32.mrf.mxu1  ;;  %715 = vst [vmem:[%s1451_s24 + $0x38] sm:$0xff] %v1542_v29  ;;  %747 = vst [vmem:[%s1451_s24 + $0x138] sm:$0xff] %v1544_v32  ;;  %v910_v47 = vmax.f32 %v1475_v51, %v1525_v16  ;;  %v787_v48 = vadd.f32 %v786_v36, %v1542_v29  ;;  %v815_v49 = vmax.f32 %v1485_v57, %v1542_v29 }
 0x101   : > { %716 = vst [vmem:[%s1451_s24 + $0x40] sm:$0xff] %v652_v33  ;;  %748 = vst [vmem:[%s1451_s24 + $0x140] sm:$0xff] %v684_v34  ;;  %v653_v50 = vmax.f32 %v508_v37, 0.0  ;;  %v685_v54 = vmax.f32 %v588_v38, 0.0  ;;  %v510_v55 = vadd.f32 %v509_v39, %v1441_v30  ;;  %v590_v56 = vadd.f32 %v589_v40, %v1441_v30 }
 0x102   : > { %v511_v52 = vpop.f32.mrf.mxu0  ;;  %v591_v53 = vpop.f32.mrf.mxu1  ;;  %v896_v59 = vadd.f32 %v895_v41, %v1544_v32  ;;  %v923_v51 = vmax.f32 %v1487_v58, %v1544_v32  ;;  %v775_v63 = vadd.f32 %v774_v42, %v652_v33  ;;  %v1573_v0 = vmax.f32 %v801_v9, %v652_v33 }
 0x103   : > { %v512_v60 = vadd.f32 %v511_v52, %v1444_v31  ;;  %v592_v61 = vadd.f32 %v591_v53, %v1444_v31  ;;  %v884_v1 = vadd.f32 %v883_v46, %v684_v34  ;;  %v1575_v2 = vmax.f32 %v909_v10, %v684_v34  ;;  %717 = vst [vmem:[%s1451_s24 + $0x48] sm:$0xff] %v653_v50 }
 0x104   : > { %v515_v57 = vpop.f32.mrf.mxu0  ;;  %v595_v62 = vpop.f32.mrf.mxu1  ;;  %749 = vst [vmem:[%s1451_s24 + $0x148] sm:$0xff] %v685_v54  ;;  %v654_v3 = vmax.f32 %v510_v55, 0.0  ;;  %v686_v4 = vmax.f32 %v590_v56, 0.0  ;;  %v788_v16 = vadd.f32 %v787_v48, %v653_v50  ;;  %v1586_v17 = vmax.f32 %v814_v13, %v653_v50 }
 0x105   : > { %v655_v58 = vmax.f32 %v512_v60, 0.0  ;;  %v687_v7 = vmax.f32 %v592_v61, 0.0  ;;  %v516_v12 = vadd.f32 %v515_v57, %v1441_v30  ;;  %v596_v9 = vadd.f32 %v595_v62, %v1441_v30 }
 0x106   : > { %v517_v8 = vpop.f32.mrf.mxu0  ;;  %v597_v11 = vpop.f32.mrf.mxu1  ;;  %v897_v18 = vadd.f32 %v896_v59, %v685_v54  ;;  %v1591_v19 = vmax.f32 %v922_v14, %v685_v54  ;;  %718 = vst [vmem:[%s1451_s24 + $0x50] sm:$0xff] %v654_v3  ;;  %750 = vst [vmem:[%s1451_s24 + $0x150] sm:$0xff] %v686_v4  ;;  %v776_v22 = vadd.f32 %v775_v63, %v654_v3 }
 0x107   : > { %v518_v15 = vadd.f32 %v517_v8, %v1444_v31  ;;  %v598_v10 = vadd.f32 %v597_v11, %v1444_v31  ;;  %719 = vst [vmem:[%s1451_s24 + $0x58] sm:$0xff] %v655_v58  ;;  %751 = vst [vmem:[%s1451_s24 + $0x158] sm:$0xff] %v687_v7  ;;  %v804_v23 = vmax.f32 %v802_v43, %v654_v3  ;;  %v656_v44 = vmax.f32 %v516_v12, 0.0 }
 0x108   : > { %v519_v20 = vpop.f32.mrf.mxu0  ;;  %v599_v21 = vpop.f32.mrf.mxu1  ;;  %v885_v24 = vadd.f32 %v884_v1, %v686_v4  ;;  %v912_v25 = vmax.f32 %v910_v47, %v686_v4  ;;  %v688_v5 = vmax.f32 %v596_v9, 0.0  ;;  %v789_v32 = vadd.f32 %v788_v16, %v655_v58 }
 0x109   : > { %v657_v13 = vmax.f32 %v518_v15, 0.0  ;;  %v689_v45 = vmax.f32 %v598_v10, 0.0  ;;  %v520_v26 = vadd.f32 %v519_v20, %v1441_v30  ;;  %v600_v27 = vadd.f32 %v599_v21, %v1441_v30  ;;  %720 = vst [vmem:[%s1451_s24 + $0x60] sm:$0xff] %v656_v44 }
 0x10a   : > { %v521_v6 = vpop.f32.mrf.mxu0  ;;  %v601_v14 = vpop.f32.mrf.mxu1  ;;  %v817_v33 = vmax.f32 %v815_v49, %v655_v58  ;;  %v898_v34 = vadd.f32 %v897_v18, %v687_v7  ;;  %v925_v35 = vmax.f32 %v923_v51, %v687_v7  ;;  %752 = vst [vmem:[%s1451_s24 + $0x160] sm:$0xff] %v688_v5  ;;  %v777_v38 = vadd.f32 %v776_v22, %v656_v44 }
 0x10b   : > { %v522_v28 = vadd.f32 %v521_v6, %v1444_v31  ;;  %v602_v29 = vadd.f32 %v601_v14, %v1444_v31  ;;  %721 = vst [vmem:[%s1451_s24 + $0x68] sm:$0xff] %v657_v13  ;;  %753 = vst [vmem:[%s1451_s24 + $0x168] sm:$0xff] %v689_v45  ;;  %v805_v39 = vmax.f32 %v1573_v0, %v656_v44  ;;  %v658_v42 = vmax.f32 %v520_v26, 0.0 }
 0x10c   : > { %v1605_v36 = vpop.f32.mrf.mxu0  ;;  %v1607_v37 = vpop.f32.mrf.mxu1  ;;  %v886_v40 = vadd.f32 %v885_v24, %v688_v5  ;;  %v913_v41 = vmax.f32 %v1575_v2, %v688_v5  ;;  %v690_v43 = vmax.f32 %v600_v27, 0.0  ;;  %v790_v52 = vadd.f32 %v789_v32, %v657_v13 }
 0x10d   : > { %v659_v46 = vmax.f32 %v522_v28, 0.0  ;;  %v691_v47 = vmax.f32 %v602_v29, 0.0  ;;  %v818_v53 = vmax.f32 %v1586_v17, %v657_v13  ;;  %v899_v50 = vadd.f32 %v898_v34, %v689_v45  ;;  %722 = vst [vmem:[%s1451_s24 + $0x70] sm:$0xff] %v658_v42 }
 0x10e   : > { %v1611_v48 = vpop.f32.mrf.mxu0  ;;  %v1613_v49 = vpop.f32.mrf.mxu1  ;;  %v926_v54 = vmax.f32 %v1591_v19, %v689_v45  ;;  %v778_v55 = vadd.f32 %v777_v38, %v658_v42  ;;  %v806_v56 = vmax.f32 %v804_v23, %v658_v42  ;;  %754 = vst [vmem:[%s1451_s24 + $0x170] sm:$0xff] %v690_v43  ;;  %v887_v59 = vadd.f32 %v886_v40, %v690_v43 }
 0x10f   : > { %v914_v51 = vmax.f32 %v912_v25, %v690_v43  ;;  %723 = vst [vmem:[%s1451_s24 + $0x78] sm:$0xff] %v659_v46  ;;  %755 = vst [vmem:[%s1451_s24 + $0x178] sm:$0xff] %v691_v47  ;;  %v791_v57 = vadd.f32 %v790_v52, %v659_v46  ;;  %v819_v62 = vmax.f32 %v817_v33, %v659_v46 }
 0x110   : > { %v1621_v60 = vpop.f32.mrf.mxu0  ;;  %v1623_v61 = vpop.f32.mrf.mxu1  ;;  %v900_v63 = vadd.f32 %v899_v50, %v691_v47  ;;  %v927_v0 = vmax.f32 %v925_v35, %v691_v47  ;;  %v779_v1 = vrot.slane %v778_v55, 4  ;;  %v807_v2 = vmax.f32 %v805_v39, %v806_v56 }
 0x111   : > { %v888_v3 = vrot.slane %v887_v59, 4  ;;  %v915_v4 = vmax.f32 %v913_v41, %v914_v51  ;;  %v792_v8 = vrot.slane %v791_v57, 4  ;;  %v820_v11 = vmax.f32 %v818_v53, %v819_v62 }
 0x112   : > { %v1625_v58 = vpop.f32.mrf.mxu0  ;;  %v1627_v7 = vpop.f32.mrf.mxu1  ;;  %v901_v12 = vrot.slane %v900_v63, 4  ;;  %v928_v9 = vmax.f32 %v926_v54, %v927_v0  ;;  %v780_v15 = vadd.f32 %v779_v1, %v778_v55  ;;  %v808_v10 = vrot.slane %v807_v2, 4 }
 0x113   : > { %v889_v16 = vadd.f32 %v888_v3, %v887_v59  ;;  %v916_v17 = vrot.slane %v915_v4, 4  ;;  %v793_v20 = vadd.f32 %v792_v8, %v791_v57  ;;  %v821_v21 = vrot.slane %v820_v11, 4 }
 0x114   : > { %v1629_v18 = vpop.f32.mrf.mxu0  ;;  %v1631_v19 = vpop.f32.mrf.mxu1  ;;  %v902_v22 = vadd.f32 %v901_v12, %v900_v63  ;;  %v929_v23 = vrot.slane %v928_v9, 4  ;;  %v781_v24 = vrot.slane %v780_v15, 2  ;;  %v809_v25 = vmax.f32 %v807_v2, %v808_v10 }
 0x115   : > { %v890_v44 = vrot.slane %v889_v16, 2  ;;  %v917_v5 = vmax.f32 %v915_v4, %v916_v17  ;;  %v794_v6 = vrot.slane %v793_v20, 2  ;;  %v822_v14 = vmax.f32 %v820_v11, %v821_v21 }
 0x116   : > { %v537_v13 = vpop.f32.mrf.mxu0  ;;  %v617_v45 = vpop.f32.mrf.mxu1  ;;  %v903_v26 = vrot.slane %v902_v22, 2  ;;  %v930_v27 = vmax.f32 %v928_v9, %v929_v23  ;;  %v782_v28 = vadd.f32 %v781_v24, %v780_v15  ;;  %v810_v29 = vrot.slane %v809_v25, 2 }
 0x117   : > { %v891_v32 = vadd.f32 %v890_v44, %v889_v16  ;;  %v918_v33 = vrot.slane %v917_v5, 2  ;;  %v795_v38 = vadd.f32 %v794_v6, %v793_v20  ;;  %v823_v39 = vrot.slane %v822_v14, 2 }
 0x118   : > { %v1633_v34 = vpop.f32.mrf.mxu0  ;;  %v1635_v35 = vpop.f32.mrf.mxu1  ;;  %v904_v40 = vadd.f32 %v903_v26, %v902_v22  ;;  %v931_v41 = vrot.slane %v930_v27, 2  ;;  %v783_v52 = vrot.slane %v782_v28, 1  ;;  %v811_v53 = vmax.f32 %v809_v25, %v810_v29 }
 0x119   : > { %v892_v42 = vrot.slane %v891_v32, 1  ;;  %v919_v43 = vmax.f32 %v917_v5, %v918_v33  ;;  %v796_v50 = vrot.slane %v795_v38, 1  ;;  %v824_v54 = vmax.f32 %v822_v14, %v823_v39 }
 0x11a   : > { %v1637_v46 = vpop.f32.mrf.mxu0  ;;  %v1639_v47 = vpop.f32.mrf.mxu1  ;;  %v905_v55 = vrot.slane %v904_v40, 1  ;;  %v932_v56 = vmax.f32 %v930_v27, %v931_v41  ;;  %v526_v59 = vadd.f32 %v1605_v36, %v1441_v30  ;;  %v606_v51 = vadd.f32 %v1607_v37, %v1441_v30 }
 0x11b   : > { %v893_v63 = vadd.f32 %v892_v42, %v891_v32  ;;  %v920_v0 = vrot.slane %v919_v43, 1  ;;  %v528_v1 = vadd.f32 %v1611_v48, %v1444_v31  ;;  %v608_v2 = vadd.f32 %v1613_v49, %v1444_v31 }
 0x11c   : > { %v1645_v57 = vpop.f32.mrf.mxu0  ;;  %v1647_v62 = vpop.f32.mrf.mxu1  ;;  %v784_v4 = vadd.f32 %v783_v52, %v782_v28  ;;  %v812_v37 = vrot.slane %v811_v53, 1  ;;  %v797_v8 = vadd.f32 %v796_v50, %v795_v38  ;;  %v825_v11 = vrot.slane %v824_v54, 1 }
 0x11d   : > { %v906_v12 = vadd.f32 %v905_v55, %v904_v40  ;;  %v933_v9 = vrot.slane %v932_v56, 1  ;;  %v1657_v15 = vmax.f32 %v526_v59, 0.0  ;;  %v1659_v48 = vmax.f32 %v606_v51, 0.0 }
 0x11e   : > { %v1653_v3 = vpop.f32.mrf.mxu0  ;;  %v1655_v36 = vpop.f32.mrf.mxu1  ;;  %v1661_v10 = vmul.f32 0.015625, %v893_v63  ;;  %v1663_v49 = vmax.f32 %v919_v43, %v920_v0  ;;  %v1665_v16 = vmax.f32 %v528_v1, 0.0  ;;  %v1667_v17 = vmax.f32 %v608_v2, 0.0 }
 0x11f   : > { %724 = vst [vmem:[%s1451_s24 + $0x80] sm:$0xff] %v1657_v15  ;;  %756 = vst [vmem:[%s1451_s24 + $0x180] sm:$0xff] %v1659_v48  ;;  %v530_v20 = vadd.f32 %v1621_v60, %v1441_v30  ;;  %v610_v21 = vadd.f32 %v1623_v61, %v1441_v30  ;;  %v532_v22 = vadd.f32 %v1625_v58, %v1444_v31  ;;  %v1715_v28 = vmul.f32 0.015625, %v797_v8 }
 0x120   : > { %v612_v23 = vadd.f32 %v1627_v7, %v1444_v31  ;;  %v1681_v24 = vpop.f32.mrf.mxu0  ;;  %v1683_v25 = vpop.f32.mrf.mxu1  ;;  %725 = vst [vmem:[%s1451_s24 + $0x88] sm:$0xff] %v1665_v16  ;;  %757 = vst [vmem:[%s1451_s24 + $0x188] sm:$0xff] %v1667_v17  ;;  %v536_v60 = vadd.f32 %v1629_v18, %v1441_v30  ;;  %v616_v61 = vadd.f32 %v1631_v19, %v1441_v30  ;;  %v1005_v38 = vrot.slane %v1661_v10, 6 }
 0x121   : > { %v538_v58 = vadd.f32 %v537_v13, %v1444_v31  ;;  %v618_v7 = vadd.f32 %v617_v45, %v1444_v31  ;;  %v1695_v44 = vmax.f32 %v530_v20, 0.0  ;;  %v1697_v5 = vmax.f32 %v610_v21, 0.0 }
 0x122   : > { %v1699_v6 = vmax.f32 %v532_v22, 0.0  ;;  %v1701_v14 = vmax.f32 %v612_v23, 0.0  ;;  %v1703_v18 = vmax.f32 %v536_v60, 0.0  ;;  %v1705_v26 = vmax.f32 %v616_v61, 0.0  ;;  %v551_v32 = vpop.f32.mrf.mxu0  ;;  %v631_v33 = vpop.f32.mrf.mxu1 }
 0x123   : > { %v1707_v19 = vmax.f32 %v538_v58, 0.0  ;;  %v1709_v13 = vmax.f32 %v618_v7, 0.0  ;;  %v1711_v45 = vmul.f32 0.015625, %v784_v4  ;;  %v1713_v27 = vmax.f32 %v811_v53, %v812_v37  ;;  %726 = vst [vmem:[%s1451_s24 + $0x90] sm:$0xff] %v1695_v44  ;;  %758 = vst [vmem:[%s1451_s24 + $0x190] sm:$0xff] %v1697_v5 }
 0x124   : > { %v1717_v29 = vmax.f32 %v824_v54, %v825_v11  ;;  %727 = vst [vmem:[%s1451_s24 + $0x98] sm:$0xff] %v1699_v6  ;;  %759 = vst [vmem:[%s1451_s24 + $0x198] sm:$0xff] %v1701_v14  ;;  %v1007_v39 = vrot.slane %v1663_v49, 6  ;;  %v1729_v40 = vmul.f32 0.015625, %v906_v12  ;;  %v1731_v41 = vmax.f32 %v932_v56, %v933_v9 }
 0x125   : > { %728 = vst [vmem:[%s1451_s24 + $0xa0] sm:$0xff] %v1703_v18  ;;  %760 = vst [vmem:[%s1451_s24 + $0x1a0] sm:$0xff] %v1705_v26  ;;  %v827_v42 = vadd.f32 %v1695_v44, %v1657_v15  ;;  %v935_v43 = vadd.f32 %v1697_v5, %v1659_v48  ;;  %v840_v52 = vadd.f32 %v1699_v6, %v1665_v16 }
 0x126   : > { %729 = vst [vmem:[%s1451_s24 + $0xa8] sm:$0xff] %v1707_v19  ;;  %761 = vst [vmem:[%s1451_s24 + $0x1a8] sm:$0xff] %v1709_v13  ;;  %v948_v53 = vadd.f32 %v1701_v14, %v1667_v17  ;;  %v540_v50 = vadd.f32 %v1633_v34, %v1441_v30  ;;  %v620_v54 = vadd.f32 %v1635_v35, %v1441_v30  ;;  %v555_v35 = vpop.f32.mrf.mxu0 }
 0x127   : > { %v542_v55 = vadd.f32 %v1637_v46, %v1444_v31  ;;  %v622_v56 = vadd.f32 %v1639_v47, %v1444_v31  ;;  %v546_v59 = vadd.f32 %v1645_v57, %v1441_v30  ;;  %v626_v51 = vadd.f32 %v1647_v62, %v1441_v30  ;;  %v635_v46 = vpop.f32.mrf.mxu1 }
 0x128   : > { %v548_v63 = vadd.f32 %v1653_v3, %v1444_v31  ;;  %v628_v34 = vadd.f32 %v1655_v36, %v1444_v31  ;;  %v1765_v0 = vmax.f32 %v540_v50, 0.0  ;;  %v1767_v47 = vmax.f32 %v620_v54, 0.0 }
 0x129   : > { %v1769_v57 = vmax.f32 %v542_v55, 0.0  ;;  %v1771_v1 = vmax.f32 %v622_v56, 0.0  ;;  %v668_v62 = vmax.f32 %v546_v59, 0.0  ;;  %v700_v2 = vmax.f32 %v626_v51, 0.0  ;;  %v637_v21 = vpop.f32.mrf.mxu1 }
 0x12a   : > { %v669_v3 = vmax.f32 %v548_v63, 0.0  ;;  %v701_v36 = vmax.f32 %v628_v34, 0.0  ;;  %v828_v4 = vadd.f32 %v827_v42, %v1703_v18  ;;  %v855_v37 = vmax.f32 %v1657_v15, %v1703_v18  ;;  %730 = vst [vmem:[%s1451_s24 + $0xb0] sm:$0xff] %v1765_v0  ;;  %762 = vst [vmem:[%s1451_s24 + $0x1b0] sm:$0xff] %v1767_v47 }
 0x12b   : > { %v936_v8 = vadd.f32 %v935_v43, %v1705_v26  ;;  %v963_v11 = vmax.f32 %v1659_v48, %v1705_v26  ;;  %731 = vst [vmem:[%s1451_s24 + $0xb8] sm:$0xff] %v1769_v57  ;;  %763 = vst [vmem:[%s1451_s24 + $0x1b8] sm:$0xff] %v1771_v1  ;;  %v841_v12 = vadd.f32 %v840_v52, %v1707_v19  ;;  %v557_v48 = vpop.f32.mrf.mxu0 }
 0x12c   : > { %v868_v9 = vmax.f32 %v1665_v16, %v1707_v19  ;;  %v949_v15 = vadd.f32 %v948_v53, %v1709_v13  ;;  %v976_v20 = vmax.f32 %v1667_v17, %v1709_v13  ;;  %732 = vst [vmem:[%s1451_s24 + $0xc0] sm:$0xff] %v668_v62  ;;  %764 = vst [vmem:[%s1451_s24 + $0x1c0] sm:$0xff] %v700_v2 }
 0x12d   : > { %733 = vst [vmem:[%s1451_s24 + $0xc8] sm:$0xff] %v669_v3  ;;  %765 = vst [vmem:[%s1451_s24 + $0x1c8] sm:$0xff] %v701_v36  ;;  %v829_v22 = vadd.f32 %v828_v4, %v1765_v0  ;;  %v856_v23 = vmax.f32 %v1695_v44, %v1765_v0  ;;  %v937_v60 = vadd.f32 %v936_v8, %v1767_v47 }
 0x12e   : > { %v964_v16 = vmax.f32 %v1697_v5, %v1767_v47  ;;  %v842_v61 = vadd.f32 %v841_v12, %v1769_v57  ;;  %v869_v17 = vmax.f32 %v1699_v6, %v1769_v57  ;;  %v950_v58 = vadd.f32 %v949_v15, %v1771_v1 }
 0x12f   : > { %v977_v7 = vmax.f32 %v1701_v14, %v1771_v1  ;;  %v550_v18 = vadd.f32 %v1681_v24, %v1441_v30  ;;  %v630_v44 = vadd.f32 %v1683_v25, %v1441_v30  ;;  %v552_v26 = vadd.f32 %v551_v32, %v1444_v31  ;;  %v559_v14 = vpop.f32.mrf.mxu0  ;;  %v639_v24 = vpop.f32.mrf.mxu1 }
 0x130   : > { %v632_v5 = vadd.f32 %v631_v33, %v1444_v31  ;;  %v556_v19 = vadd.f32 %v555_v35, %v1441_v30  ;;  %v636_v13 = vadd.f32 %v635_v46, %v1441_v30  ;;  %v558_v6 = vadd.f32 %v557_v48, %v1444_v31 }
 0x131   : > { %v638_v42 = vadd.f32 %v637_v21, %v1444_v31  ;;  %v670_v43 = vmax.f32 %v550_v18, 0.0  ;;  %v702_v25 = vmax.f32 %v630_v44, 0.0  ;;  %v671_v52 = vmax.f32 %v552_v26, 0.0  ;;  %v561_v0 = vpop.f32.mrf.mxu0  ;;  %v641_v47 = vpop.f32.mrf.mxu1 }
 0x132   : > { %v703_v32 = vmax.f32 %v632_v5, 0.0  ;;  %v672_v53 = vmax.f32 %v556_v19, 0.0  ;;  %v704_v33 = vmax.f32 %v636_v13, 0.0  ;;  %v673_v50 = vmax.f32 %v558_v6, 0.0 }
 0x133   : > { %v1819_v54 = vmax.f32 %v638_v42, 0.0  ;;  %v830_v55 = vadd.f32 %v829_v22, %v668_v62  ;;  %v857_v56 = vmax.f32 %v855_v37, %v668_v62  ;;  %v938_v59 = vadd.f32 %v937_v60, %v700_v2  ;;  %734 = vst [vmem:[%s1451_s24 + $0xd0] sm:$0xff] %v670_v43  ;;  %766 = vst [vmem:[%s1451_s24 + $0x1d0] sm:$0xff] %v702_v25 }
 0x134   : > { %v965_v51 = vmax.f32 %v963_v11, %v700_v2  ;;  %735 = vst [vmem:[%s1451_s24 + $0xd8] sm:$0xff] %v671_v52  ;;  %767 = vst [vmem:[%s1451_s24 + $0x1d8] sm:$0xff] %v703_v32  ;;  %v843_v63 = vadd.f32 %v842_v61, %v669_v3  ;;  %v870_v34 = vmax.f32 %v868_v9, %v669_v3 }
 0x135   : > { %v951_v35 = vadd.f32 %v950_v58, %v701_v36  ;;  %v978_v46 = vmax.f32 %v976_v20, %v701_v36  ;;  %736 = vst [vmem:[%s1451_s24 + $0xe0] sm:$0xff] %v672_v53  ;;  %768 = vst [vmem:[%s1451_s24 + $0x1e0] sm:$0xff] %v704_v33  ;;  %v831_v57 = vadd.f32 %v830_v55, %v670_v43 }
 0x136   : > { %737 = vst [vmem:[%s1451_s24 + $0xe8] sm:$0xff] %v673_v50  ;;  %769 = vst [vmem:[%s1451_s24 + $0x1e8] sm:$0xff] %v1819_v54  ;;  %v858_v1 = vmax.f32 %v856_v23, %v670_v43  ;;  %v939_v62 = vadd.f32 %v938_v59, %v702_v25  ;;  %v966_v4 = vmax.f32 %v964_v16, %v702_v25 }
 0x137   : > { %v844_v2 = vadd.f32 %v843_v63, %v671_v52  ;;  %v871_v37 = vmax.f32 %v869_v17, %v671_v52  ;;  %v952_v8 = vadd.f32 %v951_v35, %v703_v32  ;;  %v979_v11 = vmax.f32 %v977_v7, %v703_v32 }
 0x138   : > { %v560_v12 = vadd.f32 %v559_v14, %v1441_v30  ;;  %v640_v3 = vadd.f32 %v639_v24, %v1441_v30  ;;  %v562_v36 = vadd.f32 %v561_v0, %v1444_v31  ;;  %v642_v9 = vadd.f32 %v641_v47, %v1444_v31 }
 0x139   : > { %v832_v15 = vadd.f32 %v831_v57, %v672_v53  ;;  %v859_v20 = vmax.f32 %v857_v56, %v672_v53  ;;  %v940_v48 = vadd.f32 %v939_v62, %v704_v33  ;;  %v967_v21 = vmax.f32 %v965_v51, %v704_v33 }
 0x13a   : > { %v674_v22 = vmax.f32 %v560_v12, 0.0  ;;  %v706_v23 = vmax.f32 %v640_v3, 0.0  ;;  %v675_v60 = vmax.f32 %v562_v36, 0.0  ;;  %v707_v16 = vmax.f32 %v642_v9, 0.0 }
 0x13b   : > { %v845_v61 = vadd.f32 %v844_v2, %v673_v50  ;;  %v872_v17 = vmax.f32 %v870_v34, %v673_v50  ;;  %v953_v58 = vadd.f32 %v952_v8, %v1819_v54  ;;  %v980_v30 = vmax.f32 %v978_v46, %v1819_v54 }
 0x13c   : > { %738 = vst [vmem:[%s1451_s24 + $0xf0] sm:$0xff] %v674_v22  ;;  %v833_v7 = vadd.f32 %v832_v15, %v674_v22  ;;  %v860_v31 = vmax.f32 %v858_v1, %v674_v22  ;;  %770 = vst [vmem:[%s1451_s24 + $0x1f0] sm:$0xff] %v706_v23  ;;  %v941_v18 = vadd.f32 %v940_v48, %v706_v23 }
 0x13d   : > { %v968_v44 = vmax.f32 %v966_v4, %v706_v23  ;;  %739 = vst [vmem:[%s1451_s24 + $0xf8] sm:$0xff] %v675_v60  ;;  %771 = vst [vmem:[%s1451_s24 + $0x1f8] sm:$0xff] %v707_v16  ;;  %v846_v26 = vadd.f32 %v845_v61, %v675_v60  ;;  %v873_v5 = vmax.f32 %v871_v37, %v675_v60 }
 0x13e   : > { %v954_v19 = vadd.f32 %v953_v58, %v707_v16  ;;  %v981_v13 = vmax.f32 %v979_v11, %v707_v16  ;;  %v834_v6 = vrot.slane %v833_v7, 4  ;;  %v861_v42 = vmax.f32 %v859_v20, %v860_v31 }
 0x13f   : > { %v942_v14 = vrot.slane %v941_v18, 4  ;;  %v969_v24 = vmax.f32 %v967_v21, %v968_v44  ;;  %v847_v43 = vrot.slane %v846_v26, 4  ;;  %v874_v25 = vmax.f32 %v872_v17, %v873_v5 }
 0x140   : > { %v955_v52 = vrot.slane %v954_v19, 4  ;;  %v982_v32 = vmax.f32 %v980_v30, %v981_v13  ;;  %v835_v53 = vadd.f32 %v834_v6, %v833_v7  ;;  %v862_v33 = vrot.slane %v861_v42, 4 }
 0x141   : > { %v943_v50 = vadd.f32 %v942_v14, %v941_v18  ;;  %v970_v54 = vrot.slane %v969_v24, 4  ;;  %v848_v55 = vadd.f32 %v847_v43, %v846_v26  ;;  %v875_v56 = vrot.slane %v874_v25, 4 }
 0x142   : > { %v956_v59 = vadd.f32 %v955_v52, %v954_v19  ;;  %v983_v51 = vrot.slane %v982_v32, 4  ;;  %v836_v63 = vrot.slane %v835_v53, 2  ;;  %v863_v34 = vmax.f32 %v861_v42, %v862_v33 }
 0x143   : > { %v944_v35 = vrot.slane %v943_v50, 2  ;;  %v971_v46 = vmax.f32 %v969_v24, %v970_v54  ;;  %v849_v0 = vrot.slane %v848_v55, 2  ;;  %v876_v47 = vmax.f32 %v874_v25, %v875_v56 }
 0x144   : > { %v957_v57 = vrot.slane %v956_v59, 2  ;;  %v984_v1 = vmax.f32 %v982_v32, %v983_v51  ;;  %v837_v62 = vadd.f32 %v836_v63, %v835_v53  ;;  %v864_v4 = vrot.slane %v863_v34, 2 }
 0x145   : > { %v945_v2 = vadd.f32 %v944_v35, %v943_v50  ;;  %v972_v37 = vrot.slane %v971_v46, 2  ;;  %v850_v8 = vadd.f32 %v849_v0, %v848_v55  ;;  %v877_v11 = vrot.slane %v876_v47, 2 }
 0x146   : > { %v958_v12 = vadd.f32 %v957_v57, %v956_v59  ;;  %v985_v3 = vrot.slane %v984_v1, 2  ;;  %v838_v36 = vrot.slane %v837_v62, 1  ;;  %v865_v9 = vmax.f32 %v863_v34, %v864_v4 }
 0x147   : > { %v946_v15 = vrot.slane %v945_v2, 1  ;;  %v973_v20 = vmax.f32 %v971_v46, %v972_v37  ;;  %v851_v48 = vrot.slane %v850_v8, 1  ;;  %v878_v21 = vmax.f32 %v876_v47, %v877_v11 }
 0x148   : > { %v959_v22 = vrot.slane %v958_v12, 1  ;;  %v986_v23 = vmax.f32 %v984_v1, %v985_v3  ;;  %v839_v60 = vadd.f32 %v838_v36, %v837_v62  ;;  %v866_v16 = vrot.slane %v865_v9, 1 }
 0x149   : > { %v947_v61 = vadd.f32 %v946_v15, %v945_v2  ;;  %v974_v17 = vrot.slane %v973_v20, 1  ;;  %v852_v58 = vadd.f32 %v851_v48, %v850_v8  ;;  %v879_v30 = vrot.slane %v878_v21, 1 }
 0x14a   : > { %v960_v7 = vadd.f32 %v959_v22, %v958_v12  ;;  %v987_v31 = vrot.slane %v986_v23, 1  ;;  %v853_v18 = vmul.f32 0.015625, %v839_v60  ;;  %v867_v44 = vmax.f32 %v865_v9, %v866_v16 }
 0x14b   : > { %v961_v26 = vmul.f32 0.015625, %v947_v61  ;;  %v975_v5 = vmax.f32 %v973_v20, %v974_v17  ;;  %v854_v19 = vmul.f32 0.015625, %v852_v58  ;;  %v880_v13 = vmax.f32 %v878_v21, %v879_v30 }
 0x14c   : > { %v962_v6 = vmul.f32 0.015625, %v960_v7  ;;  %v988_v42 = vmax.f32 %v986_v23, %v987_v31  ;;  %v1006_v14 = vrot.slane %v1729_v40, 6  ;;  %v1008_v24 = vrot.slane %v1731_v41, 6 }
 0x14d   : > { %v993_v43 = vrot.slane %v853_v18, 7  ;;  %v995_v25 = vrot.slane %v867_v44, 7  ;;  %v1017_v52 = vrot.slane %v961_v26, 5  ;;  %v1019_v32 = vrot.slane %v975_v5, 5 }
 0x14e   : > { %v994_v53 = vrot.slane %v854_v19, 7  ;;  %v996_v33 = vrot.slane %v880_v13, 7  ;;  %v1018_v55 = vrot.slane %v962_v6, 5  ;;  %v1020_v56 = vrot.slane %v988_v42, 5 }
 0x14f   : > { %v1026_v50 = vsel %vm1025_vm1, %v1711_v45, %v993_v43  ;;  %v1028_v54 = vsel %vm1025_vm1, %v1713_v27, %v995_v25 }
 0x150   : > { %v1031_v40 = vsel %vm1030_vm2, %v1026_v50, %v1005_v38  ;;  %v1033_v41 = vsel %vm1030_vm2, %v1028_v54, %v1007_v39  ;;  %v1027_v59 = vsel %vm1025_vm1, %v1715_v28, %v994_v53  ;;  %v1029_v45 = vsel %vm1025_vm1, %v1717_v29, %v996_v33 }
 0x151   : > { %v1032_v51 = vsel %vm1030_vm2, %v1027_v59, %v1006_v14  ;;  %v1034_v27 = vsel %vm1030_vm2, %v1029_v45, %v1008_v24  ;;  %v1036_v63 = vsel %vm1035_vm3, %v1031_v40, %v1017_v52  ;;  %v1038_v10 = vsel %vm1035_vm3, %v1033_v41, %v1019_v32 }
 0x152   : > { %v1037_v49 = vsel %vm1035_vm3, %v1032_v51, %v1018_v55  ;;  %v1039_v38 = vsel %vm1035_vm3, %v1034_v27, %v1020_v56 }
 0x153   : > { %v1044_v28 = vcombine.low %v1036_v63, %v1037_v49  ;;  %v1045_v39 = vcombine.low %v1038_v10, %v1039_v38 }
 0x155   : > { %1048 = vst [vmem:[%s228_s26] sm:$0xff] %v1044_v28  ;;  %1049 = vst [vmem:[%s228_s26 + $0x8] sm:$0xff] %v1045_v39 }
 0x156 PF: > { %s16_s15 = sadd.s32 1, %s1303_s15  }
 0x157   : > { %p13_p2 = scmp.ge.s32.totalorder %s16_s15, 4  }
 0x159   :  { %15 = sbr.rel (!%p13_p2) target bundleno = 1 (0x1), region = 79 }
 0x15e   :  { %1090 = vsyncpa [#allocation3], 1 }
 0x15f   :  { %1092 = vsyncpa [#allocation3 + $0x1], 1 }

// kernel: stage_lstm_forward.4
= control target key start
LH: loop header
LB: loop body
LE: loop exit
PB: predicated region body
PF: predicated region fallthrough
CT: control target
= control target key end

     0   :  { %s509_s0 = inlined_call_operand.vmem [shape: s32[8], index: 0, kind: input, shape index: {}]   ;;  %s510_s1 = inlined_call_operand.vmem [shape: f32[8,64,256], index: 1, kind: input, shape index: {}, may-alias: {1,2}]   ;;  %s511_s2 = inlined_call_operand.vmem [shape: f32[8,64,256], index: 2, kind: input, shape index: {}, may-alias: {1,2}]   ;;  %s512_s3 = inlined_call_operand.vmem [shape: f32[8,1,512], index: 3, kind: output, shape index: {}]  }
   0x1   :  { %s8_s14 = sshll.u32 %s509_s0, 4  ;;  %s9_s14 = int_to_ptr.vmem [resolvable:$true] %s8_s14 }
   0x2   :  { %s402_s15 = scalar_lea.vmem %s9_s14, 16  ;;  %p407_p1 = scmp.lt.s32.totalorder %s9_s14, %s9_s14 }
   0x3   :  { %p403_p0 = scmp.ne.s32.totalorder %s9_s14, %s402_s15  ;;  %p408_p2 = scmp.lt.s32.totalorder %s402_s15, %s402_s15 }
   0x5   :  { %p409_p3 = por %p408_p2, %p407_p1 }
   0x7   :  { %p410_p4 = pnand %p409_p3, %p403_p0 }
   0x9   :  { %413 = shalt.err (!%p410_p4)  }
   0xa   :  { %s424_s16 = smov [#allocation3]  }
   0xb   :  { %11 = dma.vmem_to_smem %s9_s14, 16, %s424_s16, [#allocation2] }
   0xc   :  { %418 = dma.done.wait [#allocation2], 16 }
   0xd   :  { %419 = vsyncadd [#allocation2], 4294967280 }
   0xe   :  { %13 = sfence }
   0xf   :  { %s449_s17 = smov 0  }
  0x10 LB: > { %s378_s0 = sadd.s32 4294967295, %s422_s17   ;;  %p382_p5 = scmp.ge.s32.totalorder %s422_s17, 1  ;;  %s422_s17 = sphi %s449_s17, %s19_s17  }
  0x11   : > { %p133_p6 = scmp.lt.s32.totalorder %s422_s17, 9 }
  0x13   : > { %p134_p7 = pnand %p382_p5, %p133_p6 }
  0x14   : > { %p160_p8 = scmp.lt.s32.totalorder (!%p134_p7), %s378_s0, 7  ;;  %s165_s18 = sld [smem:[#allocation3 + %s378_s0]] (!%p134_p7) }
  0x15   : > { %137 = sbr.rel (%p134_p7) target bundleno = 74 (0x4a), region = 28 }
  0x1a   : > { %s514_s0 = smov (!%p160_p8, %s378_s0), 7  ;;  %p166_p9 = scmp.lt.s32.totalorder %s165_s18, 7 }
  0x1b   : > { %s390_s19 = sshll.u32 %s514_s0, 7  ;;  %s387_s27 = sshll.u32 %s514_s0, 2 }
  0x1c   : > { %s463_s22 = scalar_lea.vmem %s510_s1, %s390_s19  ;;  %s516_s18 = smov (!%p166_p9, %s165_s18), 7 }
  0x1d   : > { %v176_v0 = vld [vmem:[%s463_s22] sm:$0xff]  ;;  %v177_v1 = vld [vmem:[%s463_s22 + $0x8] sm:$0xff]  ;;  %v178_v2 = vld [vmem:[%s463_s22 + $0x10] sm:$0xff]  ;;  %s391_s23 = sshll.u32 %s516_s18, 7  ;;  %s175_s30 = scalar_lea.vmem %s512_s3, %s387_s27 }
  0x1e   : > { %v179_v3 = vld [vmem:[%s463_s22 + $0x18] sm:$0xff]  ;;  %v180_v4 = vld [vmem:[%s463_s22 + $0x20] sm:$0xff]  ;;  %v181_v5 = vld [vmem:[%s463_s22 + $0x28] sm:$0xff]  ;;  %s474_s26 = scalar_lea.vmem %s511_s2, %s391_s23 }
  0x1f   : > { %v182_v6 = vld [vmem:[%s463_s22 + $0x30] sm:$0xff]  ;;  %v183_v7 = vld [vmem:[%s463_s22 + $0x38] sm:$0xff]  ;;  %v184_v8 = vld [vmem:[%s463_s22 + $0x40] sm:$0xff] }
  0x20   : > { %v185_v9 = vld [vmem:[%s463_s22 + $0x48] sm:$0xff]  ;;  %v186_v10 = vld [vmem:[%s463_s22 + $0x50] sm:$0xff]  ;;  %v187_v11 = vld [vmem:[%s463_s22 + $0x58] sm:$0xff] }
  0x21   : > { %v192_v12 = vld [vmem:[%s474_s26] sm:$0xff]  ;;  %v193_v13 = vld [vmem:[%s474_s26 + $0x8] sm:$0xff]  ;;  %v194_v14 = vld [vmem:[%s474_s26 + $0x10] sm:$0xff] }
  0x22   : > { %v190_v15 = vld [vmem:[%s463_s22 + $0x70] sm:$0xff]  ;;  %v195_v16 = vld [vmem:[%s474_s26 + $0x18] sm:$0xff]  ;;  %v196_v17 = vld [vmem:[%s474_s26 + $0x20] sm:$0xff]  ;;  %v208_v19 = vsub.f32 %v176_v0, %v192_v12  ;;  %v209_v20 = vsub.f32 %v177_v1, %v193_v13  ;;  %v210_v21 = vsub.f32 %v178_v2, %v194_v14 }
  0x23   : > { %v197_v18 = vld [vmem:[%s474_s26 + $0x28] sm:$0xff]  ;;  %v198_v22 = vld [vmem:[%s474_s26 + $0x30] sm:$0xff]  ;;  %v199_v23 = vld [vmem:[%s474_s26 + $0x38] sm:$0xff]  ;;  %v211_v25 = vsub.f32 %v179_v3, %v195_v16  ;;  %v212_v26 = vsub.f32 %v180_v4, %v196_v17 }
  0x24   : > { %v200_v24 = vld [vmem:[%s474_s26 + $0x40] sm:$0xff]  ;;  %v213_v27 = vsub.f32 %v181_v5, %v197_v18  ;;  %v201_v28 = vld [vmem:[%s474_s26 + $0x48] sm:$0xff]  ;;  %v202_v29 = vld [vmem:[%s474_s26 + $0x50] sm:$0xff]  ;;  %v214_v31 = vsub.f32 %v182_v6, %v198_v22  ;;  %v224_v32 = vadd.f32 %v210_v21, %v208_v19  ;;  %v215_v35 = vsub.f32 %v183_v7, %v199_v23 }
  0x25   : > { %v203_v30 = vld [vmem:[%s474_s26 + $0x58] sm:$0xff]  ;;  %v206_v34 = vld [vmem:[%s474_s26 + $0x70] sm:$0xff]  ;;  %v216_v36 = vsub.f32 %v184_v8, %v200_v24  ;;  %v237_v37 = vadd.f32 %v211_v25, %v209_v20  ;;  %v188_v38 = vld [vmem:[%s463_s22 + $0x60] sm:$0xff]  ;;  %v217_v41 = vsub.f32 %v185_v9, %v201_v28  ;;  %v218_v42 = vsub.f32 %v186_v10, %v202_v29 }
  0x26   : > { %v191_v33 = vld [vmem:[%s463_s22 + $0x78] sm:$0xff]  ;;  %v204_v39 = vld [vmem:[%s474_s26 + $0x60] sm:$0xff]  ;;  %v219_v43 = vsub.f32 %v187_v11, %v203_v30  ;;  %v225_v44 = vadd.f32 %v224_v32, %v212_v26  ;;  %v189_v45 = vld [vmem:[%s463_s22 + $0x68] sm:$0xff]  ;;  %v222_v47 = vsub.f32 %v190_v15, %v206_v34  ;;  %v253_v49 = vmax.f32 %v208_v19, %v212_v26 }
  0x27   : > { %v207_v40 = vld [vmem:[%s474_s26 + $0x78] sm:$0xff]  ;;  %v205_v46 = vld [vmem:[%s474_s26 + $0x68] sm:$0xff]  ;;  %v238_v48 = vadd.f32 %v237_v37, %v213_v27  ;;  %v254_v50 = vmax.f32 %v210_v21, %v214_v31  ;;  %v266_v53 = vmax.f32 %v209_v20, %v213_v27  ;;  %v267_v54 = vmax.f32 %v211_v25, %v215_v35 }
  0x28   : > { %v223_v51 = vsub.f32 %v191_v33, %v207_v40  ;;  %v226_v52 = vadd.f32 %v225_v44, %v214_v31  ;;  %v220_v55 = vsub.f32 %v188_v38, %v204_v39  ;;  %v255_v57 = vmax.f32 %v253_v49, %v216_v36 }
  0x29   : > { %v239_v56 = vadd.f32 %v238_v48, %v215_v35  ;;  %v256_v58 = vmax.f32 %v254_v50, %v218_v42  ;;  %v221_v59 = vsub.f32 %v189_v45, %v205_v46  ;;  %v268_v61 = vmax.f32 %v266_v53, %v217_v41 }
  0x2a   : > { %v227_v60 = vadd.f32 %v226_v52, %v216_v36  ;;  %v269_v62 = vmax.f32 %v267_v54, %v219_v43  ;;  %v257_v0 = vmax.f32 %v255_v57, %v220_v55  ;;  %v425_v23 = vmov 1966171168  }
  0x2b   : > { %v240_v63 = vadd.f32 %v239_v56, %v217_v41  ;;  %v258_v1 = vmax.f32 %v256_v58, %v222_v47  ;;  %v270_v3 = vmax.f32 %v268_v61, %v221_v59  ;;  %v286_v24 = vunpack.c.l.s4 %v425_v23 }
  0x2c   : > { %v228_v2 = vadd.f32 %v227_v60, %v218_v42  ;;  %v271_v4 = vmax.f32 %v269_v62, %v223_v51  ;;  %v288_v25 = vlaneseq }
  0x2d   : > { %v241_v5 = vadd.f32 %v240_v63, %v219_v43  ;;  %v259_v6 = vmax.f32 %v257_v0, %v258_v1  ;;  %v287_v34 = vunpack.c.0.s8 %v286_v24 }
  0x2e   : > { %v229_v7 = vadd.f32 %v228_v2, %v220_v55  ;;  %v272_v8 = vmax.f32 %v270_v3, %v271_v4  ;;  %v289_v35 = vshrl.u32 %v288_v25, 7  ;;  %vm310_vm0 = vcmp.lt.s32.totalorder %v288_v25, 512 }
  0x2f   : > { %v242_v9 = vadd.f32 %v241_v5, %v221_v59  ;;  %v260_v10 = vrot.slane %v259_v6, 4 }
  0x30   : > { %v230_v11 = vadd.f32 %v229_v7, %v222_v47  ;;  %v273_v12 = vrot.slane %v272_v8, 4  ;;  %v290_v42 = vsub.s32 %v287_v34, %v289_v35 }
  0x31   : > { %v243_v13 = vadd.f32 %v242_v9, %v223_v51  ;;  %v261_v14 = vmax.f32 %v259_v6, %v260_v10 }
  0x32   : > { %v231_v15 = vrot.slane %v230_v11, 4  ;;  %v274_v16 = vmax.f32 %v272_v8, %v273_v12 }
  0x33   : > { %v244_v17 = vrot.slane %v243_v13, 4  ;;  %v262_v18 = vrot.slane %v261_v14, 2 }
  0x34   : > { %v232_v19 = vadd.f32 %v231_v15, %v230_v11  ;;  %v275_v20 = vrot.slane %v274_v16, 2 }
  0x35   : > { %v245_v21 = vadd.f32 %v244_v17, %v243_v13  ;;  %v263_v22 = vmax.f32 %v261_v14, %v262_v18 }
  0x36   : > { %v233_v26 = vrot.slane %v232_v19, 2  ;;  %v276_v27 = vmax.f32 %v274_v16, %v275_v20 }
  0x37   : > { %v246_v28 = vrot.slane %v245_v21, 2  ;;  %v264_v29 = vrot.slane %v263_v22, 1 }
  0x38   : > { %v234_v30 = vadd.f32 %v233_v26, %v232_v19  ;;  %v277_v31 = vrot.slane %v276_v27, 1 }
  0x39   : > { %v247_v32 = vadd.f32 %v246_v28, %v245_v21  ;;  %v265_v33 = vmax.f32 %v263_v22, %v264_v29 }
  0x3a   : > { %v235_v36 = vrot.slane %v234_v30, 1  ;;  %v278_v37 = vmax.f32 %v276_v27, %v277_v31 }
  0x3b   : > { %v248_v38 = vrot.slane %v247_v32, 1 }
  0x3c   : > { %v236_v39 = vadd.f32 %v235_v36, %v234_v30  ;;  %v284_v41 = vcombine.low %v265_v33, %v278_v37 }
  0x3d   : > { %v249_v40 = vadd.f32 %v248_v38, %v247_v32 }
  0x3e   : > { %v251_v43 = vmul.f32 0.015625, %v236_v39  ;;  %v298_v46 = vrot.slane %v284_v41, %v290_v42 }
  0x3f   : > { %v252_v44 = vmul.f32 0.015625, %v249_v40 }
  0x41   : > { %v283_v45 = vcombine.low %v251_v43, %v252_v44 }
  0x43   : > { %v291_v47 = vrot.slane %v283_v45, %v290_v42 }
  0x45   : > { %v299_v48 = vcombine.low %v291_v47, %v298_v46 }
  0x47   : > { %v306_v49 = vrot.slane %v299_v48, %v290_v42 }
  0x49   : > { %312 = vst.msk [vmem:[%s175_s30] sm:$0xf] %vm310_vm0, %v306_v49 }
  0x4a PF: > { %s19_s17 = sadd.s32 1, %s422_s17  }
  0x4b   : > { %p16_p10 = scmp.ge.s32.totalorder %s19_s17, 10  }
  0x4d   :  { %18 = sbr.rel (!%p16_p10) target bundleno = 16 (0x10), region = 61 }

// kernel: stage_lstm_forward.5
= control target key start
LH: loop header
LB: loop body
LE: loop exit
PB: predicated region body
PF: predicated region fallthrough
CT: control target
= control target key end

     0   :  { %s9418_s1 = inlined_call_operand.vmem [shape: bf16[1536,128], index: 1, kind: input, shape index: {}]   ;;  %s9419_s0 = inlined_call_operand.vmem [shape: bf16[32,1536], index: 0, kind: input, shape index: {}]   ;;  %s9420_s3 = inlined_call_operand.vmem [shape: f32[2,128,512], index: 3, kind: input, shape index: {}]   ;;  %s9421_s4 = inlined_call_operand.vmem [shape: f32[2,128,512], index: 4, kind: input, shape index: {}]   ;;  %s9422_s2 = inlined_call_operand.vmem [shape: f32[1,128], index: 2, kind: input, shape index: {}]   ;;  %s9423_s5 = inlined_call_operand.vmem [shape: f32[2,1,512], index: 5, kind: input, shape index: {}]   ;;  %s9424_s6 = inlined_call_operand.vmem [shape: f32[128,128], index: 6, kind: input, shape index: {}]   ;;  %s9425_s8 = inlined_call_operand.vmem [shape: f32[128,128], index: 8, kind: input, shape index: {}]   ;;  %s9426_s7 = inlined_call_operand.vmem [shape: f32[1,128], index: 7, kind: input, shape index: {}]   ;;  %s9427_s9 = inlined_call_operand.vmem [shape: f32[1,128], index: 9, kind: input, shape index: {}]   ;;  %s9428_s10 = inlined_call_operand.vmem [shape: f32[32,128], index: 10, kind: output, shape index: {}]  }
   0x1   :  { %v5570_v0 = vld [vmem:[%s9418_s1 + $0x78] sm:$0xff]   ;;  %v5574_v4 = vld [vmem:[%s9418_s1 + $0x70] sm:$0xff]   ;;  %v5578_v8 = vld [vmem:[%s9418_s1 + $0x68] sm:$0xff]  }
   0x2   :  { %v5571_v1 = vld [vmem:[%s9418_s1 + $0xf8] sm:$0xff]   ;;  %5285 = vmatprep.subr.bf16.mxu0 %v5570_v0  ;;  %v5575_v5 = vld [vmem:[%s9418_s1 + $0xf0] sm:$0xff]   ;;  %v5579_v9 = vld [vmem:[%s9418_s1 + $0xe8] sm:$0xff]  }
   0x3   :  { %v5572_v2 = vld [vmem:[%s9418_s1 + $0x38] sm:$0xff]   ;;  %5313 = vmatprep.subr.bf16.mxu1 %v5571_v1  ;;  %v5576_v6 = vld [vmem:[%s9418_s1 + $0x30] sm:$0xff]   ;;  %v5580_v10 = vld [vmem:[%s9418_s1 + $0x28] sm:$0xff]  }
   0x4   :  { %v5573_v3 = vld [vmem:[%s9418_s1 + $0xb8] sm:$0xff]   ;;  %5286 = vmatpush3.bf16.msra.mxu0 %v5572_v2  ;;  %v5577_v7 = vld [vmem:[%s9418_s1 + $0xb0] sm:$0xff]   ;;  %v5581_v11 = vld [vmem:[%s9418_s1 + $0xa8] sm:$0xff]  }
   0x5   :  { %5314 = vmatpush3.bf16.msra.mxu1 %v5573_v3  ;;  %5287 = vmatprep.subr.bf16.mxu0 %v5574_v4  ;;  %v5582_v12 = vld [vmem:[%s9418_s1 + $0x60] sm:$0xff]   ;;  %v5586_v16 = vld [vmem:[%s9418_s1 + $0x58] sm:$0xff]   ;;  %v5590_v20 = vld [vmem:[%s9418_s1 + $0x50] sm:$0xff]  }
   0x6   :  { %5315 = vmatprep.subr.bf16.mxu1 %v5575_v5  ;;  %v5583_v13 = vld [vmem:[%s9418_s1 + $0xe0] sm:$0xff]   ;;  %v5587_v17 = vld [vmem:[%s9418_s1 + $0xd8] sm:$0xff]   ;;  %v5591_v21 = vld [vmem:[%s9418_s1 + $0xd0] sm:$0xff]  }
   0x7   :  { %v5584_v14 = vld [vmem:[%s9418_s1 + $0x20] sm:$0xff]   ;;  %v5588_v18 = vld [vmem:[%s9418_s1 + $0x18] sm:$0xff]   ;;  %v5592_v22 = vld [vmem:[%s9418_s1 + $0x10] sm:$0xff]  }
   0x8   :  { %5288 = vmatpush3.bf16.msra.mxu0 %v5576_v6  ;;  %v5585_v15 = vld [vmem:[%s9418_s1 + $0xa0] sm:$0xff]   ;;  %v5589_v19 = vld [vmem:[%s9418_s1 + $0x98] sm:$0xff]   ;;  %v5593_v23 = vld [vmem:[%s9418_s1 + $0x90] sm:$0xff]  }
   0x9   :  { %5316 = vmatpush3.bf16.msra.mxu1 %v5577_v7  ;;  %5289 = vmatprep.subr.bf16.mxu0 %v5578_v8  ;;  %v5594_v24 = vld [vmem:[%s9418_s1 + $0x48] sm:$0xff]   ;;  %v5598_v28 = vld [vmem:[%s9418_s1 + $0x40] sm:$0xff]   ;;  %v5608_v36 = vld [vmem:[%s9418_s1 + $0x178] sm:$0xff]  }
   0xa   :  { %5317 = vmatprep.subr.bf16.mxu1 %v5579_v9  ;;  %v5595_v25 = vld [vmem:[%s9418_s1 + $0xc8] sm:$0xff]   ;;  %v5599_v29 = vld [vmem:[%s9418_s1 + $0xc0] sm:$0xff]   ;;  %v5609_v37 = vld [vmem:[%s9418_s1 + $0x1f8] sm:$0xff]  }
   0xb   :  { %v5596_v26 = vld [vmem:[%s9418_s1 + $0x8] sm:$0xff]   ;;  %v5600_v30 = vld [vmem:[%s9418_s1] sm:$0xff]   ;;  %v5610_v38 = vld [vmem:[%s9418_s1 + $0x138] sm:$0xff]  }
   0xc   :  { %5290 = vmatpush3.bf16.msra.mxu0 %v5580_v10  ;;  %v5597_v27 = vld [vmem:[%s9418_s1 + $0x88] sm:$0xff]   ;;  %v5601_v31 = vld [vmem:[%s9418_s1 + $0x80] sm:$0xff]   ;;  %v5611_v39 = vld [vmem:[%s9418_s1 + $0x1b8] sm:$0xff]  }
   0xd   :  { %5318 = vmatpush3.bf16.msra.mxu1 %v5581_v11  ;;  %5291 = vmatprep.subr.bf16.mxu0 %v5582_v12  ;;  %v5602_v32 = vld [vmem:[%s9419_s0] ss:$48 sps:$4 sm:$0xff]   ;;  %v5604_v33 = vld [vmem:[%s9419_s0 + $0x4] ss:$48 sps:$4 sm:$0xff]   ;;  %v5605_v34 = vld [vmem:[%s9419_s0 + $0x8] ss:$48 sps:$4 sm:$0xff]  }
   0xe   :  { %5319 = vmatprep.subr.bf16.mxu1 %v5583_v13  ;;  %v5607_v35 = vld [vmem:[%s9419_s0 + $0xc] ss:$48 sps:$4 sm:$0xff]   ;;  %987 = vmatprep.mubr.bf16.mxu0 %v5604_v33  ;;  %v5612_v40 = vld [vmem:[%s9418_s1 + $0x170] sm:$0xff]   ;;  %v5620_v48 = vld [vmem:[%s9418_s1 + $0x160] sm:$0xff]  }
   0xf   :  { %1036 = vmatprep.mubr.bf16.mxu1 %v5607_v35  ;;  %v5613_v41 = vld [vmem:[%s9418_s1 + $0x1f0] sm:$0xff]   ;;  %v5616_v44 = vld [vmem:[%s9418_s1 + $0x168] sm:$0xff]   ;;  %v5621_v49 = vld [vmem:[%s9418_s1 + $0x1e0] sm:$0xff]  }
  0x10   :  { %5292 = vmatpush3.bf16.msra.mxu0 %v5584_v14  ;;  %v5614_v42 = vld [vmem:[%s9418_s1 + $0x130] sm:$0xff]   ;;  %v5617_v45 = vld [vmem:[%s9418_s1 + $0x1e8] sm:$0xff]   ;;  %v5622_v50 = vld [vmem:[%s9418_s1 + $0x120] sm:$0xff]  }
  0x11   :  { %5320 = vmatpush3.bf16.msra.mxu1 %v5585_v15  ;;  %5293 = vmatprep.subr.bf16.mxu0 %v5586_v16  ;;  %v5615_v43 = vld [vmem:[%s9418_s1 + $0x1b0] sm:$0xff]   ;;  %v5618_v46 = vld [vmem:[%s9418_s1 + $0x128] sm:$0xff]   ;;  %v5623_v51 = vld [vmem:[%s9418_s1 + $0x1a0] sm:$0xff]  }
  0x12   :  { %5321 = vmatprep.subr.bf16.mxu1 %v5587_v17  ;;  %v5619_v47 = vld [vmem:[%s9418_s1 + $0x1a8] sm:$0xff]   ;;  %v5624_v52 = vld [vmem:[%s9418_s1 + $0x158] sm:$0xff]   ;;  %v5628_v56 = vld [vmem:[%s9419_s0 + $0x64] ss:$48 sps:$4 sm:$0xff]  }
  0x13   :  { %v5625_v53 = vld [vmem:[%s9418_s1 + $0x1d8] sm:$0xff]   ;;  %v5630_v57 = vld [vmem:[%s9419_s0 + $0x60] ss:$48 sps:$4 sm:$0xff]   ;;  %v5638_v0 = vld [vmem:[%s9418_s1 + $0x148] sm:$0xff]  }
  0x14   :  { %5294 = vmatpush3.bf16.msra.mxu0 %v5588_v18  ;;  %v5626_v54 = vld [vmem:[%s9418_s1 + $0x118] sm:$0xff]   ;;  %v5633_v59 = vld [vmem:[%s9418_s1 + $0x150] sm:$0xff]   ;;  %v5639_v1 = vld [vmem:[%s9418_s1 + $0x1c8] sm:$0xff]  }
  0x15   :  { %5322 = vmatpush3.bf16.msra.mxu1 %v5589_v19  ;;  %5295 = vmatprep.subr.bf16.mxu0 %v5590_v20  ;;  %v5627_v55 = vld [vmem:[%s9418_s1 + $0x198] sm:$0xff]   ;;  %v5634_v60 = vld [vmem:[%s9418_s1 + $0x1d0] sm:$0xff]   ;;  %v5640_v2 = vld [vmem:[%s9418_s1 + $0x108] sm:$0xff]  }
  0x16   :  { %5323 = vmatprep.subr.bf16.mxu1 %v5591_v21  ;;  %v5631_v58 = vld [vmem:[%s9419_s0 + $0x6c] ss:$48 sps:$4 sm:$0xff]   ;;  %v5635_v61 = vld [vmem:[%s9419_s0 + $0x68] ss:$48 sps:$4 sm:$0xff]   ;;  %v5636_v62 = vld [vmem:[%s9418_s1 + $0x110] sm:$0xff]  }
  0x17   :  { %v5637_v63 = vld [vmem:[%s9418_s1 + $0x190] sm:$0xff]   ;;  %v5641_v3 = vld [vmem:[%s9418_s1 + $0x188] sm:$0xff]   ;;  %v5642_v4 = vld [vmem:[%s9418_s1 + $0x140] sm:$0xff]  }
  0x18   :  { %5296 = vmatpush3.bf16.msra.mxu0 %v5592_v22  ;;  %v5643_v5 = vld [vmem:[%s9418_s1 + $0x1c0] sm:$0xff]   ;;  %v5649_v10 = vld [vmem:[%s9419_s0 + $0x18] ss:$48 sps:$4 sm:$0xff]   ;;  %v5651_v11 = vld [vmem:[%s9419_s0 + $0x1c] ss:$48 sps:$4 sm:$0xff]  }
  0x19   :  { %5324 = vmatpush3.bf16.msra.mxu1 %v5593_v23  ;;  %5297 = vmatprep.subr.bf16.mxu0 %v5594_v24  ;;  %v5644_v6 = vld [vmem:[%s9418_s1 + $0x100] sm:$0xff]   ;;  %v5652_v12 = vld [vmem:[%s9418_s1 + $0x278] sm:$0xff]   ;;  %v5656_v16 = vld [vmem:[%s9418_s1 + $0x270] sm:$0xff]  }
  0x1a   :  { %5325 = vmatprep.subr.bf16.mxu1 %v5595_v25  ;;  %v5645_v7 = vld [vmem:[%s9418_s1 + $0x180] sm:$0xff]   ;;  %v5653_v13 = vld [vmem:[%s9418_s1 + $0x2f8] sm:$0xff]   ;;  %v5657_v17 = vld [vmem:[%s9418_s1 + $0x2f0] sm:$0xff]  }
  0x1b   :  { %v5646_v8 = vld [vmem:[%s9419_s0 + $0x10] ss:$48 sps:$4 sm:$0xff]   ;;  %v5648_v9 = vld [vmem:[%s9419_s0 + $0x14] ss:$48 sps:$4 sm:$0xff]   ;;  %v5654_v14 = vld [vmem:[%s9418_s1 + $0x238] sm:$0xff]  }
  0x1c   :  { %5298 = vmatpush3.bf16.msra.mxu0 %v5596_v26  ;;  %v5655_v15 = vld [vmem:[%s9418_s1 + $0x2b8] sm:$0xff]   ;;  %v5658_v18 = vld [vmem:[%s9418_s1 + $0x230] sm:$0xff]   ;;  %v5663_v22 = vld [vmem:[%s9418_s1 + $0x268] sm:$0xff]  }
  0x1d   :  { %5326 = vmatpush3.bf16.msra.mxu1 %v5597_v27  ;;  %5299 = vmatprep.subr.bf16.mxu0 %v5598_v28  ;;  %v5659_v19 = vld [vmem:[%s9418_s1 + $0x2b0] sm:$0xff]   ;;  %v5664_v23 = vld [vmem:[%s9418_s1 + $0x2e8] sm:$0xff]   ;;  %v5670_v28 = vld [vmem:[%s9418_s1 + $0x260] sm:$0xff]  }
  0x1e   :  { %5327 = vmatprep.subr.bf16.mxu1 %v5599_v29  ;;  %v5660_v20 = vld [vmem:[%s9419_s0 + $0x74] ss:$48 sps:$4 sm:$0xff]   ;;  %v5662_v21 = vld [vmem:[%s9419_s0 + $0x70] ss:$48 sps:$4 sm:$0xff]   ;;  %v5665_v24 = vld [vmem:[%s9419_s0 + $0x7c] ss:$48 sps:$4 sm:$0xff]  }
  0x1f   :  { %v5667_v25 = vld [vmem:[%s9418_s1 + $0x228] sm:$0xff]   ;;  %v5671_v29 = vld [vmem:[%s9418_s1 + $0x2e0] sm:$0xff]   ;;  %v5675_v33 = vld [vmem:[%s9418_s1 + $0x2d8] sm:$0xff]  }
  0x20   :  { %5300 = vmatpush3.bf16.msra.mxu0 %v5600_v30  ;;  %v5668_v26 = vld [vmem:[%s9418_s1 + $0x2a8] sm:$0xff]   ;;  %v5672_v30 = vld [vmem:[%s9418_s1 + $0x220] sm:$0xff]   ;;  %v5677_v35 = vld [vmem:[%s9418_s1 + $0x298] sm:$0xff]  }
  0x21   :  { %5328 = vmatpush3.bf16.msra.mxu1 %v5601_v31  ;;  %5341 = vmatprep.subr.bf16.mxu0 %v5608_v36  ;;  %v5669_v27 = vld [vmem:[%s9419_s0 + $0x78] ss:$48 sps:$4 sm:$0xff]   ;;  %v5673_v31 = vld [vmem:[%s9418_s1 + $0x2a0] sm:$0xff]   ;;  %v5678_v36 = vld [vmem:[%s9418_s1 + $0x250] sm:$0xff]  }
  0x22   :  { %5369 = vmatprep.subr.bf16.mxu1 %v5609_v37  ;;  %v5679_v37 = vld [vmem:[%s9418_s1 + $0x2d0] sm:$0xff]  }
  0x23   :  { %988 = vmatmul.mubr.bf16.vlgmr.msra.gmra.mxu0 %v5602_v32  ;;  %v5674_v32 = vld [vmem:[%s9418_s1 + $0x258] sm:$0xff]  }
  0x24   :  { %1037 = vmatmul.mubr.bf16.vlgmr.msra.gmra.mxu1 %v5605_v34  ;;  %5342 = vmatpush3.bf16.msra.mxu0 %v5610_v38  ;;  %v5676_v34 = vld [vmem:[%s9418_s1 + $0x218] sm:$0xff]   ;;  %v5680_v38 = vld [vmem:[%s9418_s1 + $0x210] sm:$0xff]  }
  0x25   :  { %5370 = vmatpush3.bf16.msra.mxu1 %v5611_v39  ;;  %5343 = vmatprep.subr.bf16.mxu0 %v5612_v40  ;;  %v5681_v39 = vld [vmem:[%s9418_s1 + $0x290] sm:$0xff]   ;;  %v5682_v40 = vld [vmem:[%s9418_s1 + $0x248] sm:$0xff]  }
  0x26   :  { %5371 = vmatprep.subr.bf16.mxu1 %v5613_v41  ;;  %995 = vmatprep.mubr.bf16.mxu0 %v5628_v56  ;;  %v5683_v41 = vld [vmem:[%s9418_s1 + $0x2c8] sm:$0xff]  }
  0x27   :  { %1044 = vmatprep.mubr.bf16.mxu1 %v5631_v58  ;;  %v1314_v56 = vld [vmem:[%s9420_s3 + $0x1e8] sm:$0xff]  ;;  %v1313_v58 = vld [vmem:[%s9420_s3 + $0x1e0] sm:$0xff] }
  0x28   :  { %5344 = vmatpush3.bf16.msra.mxu0 %v5614_v42  ;;  %v5684_v42 = vld [vmem:[%s9418_s1 + $0x208] sm:$0xff]  }
  0x29   :  { %5372 = vmatpush3.bf16.msra.mxu1 %v5615_v43  ;;  %5345 = vmatprep.subr.bf16.mxu0 %v5616_v44  ;;  %v5685_v43 = vld [vmem:[%s9418_s1 + $0x288] sm:$0xff]   ;;  %v5686_v44 = vld [vmem:[%s9418_s1 + $0x240] sm:$0xff]  }
  0x2a   :  { %5373 = vmatprep.subr.bf16.mxu1 %v5617_v45  ;;  %v5687_v45 = vld [vmem:[%s9418_s1 + $0x2c0] sm:$0xff]  }
  0x2b   :  { %996 = vmatmul.mubr.bf16.gmra.mxu0 %v5630_v57  ;;  %v1316_v57 = vld [vmem:[%s9420_s3 + $0x1f8] sm:$0xff] }
  0x2c   :  { %5346 = vmatpush3.bf16.msra.mxu0 %v5618_v46  ;;  %1045 = vmatmul.mubr.bf16.gmra.mxu1 %v5635_v61  ;;  %v5688_v46 = vld [vmem:[%s9418_s1 + $0x200] sm:$0xff]   ;;  %v1312_v61 = vld [vmem:[%s9420_s3 + $0x1d8] sm:$0xff] }
  0x2d   :  { %5374 = vmatpush3.bf16.msra.mxu1 %v5619_v47  ;;  %5347 = vmatprep.subr.bf16.mxu0 %v5620_v48  ;;  %v5689_v47 = vld [vmem:[%s9418_s1 + $0x280] sm:$0xff]  }
  0x2e   :  { %5375 = vmatprep.subr.bf16.mxu1 %v5621_v49  ;;  %1085 = vmatprep.mubr.bf16.mxu0 %v5648_v9  ;;  %v5690_v48 = vld [vmem:[%s9419_s0 + $0x20] ss:$48 sps:$4 sm:$0xff]   ;;  %v5692_v49 = vld [vmem:[%s9419_s0 + $0x24] ss:$48 sps:$4 sm:$0xff]   ;;  %v1300_v9 = vld [vmem:[%s9420_s3 + $0x178] sm:$0xff] }
  0x2f   :  { %1134 = vmatprep.mubr.bf16.mxu1 %v5651_v11  ;;  %v1299_v11 = vld [vmem:[%s9420_s3 + $0x170] sm:$0xff] }
  0x30   :  { %5348 = vmatpush3.bf16.msra.mxu0 %v5622_v50  ;;  %v5693_v50 = vld [vmem:[%s9419_s0 + $0x28] ss:$48 sps:$4 sm:$0xff]  }
  0x31   :  { %5376 = vmatpush3.bf16.msra.mxu1 %v5623_v51  ;;  %5349 = vmatprep.subr.bf16.mxu0 %v5624_v52  ;;  %v5695_v51 = vld [vmem:[%s9419_s0 + $0x2c] ss:$48 sps:$4 sm:$0xff]   ;;  %v5696_v52 = vld [vmem:[%s9419_s0 + $0x84] ss:$48 sps:$4 sm:$0xff]  }
  0x32   :  { %5377 = vmatprep.subr.bf16.mxu1 %v5625_v53  ;;  %v5699_v53 = vld [vmem:[%s9419_s0 + $0x8c] ss:$48 sps:$4 sm:$0xff]  }
  0x34   :  { %5350 = vmatpush3.bf16.msra.mxu0 %v5626_v54  ;;  %v5698_v54 = vld [vmem:[%s9419_s0 + $0x80] ss:$48 sps:$4 sm:$0xff]  }
  0x35   :  { %5378 = vmatpush3.bf16.msra.mxu1 %v5627_v55  ;;  %5351 = vmatprep.subr.bf16.mxu0 %v5633_v59  ;;  %v5701_v55 = vld [vmem:[%s9419_s0 + $0x88] ss:$48 sps:$4 sm:$0xff]   ;;  %v1315_v59 = vld [vmem:[%s9420_s3 + $0x1f0] sm:$0xff] }
  0x36   :  { %5379 = vmatprep.subr.bf16.mxu1 %v5634_v60  ;;  %v1310_v60 = vld [vmem:[%s9420_s3 + $0x1c8] sm:$0xff] }
  0x38   :  { %5352 = vmatpush3.bf16.msra.mxu0 %v5636_v62  ;;  %v1309_v62 = vld [vmem:[%s9420_s3 + $0x1c0] sm:$0xff] }
  0x39   :  { %5380 = vmatpush3.bf16.msra.mxu1 %v5637_v63  ;;  %5353 = vmatprep.subr.bf16.mxu0 %v5638_v0  ;;  %v1311_v63 = vld [vmem:[%s9420_s3 + $0x1d0] sm:$0xff]  ;;  %v1306_v0 = vld [vmem:[%s9420_s3 + $0x1a8] sm:$0xff] }
  0x3a   :  { %5381 = vmatprep.subr.bf16.mxu1 %v5639_v1  ;;  %v1308_v1 = vld [vmem:[%s9420_s3 + $0x1b8] sm:$0xff] }
  0x3c   :  { %5354 = vmatpush3.bf16.msra.mxu0 %v5640_v2  ;;  %v1305_v2 = vld [vmem:[%s9420_s3 + $0x1a0] sm:$0xff] }
  0x3d   :  { %5382 = vmatpush3.bf16.msra.mxu1 %v5641_v3  ;;  %5355 = vmatprep.subr.bf16.mxu0 %v5642_v4  ;;  %v1307_v3 = vld [vmem:[%s9420_s3 + $0x1b0] sm:$0xff]  ;;  %v1302_v4 = vld [vmem:[%s9420_s3 + $0x188] sm:$0xff] }
  0x3e   :  { %5383 = vmatprep.subr.bf16.mxu1 %v5643_v5  ;;  %v1304_v5 = vld [vmem:[%s9420_s3 + $0x198] sm:$0xff] }
  0x40   :  { %5356 = vmatpush3.bf16.msra.mxu0 %v5644_v6  ;;  %v1301_v6 = vld [vmem:[%s9420_s3 + $0x180] sm:$0xff] }
  0x41   :  { %5384 = vmatpush3.bf16.msra.mxu1 %v5645_v7  ;;  %5397 = vmatprep.subr.bf16.mxu0 %v5652_v12  ;;  %v1303_v7 = vld [vmem:[%s9420_s3 + $0x190] sm:$0xff]  ;;  %v1294_v12 = vld [vmem:[%s9420_s3 + $0x148] sm:$0xff] }
  0x42   :  { %5425 = vmatprep.subr.bf16.mxu1 %v5653_v13  ;;  %v1296_v13 = vld [vmem:[%s9420_s3 + $0x158] sm:$0xff] }
  0x43   :  { %1086 = vmatmul.mubr.bf16.vlgmr.msra.gmra.mxu0 %v5646_v8  ;;  %v1298_v8 = vld [vmem:[%s9420_s3 + $0x168] sm:$0xff] }
  0x44   :  { %1135 = vmatmul.mubr.bf16.vlgmr.msra.gmra.mxu1 %v5649_v10  ;;  %5398 = vmatpush3.bf16.msra.mxu0 %v5654_v14  ;;  %v1297_v10 = vld [vmem:[%s9420_s3 + $0x160] sm:$0xff] }
  0x45   :  { %5426 = vmatpush3.bf16.msra.mxu1 %v5655_v15  ;;  %5399 = vmatprep.subr.bf16.mxu0 %v5656_v16  ;;  %v1293_v14 = vld [vmem:[%s9420_s3 + $0x140] sm:$0xff]  ;;  %v1295_v15 = vld [vmem:[%s9420_s3 + $0x150] sm:$0xff]  ;;  %v1290_v16 = vld [vmem:[%s9420_s3 + $0x128] sm:$0xff] }
  0x46   :  { %5427 = vmatprep.subr.bf16.mxu1 %v5657_v17  ;;  %1093 = vmatprep.mubr.bf16.mxu0 %v5660_v20  ;;  %v1292_v17 = vld [vmem:[%s9420_s3 + $0x138] sm:$0xff]  ;;  %v1286_v20 = vld [vmem:[%s9420_s3 + $0x108] sm:$0xff] }
  0x47   :  { %1142 = vmatprep.mubr.bf16.mxu1 %v5665_v24  ;;  %v1282_v24 = vld [vmem:[%s9420_s3 + $0xe8] sm:$0xff] }
  0x48   :  { %5400 = vmatpush3.bf16.msra.mxu0 %v5658_v18  ;;  %v1289_v18 = vld [vmem:[%s9420_s3 + $0x120] sm:$0xff] }
  0x49   :  { %5428 = vmatpush3.bf16.msra.mxu1 %v5659_v19  ;;  %5401 = vmatprep.subr.bf16.mxu0 %v5663_v22  ;;  %v1291_v19 = vld [vmem:[%s9420_s3 + $0x130] sm:$0xff]  ;;  %v1285_v22 = vld [vmem:[%s9420_s3 + $0x100] sm:$0xff] }
  0x4a   :  { %5429 = vmatprep.subr.bf16.mxu1 %v5664_v23  ;;  %v1287_v23 = vld [vmem:[%s9420_s3 + $0x110] sm:$0xff] }
  0x4b   :  { %1094 = vmatmul.mubr.bf16.gmra.mxu0 %v5662_v21  ;;  %v1288_v21 = vld [vmem:[%s9420_s3 + $0x118] sm:$0xff] }
  0x4c   :  { %5402 = vmatpush3.bf16.msra.mxu0 %v5667_v25  ;;  %1143 = vmatmul.mubr.bf16.gmra.mxu1 %v5669_v27  ;;  %v1284_v25 = vld [vmem:[%s9420_s3 + $0xf8] sm:$0xff]  ;;  %v1283_v27 = vld [vmem:[%s9420_s3 + $0xf0] sm:$0xff] }
  0x4d   :  { %5430 = vmatpush3.bf16.msra.mxu1 %v5668_v26  ;;  %5403 = vmatprep.subr.bf16.mxu0 %v5670_v28  ;;  %v1281_v26 = vld [vmem:[%s9420_s3 + $0xe0] sm:$0xff]  ;;  %v1278_v28 = vld [vmem:[%s9420_s3 + $0xc8] sm:$0xff] }
  0x4e   :  { %5431 = vmatprep.subr.bf16.mxu1 %v5671_v29  ;;  %1183 = vmatprep.mubr.bf16.mxu0 %v5692_v49  ;;  %v1280_v29 = vld [vmem:[%s9420_s3 + $0xd8] sm:$0xff] }
  0x4f   :  { %1232 = vmatprep.mubr.bf16.mxu1 %v5695_v51  ;;  %v1260_v49 = vld [vmem:[%s9420_s3 + $0x38] sm:$0xff]  ;;  %v1259_v51 = vld [vmem:[%s9420_s3 + $0x30] sm:$0xff] }
  0x50   :  { %5404 = vmatpush3.bf16.msra.mxu0 %v5672_v30  ;;  %v1277_v30 = vld [vmem:[%s9420_s3 + $0xc0] sm:$0xff] }
  0x51   :  { %5432 = vmatpush3.bf16.msra.mxu1 %v5673_v31  ;;  %5405 = vmatprep.subr.bf16.mxu0 %v5674_v32  ;;  %v1279_v31 = vld [vmem:[%s9420_s3 + $0xd0] sm:$0xff]  ;;  %v1274_v32 = vld [vmem:[%s9420_s3 + $0xa8] sm:$0xff] }
  0x52   :  { %5433 = vmatprep.subr.bf16.mxu1 %v5675_v33  ;;  %v1276_v33 = vld [vmem:[%s9420_s3 + $0xb8] sm:$0xff] }
  0x54   :  { %5406 = vmatpush3.bf16.msra.mxu0 %v5676_v34  ;;  %v1273_v34 = vld [vmem:[%s9420_s3 + $0xa0] sm:$0xff] }
  0x55   :  { %5434 = vmatpush3.bf16.msra.mxu1 %v5677_v35  ;;  %5407 = vmatprep.subr.bf16.mxu0 %v5678_v36  ;;  %v1275_v35 = vld [vmem:[%s9420_s3 + $0xb0] sm:$0xff]  ;;  %v1270_v36 = vld [vmem:[%s9420_s3 + $0x88] sm:$0xff] }
  0x56   :  { %5435 = vmatprep.subr.bf16.mxu1 %v5679_v37  ;;  %v1272_v37 = vld [vmem:[%s9420_s3 + $0x98] sm:$0xff] }
  0x58   :  { %5408 = vmatpush3.bf16.msra.mxu0 %v5680_v38  ;;  %v1269_v38 = vld [vmem:[%s9420_s3 + $0x80] sm:$0xff] }
  0x59   :  { %5436 = vmatpush3.bf16.msra.mxu1 %v5681_v39  ;;  %5409 = vmatprep.subr.bf16.mxu0 %v5682_v40  ;;  %v1271_v39 = vld [vmem:[%s9420_s3 + $0x90] sm:$0xff]  ;;  %v1266_v40 = vld [vmem:[%s9420_s3 + $0x68] sm:$0xff] }
  0x5a   :  { %5437 = vmatprep.subr.bf16.mxu1 %v5683_v41  ;;  %v1268_v41 = vld [vmem:[%s9420_s3 + $0x78] sm:$0xff] }
  0x5c   :  { %5410 = vmatpush3.bf16.msra.mxu0 %v5684_v42  ;;  %v1265_v42 = vld [vmem:[%s9420_s3 + $0x60] sm:$0xff] }
  0x5d   :  { %5438 = vmatpush3.bf16.msra.mxu1 %v5685_v43  ;;  %5411 = vmatprep.subr.bf16.mxu0 %v5686_v44  ;;  %v1267_v43 = vld [vmem:[%s9420_s3 + $0x70] sm:$0xff]  ;;  %v1262_v44 = vld [vmem:[%s9420_s3 + $0x48] sm:$0xff] }
  0x5e   :  { %5439 = vmatprep.subr.bf16.mxu1 %v5687_v45  ;;  %v1264_v45 = vld [vmem:[%s9420_s3 + $0x58] sm:$0xff] }
  0x60   :  { %5412 = vmatpush3.bf16.msra.mxu0 %v5688_v46  ;;  %v1261_v46 = vld [vmem:[%s9420_s3 + $0x40] sm:$0xff] }
  0x61   :  { %5440 = vmatpush3.bf16.msra.mxu1 %v5689_v47  ;;  %1339 = vmatprep.subr.mxu0 %v1314_v56  ;;  %v1263_v47 = vld [vmem:[%s9420_s3 + $0x50] sm:$0xff]  ;;  %v1601_v56 = vld [vmem:[%s9421_s4 + $0x1e8] sm:$0xff] }
  0x62   :  { %1428 = vmatprep.subr.mxu1 %v1316_v57  ;;  %v1603_v57 = vld [vmem:[%s9421_s4 + $0x1f8] sm:$0xff] }
  0x63   :  { %1184 = vmatmul.mubr.bf16.vlgmr.msra.gmra.mxu0 %v5690_v48  ;;  %v1258_v48 = vld [vmem:[%s9420_s3 + $0x28] sm:$0xff] }
  0x64   :  { %1233 = vmatmul.mubr.bf16.vlgmr.msra.gmra.mxu1 %v5693_v50  ;;  %1191 = vmatprep.mubr.bf16.mxu0 %v5696_v52  ;;  %v1257_v50 = vld [vmem:[%s9420_s3 + $0x20] sm:$0xff]  ;;  %v1254_v52 = vld [vmem:[%s9420_s3 + $0x8] sm:$0xff] }
  0x65   :  { %1240 = vmatprep.mubr.bf16.mxu1 %v5699_v53  ;;  %1340 = vmatpush1.msra.mxu0 %v1313_v58  ;;  %v1256_v53 = vld [vmem:[%s9420_s3 + $0x18] sm:$0xff]  ;;  %v9431_v58 = vmov 0.0  }
  0x66   :  { %1429 = vmatpush1.msra.mxu1 %v1315_v59  ;;  %1341 = vmatprep.subr.mxu0 %v1310_v60 }
  0x67   :  { %1430 = vmatprep.subr.mxu1 %v1312_v61  ;;  %1342 = vmatpush1.msra.mxu0 %v1309_v62 }
  0x68   :  { %1431 = vmatpush1.msra.mxu1 %v1311_v63  ;;  %1343 = vmatprep.subr.mxu0 %v1306_v0 }
  0x69   :  { %1432 = vmatprep.subr.mxu1 %v1308_v1  ;;  %1344 = vmatpush1.msra.mxu0 %v1305_v2 }
  0x6a   :  { %1433 = vmatpush1.msra.mxu1 %v1307_v3  ;;  %1345 = vmatprep.subr.mxu0 %v1302_v4 }
  0x6b   :  { %1192 = vmatmul.mubr.bf16.gmra.mxu0 %v5698_v54  ;;  %1434 = vmatprep.subr.mxu1 %v1304_v5  ;;  %v1253_v54 = vld [vmem:[%s9420_s3] sm:$0xff] }
  0x6c   :  { %1241 = vmatmul.mubr.bf16.gmra.mxu1 %v5701_v55  ;;  %1346 = vmatpush1.msra.mxu0 %v1301_v6  ;;  %v1255_v55 = vld [vmem:[%s9420_s3 + $0x10] sm:$0xff] }
  0x6d   :  { %1435 = vmatpush1.msra.mxu1 %v1303_v7  ;;  %1347 = vmatprep.subr.mxu0 %v1298_v8 }
  0x6e   :  { %1436 = vmatprep.subr.mxu1 %v1300_v9  ;;  %1348 = vmatpush1.msra.mxu0 %v1297_v10 }
  0x6f   :  { %1437 = vmatpush1.msra.mxu1 %v1299_v11  ;;  %1349 = vmatprep.subr.mxu0 %v1294_v12 }
  0x70   :  { %1438 = vmatprep.subr.mxu1 %v1296_v13  ;;  %1350 = vmatpush1.msra.mxu0 %v1293_v14 }
  0x71   :  { %1439 = vmatpush1.msra.mxu1 %v1295_v15  ;;  %1351 = vmatprep.subr.mxu0 %v1290_v16 }
  0x72   :  { %1440 = vmatprep.subr.mxu1 %v1292_v17  ;;  %1352 = vmatpush1.msra.mxu0 %v1289_v18 }
  0x73   :  { %1441 = vmatpush1.msra.mxu1 %v1291_v19  ;;  %1353 = vmatprep.subr.mxu0 %v1286_v20 }
  0x74   :  { %1442 = vmatprep.subr.mxu1 %v1288_v21  ;;  %1354 = vmatpush1.msra.mxu0 %v1285_v22  ;;  %v4618_v22 = vld [vmem:[%s9422_s2] ss:$0 sm:$0xff] }
  0x75   :  { %1443 = vmatpush1.msra.mxu1 %v1287_v23  ;;  %1355 = vmatprep.subr.mxu0 %v1282_v24 }
  0x76   :  { %1444 = vmatprep.subr.mxu1 %v1284_v25  ;;  %1356 = vmatpush1.msra.mxu0 %v1281_v26 }
  0x77   :  { %1445 = vmatpush1.msra.mxu1 %v1283_v27  ;;  %1357 = vmatprep.subr.mxu0 %v1278_v28 }
  0x78   :  { %1446 = vmatprep.subr.mxu1 %v1280_v29  ;;  %1358 = vmatpush1.msra.mxu0 %v1277_v30 }
  0x79   :  { %1447 = vmatpush1.msra.mxu1 %v1279_v31  ;;  %1359 = vmatprep.subr.mxu0 %v1274_v32 }
  0x7a   :  { %1448 = vmatprep.subr.mxu1 %v1276_v33  ;;  %1360 = vmatpush1.msra.mxu0 %v1273_v34 }
  0x7b   :  { %1449 = vmatpush1.msra.mxu1 %v1275_v35  ;;  %1361 = vmatprep.subr.mxu0 %v1270_v36 }
  0x7c   :  { %1450 = vmatprep.subr.mxu1 %v1272_v37  ;;  %1362 = vmatpush1.msra.mxu0 %v1269_v38 }
  0x7d   :  { %1451 = vmatpush1.msra.mxu1 %v1271_v39  ;;  %1363 = vmatprep.subr.mxu0 %v1266_v40 }
  0x7e   :  { %1452 = vmatprep.subr.mxu1 %v1268_v41  ;;  %1364 = vmatpush1.msra.mxu0 %v1265_v42 }
  0x7f   :  { %1453 = vmatpush1.msra.mxu1 %v1267_v43  ;;  %1365 = vmatprep.subr.mxu0 %v1262_v44 }
  0x80   :  { %1454 = vmatprep.subr.mxu1 %v1264_v45  ;;  %1366 = vmatpush1.msra.mxu0 %v1261_v46 }
  0x81   :  { %1455 = vmatpush1.msra.mxu1 %v1263_v47  ;;  %1367 = vmatprep.subr.mxu0 %v1258_v48 }
  0x82   :  { %1456 = vmatprep.subr.mxu1 %v1260_v49  ;;  %1368 = vmatpush1.msra.mxu0 %v1257_v50 }
  0x83   :  { %1457 = vmatpush1.msra.mxu1 %v1259_v51  ;;  %1369 = vmatprep.subr.mxu0 %v1254_v52 }
  0x84   :  { %1458 = vmatprep.subr.mxu1 %v1256_v53  ;;  %1370 = vmatpush1.msra.mxu0 %v1253_v54 }
  0x85   :  { %1459 = vmatpush1.msra.mxu1 %v1255_v55  ;;  %1403 = vmatprep.mubr.f32.mxu0 %v9431_v58 }
  0x86   :  { %1492 = vmatprep.mubr.f32.mxu1 %v9431_v58  ;;  %1604 = vmatprep.subr.mxu0 %v1601_v56 }
  0x87   :  { %1675 = vmatprep.subr.mxu1 %v1603_v57 }
  0xe3   :  { %v5301_v59 = vpop.f32.mrf.mxu0 }
  0xe4   :  { %v5329_v60 = vpop.f32.mrf.mxu1 }
  0xe5   :  { %v5302_v61 = vpop.f32.mrf.mxu0 }
  0xe6   :  { %v5330_v62 = vpop.f32.mrf.mxu1  ;;  %v5303_v21 = vadd.f32 %v5302_v61, %v5301_v59 }
  0xe7   :  { %v5304_v63 = vpop.f32.mrf.mxu0  ;;  %v5331_v26 = vadd.f32 %v5330_v62, %v5329_v60 }
  0xe8   :  { %v5332_v0 = vpop.f32.mrf.mxu1  ;;  %v990_v25 = vadd.f32 %v5303_v21, %v4618_v22  ;;  %v6482_v21 = vld [vmem:[%s9421_s4 + $0x1c0] sm:$0xff] }
  0xe9   :  { %v5305_v1 = vpop.f32.mrf.mxu0 }
  0xea   :  { %v5333_v3 = vpop.f32.mrf.mxu1  ;;  %v5306_v27 = vadd.f32 %v5305_v1, %v5304_v63  ;;  %v1039_v32 = vadd.f32 %v5331_v26, %v990_v25 }
  0xeb   :  { %v5307_v2 = vpop.f32.mrf.mxu0  ;;  %v5334_v35 = vadd.f32 %v5333_v3, %v5332_v0 }
  0xec   :  { %v5335_v5 = vpop.f32.mrf.mxu1  ;;  %v993_v33 = vadd.f32 %v5306_v27, %v4618_v22 }
  0xed   :  { %v5308_v4 = vpop.f32.mrf.mxu0 }
  0xee   :  { %v5336_v7 = vpop.f32.mrf.mxu1  ;;  %v5309_v30 = vadd.f32 %v5308_v4, %v5307_v2  ;;  %v1042_v44 = vadd.f32 %v5334_v35, %v993_v33  ;;  %v6510_v35 = vld [vmem:[%s9421_s4 + $0x1a0] sm:$0xff] }
  0xef   :  { %v5310_v6 = vpop.f32.mrf.mxu0  ;;  %v5337_v40 = vadd.f32 %v5336_v7, %v5335_v5 }
  0xf0   :  { %v5338_v9 = vpop.f32.mrf.mxu1  ;;  %v998_v39 = vadd.f32 %v5309_v30, %v4618_v22 }
  0xf1   :  { %v5311_v8 = vpop.f32.mrf.mxu0 }
  0xf2   :  { %v5339_v11 = vpop.f32.mrf.mxu1  ;;  %v5312_v41 = vadd.f32 %v5311_v8, %v5310_v6  ;;  %v1047_v51 = vadd.f32 %v5337_v40, %v998_v39  ;;  %v6527_v39 = vld [vmem:[%s9421_s4 + $0x198] sm:$0xff] }
  0xf3   :  { %v5340_v53 = vadd.f32 %v5339_v11, %v5338_v9  ;;  %v6462_v9 = vld [vmem:[%s9421_s4 + $0x1e0] sm:$0xff]  ;;  %v6467_v11 = vld [vmem:[%s9421_s4 + $0x1f0] sm:$0xff] }
  0xf4   :  { %v1001_v52 = vadd.f32 %v5312_v41, %v4618_v22  ;;  %v6487_v22 = vld [vmem:[%s9421_s4 + $0x1d0] sm:$0xff] }
  0xf6   :  { %v1050_v4 = vadd.f32 %v5340_v53, %v1001_v52  ;;  %v6582_v52 = vld [vmem:[%s9421_s4 + $0x140] sm:$0xff]  ;;  %v6587_v53 = vld [vmem:[%s9421_s4 + $0x150] sm:$0xff] }
 0x103   :  { %v5357_v10 = vpop.f32.mrf.mxu0 }
 0x104   :  { %v5385_v12 = vpop.f32.mrf.mxu1 }
 0x105   :  { %v5358_v13 = vpop.f32.mrf.mxu0 }
 0x106   :  { %v5386_v14 = vpop.f32.mrf.mxu1  ;;  %v5359_v29 = vadd.f32 %v5358_v13, %v5357_v10 }
 0x107   :  { %v5360_v15 = vpop.f32.mrf.mxu0  ;;  %v5387_v37 = vadd.f32 %v5386_v14, %v5385_v12 }
 0x108   :  { %v5388_v16 = vpop.f32.mrf.mxu1  ;;  %v1088_v36 = vadd.f32 %v5359_v29, %v1039_v32  ;;  %v6501_v29 = vld [vmem:[%s9421_s4 + $0x1b8] sm:$0xff] }
 0x109   :  { %v5361_v17 = vpop.f32.mrf.mxu0 }
 0x10a   :  { %v5389_v18 = vpop.f32.mrf.mxu1  ;;  %v5362_v38 = vadd.f32 %v5361_v17, %v5360_v15  ;;  %v1137_v48 = vadd.f32 %v5387_v37, %v1088_v36  ;;  %v6477_v17 = vld [vmem:[%s9421_s4 + $0x1d8] sm:$0xff]  ;;  %v6515_v36 = vld [vmem:[%s9421_s4 + $0x1b0] sm:$0xff] }
 0x10b   :  { %v5363_v19 = vpop.f32.mrf.mxu0  ;;  %v5390_v56 = vadd.f32 %v5389_v18, %v5388_v16  ;;  %v6472_v16 = vld [vmem:[%s9421_s4 + $0x1c8] sm:$0xff] }
 0x10c   :  { %v5391_v20 = vpop.f32.mrf.mxu1  ;;  %v1091_v49 = vadd.f32 %v5362_v38, %v1042_v44  ;;  %v6522_v38 = vld [vmem:[%s9421_s4 + $0x188] sm:$0xff] }
 0x10d   :  { %v5364_v23 = vpop.f32.mrf.mxu0 }
 0x10e   :  { %v5392_v24 = vpop.f32.mrf.mxu1  ;;  %v5365_v45 = vadd.f32 %v5364_v23, %v5363_v19  ;;  %v1140_v1 = vadd.f32 %v5390_v56, %v1091_v49  ;;  %v6565_v49 = vld [vmem:[%s9421_s4 + $0x170] sm:$0xff]  ;;  %v6601_v56 = vld [vmem:[%s9421_s4 + $0x138] sm:$0xff] }
 0x10f   :  { %v5366_v28 = vpop.f32.mrf.mxu0  ;;  %v5393_v61 = vadd.f32 %v5392_v24, %v5391_v20 }
 0x110   :  { %v5394_v31 = vpop.f32.mrf.mxu1  ;;  %v1096_v60 = vadd.f32 %v5365_v45, %v1047_v51  ;;  %v6546_v45 = vld [vmem:[%s9421_s4 + $0x168] sm:$0xff]  ;;  %v6577_v51 = vld [vmem:[%s9421_s4 + $0x158] sm:$0xff] }
 0x111   :  { %v5367_v34 = vpop.f32.mrf.mxu0 }
 0x112   :  { %v5395_v42 = vpop.f32.mrf.mxu1  ;;  %v5368_v62 = vadd.f32 %v5367_v34, %v5366_v28  ;;  %v1145_v12 = vadd.f32 %v5393_v61, %v1096_v60  ;;  %v6496_v28 = vld [vmem:[%s9421_s4 + $0x1a8] sm:$0xff]  ;;  %v6627_v61 = vld [vmem:[%s9421_s4 + $0x118] sm:$0xff] }
 0x113   :  { %v5396_v18 = vadd.f32 %v5395_v42, %v5394_v31  ;;  %v6532_v42 = vld [vmem:[%s9421_s4 + $0x180] sm:$0xff]  ;;  %v6622_v60 = vld [vmem:[%s9421_s4 + $0x108] sm:$0xff] }
 0x114   :  { %v1099_v13 = vadd.f32 %v5368_v62, %v1050_v4  ;;  %v6632_v62 = vld [vmem:[%s9421_s4 + $0x100] sm:$0xff]  ;;  %v6668_v4 = vld [vmem:[%s9421_s4 + $0xc8] sm:$0xff] }
 0x116   :  { %v1148_v32 = vadd.f32 %v5396_v18, %v1099_v13  ;;  %v6709_v13 = vld [vmem:[%s9421_s4 + $0xb0] sm:$0xff]  ;;  %v6728_v18 = vld [vmem:[%s9421_s4 + $0x80] sm:$0xff] }
 0x117   :  { %9713 = vst [vmem:[#allocation7_spill] sm:$0xff] %v6709_v13  ;;  %9716 = vst [vmem:[#allocation10_spill] sm:$0xff] %v6728_v18 }
 0x123   :  { %v5413_v43 = vpop.f32.mrf.mxu0 }
 0x124   :  { %v5441_v46 = vpop.f32.mrf.mxu1 }
 0x125   :  { %v5414_v47 = vpop.f32.mrf.mxu0 }
 0x126   :  { %v5415_v50 = vadd.f32 %v5414_v47, %v5413_v43  ;;  %v5442_v54 = vpop.f32.mrf.mxu1  ;;  %v6537_v43 = vld [vmem:[%s9421_s4 + $0x190] sm:$0xff] }
 0x127   :  { %v5416_v55 = vpop.f32.mrf.mxu0  ;;  %v5443_v59 = vadd.f32 %v5442_v54, %v5441_v46  ;;  %v6551_v46 = vld [vmem:[%s9421_s4 + $0x178] sm:$0xff] }
 0x128   :  { %v1186_v57 = vadd.f32 %v5415_v50, %v1137_v48  ;;  %v5444_v63 = vpop.f32.mrf.mxu1  ;;  %v6560_v48 = vld [vmem:[%s9421_s4 + $0x160] sm:$0xff]  ;;  %v6572_v50 = vld [vmem:[%s9421_s4 + $0x148] sm:$0xff] }
 0x129   :  { %v5417_v0 = vpop.f32.mrf.mxu0 }
 0x12a   :  { %v1235_v2 = vadd.f32 %v5443_v59, %v1186_v57  ;;  %v5418_v3 = vadd.f32 %v5417_v0, %v5416_v55  ;;  %v5445_v5 = vpop.f32.mrf.mxu1  ;;  %v6596_v55 = vld [vmem:[%s9421_s4 + $0x128] sm:$0xff]  ;;  %v6610_v57 = vld [vmem:[%s9421_s4 + $0x120] sm:$0xff]  ;;  %v6615_v59 = vld [vmem:[%s9421_s4 + $0x130] sm:$0xff] }
 0x12b   :  { %v5419_v6 = vpop.f32.mrf.mxu0  ;;  %v5446_v10 = vadd.f32 %v5445_v5, %v5444_v63  ;;  %v6637_v63 = vld [vmem:[%s9421_s4 + $0x110] sm:$0xff]  ;;  %v6644_v0 = vld [vmem:[%s9421_s4 + $0xe8] sm:$0xff]  ;;  %v6673_v5 = vld [vmem:[%s9421_s4 + $0xd8] sm:$0xff] }
 0x12c   :  { %v1249_v7 = vmax.f32 %v1235_v2, 0.0  ;;  %v1189_v8 = vadd.f32 %v5418_v3, %v1140_v1  ;;  %v5447_v15 = vpop.f32.mrf.mxu1  ;;  %v6649_v1 = vld [vmem:[%s9421_s4 + $0xf8] sm:$0xff]  ;;  %v6656_v2 = vld [vmem:[%s9421_s4 + $0xe0] sm:$0xff]  ;;  %v6661_v3 = vld [vmem:[%s9421_s4 + $0xf0] sm:$0xff] }
 0x12d   :  { %v5420_v14 = vpop.f32.mrf.mxu0 }
 0x12e   :  { %v1238_v19 = vadd.f32 %v5446_v10, %v1189_v8  ;;  %v5421_v20 = vadd.f32 %v5420_v14, %v5419_v6  ;;  %1404 = vmatmul.mubr.f32.vlgmr.msra.gmra.mxu0 %v1249_v7  ;;  %1493 = vmatmul.mubr.f32.vlgmr.msra.gmra.mxu1 %v1249_v7  ;;  %v5448_v24 = vpop.f32.mrf.mxu1  ;;  %v6680_v6 = vld [vmem:[%s9421_s4 + $0xc0] sm:$0xff]  ;;  %v6685_v7 = vld [vmem:[%s9421_s4 + $0xd0] sm:$0xff]  ;;  %v6692_v8 = vld [vmem:[%s9421_s4 + $0xa8] sm:$0xff] }
 0x12f   :  { %1605 = vmatpush1.msra.mxu0 %v6462_v9  ;;  %1676 = vmatpush1.msra.mxu1 %v6467_v11  ;;  %v5422_v23 = vpop.f32.mrf.mxu0  ;;  %v5449_v27 = vadd.f32 %v5448_v24, %v5447_v15  ;;  %9710 = vst [vmem:[#allocation4_spill] sm:$0xff] %v6692_v8  ;;  %v6697_v10 = vld [vmem:[%s9421_s4 + $0xb8] sm:$0xff]  ;;  %v6716_v14 = vld [vmem:[%s9421_s4 + $0x88] sm:$0xff]  ;;  %v6752_v24 = vld [vmem:[%s9421_s4 + $0x60] sm:$0xff] }
 0x130   :  { %v1250_v25 = vmax.f32 %v1238_v19, 0.0  ;;  %v1194_v26 = vadd.f32 %v5421_v20, %v1145_v12  ;;  %1606 = vmatprep.subr.mxu0 %v6472_v16  ;;  %1677 = vmatprep.subr.mxu1 %v6477_v17  ;;  %v5450_v31 = vpop.f32.mrf.mxu1  ;;  %9711 = vst [vmem:[#allocation5_spill] sm:$0xff] %v6697_v10  ;;  %v6704_v12 = vld [vmem:[%s9421_s4 + $0xa0] sm:$0xff]  ;;  %9714 = vst [vmem:[#allocation8_spill] sm:$0xff] %v6716_v14  ;;  %v6721_v15 = vld [vmem:[%s9421_s4 + $0x98] sm:$0xff] }
 0x131   :  { %1607 = vmatpush1.msra.mxu0 %v6482_v21  ;;  %1678 = vmatpush1.msra.mxu1 %v6487_v22  ;;  %v5423_v30 = vpop.f32.mrf.mxu0  ;;  %9712 = vst [vmem:[#allocation6_spill] sm:$0xff] %v6704_v12  ;;  %9715 = vst [vmem:[#allocation9_spill] sm:$0xff] %v6721_v15  ;;  %v6733_v19 = vld [vmem:[%s9421_s4 + $0x90] sm:$0xff]  ;;  %v6740_v20 = vld [vmem:[%s9421_s4 + $0x68] sm:$0xff] }
 0x132   :  { %v1243_v33 = vadd.f32 %v5449_v27, %v1194_v26  ;;  %v5424_v34 = vadd.f32 %v5423_v30, %v5422_v23  ;;  %1409 = vmatprep.mubr.f32.mxu0 %v9431_v58  ;;  %1498 = vmatprep.mubr.f32.mxu1 %v9431_v58  ;;  %v5451_v37 = vpop.f32.mrf.mxu1  ;;  %9717 = vst [vmem:[#allocation11_spill] sm:$0xff] %v6733_v19  ;;  %9718 = vst [vmem:[#allocation12_spill] sm:$0xff] %v6740_v20  ;;  %v6745_v23 = vld [vmem:[%s9421_s4 + $0x78] sm:$0xff]  ;;  %v6764_v26 = vld [vmem:[%s9421_s4 + $0x48] sm:$0xff] }
 0x133   :  { %1608 = vmatprep.subr.mxu0 %v6496_v28  ;;  %1679 = vmatprep.subr.mxu1 %v6501_v29  ;;  %v5452_v41 = vadd.f32 %v5451_v37, %v5450_v31  ;;  %9719 = vst [vmem:[#allocation13_spill] sm:$0xff] %v6745_v23  ;;  %9720 = vst [vmem:[#allocation14_spill] sm:$0xff] %v6752_v24  ;;  %v6769_v27 = vld [vmem:[%s9421_s4 + $0x58] sm:$0xff]  ;;  %v6776_v30 = vld [vmem:[%s9421_s4 + $0x40] sm:$0xff] }
 0x134   :  { %v1197_v40 = vadd.f32 %v5424_v34, %v1148_v32  ;;  %1410 = vmatmul.mubr.f32.gmra.mxu0 %v1250_v25  ;;  %1499 = vmatmul.mubr.f32.gmra.mxu1 %v1250_v25  ;;  %v1251_v44 = vmax.f32 %v1243_v33, 0.0  ;;  %v6757_v25 = vld [vmem:[%s9421_s4 + $0x70] sm:$0xff]  ;;  %9722 = vst [vmem:[#allocation16_spill] sm:$0xff] %v6764_v26  ;;  %9723 = vst [vmem:[#allocation17_spill] sm:$0xff] %v6769_v27  ;;  %v6788_v32 = vld [vmem:[%s9421_s4 + $0x28] sm:$0xff] }
 0x135   :  { %1609 = vmatpush1.msra.mxu0 %v6510_v35  ;;  %1680 = vmatpush1.msra.mxu1 %v6515_v36  ;;  %9721 = vst [vmem:[#allocation15_spill] sm:$0xff] %v6757_v25  ;;  %9724 = vst [vmem:[#allocation18_spill] sm:$0xff] %v6776_v30  ;;  %v6781_v31 = vld [vmem:[%s9421_s4 + $0x50] sm:$0xff]  ;;  %v6793_v33 = vld [vmem:[%s9421_s4 + $0x38] sm:$0xff] }
 0x136   :  { %1610 = vmatprep.subr.mxu0 %v6522_v38  ;;  %1681 = vmatprep.subr.mxu1 %v6527_v39  ;;  %v1246_v47 = vadd.f32 %v5452_v41, %v1197_v40  ;;  %9725 = vst [vmem:[#allocation19_spill] sm:$0xff] %v6781_v31  ;;  %9726 = vst [vmem:[#allocation20_spill] sm:$0xff] %v6788_v32  ;;  %v6800_v34 = vld [vmem:[%s9421_s4 + $0x20] sm:$0xff]  ;;  %v6805_v37 = vld [vmem:[%s9421_s4 + $0x30] sm:$0xff] }
 0x137   :  { %1611 = vmatpush1.msra.mxu0 %v6532_v42  ;;  %1682 = vmatpush1.msra.mxu1 %v6537_v43  ;;  %9727 = vst [vmem:[#allocation21_spill] sm:$0xff] %v6793_v33  ;;  %9728 = vst [vmem:[#allocation22_spill] sm:$0xff] %v6800_v34  ;;  %v6812_v40 = vld [vmem:[%s9421_s4 + $0x8] sm:$0xff]  ;;  %v6817_v41 = vld [vmem:[%s9421_s4 + $0x18] sm:$0xff] }
 0x138   :  { %1415 = vmatprep.mubr.f32.mxu0 %v9431_v58  ;;  %1504 = vmatprep.mubr.f32.mxu1 %v9431_v58  ;;  %v1252_v54 = vmax.f32 %v1246_v47, 0.0  ;;  %9729 = vst [vmem:[#allocation23_spill] sm:$0xff] %v6805_v37  ;;  %9730 = vst [vmem:[#allocation24_spill] sm:$0xff] %v6812_v40  ;;  %v6831_v47 = vld [vmem:[%s9421_s4 + $0x10] sm:$0xff] }
 0x139   :  { %1612 = vmatprep.subr.mxu0 %v6546_v45  ;;  %1683 = vmatprep.subr.mxu1 %v6551_v46  ;;  %9731 = vst [vmem:[#allocation25_spill] sm:$0xff] %v6817_v41  ;;  %9733 = vst [vmem:[#allocation27_spill] sm:$0xff] %v6831_v47 }
 0x13a   :  { %1416 = vmatmul.mubr.f32.gmra.mxu0 %v1251_v44  ;;  %1505 = vmatmul.mubr.f32.gmra.mxu1 %v1251_v44  ;;  %v6824_v44 = vld [vmem:[%s9421_s4] sm:$0xff] }
 0x13b   :  { %1613 = vmatpush1.msra.mxu0 %v6560_v48  ;;  %1684 = vmatpush1.msra.mxu1 %v6565_v49  ;;  %9732 = vst [vmem:[#allocation26_spill] sm:$0xff] %v6824_v44 }
 0x13c   :  { %1614 = vmatprep.subr.mxu0 %v6572_v50  ;;  %1685 = vmatprep.subr.mxu1 %v6577_v51 }
 0x13d   :  { %1615 = vmatpush1.msra.mxu0 %v6582_v52  ;;  %1686 = vmatpush1.msra.mxu1 %v6587_v53 }
 0x13e   :  { %1421 = vmatprep.mubr.f32.mxu0 %v9431_v58  ;;  %1510 = vmatprep.mubr.f32.mxu1 %v9431_v58 }
 0x13f   :  { %1616 = vmatprep.subr.mxu0 %v6596_v55  ;;  %1687 = vmatprep.subr.mxu1 %v6601_v56 }
 0x140   :  { %1422 = vmatmul.mubr.f32.gmra.mxu0 %v1252_v54  ;;  %1511 = vmatmul.mubr.f32.gmra.mxu1 %v1252_v54  ;;  %v6846_v54 = vld [vmem:[%s9420_s3 + $0x3e8] sm:$0xff] }
 0x141   :  { %1617 = vmatpush1.msra.mxu0 %v6610_v57  ;;  %1688 = vmatpush1.msra.mxu1 %v6615_v59  ;;  %9734 = vst [vmem:[#allocation28_spill] sm:$0xff] %v6846_v54 }
 0x142   :  { %1618 = vmatprep.subr.mxu0 %v6622_v60  ;;  %1689 = vmatprep.subr.mxu1 %v6627_v61 }
 0x143   :  { %1619 = vmatpush1.msra.mxu0 %v6632_v62  ;;  %1690 = vmatpush1.msra.mxu1 %v6637_v63 }
 0x144   :  { %1620 = vmatprep.subr.mxu0 %v6644_v0  ;;  %1691 = vmatprep.subr.mxu1 %v6649_v1 }
 0x145   :  { %1621 = vmatpush1.msra.mxu0 %v6656_v2  ;;  %1692 = vmatpush1.msra.mxu1 %v6661_v3 }
 0x146   :  { %1622 = vmatprep.subr.mxu0 %v6668_v4  ;;  %1693 = vmatprep.subr.mxu1 %v6673_v5 }
 0x147   :  { %1623 = vmatpush1.msra.mxu0 %v6680_v6  ;;  %1694 = vmatpush1.msra.mxu1 %v6685_v7 }
 0x148   :  { %1624 = vmatprep.subr.mxu0 %v6692_v8  ;;  %1695 = vmatprep.subr.mxu1 %v6697_v10 }
 0x149   :  { %1625 = vmatpush1.msra.mxu0 %v6704_v12  ;;  %1696 = vmatpush1.msra.mxu1 %v6709_v13 }
 0x14a   :  { %1626 = vmatprep.subr.mxu0 %v6716_v14  ;;  %1697 = vmatprep.subr.mxu1 %v6721_v15 }
 0x14b   :  { %1627 = vmatpush1.msra.mxu0 %v6728_v18  ;;  %1698 = vmatpush1.msra.mxu1 %v6733_v19 }
 0x14c   :  { %1628 = vmatprep.subr.mxu0 %v6740_v20  ;;  %1699 = vmatprep.subr.mxu1 %v6745_v23 }
 0x14d   :  { %1629 = vmatpush1.msra.mxu0 %v6752_v24  ;;  %1700 = vmatpush1.msra.mxu1 %v6757_v25 }
 0x14e   :  { %1630 = vmatprep.subr.mxu0 %v6764_v26  ;;  %1701 = vmatprep.subr.mxu1 %v6769_v27 }
 0x14f   :  { %1631 = vmatpush1.msra.mxu0 %v6776_v30  ;;  %1702 = vmatpush1.msra.mxu1 %v6781_v31 }
 0x150   :  { %1632 = vmatprep.subr.mxu0 %v6788_v32  ;;  %1703 = vmatprep.subr.mxu1 %v6793_v33 }
 0x151   :  { %1633 = vmatpush1.msra.mxu0 %v6800_v34  ;;  %1704 = vmatpush1.msra.mxu1 %v6805_v37  ;;  %v7094_v37 = vld [vmem:[%s9420_s3 + $0x2a0] sm:$0xff]  ;;  %v7111_v34 = vld [vmem:[%s9420_s3 + $0x298] sm:$0xff] }
 0x152   :  { %1634 = vmatprep.subr.mxu0 %v6812_v40  ;;  %1705 = vmatprep.subr.mxu1 %v6817_v41  ;;  %v7060_v41 = vld [vmem:[%s9420_s3 + $0x2c8] sm:$0xff]  ;;  %v7077_v40 = vld [vmem:[%s9420_s3 + $0x2d0] sm:$0xff]  ;;  %9776 = vst [vmem:[#allocation70_spill] sm:$0xff] %v7094_v37  ;;  %9779 = vst [vmem:[#allocation73_spill] sm:$0xff] %v7111_v34 }
 0x153   :  { %1635 = vmatpush1.msra.mxu0 %v6824_v44  ;;  %1668 = vmatprep.mubr.f32.mxu0 %v9431_v58  ;;  %v6851_v44 = vld [vmem:[%s9420_s3 + $0x3f8] sm:$0xff]  ;;  %9770 = vst [vmem:[#allocation64_spill] sm:$0xff] %v7060_v41  ;;  %9773 = vst [vmem:[#allocation67_spill] sm:$0xff] %v7077_v40 }
 0x154   :  { %1706 = vmatpush1.msra.mxu1 %v6831_v47  ;;  %1739 = vmatprep.mubr.f32.mxu1 %v9431_v58  ;;  %9735 = vst [vmem:[#allocation29_spill] sm:$0xff] %v6851_v44  ;;  %v6858_v47 = vld [vmem:[%s9420_s3 + $0x3e0] sm:$0xff] }
 0x155   :  { %1669 = vmatmul.mubr.f32.vlgmr.msra.gmra.mxu0 %v9431_v58  ;;  %1740 = vmatmul.mubr.f32.vlgmr.msra.gmra.mxu1 %v9431_v58  ;;  %9736 = vst [vmem:[#allocation30_spill] sm:$0xff] %v6858_v47 }
 0x156   :  { %1926 = vmatprep.mubr.f32.mxu0 %v9431_v58  ;;  %1997 = vmatprep.mubr.f32.mxu1 %v9431_v58  ;;  %v6863_v58 = vld [vmem:[%s9420_s3 + $0x3f0] sm:$0xff] }
 0x157   :  { %1862 = vmatprep.subr.mxu0 %v6846_v54  ;;  %1933 = vmatprep.subr.mxu1 %v6851_v44  ;;  %9737 = vst [vmem:[#allocation31_spill] sm:$0xff] %v6863_v58  ;;  %v6870_v54 = vld [vmem:[%s9420_s3 + $0x3c8] sm:$0xff]  ;;  %v6875_v44 = vld [vmem:[%s9420_s3 + $0x3d8] sm:$0xff] }
 0x158   :  { %1863 = vmatpush1.msra.mxu0 %v6858_v47  ;;  %1934 = vmatpush1.msra.mxu1 %v6863_v58  ;;  %9738 = vst [vmem:[#allocation32_spill] sm:$0xff] %v6870_v54  ;;  %9739 = vst [vmem:[#allocation33_spill] sm:$0xff] %v6875_v44  ;;  %v6882_v47 = vld [vmem:[%s9420_s3 + $0x3c0] sm:$0xff]  ;;  %v6887_v58 = vld [vmem:[%s9420_s3 + $0x3d0] sm:$0xff] }
 0x159   :  { %1864 = vmatprep.subr.mxu0 %v6870_v54  ;;  %1935 = vmatprep.subr.mxu1 %v6875_v44  ;;  %9740 = vst [vmem:[#allocation34_spill] sm:$0xff] %v6882_v47  ;;  %9741 = vst [vmem:[#allocation35_spill] sm:$0xff] %v6887_v58  ;;  %v6894_v54 = vld [vmem:[%s9420_s3 + $0x3a8] sm:$0xff]  ;;  %v6899_v44 = vld [vmem:[%s9420_s3 + $0x3b8] sm:$0xff] }
 0x15a   :  { %1865 = vmatpush1.msra.mxu0 %v6882_v47  ;;  %1936 = vmatpush1.msra.mxu1 %v6887_v58  ;;  %9742 = vst [vmem:[#allocation36_spill] sm:$0xff] %v6894_v54  ;;  %9743 = vst [vmem:[#allocation37_spill] sm:$0xff] %v6899_v44  ;;  %v6906_v47 = vld [vmem:[%s9420_s3 + $0x3a0] sm:$0xff]  ;;  %v6911_v58 = vld [vmem:[%s9420_s3 + $0x3b0] sm:$0xff] }
 0x15b   :  { %1866 = vmatprep.subr.mxu0 %v6894_v54  ;;  %1937 = vmatprep.subr.mxu1 %v6899_v44  ;;  %9744 = vst [vmem:[#allocation38_spill] sm:$0xff] %v6906_v47  ;;  %9745 = vst [vmem:[#allocation39_spill] sm:$0xff] %v6911_v58  ;;  %v6918_v54 = vld [vmem:[%s9420_s3 + $0x388] sm:$0xff]  ;;  %v6923_v44 = vld [vmem:[%s9420_s3 + $0x398] sm:$0xff] }
 0x15c   :  { %1867 = vmatpush1.msra.mxu0 %v6906_v47  ;;  %1938 = vmatpush1.msra.mxu1 %v6911_v58  ;;  %9746 = vst [vmem:[#allocation40_spill] sm:$0xff] %v6918_v54  ;;  %9747 = vst [vmem:[#allocation41_spill] sm:$0xff] %v6923_v44  ;;  %v6930_v47 = vld [vmem:[%s9420_s3 + $0x380] sm:$0xff]  ;;  %v6935_v58 = vld [vmem:[%s9420_s3 + $0x390] sm:$0xff] }
 0x15d   :  { %1868 = vmatprep.subr.mxu0 %v6918_v54  ;;  %1939 = vmatprep.subr.mxu1 %v6923_v44  ;;  %9748 = vst [vmem:[#allocation42_spill] sm:$0xff] %v6930_v47  ;;  %9749 = vst [vmem:[#allocation43_spill] sm:$0xff] %v6935_v58  ;;  %v6942_v54 = vld [vmem:[%s9420_s3 + $0x368] sm:$0xff]  ;;  %v6947_v44 = vld [vmem:[%s9420_s3 + $0x378] sm:$0xff] }
 0x15e   :  { %1869 = vmatpush1.msra.mxu0 %v6930_v47  ;;  %1940 = vmatpush1.msra.mxu1 %v6935_v58  ;;  %9750 = vst [vmem:[#allocation44_spill] sm:$0xff] %v6942_v54  ;;  %9751 = vst [vmem:[#allocation45_spill] sm:$0xff] %v6947_v44  ;;  %v6954_v47 = vld [vmem:[%s9420_s3 + $0x360] sm:$0xff]  ;;  %v6959_v58 = vld [vmem:[%s9420_s3 + $0x370] sm:$0xff] }
 0x15f   :  { %1870 = vmatprep.subr.mxu0 %v6942_v54  ;;  %1941 = vmatprep.subr.mxu1 %v6947_v44  ;;  %9752 = vst [vmem:[#allocation46_spill] sm:$0xff] %v6954_v47  ;;  %9753 = vst [vmem:[#allocation47_spill] sm:$0xff] %v6959_v58  ;;  %v6966_v54 = vld [vmem:[%s9420_s3 + $0x348] sm:$0xff]  ;;  %v6971_v44 = vld [vmem:[%s9420_s3 + $0x358] sm:$0xff] }
 0x160   :  { %1871 = vmatpush1.msra.mxu0 %v6954_v47  ;;  %1942 = vmatpush1.msra.mxu1 %v6959_v58  ;;  %9754 = vst [vmem:[#allocation48_spill] sm:$0xff] %v6966_v54  ;;  %9755 = vst [vmem:[#allocation49_spill] sm:$0xff] %v6971_v44  ;;  %v6978_v47 = vld [vmem:[%s9420_s3 + $0x340] sm:$0xff]  ;;  %v6983_v58 = vld [vmem:[%s9420_s3 + $0x350] sm:$0xff] }
 0x161   :  { %1872 = vmatprep.subr.mxu0 %v6966_v54  ;;  %1943 = vmatprep.subr.mxu1 %v6971_v44  ;;  %9756 = vst [vmem:[#allocation50_spill] sm:$0xff] %v6978_v47  ;;  %9757 = vst [vmem:[#allocation51_spill] sm:$0xff] %v6983_v58  ;;  %v6990_v54 = vld [vmem:[%s9420_s3 + $0x328] sm:$0xff]  ;;  %v6995_v44 = vld [vmem:[%s9420_s3 + $0x338] sm:$0xff] }
 0x162   :  { %1873 = vmatpush1.msra.mxu0 %v6978_v47  ;;  %1944 = vmatpush1.msra.mxu1 %v6983_v58  ;;  %9758 = vst [vmem:[#allocation52_spill] sm:$0xff] %v6990_v54  ;;  %9759 = vst [vmem:[#allocation53_spill] sm:$0xff] %v6995_v44  ;;  %v7002_v47 = vld [vmem:[%s9420_s3 + $0x320] sm:$0xff]  ;;  %v7007_v58 = vld [vmem:[%s9420_s3 + $0x330] sm:$0xff] }
 0x163   :  { %1874 = vmatprep.subr.mxu0 %v6990_v54  ;;  %1945 = vmatprep.subr.mxu1 %v6995_v44  ;;  %9760 = vst [vmem:[#allocation54_spill] sm:$0xff] %v7002_v47  ;;  %9761 = vst [vmem:[#allocation55_spill] sm:$0xff] %v7007_v58  ;;  %v7014_v54 = vld [vmem:[%s9420_s3 + $0x308] sm:$0xff]  ;;  %v7019_v44 = vld [vmem:[%s9420_s3 + $0x318] sm:$0xff] }
 0x164   :  { %1875 = vmatpush1.msra.mxu0 %v7002_v47  ;;  %1946 = vmatpush1.msra.mxu1 %v7007_v58  ;;  %9762 = vst [vmem:[#allocation56_spill] sm:$0xff] %v7014_v54  ;;  %9763 = vst [vmem:[#allocation57_spill] sm:$0xff] %v7019_v44  ;;  %v7026_v47 = vld [vmem:[%s9420_s3 + $0x300] sm:$0xff]  ;;  %v7031_v58 = vld [vmem:[%s9420_s3 + $0x310] sm:$0xff] }
 0x165   :  { %1876 = vmatprep.subr.mxu0 %v7014_v54  ;;  %1947 = vmatprep.subr.mxu1 %v7019_v44  ;;  %9764 = vst [vmem:[#allocation58_spill] sm:$0xff] %v7026_v47  ;;  %9765 = vst [vmem:[#allocation59_spill] sm:$0xff] %v7031_v58  ;;  %v7038_v54 = vld [vmem:[%s9420_s3 + $0x2e8] sm:$0xff]  ;;  %v7043_v44 = vld [vmem:[%s9420_s3 + $0x2f8] sm:$0xff] }
 0x166   :  { %1877 = vmatpush1.msra.mxu0 %v7026_v47  ;;  %1948 = vmatpush1.msra.mxu1 %v7031_v58  ;;  %9766 = vst [vmem:[#allocation60_spill] sm:$0xff] %v7038_v54  ;;  %9767 = vst [vmem:[#allocation61_spill] sm:$0xff] %v7043_v44  ;;  %v7050_v47 = vld [vmem:[%s9420_s3 + $0x2e0] sm:$0xff]  ;;  %v7055_v58 = vld [vmem:[%s9420_s3 + $0x2f0] sm:$0xff] }
 0x167   :  { %1878 = vmatprep.subr.mxu0 %v7038_v54  ;;  %1949 = vmatprep.subr.mxu1 %v7043_v44  ;;  %9768 = vst [vmem:[#allocation62_spill] sm:$0xff] %v7050_v47  ;;  %9769 = vst [vmem:[#allocation63_spill] sm:$0xff] %v7055_v58  ;;  %v7067_v44 = vld [vmem:[%s9420_s3 + $0x2d8] sm:$0xff]  ;;  %v7072_v54 = vld [vmem:[%s9420_s3 + $0x2c0] sm:$0xff] }
 0x168   :  { %1879 = vmatpush1.msra.mxu0 %v7050_v47  ;;  %1950 = vmatpush1.msra.mxu1 %v7055_v58  ;;  %9771 = vst [vmem:[#allocation65_spill] sm:$0xff] %v7067_v44  ;;  %9772 = vst [vmem:[#allocation66_spill] sm:$0xff] %v7072_v54  ;;  %v7084_v58 = vld [vmem:[%s9420_s3 + $0x2a8] sm:$0xff]  ;;  %v7089_v47 = vld [vmem:[%s9420_s3 + $0x2b8] sm:$0xff] }
 0x169   :  { %1880 = vmatprep.subr.mxu0 %v7060_v41  ;;  %1951 = vmatprep.subr.mxu1 %v7067_v44  ;;  %9774 = vst [vmem:[#allocation68_spill] sm:$0xff] %v7084_v58  ;;  %9775 = vst [vmem:[#allocation69_spill] sm:$0xff] %v7089_v47  ;;  %v7101_v44 = vld [vmem:[%s9420_s3 + $0x2b0] sm:$0xff]  ;;  %v7106_v41 = vld [vmem:[%s9420_s3 + $0x288] sm:$0xff] }
 0x16a   :  { %1881 = vmatpush1.msra.mxu0 %v7072_v54  ;;  %1952 = vmatpush1.msra.mxu1 %v7077_v40  ;;  %9777 = vst [vmem:[#allocation71_spill] sm:$0xff] %v7101_v44  ;;  %9778 = vst [vmem:[#allocation72_spill] sm:$0xff] %v7106_v41  ;;  %v7118_v40 = vld [vmem:[%s9420_s3 + $0x280] sm:$0xff]  ;;  %v7123_v54 = vld [vmem:[%s9420_s3 + $0x290] sm:$0xff] }
 0x16b   :  { %1882 = vmatprep.subr.mxu0 %v7084_v58  ;;  %1953 = vmatprep.subr.mxu1 %v7089_v47  ;;  %9780 = vst [vmem:[#allocation74_spill] sm:$0xff] %v7118_v40  ;;  %9781 = vst [vmem:[#allocation75_spill] sm:$0xff] %v7123_v54  ;;  %v7130_v58 = vld [vmem:[%s9420_s3 + $0x268] sm:$0xff]  ;;  %v7135_v47 = vld [vmem:[%s9420_s3 + $0x278] sm:$0xff] }
 0x16c   :  { %1883 = vmatpush1.msra.mxu0 %v7094_v37  ;;  %1954 = vmatpush1.msra.mxu1 %v7101_v44  ;;  %9782 = vst [vmem:[#allocation76_spill] sm:$0xff] %v7130_v58  ;;  %9783 = vst [vmem:[#allocation77_spill] sm:$0xff] %v7135_v47  ;;  %v7142_v37 = vld [vmem:[%s9420_s3 + $0x260] sm:$0xff]  ;;  %v7147_v44 = vld [vmem:[%s9420_s3 + $0x270] sm:$0xff] }
 0x16d   :  { %1884 = vmatprep.subr.mxu0 %v7106_v41  ;;  %1955 = vmatprep.subr.mxu1 %v7111_v34  ;;  %9784 = vst [vmem:[#allocation78_spill] sm:$0xff] %v7142_v37  ;;  %9785 = vst [vmem:[#allocation79_spill] sm:$0xff] %v7147_v44  ;;  %v7154_v41 = vld [vmem:[%s9420_s3 + $0x248] sm:$0xff]  ;;  %v7159_v34 = vld [vmem:[%s9420_s3 + $0x258] sm:$0xff] }
 0x16e   :  { %1885 = vmatpush1.msra.mxu0 %v7118_v40  ;;  %1956 = vmatpush1.msra.mxu1 %v7123_v54  ;;  %9786 = vst [vmem:[#allocation80_spill] sm:$0xff] %v7154_v41  ;;  %9787 = vst [vmem:[#allocation81_spill] sm:$0xff] %v7159_v34  ;;  %v7166_v40 = vld [vmem:[%s9420_s3 + $0x240] sm:$0xff]  ;;  %v7171_v54 = vld [vmem:[%s9420_s3 + $0x250] sm:$0xff] }
 0x16f   :  { %1886 = vmatprep.subr.mxu0 %v7130_v58  ;;  %1957 = vmatprep.subr.mxu1 %v7135_v47  ;;  %9788 = vst [vmem:[#allocation82_spill] sm:$0xff] %v7166_v40  ;;  %9789 = vst [vmem:[#allocation83_spill] sm:$0xff] %v7171_v54  ;;  %v7178_v58 = vld [vmem:[%s9420_s3 + $0x228] sm:$0xff]  ;;  %v7183_v47 = vld [vmem:[%s9420_s3 + $0x238] sm:$0xff] }
 0x170   :  { %1887 = vmatpush1.msra.mxu0 %v7142_v37  ;;  %1958 = vmatpush1.msra.mxu1 %v7147_v44  ;;  %9790 = vst [vmem:[#allocation84_spill] sm:$0xff] %v7178_v58  ;;  %9791 = vst [vmem:[#allocation85_spill] sm:$0xff] %v7183_v47  ;;  %v7190_v37 = vld [vmem:[%s9420_s3 + $0x220] sm:$0xff]  ;;  %v7195_v44 = vld [vmem:[%s9420_s3 + $0x230] sm:$0xff] }
 0x171   :  { %1888 = vmatprep.subr.mxu0 %v7154_v41  ;;  %1959 = vmatprep.subr.mxu1 %v7159_v34  ;;  %9792 = vst [vmem:[#allocation86_spill] sm:$0xff] %v7190_v37  ;;  %9793 = vst [vmem:[#allocation87_spill] sm:$0xff] %v7195_v44  ;;  %v7202_v41 = vld [vmem:[%s9420_s3 + $0x208] sm:$0xff]  ;;  %v7207_v34 = vld [vmem:[%s9420_s3 + $0x218] sm:$0xff] }
 0x172   :  { %1889 = vmatpush1.msra.mxu0 %v7166_v40  ;;  %1960 = vmatpush1.msra.mxu1 %v7171_v54  ;;  %9794 = vst [vmem:[#allocation88_spill] sm:$0xff] %v7202_v41  ;;  %9795 = vst [vmem:[#allocation89_spill] sm:$0xff] %v7207_v34  ;;  %v7214_v40 = vld [vmem:[%s9420_s3 + $0x200] sm:$0xff]  ;;  %v7219_v54 = vld [vmem:[%s9420_s3 + $0x210] sm:$0xff] }
 0x173   :  { %1890 = vmatprep.subr.mxu0 %v7178_v58  ;;  %1961 = vmatprep.subr.mxu1 %v7183_v47  ;;  %9796 = vst [vmem:[#allocation90_spill] sm:$0xff] %v7214_v40  ;;  %9797 = vst [vmem:[#allocation91_spill] sm:$0xff] %v7219_v54  ;;  %v7226_v58 = vld [vmem:[%s9421_s4 + $0x3e8] sm:$0xff]  ;;  %v7231_v47 = vld [vmem:[%s9421_s4 + $0x3f8] sm:$0xff] }
 0x174   :  { %1891 = vmatpush1.msra.mxu0 %v7190_v37  ;;  %1962 = vmatpush1.msra.mxu1 %v7195_v44  ;;  %9798 = vst [vmem:[#allocation92_spill] sm:$0xff] %v7226_v58  ;;  %9799 = vst [vmem:[#allocation93_spill] sm:$0xff] %v7231_v47  ;;  %v1319_v44 = vlaneseq }
 0x175   :  { %1892 = vmatprep.subr.mxu0 %v7202_v41  ;;  %1963 = vmatprep.subr.mxu1 %v7207_v34  ;;  %v1317_v34 = vld [vmem:[%s9423_s5] sm:$0xf] }
 0x176   :  { %1893 = vmatpush1.msra.mxu0 %v7214_v40  ;;  %1964 = vmatpush1.msra.mxu1 %v7219_v54  ;;  %v1320_v37 = vshrl.u32 %v1319_v44, 7 }
 0x177   :  { %2069 = vmatprep.subr.mxu0 %v7226_v58  ;;  %2140 = vmatprep.subr.mxu1 %v7231_v47 }
 0x178   :  { %v7239_v31 = vsub.s32 0, %v1320_v37  ;;  %v7241_v30 = vsub.s32 2, %v1320_v37  ;;  %v7246_v27 = vsub.s32 1, %v1320_v37  ;;  %v7248_v54 = vsub.s32 3, %v1320_v37 }
 0x17a   :  { %9800 = vst [vmem:[#allocation94_spill] sm:$0xff] %v7239_v31  ;;  %9801 = vst [vmem:[#allocation95_spill] sm:$0xff] %v7241_v30  ;;  %v1322_v47 = vrot.slane %v1317_v34, %v7239_v31  ;;  %v1330_v44 = vrot.slane %v1317_v34, %v7241_v30  ;;  %v1326_v25 = vrot.slane %v1317_v34, %v7246_v27 }
 0x17b   :  { %9802 = vst [vmem:[#allocation96_spill] sm:$0xff] %v7246_v27  ;;  %9803 = vst [vmem:[#allocation97_spill] sm:$0xff] %v7248_v54  ;;  %v1334_v24 = vrot.slane %v1317_v34, %v7248_v54 }
 0x1ee   :  { %v1405_v33 = vpop.f32.mrf.mxu0  ;;  %v1494_v32 = vpop.f32.mrf.mxu1 }
 0x1f0   :  { %v1407_v41 = vpop.f32.mrf.mxu0  ;;  %v1496_v40 = vpop.f32.mrf.mxu1 }
 0x1f4   :  { %v1411_v58 = vpop.f32.mrf.mxu0  ;;  %v1500_v26 = vpop.f32.mrf.mxu1 }
 0x1f5   :  { %v7254_v23 = vadd.f32 %v1411_v58, %v1322_v47  ;;  %v7256_v20 = vadd.f32 %v1500_v26, %v1330_v44 }
 0x1f6   :  { %v1413_v19 = vpop.f32.mrf.mxu0  ;;  %v1502_v18 = vpop.f32.mrf.mxu1 }
 0x1f7   :  { %9804 = vst [vmem:[#allocation98_spill] sm:$0xff] %v7254_v23  ;;  %9805 = vst [vmem:[#allocation99_spill] sm:$0xff] %v7256_v20  ;;  %v7258_v15 = vadd.f32 %v1413_v19, %v1326_v25  ;;  %v7260_v37 = vadd.f32 %v1502_v18, %v1334_v24 }
 0x1f9   :  { %9806 = vst [vmem:[#allocation100_spill] sm:$0xff] %v7258_v15  ;;  %9807 = vst [vmem:[#allocation101_spill] sm:$0xff] %v7260_v37 }
 0x1fa   :  { %v1417_v14 = vpop.f32.mrf.mxu0  ;;  %v1506_v31 = vpop.f32.mrf.mxu1 }
 0x1fb   :  { %v7262_v13 = vadd.f32 %v1417_v14, %v1322_v47  ;;  %v7264_v30 = vadd.f32 %v1506_v31, %v1330_v44  ;;  %v1406_v31 = vadd.f32 %v1405_v33, %v1322_v47 }
 0x1fc   :  { %v1419_v12 = vpop.f32.mrf.mxu0  ;;  %v1508_v27 = vpop.f32.mrf.mxu1 }
 0x1fd   :  { %9808 = vst [vmem:[#allocation102_spill] sm:$0xff] %v7262_v13  ;;  %9809 = vst [vmem:[#allocation103_spill] sm:$0xff] %v7264_v30  ;;  %v7266_v10 = vadd.f32 %v1419_v12, %v1326_v25  ;;  %v7268_v58 = vadd.f32 %v1508_v27, %v1334_v24  ;;  %v1408_v13 = vadd.f32 %v1407_v41, %v1326_v25 }
 0x1ff   :  { %9810 = vst [vmem:[#allocation104_spill] sm:$0xff] %v7266_v10  ;;  %9811 = vst [vmem:[#allocation105_spill] sm:$0xff] %v7268_v58 }
 0x200   :  { %v1423_v26 = vpop.f32.mrf.mxu0  ;;  %v1512_v34 = vpop.f32.mrf.mxu1 }
 0x201   :  { %v7270_v54 = vadd.f32 %v1423_v26, %v1322_v47  ;;  %v7272_v19 = vadd.f32 %v1512_v34, %v1330_v44  ;;  %v1497_v34 = vadd.f32 %v1496_v40, %v1334_v24 }
 0x202   :  { %v1425_v18 = vpop.f32.mrf.mxu0  ;;  %v1514_v20 = vpop.f32.mrf.mxu1 }
 0x203   :  { %9812 = vst [vmem:[#allocation106_spill] sm:$0xff] %v7270_v54  ;;  %9813 = vst [vmem:[#allocation107_spill] sm:$0xff] %v7272_v19  ;;  %v7274_v37 = vadd.f32 %v1425_v18, %v1326_v25  ;;  %v7276_v14 = vadd.f32 %v1514_v20, %v1334_v24  ;;  %v1495_v54 = vadd.f32 %v1494_v32, %v1330_v44  ;;  %v7296_v44 = vld [vmem:[%s9421_s4 + $0x3c8] sm:$0xff] }
 0x205   :  { %9814 = vst [vmem:[#allocation108_spill] sm:$0xff] %v7274_v37  ;;  %9815 = vst [vmem:[#allocation109_spill] sm:$0xff] %v7276_v14 }
 0x215   :  { %v1670_v30 = vpop.f32.mrf.mxu0  ;;  %v1741_v58 = vpop.f32.mrf.mxu1 }
 0x216   :  { %v1746_v15 = vadd.f32 %v1670_v30, %v1406_v31  ;;  %v1748_v37 = vadd.f32 %v1741_v58, %v1495_v54  ;;  %v7291_v54 = vld [vmem:[%s9421_s4 + $0x3f0] sm:$0xff]  ;;  %v7308_v58 = vld [vmem:[%s9421_s4 + $0x3c0] sm:$0xff]  ;;  %v7325_v31 = vld [vmem:[%s9421_s4 + $0x3b8] sm:$0xff] }
 0x217   :  { %v1672_v12 = vpop.f32.mrf.mxu0  ;;  %v1743_v26 = vpop.f32.mrf.mxu1 }
 0x218   :  { %v4739_v10 = vmul.f32 -1.442695, %v1746_v15  ;;  %v1747_v27 = vadd.f32 %v1672_v12, %v1408_v13  ;;  %v1749_v19 = vadd.f32 %v1743_v26, %v1497_v34  ;;  %v7332_v12 = vld [vmem:[%s9421_s4 + $0x3a0] sm:$0xff]  ;;  %v7344_v26 = vld [vmem:[%s9421_s4 + $0x388] sm:$0xff]  ;;  %v7349_v34 = vld [vmem:[%s9421_s4 + $0x398] sm:$0xff] }
 0x21a   :  { %5702 = vpow2.f32 %v4739_v10  ;;  %v4740_v23 = vmul.f32 -1.442695, %v1747_v27  ;;  %v4741_v8 = vmul.f32 -1.442695, %v1749_v19  ;;  %v7313_v19 = vld [vmem:[%s9421_s4 + $0x3d0] sm:$0xff] }
 0x21b   :  { %v7337_v27 = vld [vmem:[%s9421_s4 + $0x3b0] sm:$0xff] }
 0x21c   :  { %5704 = vpow2.f32 %v4740_v23 }
 0x21d   :  { %5706 = vpow2.f32 %v4741_v8  ;;  %v7286_v8 = vld [vmem:[%s9421_s4 + $0x3e0] sm:$0xff] }
 0x227   :  { %v5703_v18 = vpop.eup %5702 }
 0x228   :  { %v1753_v20 = vadd.f32 1.0, %v5703_v18  ;;  %v7356_v18 = vld [vmem:[%s9421_s4 + $0x380] sm:$0xff] }
 0x229   :  { %v5705_v14 = vpop.eup %5704 }
 0x22a   :  { %5708 = vrcp.f32 %v1753_v20  ;;  %v1759_v25 = vadd.f32 1.0, %v5705_v14  ;;  %v5707_v15 = vpop.eup %5706  ;;  %v7320_v14 = vld [vmem:[%s9421_s4 + $0x3a8] sm:$0xff]  ;;  %v7361_v20 = vld [vmem:[%s9421_s4 + $0x390] sm:$0xff] }
 0x22b   :  { %5710 = vtanh.f32 %v1748_v37  ;;  %v1766_v33 = vadd.f32 1.0, %v5707_v15  ;;  %v7301_v37 = vld [vmem:[%s9421_s4 + $0x3d8] sm:$0xff] }
 0x22c   :  { %5712 = vrcp.f32 %v1759_v25  ;;  %v7368_v25 = vld [vmem:[%s9421_s4 + $0x368] sm:$0xff]  ;;  %v7373_v15 = vld [vmem:[%s9421_s4 + $0x378] sm:$0xff] }
 0x22d   :  { %5714 = vrcp.f32 %v1766_v33  ;;  %v7397_v33 = vld [vmem:[%s9421_s4 + $0x358] sm:$0xff] }
 0x22e   :  { %9819 = vst [vmem:[#allocation113_spill] sm:$0xff] %v7397_v33 }
 0x237   :  { %v5709_v13 = vpop.eup %5708 }
 0x238   :  { %v5711_v10 = vpop.eup %5710 }
 0x239   :  { %v5713_v30 = vpop.eup %5712  ;;  %v1770_v41 = vmul.f32 %v5711_v10, %v5709_v13  ;;  %v7380_v13 = vld [vmem:[%s9421_s4 + $0x360] sm:$0xff]  ;;  %v7385_v10 = vld [vmem:[%s9421_s4 + $0x370] sm:$0xff] }
 0x23a   :  { %v1769_v23 = vmul.f32 0.0, %v5713_v30  ;;  %v5715_v32 = vpop.eup %5714  ;;  %9816 = vst [vmem:[#allocation110_spill] sm:$0xff] %v7380_v13  ;;  %9817 = vst [vmem:[#allocation111_spill] sm:$0xff] %v7385_v10  ;;  %v7392_v30 = vld [vmem:[%s9421_s4 + $0x348] sm:$0xff] }
 0x23b   :  { %9818 = vst [vmem:[#allocation112_spill] sm:$0xff] %v7392_v30 }
 0x23c   :  { %v7278_v24 = vadd.f32 %v1770_v41, %v1769_v23  ;;  %v7404_v23 = vld [vmem:[%s9421_s4 + $0x340] sm:$0xff]  ;;  %v7409_v41 = vld [vmem:[%s9421_s4 + $0x350] sm:$0xff] }
 0x23d   :  { %9820 = vst [vmem:[#allocation114_spill] sm:$0xff] %v7404_v23  ;;  %9821 = vst [vmem:[#allocation115_spill] sm:$0xff] %v7409_v41 }
 0x23e   :  { %5716 = vtanh.f32 %v7278_v24 }
 0x24b   :  { %v5717_v40 = vpop.eup %5716 }
 0x24c   :  { %v7281_v47 = vmul.f32 %v5717_v40, %v5715_v32  ;;  %v7416_v32 = vld [vmem:[%s9421_s4 + $0x328] sm:$0xff]  ;;  %v7421_v40 = vld [vmem:[%s9421_s4 + $0x338] sm:$0xff] }
 0x24d   :  { %9822 = vst [vmem:[#allocation116_spill] sm:$0xff] %v7416_v32  ;;  %9823 = vst [vmem:[#allocation117_spill] sm:$0xff] %v7421_v40 }
 0x24e   :  { %1927 = vmatmul.mubr.f32.vlgmr.msra.gmra.mxu0 %v7281_v47  ;;  %1998 = vmatmul.mubr.f32.vlgmr.msra.gmra.mxu1 %v7281_v47 }
 0x24f   :  { %2070 = vmatpush1.msra.mxu0 %v7286_v8  ;;  %2141 = vmatpush1.msra.mxu1 %v7291_v54 }
 0x250   :  { %2071 = vmatprep.subr.mxu0 %v7296_v44  ;;  %2142 = vmatprep.subr.mxu1 %v7301_v37 }
 0x251   :  { %2072 = vmatpush1.msra.mxu0 %v7308_v58  ;;  %2143 = vmatpush1.msra.mxu1 %v7313_v19 }
 0x252   :  { %2073 = vmatprep.subr.mxu0 %v7320_v14  ;;  %2144 = vmatprep.subr.mxu1 %v7325_v31 }
 0x253   :  { %2074 = vmatpush1.msra.mxu0 %v7332_v12  ;;  %2145 = vmatpush1.msra.mxu1 %v7337_v27 }
 0x254   :  { %2075 = vmatprep.subr.mxu0 %v7344_v26  ;;  %2146 = vmatprep.subr.mxu1 %v7349_v34 }
 0x255   :  { %2076 = vmatpush1.msra.mxu0 %v7356_v18  ;;  %2147 = vmatpush1.msra.mxu1 %v7361_v20 }
 0x256   :  { %2077 = vmatprep.subr.mxu0 %v7368_v25  ;;  %2148 = vmatprep.subr.mxu1 %v7373_v15 }
 0x257   :  { %2078 = vmatpush1.msra.mxu0 %v7380_v13  ;;  %2149 = vmatpush1.msra.mxu1 %v7385_v10  ;;  %v7428_v13 = vld [vmem:[%s9421_s4 + $0x320] sm:$0xff]  ;;  %v7433_v10 = vld [vmem:[%s9421_s4 + $0x330] sm:$0xff] }
 0x258   :  { %2079 = vmatprep.subr.mxu0 %v7392_v30  ;;  %2150 = vmatprep.subr.mxu1 %v7397_v33  ;;  %9824 = vst [vmem:[#allocation118_spill] sm:$0xff] %v7428_v13  ;;  %9825 = vst [vmem:[#allocation119_spill] sm:$0xff] %v7433_v10  ;;  %v7440_v30 = vld [vmem:[%s9421_s4 + $0x308] sm:$0xff]  ;;  %v7445_v33 = vld [vmem:[%s9421_s4 + $0x318] sm:$0xff] }
 0x259   :  { %2080 = vmatpush1.msra.mxu0 %v7404_v23  ;;  %2151 = vmatpush1.msra.mxu1 %v7409_v41  ;;  %9826 = vst [vmem:[#allocation120_spill] sm:$0xff] %v7440_v30  ;;  %9827 = vst [vmem:[#allocation121_spill] sm:$0xff] %v7445_v33  ;;  %v7452_v23 = vld [vmem:[%s9421_s4 + $0x300] sm:$0xff]  ;;  %v7457_v41 = vld [vmem:[%s9421_s4 + $0x310] sm:$0xff] }
 0x25a   :  { %2081 = vmatprep.subr.mxu0 %v7416_v32  ;;  %2152 = vmatprep.subr.mxu1 %v7421_v40  ;;  %9828 = vst [vmem:[#allocation122_spill] sm:$0xff] %v7452_v23  ;;  %9829 = vst [vmem:[#allocation123_spill] sm:$0xff] %v7457_v41  ;;  %v7464_v32 = vld [vmem:[%s9421_s4 + $0x2e8] sm:$0xff]  ;;  %v7469_v40 = vld [vmem:[%s9421_s4 + $0x2f8] sm:$0xff] }
 0x25b   :  { %2082 = vmatpush1.msra.mxu0 %v7428_v13  ;;  %2153 = vmatpush1.msra.mxu1 %v7433_v10  ;;  %9830 = vst [vmem:[#allocation124_spill] sm:$0xff] %v7464_v32  ;;  %9831 = vst [vmem:[#allocation125_spill] sm:$0xff] %v7469_v40  ;;  %v7476_v13 = vld [vmem:[%s9421_s4 + $0x2e0] sm:$0xff]  ;;  %v7481_v10 = vld [vmem:[%s9421_s4 + $0x2f0] sm:$0xff] }
 0x25c   :  { %2083 = vmatprep.subr.mxu0 %v7440_v30  ;;  %2154 = vmatprep.subr.mxu1 %v7445_v33  ;;  %9832 = vst [vmem:[#allocation126_spill] sm:$0xff] %v7476_v13  ;;  %9833 = vst [vmem:[#allocation127_spill] sm:$0xff] %v7481_v10  ;;  %v7488_v30 = vld [vmem:[%s9421_s4 + $0x2c8] sm:$0xff]  ;;  %v7493_v33 = vld [vmem:[%s9421_s4 + $0x2d8] sm:$0xff] }
 0x25d   :  { %2084 = vmatpush1.msra.mxu0 %v7452_v23  ;;  %2155 = vmatpush1.msra.mxu1 %v7457_v41  ;;  %9834 = vst [vmem:[#allocation128_spill] sm:$0xff] %v7488_v30  ;;  %9835 = vst [vmem:[#allocation129_spill] sm:$0xff] %v7493_v33  ;;  %v7500_v23 = vld [vmem:[%s9421_s4 + $0x2c0] sm:$0xff]  ;;  %v7505_v41 = vld [vmem:[%s9421_s4 + $0x2d0] sm:$0xff] }
 0x25e   :  { %2085 = vmatprep.subr.mxu0 %v7464_v32  ;;  %2156 = vmatprep.subr.mxu1 %v7469_v40  ;;  %9836 = vst [vmem:[#allocation130_spill] sm:$0xff] %v7500_v23  ;;  %9837 = vst [vmem:[#allocation131_spill] sm:$0xff] %v7505_v41  ;;  %v7512_v32 = vld [vmem:[%s9421_s4 + $0x2a8] sm:$0xff]  ;;  %v7517_v40 = vld [vmem:[%s9421_s4 + $0x2b8] sm:$0xff] }
 0x25f   :  { %2086 = vmatpush1.msra.mxu0 %v7476_v13  ;;  %2157 = vmatpush1.msra.mxu1 %v7481_v10  ;;  %9838 = vst [vmem:[#allocation132_spill] sm:$0xff] %v7512_v32  ;;  %9839 = vst [vmem:[#allocation133_spill] sm:$0xff] %v7517_v40  ;;  %v7524_v13 = vld [vmem:[%s9421_s4 + $0x2a0] sm:$0xff]  ;;  %v7529_v10 = vld [vmem:[%s9421_s4 + $0x2b0] sm:$0xff] }
 0x260   :  { %2087 = vmatprep.subr.mxu0 %v7488_v30  ;;  %2158 = vmatprep.subr.mxu1 %v7493_v33  ;;  %9840 = vst [vmem:[#allocation134_spill] sm:$0xff] %v7524_v13  ;;  %9841 = vst [vmem:[#allocation135_spill] sm:$0xff] %v7529_v10  ;;  %v7536_v30 = vld [vmem:[%s9421_s4 + $0x288] sm:$0xff]  ;;  %v7541_v33 = vld [vmem:[%s9421_s4 + $0x298] sm:$0xff] }
 0x261   :  { %2088 = vmatpush1.msra.mxu0 %v7500_v23  ;;  %2159 = vmatpush1.msra.mxu1 %v7505_v41  ;;  %9842 = vst [vmem:[#allocation136_spill] sm:$0xff] %v7536_v30  ;;  %9843 = vst [vmem:[#allocation137_spill] sm:$0xff] %v7541_v33  ;;  %v7548_v23 = vld [vmem:[%s9421_s4 + $0x280] sm:$0xff]  ;;  %v7553_v41 = vld [vmem:[%s9421_s4 + $0x290] sm:$0xff] }
 0x262   :  { %2089 = vmatprep.subr.mxu0 %v7512_v32  ;;  %2160 = vmatprep.subr.mxu1 %v7517_v40  ;;  %9844 = vst [vmem:[#allocation138_spill] sm:$0xff] %v7548_v23  ;;  %9845 = vst [vmem:[#allocation139_spill] sm:$0xff] %v7553_v41  ;;  %v7560_v32 = vld [vmem:[%s9421_s4 + $0x268] sm:$0xff]  ;;  %v7565_v40 = vld [vmem:[%s9421_s4 + $0x278] sm:$0xff] }
 0x263   :  { %2090 = vmatpush1.msra.mxu0 %v7524_v13  ;;  %2161 = vmatpush1.msra.mxu1 %v7529_v10  ;;  %9846 = vst [vmem:[#allocation140_spill] sm:$0xff] %v7560_v32  ;;  %9847 = vst [vmem:[#allocation141_spill] sm:$0xff] %v7565_v40  ;;  %v7572_v13 = vld [vmem:[%s9421_s4 + $0x260] sm:$0xff]  ;;  %v7577_v10 = vld [vmem:[%s9421_s4 + $0x270] sm:$0xff] }
 0x264   :  { %2091 = vmatprep.subr.mxu0 %v7536_v30  ;;  %2162 = vmatprep.subr.mxu1 %v7541_v33  ;;  %9848 = vst [vmem:[#allocation142_spill] sm:$0xff] %v7572_v13  ;;  %9849 = vst [vmem:[#allocation143_spill] sm:$0xff] %v7577_v10  ;;  %v7584_v30 = vld [vmem:[%s9421_s4 + $0x248] sm:$0xff]  ;;  %v7589_v33 = vld [vmem:[%s9421_s4 + $0x258] sm:$0xff] }
 0x265   :  { %2092 = vmatpush1.msra.mxu0 %v7548_v23  ;;  %2163 = vmatpush1.msra.mxu1 %v7553_v41  ;;  %9850 = vst [vmem:[#allocation144_spill] sm:$0xff] %v7584_v30  ;;  %9851 = vst [vmem:[#allocation145_spill] sm:$0xff] %v7589_v33  ;;  %v7596_v23 = vld [vmem:[%s9421_s4 + $0x240] sm:$0xff]  ;;  %v7601_v41 = vld [vmem:[%s9421_s4 + $0x250] sm:$0xff] }
 0x266   :  { %2093 = vmatprep.subr.mxu0 %v7560_v32  ;;  %2164 = vmatprep.subr.mxu1 %v7565_v40  ;;  %9852 = vst [vmem:[#allocation146_spill] sm:$0xff] %v7596_v23  ;;  %9853 = vst [vmem:[#allocation147_spill] sm:$0xff] %v7601_v41  ;;  %v7608_v32 = vld [vmem:[%s9421_s4 + $0x228] sm:$0xff]  ;;  %v7613_v40 = vld [vmem:[%s9421_s4 + $0x238] sm:$0xff] }
 0x267   :  { %2094 = vmatpush1.msra.mxu0 %v7572_v13  ;;  %2165 = vmatpush1.msra.mxu1 %v7577_v10  ;;  %9854 = vst [vmem:[#allocation148_spill] sm:$0xff] %v7613_v40  ;;  %v7620_v13 = vld [vmem:[%s9421_s4 + $0x220] sm:$0xff]  ;;  %v7625_v10 = vld [vmem:[%s9421_s4 + $0x230] sm:$0xff] }
 0x268   :  { %2095 = vmatprep.subr.mxu0 %v7584_v30  ;;  %2166 = vmatprep.subr.mxu1 %v7589_v33  ;;  %9855 = vst [vmem:[#allocation149_spill] sm:$0xff] %v7625_v10  ;;  %v7632_v30 = vld [vmem:[%s9421_s4 + $0x208] sm:$0xff]  ;;  %v7637_v33 = vld [vmem:[%s9421_s4 + $0x218] sm:$0xff] }
 0x269   :  { %2096 = vmatpush1.msra.mxu0 %v7596_v23  ;;  %2167 = vmatpush1.msra.mxu1 %v7601_v41  ;;  %9856 = vst [vmem:[#allocation150_spill] sm:$0xff] %v7637_v33  ;;  %v7644_v23 = vld [vmem:[%s9421_s4 + $0x200] sm:$0xff]  ;;  %v7651_v41 = vld [vmem:[%s9421_s4 + $0x210] sm:$0xff] }
 0x26a   :  { %2097 = vmatprep.subr.mxu0 %v7608_v32  ;;  %2168 = vmatprep.subr.mxu1 %v7613_v40  ;;  %v9857_v40 = vmov 0.0  }
 0x26b   :  { %2098 = vmatpush1.msra.mxu0 %v7620_v13  ;;  %2169 = vmatpush1.msra.mxu1 %v7625_v10  ;;  %v5838_v10 = vld [vmem:[%s9421_s4 + $0x1e8] sm:$0xff] }
 0x26c   :  { %2099 = vmatprep.subr.mxu0 %v7632_v30  ;;  %2170 = vmatprep.subr.mxu1 %v7637_v33  ;;  %v5839_v33 = vld [vmem:[%s9421_s4 + $0x1f8] sm:$0xff] }
 0x26d   :  { %2100 = vmatpush1.msra.mxu0 %v7644_v23  ;;  %2133 = vmatprep.mubr.f32.mxu0 %v9857_v40 }
 0x26e   :  { %2171 = vmatpush1.msra.mxu1 %v7651_v41  ;;  %2204 = vmatprep.mubr.f32.mxu1 %v9857_v40 }
 0x26f   :  { %2134 = vmatmul.mubr.f32.vlgmr.msra.gmra.mxu0 %v9857_v40  ;;  %2205 = vmatmul.mubr.f32.vlgmr.msra.gmra.mxu1 %v9857_v40 }
 0x270   :  { %2311 = vmatprep.subr.mxu0 %v5838_v10  ;;  %2382 = vmatprep.subr.mxu1 %v5839_v33  ;;  %v9897_v10 = vld [vmem:[#allocation43_spill] sm:$0xff]  ;;  %v9898_v33 = vld [vmem:[#allocation44_spill] sm:$0xff] }
 0x271   :  { %2312 = vmatpush1.msra.mxu0 %v6462_v9  ;;  %2383 = vmatpush1.msra.mxu1 %v6467_v11  ;;  %v9858_v9 = vld [vmem:[#allocation4_spill] sm:$0xff]  ;;  %v9859_v11 = vld [vmem:[#allocation5_spill] sm:$0xff] }
 0x272   :  { %2313 = vmatprep.subr.mxu0 %v6472_v16  ;;  %2384 = vmatprep.subr.mxu1 %v6477_v17  ;;  %v9860_v16 = vld [vmem:[#allocation6_spill] sm:$0xff]  ;;  %v9861_v17 = vld [vmem:[#allocation7_spill] sm:$0xff] }
 0x273   :  { %2314 = vmatpush1.msra.mxu0 %v6482_v21  ;;  %2385 = vmatpush1.msra.mxu1 %v6487_v22  ;;  %v9862_v21 = vld [vmem:[#allocation8_spill] sm:$0xff]  ;;  %v9863_v22 = vld [vmem:[#allocation9_spill] sm:$0xff] }
 0x274   :  { %2315 = vmatprep.subr.mxu0 %v6496_v28  ;;  %2386 = vmatprep.subr.mxu1 %v6501_v29  ;;  %v9864_v28 = vld [vmem:[#allocation10_spill] sm:$0xff]  ;;  %v9865_v29 = vld [vmem:[#allocation11_spill] sm:$0xff] }
 0x275   :  { %2316 = vmatpush1.msra.mxu0 %v6510_v35  ;;  %2387 = vmatpush1.msra.mxu1 %v6515_v36  ;;  %v9866_v35 = vld [vmem:[#allocation12_spill] sm:$0xff]  ;;  %v9867_v36 = vld [vmem:[#allocation13_spill] sm:$0xff] }
 0x276   :  { %2317 = vmatprep.subr.mxu0 %v6522_v38  ;;  %2388 = vmatprep.subr.mxu1 %v6527_v39  ;;  %v9868_v38 = vld [vmem:[#allocation14_spill] sm:$0xff]  ;;  %v9869_v39 = vld [vmem:[#allocation15_spill] sm:$0xff] }
 0x277   :  { %2318 = vmatpush1.msra.mxu0 %v6532_v42  ;;  %2389 = vmatpush1.msra.mxu1 %v6537_v43  ;;  %v9870_v42 = vld [vmem:[#allocation16_spill] sm:$0xff]  ;;  %v9871_v43 = vld [vmem:[#allocation17_spill] sm:$0xff] }
 0x278   :  { %2319 = vmatprep.subr.mxu0 %v6546_v45  ;;  %2390 = vmatprep.subr.mxu1 %v6551_v46  ;;  %v9872_v45 = vld [vmem:[#allocation18_spill] sm:$0xff]  ;;  %v9873_v46 = vld [vmem:[#allocation19_spill] sm:$0xff] }
 0x279   :  { %2320 = vmatpush1.msra.mxu0 %v6560_v48  ;;  %2391 = vmatpush1.msra.mxu1 %v6565_v49  ;;  %v9874_v48 = vld [vmem:[#allocation20_spill] sm:$0xff]  ;;  %v9875_v49 = vld [vmem:[#allocation21_spill] sm:$0xff] }
 0x27a   :  { %2321 = vmatprep.subr.mxu0 %v6572_v50  ;;  %2392 = vmatprep.subr.mxu1 %v6577_v51  ;;  %v9876_v50 = vld [vmem:[#allocation22_spill] sm:$0xff]  ;;  %v9877_v51 = vld [vmem:[#allocation23_spill] sm:$0xff] }
 0x27b   :  { %2322 = vmatpush1.msra.mxu0 %v6582_v52  ;;  %2393 = vmatpush1.msra.mxu1 %v6587_v53  ;;  %v9878_v52 = vld [vmem:[#allocation24_spill] sm:$0xff]  ;;  %v9879_v53 = vld [vmem:[#allocation25_spill] sm:$0xff] }
 0x27c   :  { %2323 = vmatprep.subr.mxu0 %v6596_v55  ;;  %2394 = vmatprep.subr.mxu1 %v6601_v56  ;;  %v9880_v55 = vld [vmem:[#allocation26_spill] sm:$0xff]  ;;  %v9881_v56 = vld [vmem:[#allocation27_spill] sm:$0xff] }
 0x27d   :  { %2324 = vmatpush1.msra.mxu0 %v6610_v57  ;;  %2395 = vmatpush1.msra.mxu1 %v6615_v59  ;;  %v9882_v57 = vld [vmem:[#allocation28_spill] sm:$0xff]  ;;  %v9883_v59 = vld [vmem:[#allocation29_spill] sm:$0xff] }
 0x27e   :  { %2325 = vmatprep.subr.mxu0 %v6622_v60  ;;  %2396 = vmatprep.subr.mxu1 %v6627_v61  ;;  %v9884_v60 = vld [vmem:[#allocation30_spill] sm:$0xff]  ;;  %v9885_v61 = vld [vmem:[#allocation31_spill] sm:$0xff] }
 0x27f   :  { %2326 = vmatpush1.msra.mxu0 %v6632_v62  ;;  %2397 = vmatpush1.msra.mxu1 %v6637_v63  ;;  %v9886_v62 = vld [vmem:[#allocation32_spill] sm:$0xff]  ;;  %v9887_v63 = vld [vmem:[#allocation33_spill] sm:$0xff] }
 0x280   :  { %2327 = vmatprep.subr.mxu0 %v6644_v0  ;;  %2398 = vmatprep.subr.mxu1 %v6649_v1  ;;  %v9888_v0 = vld [vmem:[#allocation34_spill] sm:$0xff]  ;;  %v9889_v1 = vld [vmem:[#allocation35_spill] sm:$0xff] }
 0x281   :  { %2328 = vmatpush1.msra.mxu0 %v6656_v2  ;;  %2399 = vmatpush1.msra.mxu1 %v6661_v3  ;;  %v9890_v2 = vld [vmem:[#allocation36_spill] sm:$0xff]  ;;  %v9891_v3 = vld [vmem:[#allocation37_spill] sm:$0xff] }
 0x282   :  { %2329 = vmatprep.subr.mxu0 %v6668_v4  ;;  %2400 = vmatprep.subr.mxu1 %v6673_v5  ;;  %v9892_v4 = vld [vmem:[#allocation38_spill] sm:$0xff]  ;;  %v9893_v5 = vld [vmem:[#allocation39_spill] sm:$0xff] }
 0x283   :  { %2330 = vmatpush1.msra.mxu0 %v6680_v6  ;;  %2401 = vmatpush1.msra.mxu1 %v6685_v7  ;;  %v9894_v6 = vld [vmem:[#allocation40_spill] sm:$0xff]  ;;  %v9895_v7 = vld [vmem:[#allocation41_spill] sm:$0xff] }
 0x284   :  { %2331 = vmatprep.subr.mxu0 %v9858_v9  ;;  %2402 = vmatprep.subr.mxu1 %v9859_v11  ;;  %v9899_v9 = vld [vmem:[#allocation45_spill] sm:$0xff]  ;;  %v9900_v11 = vld [vmem:[#allocation46_spill] sm:$0xff] }
 0x285   :  { %2332 = vmatpush1.msra.mxu0 %v9860_v16  ;;  %2403 = vmatpush1.msra.mxu1 %v9861_v17  ;;  %v9901_v16 = vld [vmem:[#allocation47_spill] sm:$0xff]  ;;  %v9902_v17 = vld [vmem:[#allocation48_spill] sm:$0xff] }
 0x286   :  { %2333 = vmatprep.subr.mxu0 %v9862_v21  ;;  %2404 = vmatprep.subr.mxu1 %v9863_v22  ;;  %v9903_v21 = vld [vmem:[#allocation49_spill] sm:$0xff]  ;;  %v9904_v22 = vld [vmem:[#allocation50_spill] sm:$0xff] }
 0x287   :  { %2334 = vmatpush1.msra.mxu0 %v9864_v28  ;;  %2405 = vmatpush1.msra.mxu1 %v9865_v29  ;;  %v9905_v28 = vld [vmem:[#allocation51_spill] sm:$0xff]  ;;  %v9906_v29 = vld [vmem:[#allocation52_spill] sm:$0xff] }
 0x288   :  { %2335 = vmatprep.subr.mxu0 %v9866_v35  ;;  %2406 = vmatprep.subr.mxu1 %v9867_v36  ;;  %v9907_v35 = vld [vmem:[#allocation53_spill] sm:$0xff]  ;;  %v9908_v36 = vld [vmem:[#allocation54_spill] sm:$0xff] }
 0x289   :  { %2336 = vmatpush1.msra.mxu0 %v9868_v38  ;;  %2407 = vmatpush1.msra.mxu1 %v9869_v39  ;;  %v9909_v38 = vld [vmem:[#allocation55_spill] sm:$0xff]  ;;  %v9910_v39 = vld [vmem:[#allocation56_spill] sm:$0xff] }
 0x28a   :  { %2337 = vmatprep.subr.mxu0 %v9870_v42  ;;  %2408 = vmatprep.subr.mxu1 %v9871_v43  ;;  %v9911_v42 = vld [vmem:[#allocation57_spill] sm:$0xff]  ;;  %v9912_v43 = vld [vmem:[#allocation58_spill] sm:$0xff] }
 0x28b   :  { %2338 = vmatpush1.msra.mxu0 %v9872_v45  ;;  %2409 = vmatpush1.msra.mxu1 %v9873_v46  ;;  %v9913_v45 = vld [vmem:[#allocation59_spill] sm:$0xff]  ;;  %v9914_v46 = vld [vmem:[#allocation60_spill] sm:$0xff] }
 0x28c   :  { %2339 = vmatprep.subr.mxu0 %v9874_v48  ;;  %2410 = vmatprep.subr.mxu1 %v9875_v49  ;;  %v9915_v48 = vld [vmem:[#allocation61_spill] sm:$0xff]  ;;  %v9916_v49 = vld [vmem:[#allocation62_spill] sm:$0xff] }
 0x28d   :  { %2340 = vmatpush1.msra.mxu0 %v9876_v50  ;;  %2411 = vmatpush1.msra.mxu1 %v9877_v51  ;;  %v9917_v50 = vld [vmem:[#allocation63_spill] sm:$0xff]  ;;  %v9918_v51 = vld [vmem:[#allocation64_spill] sm:$0xff] }
 0x28e   :  { %2341 = vmatprep.subr.mxu0 %v9878_v52  ;;  %2412 = vmatprep.subr.mxu1 %v9879_v53  ;;  %v9919_v52 = vld [vmem:[#allocation65_spill] sm:$0xff]  ;;  %v9920_v53 = vld [vmem:[#allocation66_spill] sm:$0xff] }
 0x28f   :  { %2342 = vmatpush1.msra.mxu0 %v9880_v55  ;;  %2375 = vmatprep.mubr.f32.mxu0 %v9857_v40  ;;  %v9921_v55 = vld [vmem:[#allocation67_spill] sm:$0xff] }
 0x290   :  { %2413 = vmatpush1.msra.mxu1 %v9881_v56  ;;  %2446 = vmatprep.mubr.f32.mxu1 %v9857_v40  ;;  %v9922_v56 = vld [vmem:[#allocation68_spill] sm:$0xff] }
 0x291   :  { %2376 = vmatmul.mubr.f32.vlgmr.msra.gmra.mxu0 %v7281_v47  ;;  %2447 = vmatmul.mubr.f32.vlgmr.msra.gmra.mxu1 %v7281_v47  ;;  %v9896_v47 = vld [vmem:[#allocation42_spill] sm:$0xff] }
 0x292   :  { %2567 = vmatprep.subr.mxu0 %v9882_v57  ;;  %2638 = vmatprep.subr.mxu1 %v9883_v59  ;;  %v9923_v57 = vld [vmem:[#allocation69_spill] sm:$0xff]  ;;  %v9924_v59 = vld [vmem:[#allocation70_spill] sm:$0xff] }
 0x293   :  { %2568 = vmatpush1.msra.mxu0 %v9884_v60  ;;  %2639 = vmatpush1.msra.mxu1 %v9885_v61  ;;  %v9925_v60 = vld [vmem:[#allocation71_spill] sm:$0xff]  ;;  %v9926_v61 = vld [vmem:[#allocation72_spill] sm:$0xff] }
 0x294   :  { %2569 = vmatprep.subr.mxu0 %v9886_v62  ;;  %2640 = vmatprep.subr.mxu1 %v9887_v63  ;;  %v9927_v62 = vld [vmem:[#allocation73_spill] sm:$0xff]  ;;  %v9928_v63 = vld [vmem:[#allocation74_spill] sm:$0xff] }
 0x295   :  { %2570 = vmatpush1.msra.mxu0 %v9888_v0  ;;  %2641 = vmatpush1.msra.mxu1 %v9889_v1  ;;  %v9929_v0 = vld [vmem:[#allocation75_spill] sm:$0xff]  ;;  %v9930_v1 = vld [vmem:[#allocation76_spill] sm:$0xff] }
 0x296   :  { %2571 = vmatprep.subr.mxu0 %v9890_v2  ;;  %2642 = vmatprep.subr.mxu1 %v9891_v3  ;;  %v9931_v2 = vld [vmem:[#allocation77_spill] sm:$0xff]  ;;  %v9932_v3 = vld [vmem:[#allocation78_spill] sm:$0xff] }
 0x297   :  { %2572 = vmatpush1.msra.mxu0 %v9892_v4  ;;  %2643 = vmatpush1.msra.mxu1 %v9893_v5  ;;  %v9933_v4 = vld [vmem:[#allocation79_spill] sm:$0xff]  ;;  %v9934_v5 = vld [vmem:[#allocation80_spill] sm:$0xff] }
 0x298   :  { %2573 = vmatprep.subr.mxu0 %v9894_v6  ;;  %2644 = vmatprep.subr.mxu1 %v9895_v7  ;;  %v9935_v6 = vld [vmem:[#allocation81_spill] sm:$0xff]  ;;  %v9936_v7 = vld [vmem:[#allocation82_spill] sm:$0xff] }
 0x299   :  { %2574 = vmatpush1.msra.mxu0 %v9896_v47  ;;  %2645 = vmatpush1.msra.mxu1 %v9897_v10  ;;  %v9937_v47 = vld [vmem:[#allocation83_spill] sm:$0xff]  ;;  %v9938_v10 = vld [vmem:[#allocation84_spill] sm:$0xff] }
 0x29a   :  { %2575 = vmatprep.subr.mxu0 %v9898_v33  ;;  %2646 = vmatprep.subr.mxu1 %v9899_v9  ;;  %v9939_v33 = vld [vmem:[#allocation85_spill] sm:$0xff]  ;;  %v9940_v9 = vld [vmem:[#allocation86_spill] sm:$0xff] }
 0x29b   :  { %2576 = vmatpush1.msra.mxu0 %v9900_v11  ;;  %2647 = vmatpush1.msra.mxu1 %v9901_v16  ;;  %v9941_v11 = vld [vmem:[#allocation87_spill] sm:$0xff]  ;;  %v9942_v16 = vld [vmem:[#allocation88_spill] sm:$0xff] }
 0x29c   :  { %2577 = vmatprep.subr.mxu0 %v9902_v17  ;;  %2648 = vmatprep.subr.mxu1 %v9903_v21  ;;  %v9943_v17 = vld [vmem:[#allocation89_spill] sm:$0xff]  ;;  %v9944_v21 = vld [vmem:[#allocation90_spill] sm:$0xff] }
 0x29d   :  { %2578 = vmatpush1.msra.mxu0 %v9904_v22  ;;  %2649 = vmatpush1.msra.mxu1 %v9905_v28  ;;  %v9945_v22 = vld [vmem:[#allocation91_spill] sm:$0xff]  ;;  %v9946_v28 = vld [vmem:[#allocation92_spill] sm:$0xff] }
 0x29e   :  { %2579 = vmatprep.subr.mxu0 %v9906_v29  ;;  %2650 = vmatprep.subr.mxu1 %v9907_v35  ;;  %v9947_v29 = vld [vmem:[#allocation93_spill] sm:$0xff] }
 0x29f   :  { %2580 = vmatpush1.msra.mxu0 %v9908_v36  ;;  %2651 = vmatpush1.msra.mxu1 %v9909_v38 }
 0x2a0   :  { %2581 = vmatprep.subr.mxu0 %v9910_v39  ;;  %2652 = vmatprep.subr.mxu1 %v9911_v42 }
 0x2a1   :  { %2582 = vmatpush1.msra.mxu0 %v9912_v43  ;;  %2653 = vmatpush1.msra.mxu1 %v9913_v45 }
 0x2a2   :  { %2583 = vmatprep.subr.mxu0 %v9914_v46  ;;  %2654 = vmatprep.subr.mxu1 %v9915_v48  ;;  %v9948_v48 = vld [vmem:[#allocation98_spill] sm:$0xff] }
 0x2a3   :  { %2584 = vmatpush1.msra.mxu0 %v9916_v49  ;;  %2655 = vmatpush1.msra.mxu1 %v9917_v50 }
 0x2a4   :  { %2585 = vmatprep.subr.mxu0 %v9918_v51  ;;  %2656 = vmatprep.subr.mxu1 %v9919_v52 }
 0x2a5   :  { %2586 = vmatpush1.msra.mxu0 %v9920_v53  ;;  %2657 = vmatpush1.msra.mxu1 %v9921_v55  ;;  %v9949_v53 = vld [vmem:[#allocation100_spill] sm:$0xff] }
 0x2a6   :  { %2587 = vmatprep.subr.mxu0 %v9922_v56  ;;  %2658 = vmatprep.subr.mxu1 %v9923_v57 }
 0x2a7   :  { %2588 = vmatpush1.msra.mxu0 %v9924_v59  ;;  %2659 = vmatpush1.msra.mxu1 %v9925_v60  ;;  %v9950_v60 = vld [vmem:[#allocation101_spill] sm:$0xff] }
 0x2a8   :  { %2589 = vmatprep.subr.mxu0 %v9926_v61  ;;  %2660 = vmatprep.subr.mxu1 %v9927_v62  ;;  %v4806_v62 = vld [vmem:[%s9423_s5 + $0x4] sm:$0xf] }
 0x2a9   :  { %2590 = vmatpush1.msra.mxu0 %v9928_v63  ;;  %2661 = vmatpush1.msra.mxu1 %v9929_v0  ;;  %v9951_v63 = vld [vmem:[#allocation96_spill] sm:$0xff] }
 0x2aa   :  { %2591 = vmatprep.subr.mxu0 %v9930_v1  ;;  %2662 = vmatprep.subr.mxu1 %v9931_v2  ;;  %v1849_v0 = vrot.slane %v4806_v62, %v9951_v63  ;;  %v9952_v1 = vld [vmem:[#allocation99_spill] sm:$0xff] }
 0x2ab   :  { %2592 = vmatpush1.msra.mxu0 %v9932_v3  ;;  %2663 = vmatpush1.msra.mxu1 %v9933_v4  ;;  %v9953_v4 = vld [vmem:[#allocation94_spill] sm:$0xff] }
 0x2ac   :  { %2593 = vmatprep.subr.mxu0 %v9934_v5  ;;  %2664 = vmatprep.subr.mxu1 %v9935_v6  ;;  %v1845_v5 = vrot.slane %v4806_v62, %v9953_v4 }
 0x2ad   :  { %2594 = vmatpush1.msra.mxu0 %v9936_v7  ;;  %2665 = vmatpush1.msra.mxu1 %v9937_v47 }
 0x2ae   :  { %2595 = vmatprep.subr.mxu0 %v9938_v10  ;;  %2666 = vmatprep.subr.mxu1 %v9939_v33 }
 0x2af   :  { %2596 = vmatpush1.msra.mxu0 %v9940_v9  ;;  %2667 = vmatpush1.msra.mxu1 %v9941_v11 }
 0x2b0   :  { %2597 = vmatprep.subr.mxu0 %v9942_v16  ;;  %2668 = vmatprep.subr.mxu1 %v9943_v17 }
 0x2b1   :  { %2598 = vmatpush1.msra.mxu0 %v9944_v21  ;;  %2669 = vmatpush1.msra.mxu1 %v9945_v22 }
 0x2b2   :  { %2631 = vmatprep.mubr.f32.mxu0 %v9857_v40  ;;  %2702 = vmatprep.mubr.f32.mxu1 %v9857_v40 }
 0x2b3   :  { %2773 = vmatprep.subr.mxu0 %v9946_v28  ;;  %2844 = vmatprep.subr.mxu1 %v9947_v29 }
 0x30e   :  { %v1928_v35 = vpop.f32.mrf.mxu0  ;;  %v1999_v38 = vpop.f32.mrf.mxu1 }
 0x30f   :  { %v1929_v33 = vadd.f32 %v1928_v35, %v1845_v5  ;;  %v9954_v35 = vld [vmem:[#allocation97_spill] sm:$0xff]  ;;  %v9969_v5 = vld [vmem:[#allocation123_spill] sm:$0xff] }
 0x310   :  { %v1930_v36 = vpop.f32.mrf.mxu0  ;;  %v2001_v42 = vpop.f32.mrf.mxu1 }
 0x311   :  { %v1931_v7 = vadd.f32 %v1930_v36, %v1849_v0 }
 0x32f   :  { %v2135_v39 = vpop.f32.mrf.mxu0  ;;  %v2206_v45 = vpop.f32.mrf.mxu1 }
 0x330   :  { %v2211_v16 = vadd.f32 %v2135_v39, %v1929_v33  ;;  %v9955_v39 = vld [vmem:[#allocation95_spill] sm:$0xff]  ;;  %v9974_v33 = vld [vmem:[#allocation128_spill] sm:$0xff] }
 0x331   :  { %v2137_v43 = vpop.f32.mrf.mxu0  ;;  %v2208_v51 = vpop.f32.mrf.mxu1 }
 0x332   :  { %v2212_v9 = vadd.f32 %v2137_v43, %v1931_v7  ;;  %v4871_v21 = vmul.f32 -1.442695, %v2211_v16  ;;  %v1857_v43 = vrot.slane %v4806_v62, %v9954_v35  ;;  %v9971_v7 = vld [vmem:[#allocation125_spill] sm:$0xff]  ;;  %v9977_v16 = vld [vmem:[#allocation131_spill] sm:$0xff] }
 0x334   :  { %v4872_v17 = vmul.f32 -1.442695, %v2212_v9  ;;  %v9975_v9 = vld [vmem:[#allocation129_spill] sm:$0xff] }
 0x351   :  { %v2377_v46 = vpop.f32.mrf.mxu0  ;;  %v2448_v56 = vpop.f32.mrf.mxu1 }
 0x352   :  { %v2453_v49 = vadd.f32 %v2377_v46, %v9948_v48  ;;  %v2455_v2 = vadd.f32 %v2448_v56, %v9952_v1  ;;  %v2002_v56 = vadd.f32 %v2001_v42, %v1857_v43  ;;  %v9965_v42 = vld [vmem:[#allocation119_spill] sm:$0xff]  ;;  %v9987_v43 = vld [vmem:[#allocation141_spill] sm:$0xff] }
 0x353   :  { %v2379_v50 = vpop.f32.mrf.mxu0  ;;  %v2450_v59 = vpop.f32.mrf.mxu1 }
 0x354   :  { %v4874_v52 = vmul.f32 -1.442695, %v2453_v49  ;;  %v2454_v55 = vadd.f32 %v2379_v50, %v9949_v53  ;;  %v2456_v61 = vadd.f32 %v2450_v59, %v9950_v60  ;;  %v1853_v53 = vrot.slane %v4806_v62, %v9955_v39  ;;  %v9968_v62 = vld [vmem:[#allocation122_spill] sm:$0xff] }
 0x356   :  { %5718 = vpow2.f32 %v4874_v52  ;;  %v4875_v57 = vmul.f32 -1.442695, %v2454_v55  ;;  %v4876_v3 = vmul.f32 -1.442695, %v2456_v61  ;;  %v2000_v59 = vadd.f32 %v1999_v38, %v1853_v53  ;;  %v9989_v53 = vld [vmem:[#allocation143_spill] sm:$0xff] }
 0x357   :  { %v2214_v61 = vadd.f32 %v2208_v51, %v2002_v56  ;;  %v9967_v51 = vld [vmem:[#allocation121_spill] sm:$0xff] }
 0x358   :  { %5720 = vpow2.f32 %v4875_v57  ;;  %v2213_v0 = vadd.f32 %v2206_v45, %v2000_v59  ;;  %v9966_v45 = vld [vmem:[#allocation120_spill] sm:$0xff]  ;;  %v9991_v56 = vld [vmem:[#allocation145_spill] sm:$0xff]  ;;  %v9993_v59 = vld [vmem:[#allocation147_spill] sm:$0xff] }
 0x359   :  { %5722 = vtanh.f32 %v2455_v2 }
 0x35a   :  { %5724 = vpow2.f32 %v4876_v3 }
 0x363   :  { %v5719_v6 = vpop.eup %5718 }
 0x364   :  { %v2460_v47 = vadd.f32 1.0, %v5719_v6  ;;  %v9970_v6 = vld [vmem:[#allocation124_spill] sm:$0xff] }
 0x365   :  { %v5721_v10 = vpop.eup %5720 }
 0x366   :  { %5726 = vrcp.f32 %v2460_v47  ;;  %v2466_v11 = vadd.f32 1.0, %v5721_v10  ;;  %v5723_v22 = vpop.eup %5722  ;;  %v9972_v47 = vld [vmem:[#allocation126_spill] sm:$0xff]  ;;  %v9973_v10 = vld [vmem:[#allocation127_spill] sm:$0xff] }
 0x367   :  { %v5725_v28 = vpop.eup %5724 }
 0x368   :  { %5728 = vrcp.f32 %v2466_v11  ;;  %v2473_v36 = vadd.f32 1.0, %v5725_v28  ;;  %v9976_v11 = vld [vmem:[#allocation130_spill] sm:$0xff]  ;;  %v9981_v28 = vld [vmem:[#allocation135_spill] sm:$0xff] }
 0x369   :  { %5730 = vpow2.f32 %v4872_v17  ;;  %v9978_v17 = vld [vmem:[#allocation132_spill] sm:$0xff] }
 0x36a   :  { %5732 = vpow2.f32 %v4871_v21  ;;  %v9979_v21 = vld [vmem:[#allocation133_spill] sm:$0xff] }
 0x36b   :  { %5734 = vrcp.f32 %v2473_v36  ;;  %v9985_v36 = vld [vmem:[#allocation139_spill] sm:$0xff] }
 0x373   :  { %v5727_v29 = vpop.eup %5726 }
 0x374   :  { %v2477_v46 = vmul.f32 %v5727_v29, %v5723_v22  ;;  %v9980_v22 = vld [vmem:[#allocation134_spill] sm:$0xff]  ;;  %v9982_v29 = vld [vmem:[#allocation136_spill] sm:$0xff] }
 0x375   :  { %v5729_v48 = vpop.eup %5728 }
 0x376   :  { %v2476_v49 = vmul.f32 %v5729_v48, %v7278_v24  ;;  %v5731_v52 = vpop.eup %5730  ;;  %v4873_v24 = vmul.f32 -1.442695, %v2214_v61  ;;  %v9984_v48 = vld [vmem:[#allocation138_spill] sm:$0xff]  ;;  %v9994_v61 = vld [vmem:[#allocation148_spill] sm:$0xff] }
 0x377   :  { %v5733_v55 = vpop.eup %5732  ;;  %v2224_v57 = vadd.f32 1.0, %v5731_v52  ;;  %v9988_v52 = vld [vmem:[#allocation142_spill] sm:$0xff] }
 0x378   :  { %v7811_v50 = vadd.f32 %v2477_v46, %v2476_v49  ;;  %v2218_v60 = vadd.f32 1.0, %v5733_v55  ;;  %v5735_v1 = vpop.eup %5734  ;;  %v9983_v46 = vld [vmem:[#allocation137_spill] sm:$0xff]  ;;  %v9986_v49 = vld [vmem:[#allocation140_spill] sm:$0xff] }
 0x379   :  { %v9990_v55 = vld [vmem:[#allocation144_spill] sm:$0xff] }
 0x37a   :  { %5736 = vtanh.f32 %v7811_v50 }
 0x37b   :  { %5738 = vrcp.f32 %v2224_v57  ;;  %v9992_v57 = vld [vmem:[#allocation146_spill] sm:$0xff] }
 0x37c   :  { %5740 = vrcp.f32 %v2218_v60 }
 0x37d   :  { %5742 = vtanh.f32 %v2213_v0  ;;  %v9995_v0 = vld [vmem:[#allocation149_spill] sm:$0xff] }
 0x37e   :  { %5744 = vpow2.f32 %v4873_v24 }
 0x387   :  { %v5737_v2 = vpop.eup %5736 }
 0x388   :  { %v7816_v3 = vmul.f32 %v5737_v2, %v5735_v1  ;;  %v5739_v38 = vpop.eup %5738  ;;  %v9996_v1 = vld [vmem:[#allocation150_spill] sm:$0xff] }
 0x38a   :  { %2632 = vmatmul.mubr.f32.vlgmr.msra.gmra.mxu0 %v7816_v3  ;;  %2703 = vmatmul.mubr.f32.vlgmr.msra.gmra.mxu1 %v7816_v3 }
 0x38b   :  { %2774 = vmatpush1.msra.mxu0 %v7286_v8  ;;  %2845 = vmatpush1.msra.mxu1 %v7291_v54  ;;  %v5741_v8 = vpop.eup %5740  ;;  %v2234_v54 = vmul.f32 0.0, %v5739_v38  ;;  %v7919_v38 = vld [vmem:[%s9421_s4 + $0x1d8] sm:$0xff] }
 0x38c   :  { %2775 = vmatprep.subr.mxu0 %v7296_v44  ;;  %2846 = vmatprep.subr.mxu1 %v7301_v37  ;;  %v5743_v44 = vpop.eup %5742 }
 0x38d   :  { %2776 = vmatpush1.msra.mxu0 %v7308_v58  ;;  %2847 = vmatpush1.msra.mxu1 %v7313_v19  ;;  %v2235_v37 = vmul.f32 %v5743_v44, %v5741_v8  ;;  %v9956_v58 = vld [vmem:[#allocation110_spill] sm:$0xff]  ;;  %v9957_v19 = vld [vmem:[#allocation111_spill] sm:$0xff]  ;;  %v7926_v8 = vld [vmem:[%s9421_s4 + $0x1c0] sm:$0xff] }
 0x38e   :  { %2777 = vmatprep.subr.mxu0 %v7320_v14  ;;  %2848 = vmatprep.subr.mxu1 %v7325_v31  ;;  %v5745_v14 = vpop.eup %5744  ;;  %v9958_v31 = vld [vmem:[#allocation112_spill] sm:$0xff]  ;;  %v7938_v44 = vld [vmem:[%s9421_s4 + $0x1a8] sm:$0xff] }
 0x38f   :  { %2778 = vmatpush1.msra.mxu0 %v7332_v12  ;;  %2849 = vmatpush1.msra.mxu1 %v7337_v27  ;;  %v9959_v12 = vld [vmem:[#allocation113_spill] sm:$0xff]  ;;  %v7840_v27 = vadd.f32 %v2235_v37, %v2234_v54  ;;  %v7931_v54 = vld [vmem:[%s9421_s4 + $0x1d0] sm:$0xff]  ;;  %v7943_v37 = vld [vmem:[%s9421_s4 + $0x1b8] sm:$0xff] }
 0x390   :  { %2779 = vmatprep.subr.mxu0 %v7344_v26  ;;  %2850 = vmatprep.subr.mxu1 %v7349_v34  ;;  %v9960_v26 = vld [vmem:[#allocation114_spill] sm:$0xff]  ;;  %v9961_v34 = vld [vmem:[#allocation115_spill] sm:$0xff] }
 0x391   :  { %2780 = vmatpush1.msra.mxu0 %v7356_v18  ;;  %2851 = vmatpush1.msra.mxu1 %v7361_v20  ;;  %v9962_v18 = vld [vmem:[#allocation116_spill] sm:$0xff]  ;;  %v9963_v20 = vld [vmem:[#allocation117_spill] sm:$0xff]  ;;  %5746 = vtanh.f32 %v7840_v27 }
 0x392   :  { %2781 = vmatprep.subr.mxu0 %v7368_v25  ;;  %2852 = vmatprep.subr.mxu1 %v7373_v15  ;;  %v2231_v25 = vadd.f32 1.0, %v5745_v14  ;;  %v9964_v15 = vld [vmem:[#allocation118_spill] sm:$0xff]  ;;  %v7962_v14 = vld [vmem:[%s9421_s4 + $0x188] sm:$0xff] }
 0x393   :  { %2782 = vmatpush1.msra.mxu0 %v9956_v58  ;;  %2853 = vmatpush1.msra.mxu1 %v9957_v19  ;;  %v7950_v58 = vld [vmem:[%s9421_s4 + $0x1a0] sm:$0xff]  ;;  %v7955_v19 = vld [vmem:[%s9421_s4 + $0x1b0] sm:$0xff] }
 0x394   :  { %2783 = vmatprep.subr.mxu0 %v9958_v31  ;;  %2854 = vmatprep.subr.mxu1 %v9959_v12  ;;  %5748 = vrcp.f32 %v2231_v25  ;;  %v7967_v31 = vld [vmem:[%s9421_s4 + $0x198] sm:$0xff]  ;;  %v7974_v12 = vld [vmem:[%s9421_s4 + $0x180] sm:$0xff]  ;;  %v8003_v25 = vld [vmem:[%s9421_s4 + $0x170] sm:$0xff] }
 0x395   :  { %2784 = vmatpush1.msra.mxu0 %v9960_v26  ;;  %2855 = vmatpush1.msra.mxu1 %v9961_v34  ;;  %v7979_v26 = vld [vmem:[%s9421_s4 + $0x190] sm:$0xff]  ;;  %v7986_v34 = vld [vmem:[%s9421_s4 + $0x168] sm:$0xff] }
 0x396   :  { %2785 = vmatprep.subr.mxu0 %v9962_v18  ;;  %2856 = vmatprep.subr.mxu1 %v9963_v20  ;;  %v7991_v18 = vld [vmem:[%s9421_s4 + $0x178] sm:$0xff]  ;;  %v7998_v20 = vld [vmem:[%s9421_s4 + $0x160] sm:$0xff] }
 0x397   :  { %2786 = vmatpush1.msra.mxu0 %v9964_v15  ;;  %2857 = vmatpush1.msra.mxu1 %v9965_v42  ;;  %v8010_v15 = vld [vmem:[%s9421_s4 + $0x148] sm:$0xff]  ;;  %v8015_v42 = vld [vmem:[%s9421_s4 + $0x158] sm:$0xff] }
 0x398   :  { %2787 = vmatprep.subr.mxu0 %v9966_v45  ;;  %2858 = vmatprep.subr.mxu1 %v9967_v51  ;;  %v8022_v45 = vld [vmem:[%s9421_s4 + $0x140] sm:$0xff]  ;;  %v8027_v51 = vld [vmem:[%s9421_s4 + $0x150] sm:$0xff] }
 0x399   :  { %2788 = vmatpush1.msra.mxu0 %v9968_v62  ;;  %2859 = vmatpush1.msra.mxu1 %v9969_v5  ;;  %v8034_v62 = vld [vmem:[%s9421_s4 + $0x128] sm:$0xff]  ;;  %v8039_v5 = vld [vmem:[%s9421_s4 + $0x138] sm:$0xff] }
 0x39a   :  { %2789 = vmatprep.subr.mxu0 %v9970_v6  ;;  %2860 = vmatprep.subr.mxu1 %v9971_v7  ;;  %v8046_v6 = vld [vmem:[%s9421_s4 + $0x120] sm:$0xff]  ;;  %v8051_v7 = vld [vmem:[%s9421_s4 + $0x130] sm:$0xff] }
 0x39b   :  { %2790 = vmatpush1.msra.mxu0 %v9972_v47  ;;  %2861 = vmatpush1.msra.mxu1 %v9973_v10  ;;  %v8058_v47 = vld [vmem:[%s9421_s4 + $0x108] sm:$0xff]  ;;  %v8063_v10 = vld [vmem:[%s9421_s4 + $0x118] sm:$0xff] }
 0x39c   :  { %2791 = vmatprep.subr.mxu0 %v9974_v33  ;;  %2862 = vmatprep.subr.mxu1 %v9975_v9  ;;  %v8070_v33 = vld [vmem:[%s9421_s4 + $0x100] sm:$0xff]  ;;  %v8075_v9 = vld [vmem:[%s9421_s4 + $0x110] sm:$0xff] }
 0x39d   :  { %2792 = vmatpush1.msra.mxu0 %v9976_v11  ;;  %2863 = vmatpush1.msra.mxu1 %v9977_v16  ;;  %9998 = vst [vmem:[#allocation5_spill] sm:$0xff] %v8075_v9  ;;  %v8082_v11 = vld [vmem:[%s9421_s4 + $0xe8] sm:$0xff]  ;;  %v8087_v16 = vld [vmem:[%s9421_s4 + $0xf8] sm:$0xff] }
 0x39e   :  { %2793 = vmatprep.subr.mxu0 %v9978_v17  ;;  %2864 = vmatprep.subr.mxu1 %v9979_v21  ;;  %v5747_v60 = vpop.eup %5746  ;;  %9999 = vst [vmem:[#allocation6_spill] sm:$0xff] %v8082_v11  ;;  %10000 = vst [vmem:[#allocation7_spill] sm:$0xff] %v8087_v16  ;;  %v8094_v17 = vld [vmem:[%s9421_s4 + $0xe0] sm:$0xff]  ;;  %v8099_v21 = vld [vmem:[%s9421_s4 + $0xf0] sm:$0xff] }
 0x39f   :  { %2794 = vmatpush1.msra.mxu0 %v9980_v22  ;;  %2865 = vmatpush1.msra.mxu1 %v9981_v28  ;;  %10001 = vst [vmem:[#allocation8_spill] sm:$0xff] %v8094_v17  ;;  %10002 = vst [vmem:[#allocation9_spill] sm:$0xff] %v8099_v21  ;;  %v8106_v22 = vld [vmem:[%s9421_s4 + $0xc8] sm:$0xff]  ;;  %v8111_v28 = vld [vmem:[%s9421_s4 + $0xd8] sm:$0xff] }
 0x3a0   :  { %2795 = vmatprep.subr.mxu0 %v9982_v29  ;;  %2866 = vmatprep.subr.mxu1 %v9983_v46  ;;  %10003 = vst [vmem:[#allocation10_spill] sm:$0xff] %v8106_v22  ;;  %10004 = vst [vmem:[#allocation11_spill] sm:$0xff] %v8111_v28  ;;  %v8118_v29 = vld [vmem:[%s9421_s4 + $0xc0] sm:$0xff]  ;;  %v8123_v46 = vld [vmem:[%s9421_s4 + $0xd0] sm:$0xff] }
 0x3a1   :  { %2796 = vmatpush1.msra.mxu0 %v9984_v48  ;;  %2867 = vmatpush1.msra.mxu1 %v9985_v36  ;;  %v5749_v24 = vpop.eup %5748  ;;  %10005 = vst [vmem:[#allocation12_spill] sm:$0xff] %v8118_v29  ;;  %10006 = vst [vmem:[#allocation13_spill] sm:$0xff] %v8123_v46  ;;  %v8130_v48 = vld [vmem:[%s9421_s4 + $0xa8] sm:$0xff]  ;;  %v8135_v36 = vld [vmem:[%s9421_s4 + $0xb8] sm:$0xff] }
 0x3a2   :  { %2797 = vmatprep.subr.mxu0 %v9986_v49  ;;  %2868 = vmatprep.subr.mxu1 %v9987_v43  ;;  %v7885_v2 = vmul.f32 %v5749_v24, %v5747_v60  ;;  %10007 = vst [vmem:[#allocation14_spill] sm:$0xff] %v8130_v48  ;;  %10008 = vst [vmem:[#allocation15_spill] sm:$0xff] %v8135_v36  ;;  %v8142_v49 = vld [vmem:[%s9421_s4 + $0xa0] sm:$0xff]  ;;  %v8147_v43 = vld [vmem:[%s9421_s4 + $0xb0] sm:$0xff] }
 0x3a3   :  { %2798 = vmatpush1.msra.mxu0 %v9988_v52  ;;  %2869 = vmatpush1.msra.mxu1 %v9989_v53  ;;  %10009 = vst [vmem:[#allocation16_spill] sm:$0xff] %v8142_v49  ;;  %10010 = vst [vmem:[#allocation17_spill] sm:$0xff] %v8147_v43  ;;  %v8154_v52 = vld [vmem:[%s9421_s4 + $0x88] sm:$0xff]  ;;  %v8159_v53 = vld [vmem:[%s9421_s4 + $0x98] sm:$0xff] }
 0x3a4   :  { %2799 = vmatprep.subr.mxu0 %v9990_v55  ;;  %2870 = vmatprep.subr.mxu1 %v9991_v56  ;;  %9997 = vst [vmem:[#allocation4_spill] sm:$0xff] %v7885_v2  ;;  %10011 = vst [vmem:[#allocation18_spill] sm:$0xff] %v8154_v52  ;;  %v8166_v55 = vld [vmem:[%s9421_s4 + $0x80] sm:$0xff]  ;;  %v8171_v56 = vld [vmem:[%s9421_s4 + $0x90] sm:$0xff] }
 0x3a5   :  { %2800 = vmatpush1.msra.mxu0 %v9992_v57  ;;  %2871 = vmatpush1.msra.mxu1 %v9993_v59  ;;  %10012 = vst [vmem:[#allocation19_spill] sm:$0xff] %v8159_v53  ;;  %10013 = vst [vmem:[#allocation20_spill] sm:$0xff] %v8166_v55  ;;  %v8178_v57 = vld [vmem:[%s9421_s4 + $0x68] sm:$0xff]  ;;  %v8183_v59 = vld [vmem:[%s9421_s4 + $0x78] sm:$0xff] }
 0x3a6   :  { %2801 = vmatprep.subr.mxu0 %v7608_v32  ;;  %2872 = vmatprep.subr.mxu1 %v9994_v61  ;;  %v7890_v32 = vld [vmem:[%s9421_s4 + $0x1e8] sm:$0xff]  ;;  %10014 = vst [vmem:[#allocation21_spill] sm:$0xff] %v8171_v56  ;;  %10015 = vst [vmem:[#allocation22_spill] sm:$0xff] %v8178_v57  ;;  %v8190_v60 = vld [vmem:[%s9421_s4 + $0x60] sm:$0xff] }
 0x3a7   :  { %2802 = vmatpush1.msra.mxu0 %v7620_v13  ;;  %2873 = vmatpush1.msra.mxu1 %v9995_v0  ;;  %v7895_v13 = vld [vmem:[%s9421_s4 + $0x1f8] sm:$0xff]  ;;  %10016 = vst [vmem:[#allocation23_spill] sm:$0xff] %v8183_v59  ;;  %10017 = vst [vmem:[#allocation24_spill] sm:$0xff] %v8190_v60  ;;  %v8195_v61 = vld [vmem:[%s9421_s4 + $0x70] sm:$0xff] }
 0x3a8   :  { %2803 = vmatprep.subr.mxu0 %v7632_v30  ;;  %2874 = vmatprep.subr.mxu1 %v9996_v1  ;;  %v7902_v30 = vld [vmem:[%s9421_s4 + $0x1e0] sm:$0xff]  ;;  %10018 = vst [vmem:[#allocation25_spill] sm:$0xff] %v8195_v61  ;;  %v8202_v0 = vld [vmem:[%s9421_s4 + $0x48] sm:$0xff]  ;;  %v8207_v24 = vld [vmem:[%s9421_s4 + $0x58] sm:$0xff] }
 0x3a9   :  { %2804 = vmatpush1.msra.mxu0 %v7644_v23  ;;  %2837 = vmatprep.mubr.f32.mxu0 %v9857_v40  ;;  %v7907_v23 = vld [vmem:[%s9421_s4 + $0x1f0] sm:$0xff]  ;;  %10019 = vst [vmem:[#allocation26_spill] sm:$0xff] %v8202_v0  ;;  %10020 = vst [vmem:[#allocation27_spill] sm:$0xff] %v8207_v24  ;;  %v8214_v1 = vld [vmem:[%s9421_s4 + $0x40] sm:$0xff] }
 0x3aa   :  { %2875 = vmatpush1.msra.mxu1 %v7651_v41  ;;  %2908 = vmatprep.mubr.f32.mxu1 %v9857_v40  ;;  %v7914_v41 = vld [vmem:[%s9421_s4 + $0x1c8] sm:$0xff]  ;;  %10021 = vst [vmem:[#allocation28_spill] sm:$0xff] %v8214_v1 }
 0x3ab   :  { %2838 = vmatmul.mubr.f32.vlgmr.msra.gmra.mxu0 %v7885_v2  ;;  %2909 = vmatmul.mubr.f32.vlgmr.msra.gmra.mxu1 %v7885_v2  ;;  %v8219_v2 = vld [vmem:[%s9421_s4 + $0x50] sm:$0xff] }
 0x3ac   :  { %3016 = vmatprep.subr.mxu0 %v7890_v32  ;;  %3087 = vmatprep.subr.mxu1 %v7895_v13  ;;  %10022 = vst [vmem:[#allocation29_spill] sm:$0xff] %v8219_v2 }
 0x3ad   :  { %3017 = vmatpush1.msra.mxu0 %v7902_v30  ;;  %3088 = vmatpush1.msra.mxu1 %v7907_v23 }
 0x3ae   :  { %3018 = vmatprep.subr.mxu0 %v7914_v41  ;;  %3089 = vmatprep.subr.mxu1 %v7919_v38 }
 0x3af   :  { %3019 = vmatpush1.msra.mxu0 %v7926_v8  ;;  %3090 = vmatpush1.msra.mxu1 %v7931_v54 }
 0x3b0   :  { %3020 = vmatprep.subr.mxu0 %v7938_v44  ;;  %3091 = vmatprep.subr.mxu1 %v7943_v37 }
 0x3b1   :  { %3021 = vmatpush1.msra.mxu0 %v7950_v58  ;;  %3092 = vmatpush1.msra.mxu1 %v7955_v19 }
 0x3b2   :  { %3022 = vmatprep.subr.mxu0 %v7962_v14  ;;  %3093 = vmatprep.subr.mxu1 %v7967_v31 }
 0x3b3   :  { %3023 = vmatpush1.msra.mxu0 %v7974_v12  ;;  %3094 = vmatpush1.msra.mxu1 %v7979_v26 }
 0x3b4   :  { %3024 = vmatprep.subr.mxu0 %v7986_v34  ;;  %3095 = vmatprep.subr.mxu1 %v7991_v18 }
 0x3b5   :  { %3025 = vmatpush1.msra.mxu0 %v7998_v20  ;;  %3096 = vmatpush1.msra.mxu1 %v8003_v25 }
 0x3b6   :  { %3026 = vmatprep.subr.mxu0 %v8010_v15  ;;  %3097 = vmatprep.subr.mxu1 %v8015_v42 }
 0x3b7   :  { %3027 = vmatpush1.msra.mxu0 %v8022_v45  ;;  %3098 = vmatpush1.msra.mxu1 %v8027_v51 }
 0x3b8   :  { %3028 = vmatprep.subr.mxu0 %v8034_v62  ;;  %3099 = vmatprep.subr.mxu1 %v8039_v5 }
 0x3b9   :  { %3029 = vmatpush1.msra.mxu0 %v8046_v6  ;;  %3100 = vmatpush1.msra.mxu1 %v8051_v7 }
 0x3ba   :  { %3030 = vmatprep.subr.mxu0 %v8058_v47  ;;  %3101 = vmatprep.subr.mxu1 %v8063_v10 }
 0x3bb   :  { %3031 = vmatpush1.msra.mxu0 %v8070_v33  ;;  %3102 = vmatpush1.msra.mxu1 %v8075_v9 }
 0x3bc   :  { %3032 = vmatprep.subr.mxu0 %v8082_v11  ;;  %3103 = vmatprep.subr.mxu1 %v8087_v16 }
 0x3bd   :  { %3033 = vmatpush1.msra.mxu0 %v8094_v17  ;;  %3104 = vmatpush1.msra.mxu1 %v8099_v21  ;;  %v10100_v17 = vld [vmem:[#allocation103_spill] sm:$0xff] }
 0x3be   :  { %3034 = vmatprep.subr.mxu0 %v8106_v22  ;;  %3105 = vmatprep.subr.mxu1 %v8111_v28  ;;  %v4941_v22 = vld [vmem:[%s9423_s5 + $0x4] sm:$0xf] }
 0x3bf   :  { %3035 = vmatpush1.msra.mxu0 %v8118_v29  ;;  %3106 = vmatpush1.msra.mxu1 %v8123_v46  ;;  %v10099_v29 = vld [vmem:[#allocation105_spill] sm:$0xff]  ;;  %v2554_v21 = vrot.slane %v4941_v22, %v9951_v63 }
 0x3c0   :  { %3036 = vmatprep.subr.mxu0 %v8130_v48  ;;  %3107 = vmatprep.subr.mxu1 %v8135_v36 }
 0x3c1   :  { %3037 = vmatpush1.msra.mxu0 %v8142_v49  ;;  %3108 = vmatpush1.msra.mxu1 %v8147_v43  ;;  %v10097_v49 = vld [vmem:[#allocation102_spill] sm:$0xff] }
 0x3c2   :  { %3038 = vmatprep.subr.mxu0 %v8154_v52  ;;  %3109 = vmatprep.subr.mxu1 %v8159_v53 }
 0x3c3   :  { %3039 = vmatpush1.msra.mxu0 %v8166_v55  ;;  %3110 = vmatpush1.msra.mxu1 %v8171_v56 }
 0x3c4   :  { %3040 = vmatprep.subr.mxu0 %v8178_v57  ;;  %3111 = vmatprep.subr.mxu1 %v8183_v59  ;;  %v8226_v57 = vld [vmem:[%s9421_s4 + $0x28] sm:$0xff]  ;;  %v8231_v59 = vld [vmem:[%s9421_s4 + $0x38] sm:$0xff] }
 0x3c5   :  { %3041 = vmatpush1.msra.mxu0 %v8190_v60  ;;  %3112 = vmatpush1.msra.mxu1 %v8195_v61  ;;  %10023 = vst [vmem:[#allocation30_spill] sm:$0xff] %v8226_v57  ;;  %10024 = vst [vmem:[#allocation31_spill] sm:$0xff] %v8231_v59  ;;  %v8238_v60 = vld [vmem:[%s9421_s4 + $0x20] sm:$0xff]  ;;  %v8243_v61 = vld [vmem:[%s9421_s4 + $0x30] sm:$0xff] }
 0x3c6   :  { %3042 = vmatprep.subr.mxu0 %v8202_v0  ;;  %3113 = vmatprep.subr.mxu1 %v8207_v24  ;;  %10025 = vst [vmem:[#allocation32_spill] sm:$0xff] %v8238_v60  ;;  %10026 = vst [vmem:[#allocation33_spill] sm:$0xff] %v8243_v61  ;;  %v8250_v0 = vld [vmem:[%s9421_s4 + $0x8] sm:$0xff]  ;;  %v8255_v24 = vld [vmem:[%s9421_s4 + $0x18] sm:$0xff] }
 0x3c7   :  { %3043 = vmatpush1.msra.mxu0 %v8214_v1  ;;  %3114 = vmatpush1.msra.mxu1 %v8219_v2  ;;  %10027 = vst [vmem:[#allocation34_spill] sm:$0xff] %v8250_v0  ;;  %10028 = vst [vmem:[#allocation35_spill] sm:$0xff] %v8255_v24  ;;  %v8262_v1 = vld [vmem:[%s9421_s4] sm:$0xff]  ;;  %v8269_v2 = vld [vmem:[%s9421_s4 + $0x10] sm:$0xff] }
 0x3c8   :  { %3044 = vmatprep.subr.mxu0 %v8226_v57  ;;  %3115 = vmatprep.subr.mxu1 %v8231_v59  ;;  %10029 = vst [vmem:[#allocation36_spill] sm:$0xff] %v8262_v1  ;;  %10030 = vst [vmem:[#allocation37_spill] sm:$0xff] %v8269_v2  ;;  %v8525_v59 = vld [vmem:[%s9420_s3 + $0x2b8] sm:$0xff] }
 0x3c9   :  { %3045 = vmatpush1.msra.mxu0 %v8238_v60  ;;  %3116 = vmatpush1.msra.mxu1 %v8243_v61  ;;  %v8491_v61 = vld [vmem:[%s9420_s3 + $0x2f0] sm:$0xff]  ;;  %v8508_v60 = vld [vmem:[%s9420_s3 + $0x2c0] sm:$0xff]  ;;  %10072 = vst [vmem:[#allocation79_spill] sm:$0xff] %v8525_v59 }
 0x3ca   :  { %3046 = vmatprep.subr.mxu0 %v8250_v0  ;;  %3117 = vmatprep.subr.mxu1 %v8255_v24  ;;  %v8284_v24 = vld [vmem:[%s9420_s3 + $0x3e8] sm:$0xff]  ;;  %10066 = vst [vmem:[#allocation73_spill] sm:$0xff] %v8491_v61  ;;  %10069 = vst [vmem:[#allocation76_spill] sm:$0xff] %v8508_v60 }
 0x3cb   :  { %3047 = vmatpush1.msra.mxu0 %v8262_v1  ;;  %3080 = vmatprep.mubr.f32.mxu0 %v9857_v40  ;;  %10031 = vst [vmem:[#allocation38_spill] sm:$0xff] %v8284_v24  ;;  %v8289_v1 = vld [vmem:[%s9420_s3 + $0x3f8] sm:$0xff]  ;;  %v8474_v0 = vld [vmem:[%s9420_s3 + $0x2e8] sm:$0xff] }
 0x3cc   :  { %3118 = vmatpush1.msra.mxu1 %v8269_v2  ;;  %3151 = vmatprep.mubr.f32.mxu1 %v9857_v40  ;;  %10032 = vst [vmem:[#allocation39_spill] sm:$0xff] %v8289_v1  ;;  %v8301_v2 = vld [vmem:[%s9420_s3 + $0x3f0] sm:$0xff]  ;;  %10063 = vst [vmem:[#allocation70_spill] sm:$0xff] %v8474_v0 }
 0x3cd   :  { %3081 = vmatmul.mubr.f32.vlgmr.msra.gmra.mxu0 %v7816_v3  ;;  %3152 = vmatmul.mubr.f32.vlgmr.msra.gmra.mxu1 %v7816_v3  ;;  %v8296_v3 = vld [vmem:[%s9420_s3 + $0x3e0] sm:$0xff]  ;;  %10034 = vst [vmem:[#allocation41_spill] sm:$0xff] %v8301_v2 }
 0x3ce   :  { %3336 = vmatprep.mubr.f32.mxu0 %v9857_v40  ;;  %3407 = vmatprep.mubr.f32.mxu1 %v9857_v40  ;;  %10033 = vst [vmem:[#allocation40_spill] sm:$0xff] %v8296_v3 }
 0x3cf   :  { %3272 = vmatprep.subr.mxu0 %v8284_v24  ;;  %3343 = vmatprep.subr.mxu1 %v8289_v1  ;;  %v8308_v24 = vld [vmem:[%s9420_s3 + $0x3c8] sm:$0xff]  ;;  %v8313_v1 = vld [vmem:[%s9420_s3 + $0x3d8] sm:$0xff] }
 0x3d0   :  { %3273 = vmatpush1.msra.mxu0 %v8296_v3  ;;  %3344 = vmatpush1.msra.mxu1 %v8301_v2  ;;  %10035 = vst [vmem:[#allocation42_spill] sm:$0xff] %v8308_v24  ;;  %10036 = vst [vmem:[#allocation43_spill] sm:$0xff] %v8313_v1  ;;  %v8320_v3 = vld [vmem:[%s9420_s3 + $0x3c0] sm:$0xff]  ;;  %v8325_v2 = vld [vmem:[%s9420_s3 + $0x3d0] sm:$0xff] }
 0x3d1   :  { %3274 = vmatprep.subr.mxu0 %v8308_v24  ;;  %3345 = vmatprep.subr.mxu1 %v8313_v1  ;;  %10037 = vst [vmem:[#allocation44_spill] sm:$0xff] %v8320_v3  ;;  %10038 = vst [vmem:[#allocation45_spill] sm:$0xff] %v8325_v2  ;;  %v8332_v24 = vld [vmem:[%s9420_s3 + $0x3a8] sm:$0xff]  ;;  %v8337_v1 = vld [vmem:[%s9420_s3 + $0x3b8] sm:$0xff] }
 0x3d2   :  { %3275 = vmatpush1.msra.mxu0 %v8320_v3  ;;  %3346 = vmatpush1.msra.mxu1 %v8325_v2  ;;  %10039 = vst [vmem:[#allocation46_spill] sm:$0xff] %v8332_v24  ;;  %10040 = vst [vmem:[#allocation47_spill] sm:$0xff] %v8337_v1  ;;  %v8344_v3 = vld [vmem:[%s9420_s3 + $0x3a0] sm:$0xff]  ;;  %v8349_v2 = vld [vmem:[%s9420_s3 + $0x3b0] sm:$0xff] }
 0x3d3   :  { %3276 = vmatprep.subr.mxu0 %v8332_v24  ;;  %3347 = vmatprep.subr.mxu1 %v8337_v1  ;;  %10041 = vst [vmem:[#allocation48_spill] sm:$0xff] %v8344_v3  ;;  %10042 = vst [vmem:[#allocation49_spill] sm:$0xff] %v8349_v2  ;;  %v8356_v24 = vld [vmem:[%s9420_s3 + $0x388] sm:$0xff]  ;;  %v8361_v1 = vld [vmem:[%s9420_s3 + $0x398] sm:$0xff] }
 0x3d4   :  { %3277 = vmatpush1.msra.mxu0 %v8344_v3  ;;  %3348 = vmatpush1.msra.mxu1 %v8349_v2  ;;  %10043 = vst [vmem:[#allocation50_spill] sm:$0xff] %v8356_v24  ;;  %10044 = vst [vmem:[#allocation51_spill] sm:$0xff] %v8361_v1  ;;  %v8368_v3 = vld [vmem:[%s9420_s3 + $0x380] sm:$0xff]  ;;  %v8373_v2 = vld [vmem:[%s9420_s3 + $0x390] sm:$0xff] }
 0x3d5   :  { %3278 = vmatprep.subr.mxu0 %v8356_v24  ;;  %3349 = vmatprep.subr.mxu1 %v8361_v1  ;;  %10045 = vst [vmem:[#allocation52_spill] sm:$0xff] %v8368_v3  ;;  %10046 = vst [vmem:[#allocation53_spill] sm:$0xff] %v8373_v2  ;;  %v8380_v24 = vld [vmem:[%s9420_s3 + $0x368] sm:$0xff]  ;;  %v8385_v1 = vld [vmem:[%s9420_s3 + $0x378] sm:$0xff] }
 0x3d6   :  { %3279 = vmatpush1.msra.mxu0 %v8368_v3  ;;  %3350 = vmatpush1.msra.mxu1 %v8373_v2  ;;  %10047 = vst [vmem:[#allocation54_spill] sm:$0xff] %v8380_v24  ;;  %10048 = vst [vmem:[#allocation55_spill] sm:$0xff] %v8385_v1  ;;  %v8392_v3 = vld [vmem:[%s9420_s3 + $0x360] sm:$0xff]  ;;  %v8397_v2 = vld [vmem:[%s9420_s3 + $0x370] sm:$0xff] }
 0x3d7   :  { %3280 = vmatprep.subr.mxu0 %v8380_v24  ;;  %3351 = vmatprep.subr.mxu1 %v8385_v1  ;;  %10049 = vst [vmem:[#allocation56_spill] sm:$0xff] %v8392_v3  ;;  %10050 = vst [vmem:[#allocation57_spill] sm:$0xff] %v8397_v2  ;;  %v8404_v24 = vld [vmem:[%s9420_s3 + $0x348] sm:$0xff]  ;;  %v8409_v1 = vld [vmem:[%s9420_s3 + $0x358] sm:$0xff] }
 0x3d8   :  { %3281 = vmatpush1.msra.mxu0 %v8392_v3  ;;  %3352 = vmatpush1.msra.mxu1 %v8397_v2  ;;  %10051 = vst [vmem:[#allocation58_spill] sm:$0xff] %v8404_v24  ;;  %10052 = vst [vmem:[#allocation59_spill] sm:$0xff] %v8409_v1  ;;  %v8416_v3 = vld [vmem:[%s9420_s3 + $0x340] sm:$0xff]  ;;  %v8421_v2 = vld [vmem:[%s9420_s3 + $0x350] sm:$0xff] }
 0x3d9   :  { %3282 = vmatprep.subr.mxu0 %v8404_v24  ;;  %3353 = vmatprep.subr.mxu1 %v8409_v1  ;;  %10053 = vst [vmem:[#allocation60_spill] sm:$0xff] %v8416_v3  ;;  %10054 = vst [vmem:[#allocation61_spill] sm:$0xff] %v8421_v2  ;;  %v8428_v24 = vld [vmem:[%s9420_s3 + $0x328] sm:$0xff]  ;;  %v8433_v1 = vld [vmem:[%s9420_s3 + $0x338] sm:$0xff] }
 0x3da   :  { %3283 = vmatpush1.msra.mxu0 %v8416_v3  ;;  %3354 = vmatpush1.msra.mxu1 %v8421_v2  ;;  %10055 = vst [vmem:[#allocation62_spill] sm:$0xff] %v8428_v24  ;;  %10056 = vst [vmem:[#allocation63_spill] sm:$0xff] %v8433_v1  ;;  %v8440_v3 = vld [vmem:[%s9420_s3 + $0x320] sm:$0xff]  ;;  %v8445_v2 = vld [vmem:[%s9420_s3 + $0x330] sm:$0xff] }
 0x3db   :  { %3284 = vmatprep.subr.mxu0 %v8428_v24  ;;  %3355 = vmatprep.subr.mxu1 %v8433_v1  ;;  %10057 = vst [vmem:[#allocation64_spill] sm:$0xff] %v8440_v3  ;;  %10058 = vst [vmem:[#allocation65_spill] sm:$0xff] %v8445_v2  ;;  %v8452_v24 = vld [vmem:[%s9420_s3 + $0x308] sm:$0xff]  ;;  %v8457_v1 = vld [vmem:[%s9420_s3 + $0x318] sm:$0xff] }
 0x3dc   :  { %3285 = vmatpush1.msra.mxu0 %v8440_v3  ;;  %3356 = vmatpush1.msra.mxu1 %v8445_v2  ;;  %10059 = vst [vmem:[#allocation66_spill] sm:$0xff] %v8452_v24  ;;  %10060 = vst [vmem:[#allocation67_spill] sm:$0xff] %v8457_v1  ;;  %v8464_v3 = vld [vmem:[%s9420_s3 + $0x300] sm:$0xff]  ;;  %v8469_v2 = vld [vmem:[%s9420_s3 + $0x310] sm:$0xff] }
 0x3dd   :  { %3286 = vmatprep.subr.mxu0 %v8452_v24  ;;  %3357 = vmatprep.subr.mxu1 %v8457_v1  ;;  %10061 = vst [vmem:[#allocation68_spill] sm:$0xff] %v8464_v3  ;;  %10062 = vst [vmem:[#allocation69_spill] sm:$0xff] %v8469_v2  ;;  %v8481_v1 = vld [vmem:[%s9420_s3 + $0x2f8] sm:$0xff]  ;;  %v8486_v24 = vld [vmem:[%s9420_s3 + $0x2e0] sm:$0xff] }
 0x3de   :  { %3287 = vmatpush1.msra.mxu0 %v8464_v3  ;;  %3358 = vmatpush1.msra.mxu1 %v8469_v2  ;;  %10064 = vst [vmem:[#allocation71_spill] sm:$0xff] %v8481_v1  ;;  %10065 = vst [vmem:[#allocation72_spill] sm:$0xff] %v8486_v24  ;;  %v8498_v2 = vld [vmem:[%s9420_s3 + $0x2c8] sm:$0xff]  ;;  %v8503_v3 = vld [vmem:[%s9420_s3 + $0x2d8] sm:$0xff] }
 0x3df   :  { %3288 = vmatprep.subr.mxu0 %v8474_v0  ;;  %3359 = vmatprep.subr.mxu1 %v8481_v1  ;;  %10067 = vst [vmem:[#allocation74_spill] sm:$0xff] %v8498_v2  ;;  %10068 = vst [vmem:[#allocation75_spill] sm:$0xff] %v8503_v3  ;;  %v8515_v1 = vld [vmem:[%s9420_s3 + $0x2d0] sm:$0xff]  ;;  %v8520_v0 = vld [vmem:[%s9420_s3 + $0x2a8] sm:$0xff] }
 0x3e0   :  { %3289 = vmatpush1.msra.mxu0 %v8486_v24  ;;  %3360 = vmatpush1.msra.mxu1 %v8491_v61  ;;  %10070 = vst [vmem:[#allocation77_spill] sm:$0xff] %v8515_v1  ;;  %10071 = vst [vmem:[#allocation78_spill] sm:$0xff] %v8520_v0  ;;  %v8532_v61 = vld [vmem:[%s9420_s3 + $0x2a0] sm:$0xff]  ;;  %v8537_v24 = vld [vmem:[%s9420_s3 + $0x2b0] sm:$0xff] }
 0x3e1   :  { %3290 = vmatprep.subr.mxu0 %v8498_v2  ;;  %3361 = vmatprep.subr.mxu1 %v8503_v3  ;;  %10073 = vst [vmem:[#allocation80_spill] sm:$0xff] %v8532_v61  ;;  %10074 = vst [vmem:[#allocation81_spill] sm:$0xff] %v8537_v24  ;;  %v8544_v2 = vld [vmem:[%s9420_s3 + $0x288] sm:$0xff]  ;;  %v8549_v3 = vld [vmem:[%s9420_s3 + $0x298] sm:$0xff] }
 0x3e2   :  { %3291 = vmatpush1.msra.mxu0 %v8508_v60  ;;  %3362 = vmatpush1.msra.mxu1 %v8515_v1  ;;  %10075 = vst [vmem:[#allocation82_spill] sm:$0xff] %v8544_v2  ;;  %10076 = vst [vmem:[#allocation83_spill] sm:$0xff] %v8549_v3  ;;  %v8556_v60 = vld [vmem:[%s9420_s3 + $0x280] sm:$0xff]  ;;  %v8561_v1 = vld [vmem:[%s9420_s3 + $0x290] sm:$0xff] }
 0x3e3   :  { %3292 = vmatprep.subr.mxu0 %v8520_v0  ;;  %3363 = vmatprep.subr.mxu1 %v8525_v59  ;;  %10077 = vst [vmem:[#allocation84_spill] sm:$0xff] %v8556_v60  ;;  %10078 = vst [vmem:[#allocation85_spill] sm:$0xff] %v8561_v1  ;;  %v8568_v0 = vld [vmem:[%s9420_s3 + $0x268] sm:$0xff]  ;;  %v8573_v59 = vld [vmem:[%s9420_s3 + $0x278] sm:$0xff] }
 0x3e4   :  { %3293 = vmatpush1.msra.mxu0 %v8532_v61  ;;  %3364 = vmatpush1.msra.mxu1 %v8537_v24  ;;  %10079 = vst [vmem:[#allocation86_spill] sm:$0xff] %v8568_v0  ;;  %10080 = vst [vmem:[#allocation87_spill] sm:$0xff] %v8573_v59  ;;  %v8580_v61 = vld [vmem:[%s9420_s3 + $0x260] sm:$0xff]  ;;  %v8585_v24 = vld [vmem:[%s9420_s3 + $0x270] sm:$0xff] }
 0x3e5   :  { %3294 = vmatprep.subr.mxu0 %v8544_v2  ;;  %3365 = vmatprep.subr.mxu1 %v8549_v3  ;;  %10081 = vst [vmem:[#allocation88_spill] sm:$0xff] %v8580_v61  ;;  %10082 = vst [vmem:[#allocation89_spill] sm:$0xff] %v8585_v24  ;;  %v8592_v2 = vld [vmem:[%s9420_s3 + $0x248] sm:$0xff]  ;;  %v8597_v3 = vld [vmem:[%s9420_s3 + $0x258] sm:$0xff] }
 0x3e6   :  { %3295 = vmatpush1.msra.mxu0 %v8556_v60  ;;  %3366 = vmatpush1.msra.mxu1 %v8561_v1  ;;  %10083 = vst [vmem:[#allocation90_spill] sm:$0xff] %v8592_v2  ;;  %10084 = vst [vmem:[#allocation91_spill] sm:$0xff] %v8597_v3  ;;  %v8604_v60 = vld [vmem:[%s9420_s3 + $0x240] sm:$0xff]  ;;  %v8609_v1 = vld [vmem:[%s9420_s3 + $0x250] sm:$0xff] }
 0x3e7   :  { %3296 = vmatprep.subr.mxu0 %v8568_v0  ;;  %3367 = vmatprep.subr.mxu1 %v8573_v59  ;;  %10085 = vst [vmem:[#allocation92_spill] sm:$0xff] %v8604_v60  ;;  %10086 = vst [vmem:[#allocation93_spill] sm:$0xff] %v8609_v1  ;;  %v8616_v0 = vld [vmem:[%s9420_s3 + $0x228] sm:$0xff]  ;;  %v8621_v59 = vld [vmem:[%s9420_s3 + $0x238] sm:$0xff] }
 0x3e8   :  { %3297 = vmatpush1.msra.mxu0 %v8580_v61  ;;  %3368 = vmatpush1.msra.mxu1 %v8585_v24  ;;  %10087 = vst [vmem:[#allocation98_spill] sm:$0xff] %v8616_v0  ;;  %10088 = vst [vmem:[#allocation100_spill] sm:$0xff] %v8621_v59  ;;  %v8628_v61 = vld [vmem:[%s9420_s3 + $0x220] sm:$0xff]  ;;  %v8633_v24 = vld [vmem:[%s9420_s3 + $0x230] sm:$0xff] }
 0x3e9   :  { %3298 = vmatprep.subr.mxu0 %v8592_v2  ;;  %3369 = vmatprep.subr.mxu1 %v8597_v3  ;;  %10089 = vst [vmem:[#allocation101_spill] sm:$0xff] %v8628_v61  ;;  %10090 = vst [vmem:[#allocation99_spill] sm:$0xff] %v8633_v24  ;;  %v8640_v2 = vld [vmem:[%s9420_s3 + $0x208] sm:$0xff]  ;;  %v8645_v3 = vld [vmem:[%s9420_s3 + $0x218] sm:$0xff] }
 0x3ea   :  { %3299 = vmatpush1.msra.mxu0 %v8604_v60  ;;  %3370 = vmatpush1.msra.mxu1 %v8609_v1  ;;  %10091 = vst [vmem:[#allocation97_spill] sm:$0xff] %v8640_v2  ;;  %10092 = vst [vmem:[#allocation95_spill] sm:$0xff] %v8645_v3  ;;  %v8652_v60 = vld [vmem:[%s9420_s3 + $0x200] sm:$0xff]  ;;  %v8657_v1 = vld [vmem:[%s9420_s3 + $0x210] sm:$0xff] }
 0x3eb   :  { %3300 = vmatprep.subr.mxu0 %v8616_v0  ;;  %3371 = vmatprep.subr.mxu1 %v8621_v59  ;;  %10093 = vst [vmem:[#allocation110_spill] sm:$0xff] %v8652_v60  ;;  %10094 = vst [vmem:[#allocation111_spill] sm:$0xff] %v8657_v1  ;;  %v8664_v0 = vld [vmem:[%s9421_s4 + $0x3e8] sm:$0xff]  ;;  %v8669_v59 = vld [vmem:[%s9421_s4 + $0x3f8] sm:$0xff] }
 0x3ec   :  { %3301 = vmatpush1.msra.mxu0 %v8628_v61  ;;  %3372 = vmatpush1.msra.mxu1 %v8633_v24  ;;  %10095 = vst [vmem:[#allocation112_spill] sm:$0xff] %v8664_v0  ;;  %10096 = vst [vmem:[#allocation113_spill] sm:$0xff] %v8669_v59 }
 0x3ed   :  { %3302 = vmatprep.subr.mxu0 %v8640_v2  ;;  %3373 = vmatprep.subr.mxu1 %v8645_v3 }
 0x3ee   :  { %3303 = vmatpush1.msra.mxu0 %v8652_v60  ;;  %3374 = vmatpush1.msra.mxu1 %v8657_v1  ;;  %v10098_v60 = vld [vmem:[#allocation104_spill] sm:$0xff] }
 0x3ef   :  { %3478 = vmatprep.subr.mxu0 %v8664_v0  ;;  %3549 = vmatprep.subr.mxu1 %v8669_v59 }
 0x44a   :  { %v2633_v24 = vpop.f32.mrf.mxu0  ;;  %v2704_v57 = vpop.f32.mrf.mxu1 }
 0x44c   :  { %v2635_v61 = vpop.f32.mrf.mxu0  ;;  %v2706_v55 = vpop.f32.mrf.mxu1 }
 0x46b   :  { %v2839_v56 = vpop.f32.mrf.mxu0  ;;  %v2910_v52 = vpop.f32.mrf.mxu1 }
 0x46d   :  { %v2841_v53 = vpop.f32.mrf.mxu0  ;;  %v2912_v3 = vpop.f32.mrf.mxu1 }
 0x48d   :  { %v3082_v43 = vpop.f32.mrf.mxu0  ;;  %v3153_v1 = vpop.f32.mrf.mxu1 }
 0x48e   :  { %v3158_v2 = vadd.f32 %v3082_v43, %v10097_v49  ;;  %v3160_v49 = vadd.f32 %v3153_v1, %v10100_v17  ;;  %v2550_v43 = vrot.slane %v4941_v22, %v9953_v4 }
 0x48f   :  { %v3084_v36 = vpop.f32.mrf.mxu0  ;;  %v3155_v59 = vpop.f32.mrf.mxu1 }
 0x490   :  { %v5009_v48 = vmul.f32 -1.442695, %v3158_v2  ;;  %v3159_v46 = vadd.f32 %v3084_v36, %v10098_v60  ;;  %v3161_v28 = vadd.f32 %v3155_v59, %v10099_v29  ;;  %v2636_v36 = vadd.f32 %v2635_v61, %v2554_v21 }
 0x491   :  { %v2634_v60 = vadd.f32 %v2633_v24, %v2550_v43 }
 0x492   :  { %5750 = vpow2.f32 %v5009_v48  ;;  %v5010_v0 = vmul.f32 -1.442695, %v3159_v46  ;;  %v5011_v2 = vmul.f32 -1.442695, %v3161_v28 }
 0x493   :  { %v2915_v59 = vadd.f32 %v2839_v56, %v2634_v60  ;;  %v2558_v56 = vrot.slane %v4941_v22, %v9955_v39  ;;  %v8724_v60 = vld [vmem:[%s9421_s4 + $0x3d0] sm:$0xff] }
 0x494   :  { %5752 = vpow2.f32 %v5010_v0  ;;  %v2916_v0 = vadd.f32 %v2841_v53, %v2636_v36  ;;  %v2562_v53 = vrot.slane %v4941_v22, %v9954_v35  ;;  %v8697_v22 = vld [vmem:[%s9421_s4 + $0x3e0] sm:$0xff] }
 0x495   :  { %5754 = vtanh.f32 %v3160_v49  ;;  %v5006_v9 = vmul.f32 -1.442695, %v2915_v59  ;;  %v2705_v43 = vadd.f32 %v2704_v57, %v2558_v56  ;;  %v8712_v57 = vld [vmem:[%s9421_s4 + $0x3d8] sm:$0xff]  ;;  %v8743_v59 = vld [vmem:[%s9421_s4 + $0x3a0] sm:$0xff] }
 0x496   :  { %5756 = vpow2.f32 %v5011_v2  ;;  %v5007_v11 = vmul.f32 -1.442695, %v2916_v0  ;;  %v8731_v0 = vld [vmem:[%s9421_s4 + $0x3a8] sm:$0xff]  ;;  %v8784_v56 = vld [vmem:[%s9421_s4 + $0x378] sm:$0xff] }
 0x497   :  { %v2917_v36 = vadd.f32 %v2910_v52, %v2705_v43  ;;  %v8707_v52 = vld [vmem:[%s9421_s4 + $0x3c8] sm:$0xff]  ;;  %10101 = vst [vmem:[#allocation114_spill] sm:$0xff] %v8784_v56 }
 0x49f   :  { %v5751_v16 = vpop.eup %5750 }
 0x4a0   :  { %v3165_v48 = vadd.f32 1.0, %v5751_v16 }
 0x4a1   :  { %v5753_v46 = vpop.eup %5752 }
 0x4a2   :  { %5758 = vrcp.f32 %v3165_v48  ;;  %v3171_v29 = vadd.f32 1.0, %v5753_v46  ;;  %v5755_v17 = vpop.eup %5754 }
 0x4a3   :  { %v5757_v1 = vpop.eup %5756 }
 0x4a4   :  { %5760 = vrcp.f32 %v3171_v29  ;;  %v3178_v21 = vadd.f32 1.0, %v5757_v1  ;;  %v8736_v29 = vld [vmem:[%s9421_s4 + $0x3b8] sm:$0xff]  ;;  %v8755_v1 = vld [vmem:[%s9421_s4 + $0x388] sm:$0xff] }
 0x4a5   :  { %5762 = vpow2.f32 %v5007_v11 }
 0x4a6   :  { %5764 = vpow2.f32 %v5006_v9  ;;  %v2707_v9 = vadd.f32 %v2706_v55, %v2562_v53  ;;  %v8702_v55 = vld [vmem:[%s9421_s4 + $0x3f0] sm:$0xff] }
 0x4a7   :  { %5766 = vrcp.f32 %v3178_v21  ;;  %v8772_v53 = vld [vmem:[%s9421_s4 + $0x390] sm:$0xff] }
 0x4af   :  { %v5759_v4 = vpop.eup %5758 }
 0x4b0   :  { %v3182_v28 = vmul.f32 %v5759_v4, %v5755_v17  ;;  %v2918_v4 = vadd.f32 %v2912_v3, %v2707_v9  ;;  %v8719_v3 = vld [vmem:[%s9421_s4 + $0x3c0] sm:$0xff]  ;;  %v8748_v17 = vld [vmem:[%s9421_s4 + $0x3b0] sm:$0xff] }
 0x4b1   :  { %v5761_v63 = vpop.eup %5760  ;;  %v8791_v9 = vld [vmem:[%s9421_s4 + $0x360] sm:$0xff] }
 0x4b2   :  { %v3181_v16 = vmul.f32 %v5761_v63, %v7811_v50  ;;  %v5763_v24 = vpop.eup %5762  ;;  %v5008_v63 = vmul.f32 -1.442695, %v2918_v4  ;;  %v8809_v4 = vld [vmem:[%s9421_s4 + $0x358] sm:$0xff] }
 0x4b3   :  { %v5765_v11 = vpop.eup %5764  ;;  %v2928_v49 = vadd.f32 1.0, %v5763_v24  ;;  %v8779_v24 = vld [vmem:[%s9421_s4 + $0x368] sm:$0xff]  ;;  %10104 = vst [vmem:[#allocation117_spill] sm:$0xff] %v8809_v4 }
 0x4b4   :  { %v8687_v61 = vadd.f32 %v3182_v28, %v3181_v16  ;;  %v2922_v2 = vadd.f32 1.0, %v5765_v11  ;;  %v5767_v50 = vpop.eup %5766  ;;  %v8760_v28 = vld [vmem:[%s9421_s4 + $0x398] sm:$0xff]  ;;  %v8767_v16 = vld [vmem:[%s9421_s4 + $0x380] sm:$0xff] }
 0x4b6   :  { %5768 = vtanh.f32 %v8687_v61 }
 0x4b7   :  { %5770 = vrcp.f32 %v2928_v49  ;;  %v8796_v49 = vld [vmem:[%s9421_s4 + $0x370] sm:$0xff] }
 0x4b8   :  { %5772 = vrcp.f32 %v2922_v2  ;;  %10102 = vst [vmem:[#allocation115_spill] sm:$0xff] %v8796_v49  ;;  %v8804_v2 = vld [vmem:[%s9421_s4 + $0x348] sm:$0xff] }
 0x4b9   :  { %5774 = vtanh.f32 %v2917_v36  ;;  %10103 = vst [vmem:[#allocation116_spill] sm:$0xff] %v8804_v2 }
 0x4ba   :  { %5776 = vpow2.f32 %v5008_v63  ;;  %v8821_v63 = vld [vmem:[%s9421_s4 + $0x350] sm:$0xff] }
 0x4bb   :  { %10105 = vst [vmem:[#allocation118_spill] sm:$0xff] %v8821_v63 }
 0x4c3   :  { %v5769_v48 = vpop.eup %5768 }
 0x4c4   :  { %v8692_v46 = vmul.f32 %v5769_v48, %v5767_v50  ;;  %v5771_v21 = vpop.eup %5770  ;;  %v8828_v48 = vld [vmem:[%s9421_s4 + $0x328] sm:$0xff] }
 0x4c5   :  { %v5773_v11 = vpop.eup %5772  ;;  %v2938_v43 = vmul.f32 %v5771_v21, %v7840_v27  ;;  %v8816_v27 = vld [vmem:[%s9421_s4 + $0x340] sm:$0xff]  ;;  %10106 = vst [vmem:[#allocation119_spill] sm:$0xff] %v8828_v48  ;;  %v8833_v21 = vld [vmem:[%s9421_s4 + $0x338] sm:$0xff] }
 0x4c6   :  { %3337 = vmatmul.mubr.f32.vlgmr.msra.gmra.mxu0 %v8692_v46  ;;  %3408 = vmatmul.mubr.f32.vlgmr.msra.gmra.mxu1 %v8692_v46  ;;  %v5775_v36 = vpop.eup %5774  ;;  %10107 = vst [vmem:[#allocation120_spill] sm:$0xff] %v8833_v21 }
 0x4c7   :  { %3479 = vmatpush1.msra.mxu0 %v8697_v22  ;;  %3550 = vmatpush1.msra.mxu1 %v8702_v55  ;;  %v2939_v50 = vmul.f32 %v5775_v36, %v5773_v11  ;;  %v8840_v11 = vld [vmem:[%s9421_s4 + $0x320] sm:$0xff]  ;;  %v8845_v36 = vld [vmem:[%s9421_s4 + $0x330] sm:$0xff] }
 0x4c8   :  { %3480 = vmatprep.subr.mxu0 %v8707_v52  ;;  %3551 = vmatprep.subr.mxu1 %v8712_v57  ;;  %10108 = vst [vmem:[#allocation121_spill] sm:$0xff] %v8840_v11  ;;  %10109 = vst [vmem:[#allocation122_spill] sm:$0xff] %v8845_v36 }
 0x4c9   :  { %3481 = vmatpush1.msra.mxu0 %v8719_v3  ;;  %3552 = vmatpush1.msra.mxu1 %v8724_v60 }
 0x4ca   :  { %3482 = vmatprep.subr.mxu0 %v8731_v0  ;;  %3553 = vmatprep.subr.mxu1 %v8736_v29 }
 0x4cb   :  { %3483 = vmatpush1.msra.mxu0 %v8743_v59  ;;  %3554 = vmatpush1.msra.mxu1 %v8748_v17 }
 0x4cc   :  { %3484 = vmatprep.subr.mxu0 %v8755_v1  ;;  %3555 = vmatprep.subr.mxu1 %v8760_v28 }
 0x4cd   :  { %3485 = vmatpush1.msra.mxu0 %v8767_v16  ;;  %3556 = vmatpush1.msra.mxu1 %v8772_v53 }
 0x4ce   :  { %3486 = vmatprep.subr.mxu0 %v8779_v24  ;;  %3557 = vmatprep.subr.mxu1 %v8784_v56  ;;  %v5777_v56 = vpop.eup %5776 }
 0x4cf   :  { %3487 = vmatpush1.msra.mxu0 %v8791_v9  ;;  %3558 = vmatpush1.msra.mxu1 %v8796_v49  ;;  %v8847_v49 = vadd.f32 %v2939_v50, %v2938_v43  ;;  %v8866_v43 = vld [vmem:[%s9421_s4 + $0x300] sm:$0xff]  ;;  %v8871_v50 = vld [vmem:[%s9421_s4 + $0x310] sm:$0xff] }
 0x4d0   :  { %3488 = vmatprep.subr.mxu0 %v8804_v2  ;;  %3559 = vmatprep.subr.mxu1 %v8809_v4  ;;  %v8854_v4 = vld [vmem:[%s9421_s4 + $0x308] sm:$0xff]  ;;  %v8859_v2 = vld [vmem:[%s9421_s4 + $0x318] sm:$0xff]  ;;  %10112 = vst [vmem:[#allocation125_spill] sm:$0xff] %v8866_v43  ;;  %10113 = vst [vmem:[#allocation126_spill] sm:$0xff] %v8871_v50 }
 0x4d1   :  { %3489 = vmatpush1.msra.mxu0 %v8816_v27  ;;  %3560 = vmatpush1.msra.mxu1 %v8821_v63  ;;  %10110 = vst [vmem:[#allocation123_spill] sm:$0xff] %v8854_v4  ;;  %10111 = vst [vmem:[#allocation124_spill] sm:$0xff] %v8859_v2  ;;  %v2935_v63 = vadd.f32 1.0, %v5777_v56  ;;  %v8890_v56 = vld [vmem:[%s9421_s4 + $0x2e0] sm:$0xff]  ;;  %5778 = vtanh.f32 %v8847_v49 }
 0x4d2   :  { %3490 = vmatprep.subr.mxu0 %v8828_v48  ;;  %3561 = vmatprep.subr.mxu1 %v8833_v21  ;;  %v8878_v48 = vld [vmem:[%s9421_s4 + $0x2e8] sm:$0xff]  ;;  %v8883_v21 = vld [vmem:[%s9421_s4 + $0x2f8] sm:$0xff]  ;;  %10116 = vst [vmem:[#allocation129_spill] sm:$0xff] %v8890_v56 }
 0x4d3   :  { %3491 = vmatpush1.msra.mxu0 %v8840_v11  ;;  %3562 = vmatpush1.msra.mxu1 %v8845_v36  ;;  %10114 = vst [vmem:[#allocation127_spill] sm:$0xff] %v8878_v48  ;;  %10115 = vst [vmem:[#allocation128_spill] sm:$0xff] %v8883_v21  ;;  %v8895_v36 = vld [vmem:[%s9421_s4 + $0x2f0] sm:$0xff]  ;;  %5780 = vrcp.f32 %v2935_v63  ;;  %v8939_v63 = vld [vmem:[%s9421_s4 + $0x2a0] sm:$0xff] }
 0x4d4   :  { %3492 = vmatprep.subr.mxu0 %v8854_v4  ;;  %3563 = vmatprep.subr.mxu1 %v8859_v2  ;;  %10117 = vst [vmem:[#allocation130_spill] sm:$0xff] %v8895_v36  ;;  %v8902_v4 = vld [vmem:[%s9421_s4 + $0x2c8] sm:$0xff]  ;;  %v8907_v2 = vld [vmem:[%s9421_s4 + $0x2d8] sm:$0xff]  ;;  %10124 = vst [vmem:[#allocation137_spill] sm:$0xff] %v8939_v63 }
 0x4d5   :  { %3493 = vmatpush1.msra.mxu0 %v8866_v43  ;;  %3564 = vmatpush1.msra.mxu1 %v8871_v50  ;;  %10118 = vst [vmem:[#allocation131_spill] sm:$0xff] %v8902_v4  ;;  %10119 = vst [vmem:[#allocation132_spill] sm:$0xff] %v8907_v2  ;;  %v8915_v50 = vld [vmem:[%s9421_s4 + $0x2c0] sm:$0xff]  ;;  %v8920_v43 = vld [vmem:[%s9421_s4 + $0x2d0] sm:$0xff] }
 0x4d6   :  { %3494 = vmatprep.subr.mxu0 %v8878_v48  ;;  %3565 = vmatprep.subr.mxu1 %v8883_v21  ;;  %10120 = vst [vmem:[#allocation133_spill] sm:$0xff] %v8915_v50  ;;  %10121 = vst [vmem:[#allocation134_spill] sm:$0xff] %v8920_v43  ;;  %v8927_v48 = vld [vmem:[%s9421_s4 + $0x2a8] sm:$0xff]  ;;  %v8932_v21 = vld [vmem:[%s9421_s4 + $0x2b8] sm:$0xff] }
 0x4d7   :  { %3495 = vmatpush1.msra.mxu0 %v8890_v56  ;;  %3566 = vmatpush1.msra.mxu1 %v8895_v36  ;;  %10122 = vst [vmem:[#allocation135_spill] sm:$0xff] %v8927_v48  ;;  %10123 = vst [vmem:[#allocation136_spill] sm:$0xff] %v8932_v21  ;;  %v8944_v36 = vld [vmem:[%s9421_s4 + $0x2b0] sm:$0xff] }
 0x4d8   :  { %3496 = vmatprep.subr.mxu0 %v8902_v4  ;;  %3567 = vmatprep.subr.mxu1 %v8907_v2  ;;  %10125 = vst [vmem:[#allocation138_spill] sm:$0xff] %v8944_v36  ;;  %v8951_v4 = vld [vmem:[%s9421_s4 + $0x288] sm:$0xff]  ;;  %v8956_v2 = vld [vmem:[%s9421_s4 + $0x298] sm:$0xff] }
 0x4d9   :  { %3497 = vmatpush1.msra.mxu0 %v8915_v50  ;;  %3568 = vmatpush1.msra.mxu1 %v8920_v43  ;;  %10126 = vst [vmem:[#allocation139_spill] sm:$0xff] %v8951_v4  ;;  %10127 = vst [vmem:[#allocation140_spill] sm:$0xff] %v8956_v2  ;;  %v8963_v50 = vld [vmem:[%s9421_s4 + $0x280] sm:$0xff]  ;;  %v8968_v43 = vld [vmem:[%s9421_s4 + $0x290] sm:$0xff] }
 0x4da   :  { %3498 = vmatprep.subr.mxu0 %v8927_v48  ;;  %3569 = vmatprep.subr.mxu1 %v8932_v21  ;;  %10128 = vst [vmem:[#allocation141_spill] sm:$0xff] %v8963_v50  ;;  %10129 = vst [vmem:[#allocation142_spill] sm:$0xff] %v8968_v43  ;;  %v8975_v48 = vld [vmem:[%s9421_s4 + $0x268] sm:$0xff]  ;;  %v8980_v21 = vld [vmem:[%s9421_s4 + $0x278] sm:$0xff] }
 0x4db   :  { %3499 = vmatpush1.msra.mxu0 %v8939_v63  ;;  %3570 = vmatpush1.msra.mxu1 %v8944_v36  ;;  %10130 = vst [vmem:[#allocation143_spill] sm:$0xff] %v8975_v48  ;;  %10131 = vst [vmem:[#allocation144_spill] sm:$0xff] %v8980_v21  ;;  %v8987_v63 = vld [vmem:[%s9421_s4 + $0x260] sm:$0xff]  ;;  %v8992_v36 = vld [vmem:[%s9421_s4 + $0x270] sm:$0xff] }
 0x4dc   :  { %3500 = vmatprep.subr.mxu0 %v8951_v4  ;;  %3571 = vmatprep.subr.mxu1 %v8956_v2  ;;  %10132 = vst [vmem:[#allocation145_spill] sm:$0xff] %v8987_v63  ;;  %10133 = vst [vmem:[#allocation146_spill] sm:$0xff] %v8992_v36  ;;  %v8999_v4 = vld [vmem:[%s9421_s4 + $0x248] sm:$0xff]  ;;  %v9004_v2 = vld [vmem:[%s9421_s4 + $0x258] sm:$0xff] }
 0x4dd   :  { %3501 = vmatpush1.msra.mxu0 %v8963_v50  ;;  %3572 = vmatpush1.msra.mxu1 %v8968_v43  ;;  %10134 = vst [vmem:[#allocation147_spill] sm:$0xff] %v8999_v4  ;;  %10135 = vst [vmem:[#allocation148_spill] sm:$0xff] %v9004_v2  ;;  %v9011_v50 = vld [vmem:[%s9421_s4 + $0x240] sm:$0xff]  ;;  %v9016_v43 = vld [vmem:[%s9421_s4 + $0x250] sm:$0xff] }
 0x4de   :  { %3502 = vmatprep.subr.mxu0 %v8975_v48  ;;  %3573 = vmatprep.subr.mxu1 %v8980_v21  ;;  %10136 = vst [vmem:[#allocation149_spill] sm:$0xff] %v9011_v50  ;;  %10137 = vst [vmem:[#allocation150_spill] sm:$0xff] %v9016_v43  ;;  %v9023_v48 = vld [vmem:[%s9421_s4 + $0x228] sm:$0xff]  ;;  %v9028_v21 = vld [vmem:[%s9421_s4 + $0x238] sm:$0xff]  ;;  %v5779_v56 = vpop.eup %5778 }
 0x4df   :  { %3503 = vmatpush1.msra.mxu0 %v8987_v63  ;;  %3574 = vmatpush1.msra.mxu1 %v8992_v36  ;;  %10138 = vst [vmem:[#allocation102_spill] sm:$0xff] %v9028_v21  ;;  %v9035_v63 = vld [vmem:[%s9421_s4 + $0x220] sm:$0xff]  ;;  %v9040_v36 = vld [vmem:[%s9421_s4 + $0x230] sm:$0xff] }
 0x4e0   :  { %3504 = vmatprep.subr.mxu0 %v8999_v4  ;;  %3575 = vmatprep.subr.mxu1 %v9004_v2  ;;  %v9047_v4 = vld [vmem:[%s9421_s4 + $0x208] sm:$0xff]  ;;  %v9052_v2 = vld [vmem:[%s9421_s4 + $0x218] sm:$0xff]  ;;  %v5781_v11 = vpop.eup %5780 }
 0x4e1   :  { %3505 = vmatpush1.msra.mxu0 %v9011_v50  ;;  %3576 = vmatpush1.msra.mxu1 %v9016_v43  ;;  %v9059_v50 = vld [vmem:[%s9421_s4 + $0x200] sm:$0xff]  ;;  %v9066_v43 = vld [vmem:[%s9421_s4 + $0x210] sm:$0xff] }
 0x4e2   :  { %3506 = vmatprep.subr.mxu0 %v9023_v48  ;;  %3577 = vmatprep.subr.mxu1 %v9028_v21  ;;  %v9072_v21 = vmul.f32 %v5781_v11, %v5779_v56  ;;  %v10170_v11 = vld [vmem:[#allocation36_spill] sm:$0xff]  ;;  %v10171_v56 = vld [vmem:[#allocation37_spill] sm:$0xff] }
 0x4e3   :  { %3507 = vmatpush1.msra.mxu0 %v9035_v63  ;;  %3578 = vmatpush1.msra.mxu1 %v9040_v36 }
 0x4e4   :  { %3508 = vmatprep.subr.mxu0 %v9047_v4  ;;  %3579 = vmatprep.subr.mxu1 %v9052_v2 }
 0x4e5   :  { %3509 = vmatpush1.msra.mxu0 %v9059_v50  ;;  %3542 = vmatprep.mubr.f32.mxu0 %v9857_v40 }
 0x4e6   :  { %3580 = vmatpush1.msra.mxu1 %v9066_v43  ;;  %3613 = vmatprep.mubr.f32.mxu1 %v9857_v40 }
 0x4e7   :  { %3543 = vmatmul.mubr.f32.vlgmr.msra.gmra.mxu0 %v9072_v21  ;;  %3614 = vmatmul.mubr.f32.vlgmr.msra.gmra.mxu1 %v9072_v21 }
 0x4e8   :  { %3721 = vmatprep.subr.mxu0 %v7890_v32  ;;  %3792 = vmatprep.subr.mxu1 %v7895_v13  ;;  %v10139_v32 = vld [vmem:[#allocation5_spill] sm:$0xff]  ;;  %v10140_v13 = vld [vmem:[#allocation6_spill] sm:$0xff] }
 0x4e9   :  { %3722 = vmatpush1.msra.mxu0 %v7902_v30  ;;  %3793 = vmatpush1.msra.mxu1 %v7907_v23  ;;  %v10141_v30 = vld [vmem:[#allocation7_spill] sm:$0xff]  ;;  %v10142_v23 = vld [vmem:[#allocation8_spill] sm:$0xff] }
 0x4ea   :  { %3723 = vmatprep.subr.mxu0 %v7914_v41  ;;  %3794 = vmatprep.subr.mxu1 %v7919_v38  ;;  %v10143_v41 = vld [vmem:[#allocation9_spill] sm:$0xff]  ;;  %v10144_v38 = vld [vmem:[#allocation10_spill] sm:$0xff] }
 0x4eb   :  { %3724 = vmatpush1.msra.mxu0 %v7926_v8  ;;  %3795 = vmatpush1.msra.mxu1 %v7931_v54  ;;  %v10145_v8 = vld [vmem:[#allocation11_spill] sm:$0xff]  ;;  %v10146_v54 = vld [vmem:[#allocation12_spill] sm:$0xff] }
 0x4ec   :  { %3725 = vmatprep.subr.mxu0 %v7938_v44  ;;  %3796 = vmatprep.subr.mxu1 %v7943_v37  ;;  %v10147_v44 = vld [vmem:[#allocation13_spill] sm:$0xff]  ;;  %v10148_v37 = vld [vmem:[#allocation14_spill] sm:$0xff] }
 0x4ed   :  { %3726 = vmatpush1.msra.mxu0 %v7950_v58  ;;  %3797 = vmatpush1.msra.mxu1 %v7955_v19  ;;  %v10149_v58 = vld [vmem:[#allocation15_spill] sm:$0xff]  ;;  %v10150_v19 = vld [vmem:[#allocation16_spill] sm:$0xff] }
 0x4ee   :  { %3727 = vmatprep.subr.mxu0 %v7962_v14  ;;  %3798 = vmatprep.subr.mxu1 %v7967_v31  ;;  %v10151_v14 = vld [vmem:[#allocation17_spill] sm:$0xff]  ;;  %v10152_v31 = vld [vmem:[#allocation18_spill] sm:$0xff] }
 0x4ef   :  { %3728 = vmatpush1.msra.mxu0 %v7974_v12  ;;  %3799 = vmatpush1.msra.mxu1 %v7979_v26  ;;  %v10153_v12 = vld [vmem:[#allocation19_spill] sm:$0xff]  ;;  %v10154_v26 = vld [vmem:[#allocation20_spill] sm:$0xff] }
 0x4f0   :  { %3729 = vmatprep.subr.mxu0 %v7986_v34  ;;  %3800 = vmatprep.subr.mxu1 %v7991_v18  ;;  %v10155_v34 = vld [vmem:[#allocation21_spill] sm:$0xff]  ;;  %v10156_v18 = vld [vmem:[#allocation22_spill] sm:$0xff] }
 0x4f1   :  { %3730 = vmatpush1.msra.mxu0 %v7998_v20  ;;  %3801 = vmatpush1.msra.mxu1 %v8003_v25  ;;  %v10157_v20 = vld [vmem:[#allocation23_spill] sm:$0xff]  ;;  %v10158_v25 = vld [vmem:[#allocation24_spill] sm:$0xff] }
 0x4f2   :  { %3731 = vmatprep.subr.mxu0 %v8010_v15  ;;  %3802 = vmatprep.subr.mxu1 %v8015_v42  ;;  %v10159_v15 = vld [vmem:[#allocation25_spill] sm:$0xff]  ;;  %v10160_v42 = vld [vmem:[#allocation26_spill] sm:$0xff] }
 0x4f3   :  { %3732 = vmatpush1.msra.mxu0 %v8022_v45  ;;  %3803 = vmatpush1.msra.mxu1 %v8027_v51  ;;  %v10161_v45 = vld [vmem:[#allocation27_spill] sm:$0xff]  ;;  %v10162_v51 = vld [vmem:[#allocation28_spill] sm:$0xff] }
 0x4f4   :  { %3733 = vmatprep.subr.mxu0 %v8034_v62  ;;  %3804 = vmatprep.subr.mxu1 %v8039_v5  ;;  %v10163_v62 = vld [vmem:[#allocation29_spill] sm:$0xff]  ;;  %v10164_v5 = vld [vmem:[#allocation30_spill] sm:$0xff] }
 0x4f5   :  { %3734 = vmatpush1.msra.mxu0 %v8046_v6  ;;  %3805 = vmatpush1.msra.mxu1 %v8051_v7  ;;  %v10165_v6 = vld [vmem:[#allocation31_spill] sm:$0xff]  ;;  %v10166_v7 = vld [vmem:[#allocation32_spill] sm:$0xff] }
 0x4f6   :  { %3735 = vmatprep.subr.mxu0 %v8058_v47  ;;  %3806 = vmatprep.subr.mxu1 %v8063_v10  ;;  %v10167_v47 = vld [vmem:[#allocation33_spill] sm:$0xff]  ;;  %v10168_v10 = vld [vmem:[#allocation34_spill] sm:$0xff] }
 0x4f7   :  { %3736 = vmatpush1.msra.mxu0 %v8070_v33  ;;  %3807 = vmatpush1.msra.mxu1 %v10139_v32  ;;  %v10169_v33 = vld [vmem:[#allocation35_spill] sm:$0xff]  ;;  %v10172_v32 = vld [vmem:[#allocation38_spill] sm:$0xff] }
 0x4f8   :  { %3737 = vmatprep.subr.mxu0 %v10140_v13  ;;  %3808 = vmatprep.subr.mxu1 %v10141_v30  ;;  %v10173_v13 = vld [vmem:[#allocation39_spill] sm:$0xff]  ;;  %v10174_v30 = vld [vmem:[#allocation40_spill] sm:$0xff] }
 0x4f9   :  { %3738 = vmatpush1.msra.mxu0 %v10142_v23  ;;  %3809 = vmatpush1.msra.mxu1 %v10143_v41  ;;  %v10175_v23 = vld [vmem:[#allocation41_spill] sm:$0xff]  ;;  %v10176_v41 = vld [vmem:[#allocation42_spill] sm:$0xff] }
 0x4fa   :  { %3739 = vmatprep.subr.mxu0 %v10144_v38  ;;  %3810 = vmatprep.subr.mxu1 %v10145_v8  ;;  %v10177_v38 = vld [vmem:[#allocation43_spill] sm:$0xff]  ;;  %v10178_v8 = vld [vmem:[#allocation44_spill] sm:$0xff] }
 0x4fb   :  { %3740 = vmatpush1.msra.mxu0 %v10146_v54  ;;  %3811 = vmatpush1.msra.mxu1 %v10147_v44  ;;  %v10179_v54 = vld [vmem:[#allocation45_spill] sm:$0xff]  ;;  %v10180_v44 = vld [vmem:[#allocation46_spill] sm:$0xff] }
 0x4fc   :  { %3741 = vmatprep.subr.mxu0 %v10148_v37  ;;  %3812 = vmatprep.subr.mxu1 %v10149_v58  ;;  %v10181_v37 = vld [vmem:[#allocation47_spill] sm:$0xff]  ;;  %v10183_v58 = vld [vmem:[#allocation49_spill] sm:$0xff] }
 0x4fd   :  { %3742 = vmatpush1.msra.mxu0 %v10150_v19  ;;  %3813 = vmatpush1.msra.mxu1 %v10151_v14  ;;  %v10184_v19 = vld [vmem:[#allocation50_spill] sm:$0xff]  ;;  %v10185_v14 = vld [vmem:[#allocation51_spill] sm:$0xff] }
 0x4fe   :  { %3743 = vmatprep.subr.mxu0 %v10152_v31  ;;  %3814 = vmatprep.subr.mxu1 %v10153_v12  ;;  %v10186_v31 = vld [vmem:[#allocation52_spill] sm:$0xff]  ;;  %v10187_v12 = vld [vmem:[#allocation53_spill] sm:$0xff] }
 0x4ff   :  { %3744 = vmatpush1.msra.mxu0 %v10154_v26  ;;  %3815 = vmatpush1.msra.mxu1 %v10155_v34  ;;  %v10188_v26 = vld [vmem:[#allocation54_spill] sm:$0xff]  ;;  %v10189_v34 = vld [vmem:[#allocation55_spill] sm:$0xff] }
 0x500   :  { %3745 = vmatprep.subr.mxu0 %v10156_v18  ;;  %3816 = vmatprep.subr.mxu1 %v10157_v20  ;;  %v10190_v18 = vld [vmem:[#allocation56_spill] sm:$0xff]  ;;  %v10191_v20 = vld [vmem:[#allocation57_spill] sm:$0xff] }
 0x501   :  { %3746 = vmatpush1.msra.mxu0 %v10158_v25  ;;  %3817 = vmatpush1.msra.mxu1 %v10159_v15  ;;  %v10192_v25 = vld [vmem:[#allocation58_spill] sm:$0xff]  ;;  %v10193_v15 = vld [vmem:[#allocation59_spill] sm:$0xff] }
 0x502   :  { %3747 = vmatprep.subr.mxu0 %v10160_v42  ;;  %3818 = vmatprep.subr.mxu1 %v10161_v45  ;;  %v10194_v42 = vld [vmem:[#allocation60_spill] sm:$0xff]  ;;  %v10195_v45 = vld [vmem:[#allocation61_spill] sm:$0xff] }
 0x503   :  { %3748 = vmatpush1.msra.mxu0 %v10162_v51  ;;  %3819 = vmatpush1.msra.mxu1 %v10163_v62  ;;  %v10196_v51 = vld [vmem:[#allocation62_spill] sm:$0xff]  ;;  %v10197_v62 = vld [vmem:[#allocation63_spill] sm:$0xff] }
 0x504   :  { %3749 = vmatprep.subr.mxu0 %v10164_v5  ;;  %3820 = vmatprep.subr.mxu1 %v10165_v6  ;;  %v10198_v5 = vld [vmem:[#allocation64_spill] sm:$0xff]  ;;  %v10199_v6 = vld [vmem:[#allocation65_spill] sm:$0xff] }
 0x505   :  { %3750 = vmatpush1.msra.mxu0 %v10166_v7  ;;  %3821 = vmatpush1.msra.mxu1 %v10167_v47  ;;  %v10200_v7 = vld [vmem:[#allocation66_spill] sm:$0xff]  ;;  %v10201_v47 = vld [vmem:[#allocation67_spill] sm:$0xff] }
 0x506   :  { %3751 = vmatprep.subr.mxu0 %v10168_v10  ;;  %3822 = vmatprep.subr.mxu1 %v10169_v33  ;;  %v10202_v10 = vld [vmem:[#allocation68_spill] sm:$0xff]  ;;  %v10203_v33 = vld [vmem:[#allocation69_spill] sm:$0xff] }
 0x507   :  { %3752 = vmatpush1.msra.mxu0 %v10170_v11  ;;  %3785 = vmatprep.mubr.f32.mxu0 %v9857_v40  ;;  %v10204_v11 = vld [vmem:[#allocation70_spill] sm:$0xff] }
 0x508   :  { %3823 = vmatpush1.msra.mxu1 %v10171_v56  ;;  %3856 = vmatprep.mubr.f32.mxu1 %v9857_v40  ;;  %v10205_v56 = vld [vmem:[#allocation71_spill] sm:$0xff] }
 0x509   :  { %3786 = vmatmul.mubr.f32.vlgmr.msra.gmra.mxu0 %v8692_v46  ;;  %3857 = vmatmul.mubr.f32.vlgmr.msra.gmra.mxu1 %v8692_v46  ;;  %v10182_v46 = vld [vmem:[#allocation48_spill] sm:$0xff] }
 0x50a   :  { %3977 = vmatprep.subr.mxu0 %v10172_v32  ;;  %4048 = vmatprep.subr.mxu1 %v10173_v13  ;;  %v10206_v32 = vld [vmem:[#allocation72_spill] sm:$0xff]  ;;  %v10207_v13 = vld [vmem:[#allocation73_spill] sm:$0xff] }
 0x50b   :  { %3978 = vmatpush1.msra.mxu0 %v10174_v30  ;;  %4049 = vmatpush1.msra.mxu1 %v10175_v23  ;;  %v10208_v30 = vld [vmem:[#allocation74_spill] sm:$0xff]  ;;  %v10209_v23 = vld [vmem:[#allocation75_spill] sm:$0xff] }
 0x50c   :  { %3979 = vmatprep.subr.mxu0 %v10176_v41  ;;  %4050 = vmatprep.subr.mxu1 %v10177_v38  ;;  %v10210_v41 = vld [vmem:[#allocation76_spill] sm:$0xff]  ;;  %v10211_v38 = vld [vmem:[#allocation77_spill] sm:$0xff] }
 0x50d   :  { %3980 = vmatpush1.msra.mxu0 %v10178_v8  ;;  %4051 = vmatpush1.msra.mxu1 %v10179_v54  ;;  %v10212_v8 = vld [vmem:[#allocation78_spill] sm:$0xff]  ;;  %v10213_v54 = vld [vmem:[#allocation79_spill] sm:$0xff] }
 0x50e   :  { %3981 = vmatprep.subr.mxu0 %v10180_v44  ;;  %4052 = vmatprep.subr.mxu1 %v10181_v37  ;;  %v10214_v44 = vld [vmem:[#allocation80_spill] sm:$0xff]  ;;  %v10215_v37 = vld [vmem:[#allocation81_spill] sm:$0xff] }
 0x50f   :  { %3982 = vmatpush1.msra.mxu0 %v10182_v46  ;;  %4053 = vmatpush1.msra.mxu1 %v10183_v58  ;;  %v10216_v46 = vld [vmem:[#allocation82_spill] sm:$0xff]  ;;  %v10217_v58 = vld [vmem:[#allocation83_spill] sm:$0xff] }
 0x510   :  { %3983 = vmatprep.subr.mxu0 %v10184_v19  ;;  %4054 = vmatprep.subr.mxu1 %v10185_v14  ;;  %v10218_v19 = vld [vmem:[#allocation84_spill] sm:$0xff]  ;;  %v10219_v14 = vld [vmem:[#allocation85_spill] sm:$0xff] }
 0x511   :  { %3984 = vmatpush1.msra.mxu0 %v10186_v31  ;;  %4055 = vmatpush1.msra.mxu1 %v10187_v12  ;;  %v10220_v31 = vld [vmem:[#allocation86_spill] sm:$0xff]  ;;  %v10221_v12 = vld [vmem:[#allocation87_spill] sm:$0xff] }
 0x512   :  { %3985 = vmatprep.subr.mxu0 %v10188_v26  ;;  %4056 = vmatprep.subr.mxu1 %v10189_v34  ;;  %v10222_v26 = vld [vmem:[#allocation88_spill] sm:$0xff]  ;;  %v10223_v34 = vld [vmem:[#allocation89_spill] sm:$0xff] }
 0x513   :  { %3986 = vmatpush1.msra.mxu0 %v10190_v18  ;;  %4057 = vmatpush1.msra.mxu1 %v10191_v20  ;;  %v10224_v18 = vld [vmem:[#allocation90_spill] sm:$0xff]  ;;  %v10225_v20 = vld [vmem:[#allocation91_spill] sm:$0xff] }
 0x514   :  { %3987 = vmatprep.subr.mxu0 %v10192_v25  ;;  %4058 = vmatprep.subr.mxu1 %v10193_v15  ;;  %v10226_v25 = vld [vmem:[#allocation92_spill] sm:$0xff]  ;;  %v10227_v15 = vld [vmem:[#allocation93_spill] sm:$0xff] }
 0x515   :  { %3988 = vmatpush1.msra.mxu0 %v10194_v42  ;;  %4059 = vmatpush1.msra.mxu1 %v10195_v45  ;;  %v10228_v42 = vld [vmem:[#allocation98_spill] sm:$0xff]  ;;  %v10229_v45 = vld [vmem:[#allocation100_spill] sm:$0xff] }
 0x516   :  { %3989 = vmatprep.subr.mxu0 %v10196_v51  ;;  %4060 = vmatprep.subr.mxu1 %v10197_v62  ;;  %v10230_v51 = vld [vmem:[#allocation101_spill] sm:$0xff]  ;;  %v10231_v62 = vld [vmem:[#allocation99_spill] sm:$0xff] }
 0x517   :  { %3990 = vmatpush1.msra.mxu0 %v10198_v5  ;;  %4061 = vmatpush1.msra.mxu1 %v10199_v6  ;;  %v10232_v5 = vld [vmem:[#allocation97_spill] sm:$0xff]  ;;  %v10233_v6 = vld [vmem:[#allocation95_spill] sm:$0xff] }
 0x518   :  { %3991 = vmatprep.subr.mxu0 %v10200_v7  ;;  %4062 = vmatprep.subr.mxu1 %v10201_v47  ;;  %v10234_v7 = vld [vmem:[#allocation110_spill] sm:$0xff]  ;;  %v10235_v47 = vld [vmem:[#allocation111_spill] sm:$0xff] }
 0x519   :  { %3992 = vmatpush1.msra.mxu0 %v10202_v10  ;;  %4063 = vmatpush1.msra.mxu1 %v10203_v33  ;;  %v10236_v10 = vld [vmem:[#allocation112_spill] sm:$0xff]  ;;  %v10237_v33 = vld [vmem:[#allocation113_spill] sm:$0xff] }
 0x51a   :  { %3993 = vmatprep.subr.mxu0 %v10204_v11  ;;  %4064 = vmatprep.subr.mxu1 %v10205_v56 }
 0x51b   :  { %3994 = vmatpush1.msra.mxu0 %v10206_v32  ;;  %4065 = vmatpush1.msra.mxu1 %v10207_v13 }
 0x51c   :  { %3995 = vmatprep.subr.mxu0 %v10208_v30  ;;  %4066 = vmatprep.subr.mxu1 %v10209_v23 }
 0x51d   :  { %3996 = vmatpush1.msra.mxu0 %v10210_v41  ;;  %4067 = vmatpush1.msra.mxu1 %v10211_v38 }
 0x51e   :  { %3997 = vmatprep.subr.mxu0 %v10212_v8  ;;  %4068 = vmatprep.subr.mxu1 %v10213_v54  ;;  %v10238_v8 = vld [vmem:[#allocation106_spill] sm:$0xff] }
 0x51f   :  { %3998 = vmatpush1.msra.mxu0 %v10214_v44  ;;  %4069 = vmatpush1.msra.mxu1 %v10215_v37 }
 0x520   :  { %3999 = vmatprep.subr.mxu0 %v10216_v46  ;;  %4070 = vmatprep.subr.mxu1 %v10217_v58  ;;  %v10239_v58 = vld [vmem:[#allocation108_spill] sm:$0xff] }
 0x521   :  { %4000 = vmatpush1.msra.mxu0 %v10218_v19  ;;  %4071 = vmatpush1.msra.mxu1 %v10219_v14 }
 0x522   :  { %4001 = vmatprep.subr.mxu0 %v10220_v31  ;;  %4072 = vmatprep.subr.mxu1 %v10221_v12 }
 0x523   :  { %4002 = vmatpush1.msra.mxu0 %v10222_v26  ;;  %4073 = vmatpush1.msra.mxu1 %v10223_v34  ;;  %v10240_v26 = vld [vmem:[#allocation109_spill] sm:$0xff] }
 0x524   :  { %4003 = vmatprep.subr.mxu0 %v10224_v18  ;;  %4074 = vmatprep.subr.mxu1 %v10225_v20  ;;  %v5076_v18 = vld [vmem:[%s9423_s5 + $0x4] sm:$0xf] }
 0x525   :  { %4004 = vmatpush1.msra.mxu0 %v10226_v25  ;;  %4075 = vmatpush1.msra.mxu1 %v10227_v15  ;;  %v10241_v20 = vld [vmem:[#allocation96_spill] sm:$0xff]  ;;  %v10242_v15 = vld [vmem:[#allocation107_spill] sm:$0xff] }
 0x526   :  { %4005 = vmatprep.subr.mxu0 %v10228_v42  ;;  %4076 = vmatprep.subr.mxu1 %v10229_v45  ;;  %v3259_v25 = vrot.slane %v5076_v18, %v10241_v20  ;;  %v10243_v45 = vld [vmem:[#allocation94_spill] sm:$0xff] }
 0x527   :  { %4006 = vmatpush1.msra.mxu0 %v10230_v51  ;;  %4077 = vmatpush1.msra.mxu1 %v10231_v62  ;;  %v3255_v51 = vrot.slane %v5076_v18, %v10243_v45 }
 0x528   :  { %4007 = vmatprep.subr.mxu0 %v10232_v5  ;;  %4078 = vmatprep.subr.mxu1 %v10233_v6 }
 0x529   :  { %4008 = vmatpush1.msra.mxu0 %v10234_v7  ;;  %4079 = vmatpush1.msra.mxu1 %v10235_v47 }
 0x52a   :  { %4041 = vmatprep.mubr.f32.mxu0 %v9857_v40  ;;  %4112 = vmatprep.mubr.f32.mxu1 %v9857_v40 }
 0x52b   :  { %4183 = vmatprep.subr.mxu0 %v10236_v10  ;;  %4254 = vmatprep.subr.mxu1 %v10237_v33 }
 0x586   :  { %v3338_v11 = vpop.f32.mrf.mxu0  ;;  %v3409_v32 = vpop.f32.mrf.mxu1 }
 0x587   :  { %v3339_v10 = vadd.f32 %v3338_v11, %v3255_v51  ;;  %v3267_v11 = vrot.slane %v5076_v18, %v9954_v35 }
 0x588   :  { %v3340_v56 = vpop.f32.mrf.mxu0  ;;  %v3411_v30 = vpop.f32.mrf.mxu1 }
 0x589   :  { %v3341_v6 = vadd.f32 %v3340_v56, %v3259_v25  ;;  %v3412_v25 = vadd.f32 %v3411_v30, %v3267_v11  ;;  %v10254_v30 = vld [vmem:[#allocation124_spill] sm:$0xff]  ;;  %v10273_v11 = vld [vmem:[#allocation143_spill] sm:$0xff] }
 0x5a7   :  { %v3544_v13 = vpop.f32.mrf.mxu0  ;;  %v3615_v41 = vpop.f32.mrf.mxu1 }
 0x5a9   :  { %v3546_v23 = vpop.f32.mrf.mxu0  ;;  %v3617_v37 = vpop.f32.mrf.mxu1 }
 0x5aa   :  { %v3621_v33 = vadd.f32 %v3546_v23, %v3341_v6 }
 0x5c9   :  { %v3787_v38 = vpop.f32.mrf.mxu0  ;;  %v3858_v14 = vpop.f32.mrf.mxu1 }
 0x5ca   :  { %v3863_v54 = vadd.f32 %v3787_v38, %v10238_v8  ;;  %v3865_v42 = vadd.f32 %v3858_v14, %v10242_v15  ;;  %v3620_v8 = vadd.f32 %v3544_v13, %v3339_v10  ;;  %v3263_v13 = vrot.slane %v5076_v18, %v9955_v39  ;;  %v10258_v18 = vld [vmem:[#allocation128_spill] sm:$0xff]  ;;  %v10259_v10 = vld [vmem:[#allocation129_spill] sm:$0xff] }
 0x5cb   :  { %v3789_v44 = vpop.f32.mrf.mxu0  ;;  %v3860_v12 = vpop.f32.mrf.mxu1 }
 0x5cc   :  { %v5144_v46 = vmul.f32 -1.442695, %v3863_v54  ;;  %v3864_v19 = vadd.f32 %v3789_v44, %v10239_v58  ;;  %v3866_v34 = vadd.f32 %v3860_v12, %v10240_v26  ;;  %v5142_v54 = vmul.f32 -1.442695, %v3621_v33  ;;  %v10260_v33 = vld [vmem:[#allocation130_spill] sm:$0xff] }
 0x5cd   :  { %v5141_v44 = vmul.f32 -1.442695, %v3620_v8  ;;  %v10262_v8 = vld [vmem:[#allocation132_spill] sm:$0xff] }
 0x5ce   :  { %5782 = vpow2.f32 %v5144_v46  ;;  %v5145_v31 = vmul.f32 -1.442695, %v3864_v19  ;;  %v5146_v62 = vmul.f32 -1.442695, %v3866_v34 }
 0x5d0   :  { %5784 = vpow2.f32 %v5145_v31 }
 0x5d1   :  { %5786 = vtanh.f32 %v3865_v42  ;;  %v3410_v42 = vadd.f32 %v3409_v32, %v3263_v13  ;;  %v10275_v13 = vld [vmem:[#allocation145_spill] sm:$0xff] }
 0x5d2   :  { %5788 = vpow2.f32 %v5146_v62  ;;  %v3623_v62 = vadd.f32 %v3617_v37, %v3412_v25  ;;  %v10256_v37 = vld [vmem:[#allocation126_spill] sm:$0xff]  ;;  %v10277_v25 = vld [vmem:[#allocation147_spill] sm:$0xff] }
 0x5d4   :  { %v5143_v6 = vmul.f32 -1.442695, %v3623_v62 }
 0x5db   :  { %v5783_v5 = vpop.eup %5782 }
 0x5dc   :  { %v3870_v7 = vadd.f32 1.0, %v5783_v5  ;;  %v3622_v5 = vadd.f32 %v3615_v41, %v3410_v42  ;;  %v10255_v41 = vld [vmem:[#allocation125_spill] sm:$0xff] }
 0x5dd   :  { %v5785_v47 = vpop.eup %5784  ;;  %v10279_v42 = vld [vmem:[#allocation149_spill] sm:$0xff] }
 0x5de   :  { %5790 = vrcp.f32 %v3870_v7  ;;  %v3876_v38 = vadd.f32 1.0, %v5785_v47  ;;  %v5787_v46 = vpop.eup %5786 }
 0x5df   :  { %v5789_v58 = vpop.eup %5788 }
 0x5e0   :  { %5792 = vrcp.f32 %v3876_v38  ;;  %v3883_v56 = vadd.f32 1.0, %v5789_v58  ;;  %v10261_v38 = vld [vmem:[#allocation131_spill] sm:$0xff]  ;;  %v10266_v58 = vld [vmem:[#allocation136_spill] sm:$0xff] }
 0x5e1   :  { %5794 = vpow2.f32 %v5142_v54  ;;  %v10263_v54 = vld [vmem:[#allocation133_spill] sm:$0xff] }
 0x5e2   :  { %5796 = vpow2.f32 %v5141_v44  ;;  %v10264_v44 = vld [vmem:[#allocation134_spill] sm:$0xff] }
 0x5e3   :  { %5798 = vrcp.f32 %v3883_v56  ;;  %v10270_v56 = vld [vmem:[#allocation140_spill] sm:$0xff] }
 0x5eb   :  { %v5791_v19 = vpop.eup %5790 }
 0x5ec   :  { %v3887_v14 = vmul.f32 %v5791_v19, %v5787_v46  ;;  %v10265_v46 = vld [vmem:[#allocation135_spill] sm:$0xff]  ;;  %v10267_v19 = vld [vmem:[#allocation137_spill] sm:$0xff] }
 0x5ed   :  { %v5793_v31 = vpop.eup %5792 }
 0x5ee   :  { %v3886_v12 = vmul.f32 %v5793_v31, %v8687_v61  ;;  %v5795_v23 = vpop.eup %5794  ;;  %v10269_v31 = vld [vmem:[#allocation139_spill] sm:$0xff] }
 0x5ef   :  { %v5797_v34 = vpop.eup %5796  ;;  %v3633_v15 = vadd.f32 1.0, %v5795_v23  ;;  %v10274_v23 = vld [vmem:[#allocation144_spill] sm:$0xff] }
 0x5f0   :  { %v3888_v26 = vadd.f32 %v3887_v14, %v3886_v12  ;;  %v3627_v51 = vadd.f32 1.0, %v5797_v34  ;;  %v5799_v61 = vpop.eup %5798  ;;  %v10268_v14 = vld [vmem:[#allocation138_spill] sm:$0xff]  ;;  %v10271_v12 = vld [vmem:[#allocation141_spill] sm:$0xff] }
 0x5f1   :  { %v10276_v34 = vld [vmem:[#allocation146_spill] sm:$0xff] }
 0x5f2   :  { %5800 = vtanh.f32 %v3888_v26  ;;  %v10272_v26 = vld [vmem:[#allocation142_spill] sm:$0xff] }
 0x5f3   :  { %5802 = vrcp.f32 %v3633_v15  ;;  %v10278_v15 = vld [vmem:[#allocation148_spill] sm:$0xff] }
 0x5f4   :  { %5804 = vrcp.f32 %v3627_v51  ;;  %v10280_v51 = vld [vmem:[#allocation150_spill] sm:$0xff] }
 0x5f5   :  { %5806 = vtanh.f32 %v3622_v5  ;;  %v10281_v5 = vld [vmem:[#allocation102_spill] sm:$0xff] }
 0x5f6   :  { %5808 = vpow2.f32 %v5143_v6 }
 0x5ff   :  { %v5801_v7 = vpop.eup %5800 }
 0x600   :  { %v3890_v47 = vmul.f32 %v5801_v7, %v5799_v61  ;;  %v5803_v32 = vpop.eup %5802  ;;  %v4367_v7 = vld [vmem:[%s9424_s6 + $0x40] sm:$0xff] }
 0x602   :  { %4042 = vmatmul.mubr.f32.vlgmr.msra.gmra.mxu0 %v3890_v47  ;;  %4113 = vmatmul.mubr.f32.vlgmr.msra.gmra.mxu1 %v3890_v47  ;;  %v4366_v47 = vld [vmem:[%s9424_s6 + $0x38] sm:$0xff] }
 0x603   :  { %4184 = vmatpush1.msra.mxu0 %v8697_v22  ;;  %4255 = vmatpush1.msra.mxu1 %v8702_v55  ;;  %v5805_v22 = vpop.eup %5804  ;;  %v3643_v55 = vmul.f32 %v5803_v32, %v8847_v49  ;;  %v10253_v49 = vld [vmem:[#allocation123_spill] sm:$0xff]  ;;  %v4365_v32 = vld [vmem:[%s9424_s6 + $0x30] sm:$0xff] }
 0x604   :  { %4185 = vmatprep.subr.mxu0 %v8707_v52  ;;  %4256 = vmatprep.subr.mxu1 %v8712_v57  ;;  %v5807_v52 = vpop.eup %5806  ;;  %v10244_v57 = vld [vmem:[#allocation114_spill] sm:$0xff] }
 0x605   :  { %4186 = vmatpush1.msra.mxu0 %v8719_v3  ;;  %4257 = vmatpush1.msra.mxu1 %v8724_v60  ;;  %v3644_v3 = vmul.f32 %v5807_v52, %v5805_v22  ;;  %v10245_v60 = vld [vmem:[#allocation115_spill] sm:$0xff]  ;;  %v4364_v22 = vld [vmem:[%s9424_s6 + $0x28] sm:$0xff] }
 0x606   :  { %4187 = vmatprep.subr.mxu0 %v8731_v0  ;;  %4258 = vmatprep.subr.mxu1 %v8736_v29  ;;  %v5809_v0 = vpop.eup %5808  ;;  %v10246_v29 = vld [vmem:[#allocation116_spill] sm:$0xff]  ;;  %v4362_v52 = vld [vmem:[%s9424_s6 + $0x18] sm:$0xff] }
 0x607   :  { %4188 = vmatpush1.msra.mxu0 %v8743_v59  ;;  %4259 = vmatpush1.msra.mxu1 %v8748_v17  ;;  %v10247_v59 = vld [vmem:[#allocation117_spill] sm:$0xff]  ;;  %v9247_v17 = vadd.f32 %v3644_v3, %v3643_v55  ;;  %v4363_v55 = vld [vmem:[%s9424_s6 + $0x20] sm:$0xff] }
 0x608   :  { %4189 = vmatprep.subr.mxu0 %v8755_v1  ;;  %4260 = vmatprep.subr.mxu1 %v8760_v28  ;;  %v10248_v1 = vld [vmem:[#allocation118_spill] sm:$0xff]  ;;  %v10249_v28 = vld [vmem:[#allocation119_spill] sm:$0xff]  ;;  %v4360_v3 = vld [vmem:[%s9424_s6 + $0x8] sm:$0xff] }
 0x609   :  { %4190 = vmatpush1.msra.mxu0 %v8767_v16  ;;  %4261 = vmatpush1.msra.mxu1 %v8772_v53  ;;  %v10250_v16 = vld [vmem:[#allocation120_spill] sm:$0xff]  ;;  %v3640_v53 = vadd.f32 1.0, %v5809_v0  ;;  %5810 = vtanh.f32 %v9247_v17  ;;  %v4514_v0 = vld [vmem:[%s9425_s8 + $0x78] sm:$0xff] }
 0x60a   :  { %4191 = vmatprep.subr.mxu0 %v8779_v24  ;;  %4262 = vmatprep.subr.mxu1 %v10244_v57  ;;  %v10251_v24 = vld [vmem:[#allocation121_spill] sm:$0xff]  ;;  %v4361_v57 = vld [vmem:[%s9424_s6 + $0x10] sm:$0xff] }
 0x60b   :  { %4192 = vmatpush1.msra.mxu0 %v8791_v9  ;;  %4263 = vmatpush1.msra.mxu1 %v10245_v60  ;;  %v10252_v9 = vld [vmem:[#allocation122_spill] sm:$0xff]  ;;  %5812 = vrcp.f32 %v3640_v53  ;;  %v4359_v60 = vld [vmem:[%s9424_s6] sm:$0xff] }
 0x60c   :  { %4193 = vmatprep.subr.mxu0 %v10246_v29  ;;  %4264 = vmatprep.subr.mxu1 %v10247_v59  ;;  %v4513_v29 = vld [vmem:[%s9425_s8 + $0x70] sm:$0xff]  ;;  %v4512_v59 = vld [vmem:[%s9425_s8 + $0x68] sm:$0xff]  ;;  %v4507_v53 = vld [vmem:[%s9425_s8 + $0x40] sm:$0xff] }
 0x60d   :  { %4194 = vmatpush1.msra.mxu0 %v8816_v27  ;;  %4265 = vmatpush1.msra.mxu1 %v10248_v1  ;;  %v10257_v27 = vld [vmem:[#allocation127_spill] sm:$0xff] }
 0x60e   :  { %4195 = vmatprep.subr.mxu0 %v10249_v28  ;;  %4266 = vmatprep.subr.mxu1 %v10250_v16  ;;  %v4510_v1 = vld [vmem:[%s9425_s8 + $0x58] sm:$0xff]  ;;  %v4509_v28 = vld [vmem:[%s9425_s8 + $0x50] sm:$0xff]  ;;  %v4508_v16 = vld [vmem:[%s9425_s8 + $0x48] sm:$0xff] }
 0x60f   :  { %4196 = vmatpush1.msra.mxu0 %v10251_v24  ;;  %4267 = vmatpush1.msra.mxu1 %v10252_v9  ;;  %v4506_v24 = vld [vmem:[%s9425_s8 + $0x38] sm:$0xff]  ;;  %v4505_v9 = vld [vmem:[%s9425_s8 + $0x30] sm:$0xff] }
 0x610   :  { %4197 = vmatprep.subr.mxu0 %v10253_v49  ;;  %4268 = vmatprep.subr.mxu1 %v10254_v30  ;;  %v4504_v49 = vld [vmem:[%s9425_s8 + $0x28] sm:$0xff]  ;;  %v4503_v30 = vld [vmem:[%s9425_s8 + $0x20] sm:$0xff] }
 0x611   :  { %4198 = vmatpush1.msra.mxu0 %v10255_v41  ;;  %4269 = vmatpush1.msra.mxu1 %v10256_v37  ;;  %v4502_v41 = vld [vmem:[%s9425_s8 + $0x18] sm:$0xff]  ;;  %v4501_v37 = vld [vmem:[%s9425_s8 + $0x10] sm:$0xff] }
 0x612   :  { %4199 = vmatprep.subr.mxu0 %v10257_v27  ;;  %4270 = vmatprep.subr.mxu1 %v10258_v18  ;;  %v4500_v27 = vld [vmem:[%s9425_s8 + $0x8] sm:$0xff]  ;;  %v4499_v18 = vld [vmem:[%s9425_s8] sm:$0xff] }
 0x613   :  { %4200 = vmatpush1.msra.mxu0 %v10259_v10  ;;  %4271 = vmatpush1.msra.mxu1 %v10260_v33  ;;  %v5211_v10 = vld [vmem:[%s9423_s5 + $0x4] sm:$0xf] }
 0x614   :  { %4201 = vmatprep.subr.mxu0 %v10261_v38  ;;  %4272 = vmatprep.subr.mxu1 %v10262_v8  ;;  %v3960_v38 = vrot.slane %v5211_v10, %v10243_v45  ;;  %v3964_v8 = vrot.slane %v5211_v10, %v10241_v20  ;;  %v3968_v20 = vrot.slane %v5211_v10, %v9955_v39 }
 0x615   :  { %4202 = vmatpush1.msra.mxu0 %v10263_v54  ;;  %4273 = vmatpush1.msra.mxu1 %v10264_v44 }
 0x616   :  { %4203 = vmatprep.subr.mxu0 %v10265_v46  ;;  %4274 = vmatprep.subr.mxu1 %v10266_v58  ;;  %v5811_v62 = vpop.eup %5810 }
 0x617   :  { %4204 = vmatpush1.msra.mxu0 %v10267_v19  ;;  %4275 = vmatpush1.msra.mxu1 %v10268_v14 }
 0x618   :  { %4205 = vmatprep.subr.mxu0 %v10269_v31  ;;  %4276 = vmatprep.subr.mxu1 %v10270_v56  ;;  %v5813_v6 = vpop.eup %5812 }
 0x619   :  { %4206 = vmatpush1.msra.mxu0 %v10271_v12  ;;  %4277 = vmatpush1.msra.mxu1 %v10272_v26  ;;  %v3647_v61 = vmul.f32 %v5813_v6, %v5811_v62 }
 0x61a   :  { %4207 = vmatprep.subr.mxu0 %v10273_v11  ;;  %4278 = vmatprep.subr.mxu1 %v10274_v23  ;;  %v3972_v23 = vrot.slane %v5211_v10, %v9954_v35  ;;  %v5279_v35 = vld [vmem:[%s9426_s7] ss:$0 sm:$0xff] }
 0x61b   :  { %4208 = vmatpush1.msra.mxu0 %v10275_v13  ;;  %4279 = vmatpush1.msra.mxu1 %v10276_v34 }
 0x61c   :  { %4209 = vmatprep.subr.mxu0 %v10277_v25  ;;  %4280 = vmatprep.subr.mxu1 %v10278_v15 }
 0x61d   :  { %4210 = vmatpush1.msra.mxu0 %v10279_v42  ;;  %4281 = vmatpush1.msra.mxu1 %v10280_v51 }
 0x61e   :  { %4211 = vmatprep.subr.mxu0 %v9023_v48  ;;  %4282 = vmatprep.subr.mxu1 %v10281_v5  ;;  %v4374_v48 = vld [vmem:[%s9424_s6 + $0x78] sm:$0xff] }
 0x61f   :  { %4212 = vmatpush1.msra.mxu0 %v9035_v63  ;;  %4283 = vmatpush1.msra.mxu1 %v9040_v36  ;;  %v4372_v36 = vld [vmem:[%s9424_s6 + $0x68] sm:$0xff] }
 0x620   :  { %4213 = vmatprep.subr.mxu0 %v9047_v4  ;;  %4284 = vmatprep.subr.mxu1 %v9052_v2  ;;  %v4373_v4 = vld [vmem:[%s9424_s6 + $0x70] sm:$0xff]  ;;  %v10282_v2 = vld [vmem:[#allocation4_spill] sm:$0xff]  ;;  %v4368_v63 = vld [vmem:[%s9424_s6 + $0x48] sm:$0xff] }
 0x621   :  { %4214 = vmatpush1.msra.mxu0 %v9059_v50  ;;  %4247 = vmatprep.mubr.f32.mxu0 %v9857_v40  ;;  %v4369_v50 = vld [vmem:[%s9424_s6 + $0x50] sm:$0xff] }
 0x622   :  { %4285 = vmatpush1.msra.mxu1 %v9066_v43  ;;  %4318 = vmatprep.mubr.f32.mxu1 %v9857_v40  ;;  %v4371_v40 = vld [vmem:[%s9424_s6 + $0x60] sm:$0xff]  ;;  %v4370_v43 = vld [vmem:[%s9424_s6 + $0x58] sm:$0xff] }
 0x623   :  { %4248 = vmatmul.mubr.f32.vlgmr.msra.gmra.mxu0 %v3647_v61  ;;  %4319 = vmatmul.mubr.f32.vlgmr.msra.gmra.mxu1 %v3647_v61 }
 0x624   :  { %5493 = vmatprep.subr.mxu0 %v4374_v48  ;;  %5525 = vmatprep.mubr.f32.mxu0 %v10282_v2 }
 0x625   :  { %5494 = vmatpush3.msra.mxu0 %v4374_v48  ;;  %5531 = vmatprep.subr.mxu1 %v4514_v0 }
 0x626   :  { %5495 = vmatprep.subr.mxu0 %v4373_v4  ;;  %5532 = vmatpush3.msra.mxu1 %v4514_v0 }
 0x627   :  { %5496 = vmatpush3.msra.mxu0 %v4373_v4  ;;  %5533 = vmatprep.subr.mxu1 %v4513_v29 }
 0x628   :  { %5497 = vmatprep.subr.mxu0 %v4372_v36  ;;  %5534 = vmatpush3.msra.mxu1 %v4513_v29 }
 0x629   :  { %5498 = vmatpush3.msra.mxu0 %v4372_v36  ;;  %5535 = vmatprep.subr.mxu1 %v4512_v59 }
 0x62a   :  { %5499 = vmatprep.subr.mxu0 %v4371_v40  ;;  %5536 = vmatpush3.msra.mxu1 %v4512_v59 }
 0x62b   :  { %5500 = vmatpush3.msra.mxu0 %v4371_v40 }
 0x62c   :  { %5501 = vmatprep.subr.mxu0 %v4370_v43 }
 0x62d   :  { %5502 = vmatpush3.msra.mxu0 %v4370_v43 }
 0x62e   :  { %5503 = vmatprep.subr.mxu0 %v4369_v50 }
 0x62f   :  { %5504 = vmatpush3.msra.mxu0 %v4369_v50 }
 0x630   :  { %5505 = vmatprep.subr.mxu0 %v4368_v63 }
 0x631   :  { %5506 = vmatpush3.msra.mxu0 %v4368_v63 }
 0x632   :  { %5507 = vmatprep.subr.mxu0 %v4367_v7 }
 0x633   :  { %5508 = vmatpush3.msra.mxu0 %v4367_v7 }
 0x634   :  { %5509 = vmatprep.subr.mxu0 %v4366_v47 }
 0x635   :  { %5510 = vmatpush3.msra.mxu0 %v4366_v47 }
 0x636   :  { %5511 = vmatprep.subr.mxu0 %v4365_v32 }
 0x637   :  { %5512 = vmatpush3.msra.mxu0 %v4365_v32 }
 0x638   :  { %5513 = vmatprep.subr.mxu0 %v4364_v22 }
 0x639   :  { %5514 = vmatpush3.msra.mxu0 %v4364_v22 }
 0x63a   :  { %5515 = vmatprep.subr.mxu0 %v4363_v55 }
 0x63b   :  { %5516 = vmatpush3.msra.mxu0 %v4363_v55 }
 0x63c   :  { %5517 = vmatprep.subr.mxu0 %v4362_v52 }
 0x63d   :  { %5518 = vmatpush3.msra.mxu0 %v4362_v52 }
 0x63e   :  { %5519 = vmatprep.subr.mxu0 %v4361_v57 }
 0x63f   :  { %5520 = vmatpush3.msra.mxu0 %v4361_v57 }
 0x640   :  { %5521 = vmatprep.subr.mxu0 %v4360_v3 }
 0x641   :  { %5522 = vmatpush3.msra.mxu0 %v4360_v3 }
 0x642   :  { %5523 = vmatprep.subr.mxu0 %v4359_v60 }
 0x643   :  { %5524 = vmatpush3.msra.mxu0 %v4359_v60 }
 0x644   :  { %5526 = vmatmul.mubr.f32.vlgmr.msra.gmra.mxu0 %v9072_v21  ;;  %v4511_v21 = vld [vmem:[%s9425_s8 + $0x60] sm:$0xff] }
 0x645   :  { %5528 = vmatprep.mubr.f32.mxu0 %v3647_v61  ;;  %5537 = vmatprep.subr.mxu1 %v4511_v21 }
 0x646   :  { %5538 = vmatpush3.msra.mxu1 %v4511_v21 }
 0x647   :  { %5539 = vmatprep.subr.mxu1 %v4510_v1 }
 0x648   :  { %5540 = vmatpush3.msra.mxu1 %v4510_v1 }
 0x649   :  { %5541 = vmatprep.subr.mxu1 %v4509_v28 }
 0x64a   :  { %5542 = vmatpush3.msra.mxu1 %v4509_v28 }
 0x64b   :  { %5543 = vmatprep.subr.mxu1 %v4508_v16 }
 0x64c   :  { %5544 = vmatpush3.msra.mxu1 %v4508_v16 }
 0x64d   :  { %5545 = vmatprep.subr.mxu1 %v4507_v53 }
 0x64e   :  { %5546 = vmatpush3.msra.mxu1 %v4507_v53 }
 0x64f   :  { %5547 = vmatprep.subr.mxu1 %v4506_v24 }
 0x650   :  { %5548 = vmatpush3.msra.mxu1 %v4506_v24 }
 0x651   :  { %5549 = vmatprep.subr.mxu1 %v4505_v9 }
 0x652   :  { %5550 = vmatpush3.msra.mxu1 %v4505_v9 }
 0x653   :  { %5551 = vmatprep.subr.mxu1 %v4504_v49 }
 0x654   :  { %5552 = vmatpush3.msra.mxu1 %v4504_v49 }
 0x655   :  { %5553 = vmatprep.subr.mxu1 %v4503_v30 }
 0x656   :  { %5554 = vmatpush3.msra.mxu1 %v4503_v30 }
 0x657   :  { %5555 = vmatprep.subr.mxu1 %v4502_v41 }
 0x658   :  { %5556 = vmatpush3.msra.mxu1 %v4502_v41 }
 0x659   :  { %5557 = vmatprep.subr.mxu1 %v4501_v37 }
 0x65a   :  { %5558 = vmatpush3.msra.mxu1 %v4501_v37 }
 0x65b   :  { %5559 = vmatprep.subr.mxu1 %v4500_v27 }
 0x65c   :  { %5560 = vmatpush3.msra.mxu1 %v4500_v27 }
 0x65d   :  { %5561 = vmatprep.subr.mxu1 %v4499_v18 }
 0x65e   :  { %5562 = vmatpush3.msra.mxu1 %v4499_v18 }
 0x6c2   :  { %v4043_v33 = vpop.f32.mrf.mxu0  ;;  %v4114_v54 = vpop.f32.mrf.mxu1 }
 0x6c3   :  { %v4044_v46 = vadd.f32 %v4043_v33, %v3960_v38  ;;  %v4115_v42 = vadd.f32 %v4114_v54, %v3968_v20  ;;  %v5284_v33 = vld [vmem:[%s9427_s9] ss:$0 sm:$0xff] }
 0x6c4   :  { %v4045_v44 = vpop.f32.mrf.mxu0  ;;  %v4116_v31 = vpop.f32.mrf.mxu1 }
 0x6c5   :  { %v4046_v19 = vadd.f32 %v4045_v44, %v3964_v8  ;;  %v4117_v45 = vadd.f32 %v4116_v31, %v3972_v23 }
 0x6e3   :  { %v4249_v58 = vpop.f32.mrf.mxu0  ;;  %v4320_v11 = vpop.f32.mrf.mxu1 }
 0x6e4   :  { %v4325_v14 = vadd.f32 %v4249_v58, %v4044_v46  ;;  %v4327_v62 = vadd.f32 %v4320_v11, %v4115_v42 }
 0x6e5   :  { %v4251_v56 = vpop.f32.mrf.mxu0  ;;  %v4322_v34 = vpop.f32.mrf.mxu1 }
 0x6e6   :  { %v5276_v12 = vmul.f32 -1.442695, %v4325_v14  ;;  %v4326_v26 = vadd.f32 %v4251_v56, %v4046_v19  ;;  %v4328_v25 = vadd.f32 %v4322_v34, %v4117_v45 }
 0x6e8   :  { %5814 = vpow2.f32 %v5276_v12  ;;  %v5277_v13 = vmul.f32 -1.442695, %v4326_v26  ;;  %v5278_v15 = vmul.f32 -1.442695, %v4328_v25 }
 0x6ea   :  { %5816 = vpow2.f32 %v5277_v13 }
 0x6eb   :  { %5818 = vpow2.f32 %v5278_v15 }
 0x6f5   :  { %v5815_v51 = vpop.eup %5814 }
 0x6f6   :  { %v4332_v5 = vadd.f32 1.0, %v5815_v51 }
 0x6f7   :  { %v5817_v6 = vpop.eup %5816 }
 0x6f8   :  { %5820 = vrcp.f32 %v4332_v5  ;;  %v4338_v61 = vadd.f32 1.0, %v5817_v6  ;;  %v5819_v48 = vpop.eup %5818 }
 0x6f9   :  { %5822 = vtanh.f32 %v4327_v62  ;;  %v4345_v40 = vadd.f32 1.0, %v5819_v48 }
 0x6fa   :  { %5824 = vrcp.f32 %v4338_v61 }
 0x6fb   :  { %5826 = vrcp.f32 %v4345_v40 }
 0x704   :  { %v5527_v4 = vpop.f32.mrf.mxu0 }
 0x705   :  { %v5821_v2 = vpop.eup %5820  ;;  %v4454_v36 = vadd.f32 %v5527_v4, %v5279_v35 }
 0x706   :  { %v5823_v39 = vpop.eup %5822  ;;  %v4448_v43 = vpop.f32.mrf.mxu0 }
 0x707   :  { %v5825_v50 = vpop.eup %5824  ;;  %v4472_v63 = vmin.f32 %v4454_v36, 0.0  ;;  %v4449_v7 = vadd.f32 %v5279_v35, %v4448_v43  ;;  %v4349_v47 = vmul.f32 %v5823_v39, %v5821_v2  ;;  %vm4468_vm0 = vcmp.gt.f32.partialorder %v4454_v36, 0.0 }
 0x708   :  { %v4348_v32 = vmul.f32 %v5825_v50, %v9247_v17  ;;  %v5827_v3 = vpop.eup %5826 }
 0x709   :  { %v4477_v22 = vmul.f32 1.442695, %v4472_v63  ;;  %v4471_v55 = vmin.f32 %v4449_v7, 0.0  ;;  %vm4467_vm1 = vcmp.gt.f32.partialorder %v4449_v7, 0.0 }
 0x70a   :  { %v4350_v52 = vadd.f32 %v4349_v47, %v4348_v32 }
 0x70b   :  { %5828 = vpow2.f32 %v4477_v22  ;;  %v4475_v57 = vmul.f32 1.442695, %v4471_v55 }
 0x70c   :  { %5830 = vtanh.f32 %v4350_v52 }
 0x70d   :  { %5832 = vpow2.f32 %v4475_v57 }
 0x718   :  { %v5829_v60 = vpop.eup %5828 }
 0x719   :  { %v5831_v0 = vpop.eup %5830  ;;  %v5281_v29 = vadd.f32 -1.0, %v5829_v60 }
 0x71a   :  { %v5833_v59 = vpop.eup %5832  ;;  %v4352_v21 = vmul.f32 %v5831_v0, %v5827_v3 }
 0x71b   :  { %v4488_v1 = vmul.f32 1.6732632, %v5281_v29  ;;  %v5280_v28 = vadd.f32 -1.0, %v5833_v59 }
 0x71c   :  { %5529 = vmatmul.mubr.f32.gmra.mxu0 %v4352_v21 }
 0x71d   :  { %v4487_v16 = vmul.f32 1.6732632, %v5280_v28  ;;  %v4492_v17 = vsel %vm4468_vm0, %v4454_v36, %v4488_v1 }
 0x71e   :  { %v4496_v9 = vmul.f32 1.050701, %v4492_v17 }
 0x71f   :  { %v4491_v53 = vsel %vm4467_vm1, %v4449_v7, %v4487_v16 }
 0x720   :  { %v4495_v24 = vmul.f32 1.050701, %v4491_v53 }
 0x722   :  { %5563 = vmatprep.mubr.f32.mxu1 %v4495_v24 }
 0x723   :  { %5564 = vmatmul.mubr.f32.vlgmr.msra.gmra.mxu1 %v4496_v9 }
 0x7dc   :  { %v5530_v49 = vpop.f32.mrf.mxu0 }
 0x7dd   :  { %v4464_v30 = vadd.f32 %v5530_v49, %v5279_v35 }
 0x7de   :  { %v4458_v41 = vpop.f32.mrf.mxu0 }
 0x7df   :  { %v4474_v37 = vmin.f32 %v4464_v30, 0.0  ;;  %v4459_v27 = vadd.f32 %v5279_v35, %v4458_v41  ;;  %vm4470_vm2 = vcmp.gt.f32.partialorder %v4464_v30, 0.0 }
 0x7e1   :  { %v4481_v18 = vmul.f32 1.442695, %v4474_v37  ;;  %v4473_v10 = vmin.f32 %v4459_v27, 0.0  ;;  %vm4469_vm3 = vcmp.gt.f32.partialorder %v4459_v27, 0.0 }
 0x7e3   :  { %5834 = vpow2.f32 %v4481_v18  ;;  %v4479_v38 = vmul.f32 1.442695, %v4473_v10  ;;  %v5565_v8 = vpop.f32.mrf.mxu1 }
 0x7e4   :  { %v4594_v54 = vadd.f32 %v5565_v8, %v5284_v33 }
 0x7e5   :  { %5836 = vpow2.f32 %v4479_v38  ;;  %v4588_v44 = vpop.f32.mrf.mxu1 }
 0x7e6   :  { %4608 = vst [vmem:[%s9428_s10 + $0x8] sm:$0xff] %v4594_v54  ;;  %v4589_v46 = vadd.f32 %v5284_v33, %v4588_v44 }
 0x7e8   :  { %4607 = vst [vmem:[%s9428_s10] sm:$0xff] %v4589_v46 }
 0x7f0   :  { %v5835_v58 = vpop.eup %5834 }
 0x7f1   :  { %v5283_v19 = vadd.f32 -1.0, %v5835_v58 }
 0x7f2   :  { %v5837_v14 = vpop.eup %5836 }
 0x7f3   :  { %v5282_v31 = vadd.f32 -1.0, %v5837_v14  ;;  %v4490_v56 = vmul.f32 1.6732632, %v5283_v19 }
 0x7f5   :  { %v4489_v12 = vmul.f32 1.6732632, %v5282_v31  ;;  %v4494_v26 = vsel %vm4470_vm2, %v4464_v30, %v4490_v56 }
 0x7f6   :  { %v4498_v13 = vmul.f32 1.050701, %v4494_v26 }
 0x7f7   :  { %v4493_v11 = vsel %vm4469_vm3, %v4459_v27, %v4489_v12 }
 0x7f8   :  { %v4497_v23 = vmul.f32 1.050701, %v4493_v11 }
 0x7fa   :  { %5566 = vmatprep.mubr.f32.mxu1 %v4497_v23 }
 0x7fb   :  { %5567 = vmatmul.mubr.f32.gmra.mxu1 %v4498_v13 }
 0x8bb   :  { %v5568_v34 = vpop.f32.mrf.mxu1 }
 0x8bc   :  { %v4604_v45 = vadd.f32 %v5568_v34, %v5284_v33 }
 0x8bd   :  { %v4598_v25 = vpop.f32.mrf.mxu1 }
 0x8be   :  { %4610 = vst [vmem:[%s9428_s10 + $0x18] sm:$0xff] %v4604_v45  ;;  %v4599_v20 = vadd.f32 %v5284_v33, %v4598_v25 }
 0x8c0   :  { %4609 = vst [vmem:[%s9428_s10 + $0x10] sm:$0xff] %v4599_v20 }

</bundles_post_ra>
